<compile_context>
chip_gen: v7x
topology: tpu7x:2x2x1
jax: 0.10.0
libtpu: 0.0.40
codegen_flags: <defaults>
</compile_context>

<pallas_src>
import math
from functools import partial

import jax
import jax.numpy as jnp
from jax.experimental import pallas as pl
from jax.experimental.pallas import tpu as pltpu


# ----------------------------------------------------------------------------
# In-kernel helpers (operate on VMEM-resident values)
# ----------------------------------------------------------------------------
def _layernorm(x, g, b, eps=1e-5):
    mu = jnp.mean(x, axis=-1, keepdims=True)
    var = jnp.mean(jnp.square(x - mu), axis=-1, keepdims=True)
    return (x - mu) * jax.lax.rsqrt(var + eps) * g + b


def _gelu(x):
    # TODO(synk): torch F.gelu is erf-based; erf lowering inside Mosaic is not
    # guaranteed, so the (very close) tanh approximation is used in-kernel.
    c = 0.7978845608028654  # sqrt(2/pi)
    return 0.5 * x * (1.0 + jnp.tanh(c * (x + 0.044715 * x * x * x)))


def _heads_attention(q, k, v, H, Dh, causal):
    """q: [Lq, H*Dh], k/v: [Lk, H*Dh] f32 -> list of per-head [Lq, Dh]."""
    Lq, Lk = q.shape[0], k.shape[0]
    scale = 1.0 / math.sqrt(Dh)
    mask = None
    if causal:  # hoisted out of the per-head loop (built once, reused H times)
        ri = jax.lax.broadcasted_iota(jnp.int32, (Lq, Lk), 0)
        ci = jax.lax.broadcasted_iota(jnp.int32, (Lq, Lk), 1)
        mask = ci > ri
    heads = []
    for h in range(H):
        qh = q[:, h * Dh:(h + 1) * Dh]
        kh = k[:, h * Dh:(h + 1) * Dh]
        vh = v[:, h * Dh:(h + 1) * Dh]
        s = jax.lax.dot_general(qh, kh, (((1,), (1,)), ((), ())),
                                preferred_element_type=jnp.float32) * scale
        if causal:
            s = jnp.where(mask, jnp.float32(-1e30), s)
        m = jnp.max(s, axis=-1, keepdims=True)
        p = jnp.exp(s - m)
        p = p * pl.reciprocal(jnp.sum(p, axis=-1, keepdims=True), approx=True)
        heads.append(jnp.dot(p, vh, preferred_element_type=jnp.float32))
    return heads


def _circular_cat3(x_ref, xb, scr_ref):
    """Build [x[l-1 mod L] | x[l] | x[l+1 mod L]] along lanes via a halo scratch.

    Replaces the previous [L,L] 0/1 selection matmuls (review item): only ref
    window copies + one lane concat; the conv becomes a single matmul.
    """
    L = xb.shape[0]
    scr_ref[pl.ds(1, L), :] = xb
    scr_ref[pl.ds(0, 1), :] = x_ref[pl.ds(L - 1, 1), :]   # circular left halo
    scr_ref[pl.ds(L + 1, 1), :] = x_ref[pl.ds(0, 1), :]   # circular right halo
    return jnp.concatenate(
        [scr_ref[pl.ds(0, L), :], xb, scr_ref[pl.ds(2, L), :]], axis=1)


# ----------------------------------------------------------------------------
# Pallas kernels (grid = (batch,), each block is one [L, C] slice)
# ----------------------------------------------------------------------------
def _embed_kernel(x_ref, add_ref, w_ref, o_ref, scr_ref):
    """TokenEmbedding Conv1d(k=3, circular, no bias) + precomputed pos/temporal add."""
    xb = x_ref[...]                                        # (L, c_in)
    xcat = _circular_cat3(x_ref, xb, scr_ref)              # (L, 3*c_in)
    o_ref[...] = (jnp.dot(xcat, w_ref[...], preferred_element_type=jnp.float32)
                  + add_ref[...])


def _encoder_layer_kernel(x_ref, wqkv_ref, bqkv_ref, wo_ref, bo_ref,
                          ln1g_ref, ln1b_ref, w1_ref, b1_ref, w2_ref, b2_ref,
                          ln2g_ref, ln2b_ref, fing_ref, finb_ref, o_ref,
                          *, H, Dh, apply_final):
    dm = H * Dh
    xb = x_ref[...]                                        # (L, dm)
    qkv = jnp.dot(xb, wqkv_ref[...], preferred_element_type=jnp.float32) + bqkv_ref[...]
    heads = _heads_attention(qkv[:, :dm], qkv[:, dm:2 * dm], qkv[:, 2 * dm:],
                             H, Dh, causal=False)
    attn = (jnp.dot(jnp.concatenate(heads, axis=1), wo_ref[...],
                    preferred_element_type=jnp.float32) + bo_ref[...])
    xb = _layernorm(xb + attn, ln1g_ref[...], ln1b_ref[...])
    y = _gelu(jnp.dot(xb, w1_ref[...], preferred_element_type=jnp.float32) + b1_ref[...])
    y = jnp.dot(y, w2_ref[...], preferred_element_type=jnp.float32) + b2_ref[...]
    xb = _layernorm(xb + y, ln2g_ref[...], ln2b_ref[...])
    if apply_final:
        xb = _layernorm(xb, fing_ref[...], finb_ref[...])
    o_ref[...] = xb


def _decoder_layer_kernel(x_ref, cross_ref,
                          wsqkv_ref, bsqkv_ref, wso_ref, bso_ref, ln1g_ref, ln1b_ref,
                          wcq_ref, bcq_ref, wckv_ref, bckv_ref, wco_ref, bco_ref,
                          ln2g_ref, ln2b_ref, w1_ref, b1_ref, w2_ref, b2_ref,
                          ln3g_ref, ln3b_ref, fing_ref, finb_ref, o_ref, scr_ref,
                          *, H, Dh, mix, apply_final):
    dm = H * Dh
    xb = x_ref[...]                                        # (L, dm)
    crossb = cross_ref[...]                                # (S, dm)
    L = xb.shape[0]
    # --- masked (causal) self-attention, Informer mix=True layout -----------
    qkv = jnp.dot(xb, wsqkv_ref[...], preferred_element_type=jnp.float32) + bsqkv_ref[...]
    heads = _heads_attention(qkv[:, :dm], qkv[:, dm:2 * dm], qkv[:, 2 * dm:],
                             H, Dh, causal=True)
    z = jnp.concatenate(heads, axis=1)                     # (L, dm)
    if mix:
        # torch: [B,L,H,Dh] -> transpose(2,1).contiguous().view(B,L,-1).
        # Row-regroup done with stride-H ref reads from a VMEM scratch + concats
        # (no permutation matmuls); then ONE out-proj matmul over full dm.
        R = L // H
        scr_ref[...] = z
        rows = [scr_ref[pl.ds(j, R, stride=H), :] for j in range(H)]   # (R, dm) each
        blocks = []
        for a in range(H):
            blocks.append(jnp.concatenate(
                [rows[j][:, a * Dh:(a + 1) * Dh] for j in range(H)], axis=1))
        z = jnp.concatenate(blocks, axis=0)                # (L, dm) mixed layout
    sa = jnp.dot(z, wso_ref[...], preferred_element_type=jnp.float32) + bso_ref[...]
    xb = _layernorm(xb + sa, ln1g_ref[...], ln1b_ref[...])
    # --- cross-attention (mix=False) ----------------------------------------
    qc = jnp.dot(xb, wcq_ref[...], preferred_element_type=jnp.float32) + bcq_ref[...]
    kv = jnp.dot(crossb, wckv_ref[...], preferred_element_type=jnp.float32) + bckv_ref[...]
    heads = _heads_attention(qc, kv[:, :dm], kv[:, dm:], H, Dh, causal=False)
    ca = (jnp.dot(jnp.concatenate(heads, axis=1), wco_ref[...],
                  preferred_element_type=jnp.float32) + bco_ref[...])
    xb = _layernorm(xb + ca, ln2g_ref[...], ln2b_ref[...])
    # --- feed-forward --------------------------------------------------------
    y = _gelu(jnp.dot(xb, w1_ref[...], preferred_element_type=jnp.float32) + b1_ref[...])
    y = jnp.dot(y, w2_ref[...], preferred_element_type=jnp.float32) + b2_ref[...]
    xb = _layernorm(xb + y, ln3g_ref[...], ln3b_ref[...])
    if apply_final:
        xb = _layernorm(xb, fing_ref[...], finb_ref[...])
    o_ref[...] = xb


def _distil_conv_kernel(x_ref, wc_ref, bc_ref, o_ref, scr_ref):
    """Conv1d(k=3, circular) as ONE matmul over the lane-concatenated taps."""
    xb = x_ref[...]                                        # (L, dm)
    xcat = _circular_cat3(x_ref, xb, scr_ref)              # (L, 3*dm)
    o_ref[...] = (jnp.dot(xcat, wc_ref[...], preferred_element_type=jnp.float32)
                  + bc_ref[...])


def _distil_bn_pool_kernel(y_ref, scale_ref, shift_ref, o_ref, scr_ref):
    """BatchNorm(batch stats, pre-folded scale/shift) -> ELU -> MaxPool1d(3,2,1)."""
    yb = y_ref[...]                                        # (L, dm)
    L = yb.shape[0]
    Lout = (L - 1) // 2 + 1
    z = yb * scale_ref[...] + shift_ref[...]
    z = jnp.where(z > 0, z, jnp.exp(jnp.minimum(z, 0.0)) - 1.0)   # ELU(alpha=1)
    # Halo scratch with clamp padding (clamped value is already inside the window,
    # so the max is unchanged, equivalent to -inf padding).
    scr_ref[pl.ds(1, L), :] = z
    scr_ref[pl.ds(0, 1), :] = scr_ref[pl.ds(1, 1), :]
    scr_ref[pl.ds(L + 1, 1), :] = scr_ref[pl.ds(L, 1), :]
    m = jnp.maximum(jnp.maximum(scr_ref[pl.ds(0, L), :], z),
                    scr_ref[pl.ds(2, L), :])
    # stride-2 subsample via a strided ref read (replaces 3 selection matmuls)
    scr_ref[pl.ds(0, L), :] = m
    o_ref[...] = scr_ref[pl.ds(0, Lout, stride=2), :]


def _linear_kernel(x_ref, w_ref, b_ref, o_ref):
    o_ref[...] = (jnp.dot(x_ref[...], w_ref[...], preferred_element_type=jnp.float32)
                  + b_ref[...])


# ----------------------------------------------------------------------------
# pallas_call wrapper: batch is always a "parallel" grid axis
# ----------------------------------------------------------------------------
def _batched_call(kernel_fn, out_shape, batched, shared, scratch_shapes=()):
    """batched: 3-D [B, L, C] arrays split over the batch grid; shared: weights."""
    B = out_shape[0]
    in_specs = []
    for a in batched:
        blk = (None,) + tuple(a.shape[1:])
        in_specs.append(pl.BlockSpec(blk, lambda g, n=a.ndim: (g,) + (0,) * (n - 1)))
    for a in shared:
        in_specs.append(pl.BlockSpec(a.shape, lambda g, n=a.ndim: (0,) * n))
    out_blk = (None,) + tuple(out_shape[1:])
    return pl.pallas_call(
        kernel_fn,
        out_shape=jax.ShapeDtypeStruct(tuple(out_shape), jnp.float32),
        grid=(B,),
        in_specs=in_specs,
        out_specs=pl.BlockSpec(out_blk,
                               lambda g, n=len(out_shape): (g,) + (0,) * (n - 1)),
        scratch_shapes=list(scratch_shapes),
        compiler_params=pltpu.CompilerParams(
            dimension_semantics=("parallel",),
            # plenty for toy sizes; raise for production d_model/d_ff
            vmem_limit_bytes=32 * 1024 * 1024),
    )(*batched, *shared)


# ----------------------------------------------------------------------------
# Model forward (wrapper glue)
# ----------------------------------------------------------------------------
def sinusoid_table(n_pos, d_model):
    position = jnp.arange(n_pos, dtype=jnp.float32)[:, None]
    div_term = jnp.exp(jnp.arange(0, d_model, 2, dtype=jnp.float32)
                       * -(math.log(10000.0) / d_model))
    pe = jnp.zeros((n_pos, d_model), jnp.float32)
    pe = pe.at[:, 0::2].set(jnp.sin(position * div_term))
    pe = pe.at[:, 1::2].set(jnp.cos(position * div_term))
    return pe


def data_embedding(x, x_mark, w_token, tables, pe):
    B, L, c_in = x.shape
    d_model = w_token.shape[1]
    month_t, day_t, weekday_t, hour_t = tables
    # Temporal ("fixed") embedding gathers stay in plain JAX (tiny table lookups).
    temp = (jnp.take(hour_t, x_mark[..., 3], axis=0)
            + jnp.take(weekday_t, x_mark[..., 2], axis=0)
            + jnp.take(day_t, x_mark[..., 1], axis=0)
            + jnp.take(month_t, x_mark[..., 0], axis=0))
    # TODO(synk): PoPEEmbedding source unavailable; approximated by an extra additive
    # sinusoidal PE (hence the 2x PE term, matching the previous reference behaviour).
    addend = temp + 2.0 * pe[:L][None]                     # (B, L, d_model)
    return _batched_call(
        _embed_kernel, (B, L, d_model), batched=[x, addend], shared=[w_token],
        scratch_shapes=[pltpu.VMEM((L + 2, c_in), jnp.float32)])


def encoder_layer_call(x, p, n_heads, final_norm=None):
    B, L, dm = x.shape
    Dh = dm // n_heads
    fin_g, fin_b = final_norm if final_norm is not None else (p["ln2_g"], p["ln2_b"])
    a = p["attn"]
    shared = [a["Wqkv"], a["bqkv"], a["Wo"], a["bo"],
              p["ln1_g"], p["ln1_b"], p["W1"], p["b1"], p["W2"], p["b2"],
              p["ln2_g"], p["ln2_b"], fin_g, fin_b]
    return _batched_call(
        partial(_encoder_layer_kernel, H=n_heads, Dh=Dh,
                apply_final=final_norm is not None),
        (B, L, dm), batched=[x], shared=shared)


def distil_conv_call(x, p):
    B, L, dm = x.shape
    Lout = (L - 1) // 2 + 1
    y = _batched_call(_distil_conv_kernel, (B, L, dm), batched=[x],
                      shared=[p["Wc"], p["bc"]],
                      scratch_shapes=[pltpu.VMEM((L + 2, dm), jnp.float32)])
    # BatchNorm batch statistics (training-mode parity) via a tiny XLA reduction,
    # then a batch-parallel normalize/ELU/pool kernel.
    mu = jnp.mean(y, axis=(0, 1))
    var = jnp.mean(jnp.square(y - mu), axis=(0, 1))
    scale = p["bn_g"] * jax.lax.rsqrt(var + 1e-5)
    shift = p["bn_b"] - mu[None, :] * scale
    return _batched_call(_distil_bn_pool_kernel, (B, Lout, dm), batched=[y],
                         shared=[scale, shift],
                         scratch_shapes=[pltpu.VMEM((L + 2, dm), jnp.float32)])


def decoder_layer_call(x, cross, p, n_heads, mix, final_norm=None):
    B, L, dm = x.shape
    Dh = dm // n_heads
    fin_g, fin_b = final_norm if final_norm is not None else (p["ln3_g"], p["ln3_b"])
    sa, ca = p["self_attn"], p["cross_attn"]
    shared = [sa["Wqkv"], sa["bqkv"], sa["Wo"], sa["bo"], p["ln1_g"], p["ln1_b"],
              ca["Wq"], ca["bq"], ca["Wkv"], ca["bkv"], ca["Wo"], ca["bo"],
              p["ln2_g"], p["ln2_b"], p["W1"], p["b1"], p["W2"], p["b2"],
              p["ln3_g"], p["ln3_b"], fin_g, fin_b]
    return _batched_call(
        partial(_decoder_layer_kernel, H=n_heads, Dh=Dh, mix=mix,
                apply_final=final_norm is not None),
        (B, L, dm), batched=[x, cross], shared=shared,
        scratch_shapes=[pltpu.VMEM((L, dm), jnp.float32)])


def encoder_forward(x, p, n_heads):
    for lp, cp in zip(p["layers"][:-1], p["convs"]):
        x = encoder_layer_call(x, lp, n_heads)
        x = distil_conv_call(x, cp)
    x = encoder_layer_call(x, p["layers"][-1], n_heads,
                           final_norm=(p["norm_g"], p["norm_b"]))
    return x


def encoder_stack_forward(x, encoders_params, inp_lens, n_heads):
    L = x.shape[1]
    outs = []
    for i_len, ep in zip(inp_lens, encoders_params):
        inp_len = L // (2 ** i_len)
        outs.append(encoder_forward(x[:, -inp_len:, :], ep, n_heads))
    return jnp.concatenate(outs, axis=1)


def decoder_forward(x, cross, p, n_heads, mix):
    n = len(p["layers"])
    for i, lp in enumerate(p["layers"]):
        fn = (p["norm_g"], p["norm_b"]) if i == n - 1 else None
        x = decoder_layer_call(x, cross, lp, n_heads, mix, final_norm=fn)
    return x


def informer_stack_forward(params, cfg, x_enc, x_mark_enc, x_dec, x_mark_dec):
    B = x_enc.shape[0]
    n_heads = cfg["n_heads"]
    pred_len = cfg["pred_len"]
    enc_emb = data_embedding(x_enc, x_mark_enc, params["enc_emb_W"],
                             params["temporal_tables"], params["pe"])
    dec_emb = data_embedding(x_dec, x_mark_dec, params["dec_emb_W"],
                             params["temporal_tables"], params["pe"])
    enc_out = encoder_stack_forward(enc_emb, params["encoders"],
                                    cfg["inp_lens"], n_heads)
    if cfg["mix"]:
        assert x_dec.shape[1] % n_heads == 0, "fused mix=True path needs n_heads | dec_len"
    dec_out = decoder_forward(dec_emb, enc_out, params["decoder"], B, n_heads,
                              cfg["mix"]) if False else decoder_forward(
        dec_emb, enc_out, params["decoder"], n_heads, cfg["mix"])
    # Project only the last pred_len rows; pad output channels to 128 lanes so the
    # store is lane-dense (un-padded right after).
    dec_last = dec_out[:, -pred_len:, :]
    c_out = params["proj_W"].shape[1]
    pad_c = (-c_out) % 128
    w_p = jnp.pad(params["proj_W"], ((0, 0), (0, pad_c)))
    b_p = jnp.pad(params["proj_b"], ((0, 0), (0, pad_c)))
    out_pad = _batched_call(_linear_kernel, (B, pred_len, c_out + pad_c),
                            batched=[dec_last], shared=[w_p, b_p])
    return out_pad[:, :, :c_out]


# ----------------------------------------------------------------------------
# Deterministic parameter initialisation (QKV / KV weights pre-fused, all f32)
# ----------------------------------------------------------------------------
def init_params(key, enc_in, dec_in, c_out, d_model, n_heads, e_layers, d_layers, d_ff):
    keys = iter(jax.random.split(key, 4096))

    def w(shape):
        return 0.02 * jax.random.normal(next(keys), shape, jnp.float32)

    def zeros(*shape):
        return jnp.zeros(shape, jnp.float32)

    def ones(*shape):
        return jnp.ones(shape, jnp.float32)

    def init_self_attn(dm):
        return dict(
            Wqkv=jnp.concatenate([w((dm, dm)), w((dm, dm)), w((dm, dm))], axis=1),
            bqkv=zeros(1, 3 * dm),
            Wo=w((dm, dm)), bo=zeros(1, dm))

    def init_cross_attn(dm):
        return dict(
            Wq=w((dm, dm)), bq=zeros(1, dm),
            Wkv=jnp.concatenate([w((dm, dm)), w((dm, dm))], axis=1),
            bkv=zeros(1, 2 * dm),
            Wo=w((dm, dm)), bo=zeros(1, dm))

    def init_enc_layer(dm, dff):
        return dict(attn=init_self_attn(dm),
                    W1=w((dm, dff)), b1=zeros(1, dff),
                    W2=w((dff, dm)), b2=zeros(1, dm),
                    ln1_g=ones(1, dm), ln1_b=zeros(1, dm),
                    ln2_g=ones(1, dm), ln2_b=zeros(1, dm))

    def init_conv_layer(dm):
        return dict(Wc=w((3 * dm, dm)), bc=zeros(1, dm),
                    bn_g=ones(1, dm), bn_b=zeros(1, dm))

    def init_dec_layer(dm, dff):
        return dict(self_attn=init_self_attn(dm), cross_attn=init_cross_attn(dm),
                    W1=w((dm, dff)), b1=zeros(1, dff),
                    W2=w((dff, dm)), b2=zeros(1, dm),
                    ln1_g=ones(1, dm), ln1_b=zeros(1, dm),
                    ln2_g=ones(1, dm), ln2_b=zeros(1, dm),
                    ln3_g=ones(1, dm), ln3_b=zeros(1, dm))

    encoders = [dict(layers=[init_enc_layer(d_model, d_ff) for _ in range(el)],
                     convs=[init_conv_layer(d_model) for _ in range(el - 1)],
                     norm_g=ones(1, d_model), norm_b=zeros(1, d_model))
                for el in e_layers]
    decoder = dict(layers=[init_dec_layer(d_model, d_ff) for _ in range(d_layers)],
                   norm_g=ones(1, d_model), norm_b=zeros(1, d_model))

    return dict(
        enc_emb_W=w((3 * enc_in, d_model)),
        dec_emb_W=w((3 * dec_in, d_model)),
        pe=sinusoid_table(128, d_model),
        temporal_tables=(sinusoid_table(13, d_model),   # month
                         sinusoid_table(32, d_model),   # day
                         sinusoid_table(7, d_model),    # weekday
                         sinusoid_table(24, d_model)),  # hour
        encoders=encoders, decoder=decoder,
        proj_W=w((d_model, c_out)), proj_b=zeros(1, c_out))


# ----------------------------------------------------------------------------
# Main
# ----------------------------------------------------------------------------
if __name__ == "__main__":
    # Small config consistent with InformerStack(__init__)
    enc_in = dec_in = c_out = 4
    seq_len, label_len, out_len = 16, 8, 8
    d_model, n_heads, d_ff = 32, 4, 32
    e_layers = [3, 2, 1]
    d_layers = 2
    B = 2
    dec_len = label_len + out_len

    cfg = dict(inp_lens=list(range(len(e_layers))), n_heads=n_heads, mix=True,
               pred_len=out_len)

    key = jax.random.PRNGKey(0)
    kp, k1, k2, k3, k4 = jax.random.split(key, 5)
    params = init_params(kp, enc_in, dec_in, c_out, d_model, n_heads,
                         e_layers, d_layers, d_ff)

    x_enc = jax.random.normal(k1, (B, seq_len, enc_in), jnp.float32)
    x_dec = jax.random.normal(k2, (B, dec_len, dec_in), jnp.float32)

    def rand_mark(k, L):
        km, kd, kw, kh = jax.random.split(k, 4)
        month = jax.random.randint(km, (B, L, 1), 1, 13)
        day = jax.random.randint(kd, (B, L, 1), 1, 32)
        weekday = jax.random.randint(kw, (B, L, 1), 0, 7)
        hour = jax.random.randint(kh, (B, L, 1), 0, 24)
        return jnp.concatenate([month, day, weekday, hour], axis=-1).astype(jnp.int32)

    x_mark_enc = rand_mark(k3, seq_len)
    x_mark_dec = rand_mark(k4, dec_len)

    @jax.jit
    def run(params, xe, me, xd, md):
        return informer_stack_forward(params, cfg, xe, me, xd, md)

    out = jax.block_until_ready(run(params, x_enc, x_mark_enc, x_dec, x_mark_dec))
    assert out.shape == (B, out_len, c_out), out.shape
    assert bool(jnp.all(jnp.isfinite(out)))
    print("KERNEL_OK")
</pallas_src>

<mosaic_0001>
module attributes {stable_mosaic.version = 11 : i64} {
  func.func @_embed_kernel(%arg0: i32, %arg1: memref<1x16x4xf32, #tpu.memory_space<vmem>>, %arg2: memref<1x16x32xf32, #tpu.memory_space<vmem>>, %arg3: memref<12x32xf32, #tpu.memory_space<vmem>>, %arg4: memref<1x16x32xf32, #tpu.memory_space<vmem>>, %arg5: memref<18x4xf32, #tpu.memory_space<vmem>>) attributes {dimension_semantics = [#tpu.dimension_semantics<parallel>], iteration_bounds = array<i64: 2>, scalar_prefetch = 0 : i64, scratch_operands = 1 : i64, tpu.core_type = #tpu.core_type<tc>, window_params = [{transform_indices = @transform_0, window_bounds = array<i64: 1, 16, 4>}, {transform_indices = @transform_1, window_bounds = array<i64: 1, 16, 32>}, {pipeline_mode = #tpu.pipeline_mode<synchronous>, transform_indices = @transform_2, window_bounds = array<i64: 12, 32>}, {transform_indices = @transform_3, window_bounds = array<i64: 1, 16, 32>}]} {
    %c0 = arith.constant 0 : index
    %c0_0 = arith.constant 0 : index
    %c0_1 = arith.constant 0 : index
    %0 = vector.load %arg1[%c0, %c0_0, %c0_1] : memref<1x16x4xf32, #tpu.memory_space<vmem>>, vector<1x16x4xf32>
    %1 = vector.shape_cast %0 : vector<1x16x4xf32> to vector<16x4xf32>
    %c1 = arith.constant 1 : index
    %c0_2 = arith.constant 0 : index
    %2 = vector.load %arg5[%c1, %c0_2] : memref<18x4xf32, #tpu.memory_space<vmem>>, vector<16x4xf32>
    tpu.vector_store %arg5[%c1, %c0_2], %1 {strides = array<i32>} : memref<18x4xf32, #tpu.memory_space<vmem>>, vector<16x4xf32>,
    %c0_3 = arith.constant 0 : index
    %c15 = arith.constant 15 : index
    %c0_4 = arith.constant 0 : index
    %3 = vector.load %arg1[%c0_3, %c15, %c0_4] : memref<1x16x4xf32, #tpu.memory_space<vmem>>, vector<1x1x4xf32>
    %4 = vector.shape_cast %3 : vector<1x1x4xf32> to vector<1x4xf32>
    %c0_5 = arith.constant 0 : index
    %c0_6 = arith.constant 0 : index
    %5 = vector.load %arg5[%c0_5, %c0_6] : memref<18x4xf32, #tpu.memory_space<vmem>>, vector<1x4xf32>
    tpu.vector_store %arg5[%c0_5, %c0_6], %4 {strides = array<i32>} : memref<18x4xf32, #tpu.memory_space<vmem>>, vector<1x4xf32>,
    %c0_7 = arith.constant 0 : index
    %c0_8 = arith.constant 0 : index
    %c0_9 = arith.constant 0 : index
    %6 = vector.load %arg1[%c0_7, %c0_8, %c0_9] : memref<1x16x4xf32, #tpu.memory_space<vmem>>, vector<1x1x4xf32>
    %7 = vector.shape_cast %6 : vector<1x1x4xf32> to vector<1x4xf32>
    %c17 = arith.constant 17 : index
    %c0_10 = arith.constant 0 : index
    %8 = vector.load %arg5[%c17, %c0_10] : memref<18x4xf32, #tpu.memory_space<vmem>>, vector<1x4xf32>
    tpu.vector_store %arg5[%c17, %c0_10], %7 {strides = array<i32>} : memref<18x4xf32, #tpu.memory_space<vmem>>, vector<1x4xf32>,
    %c0_11 = arith.constant 0 : index
    %c0_12 = arith.constant 0 : index
    %9 = vector.load %arg5[%c0_11, %c0_12] : memref<18x4xf32, #tpu.memory_space<vmem>>, vector<16x4xf32>
    %c2 = arith.constant 2 : index
    %c0_13 = arith.constant 0 : index
    %10 = vector.load %arg5[%c2, %c0_13] : memref<18x4xf32, #tpu.memory_space<vmem>>, vector<16x4xf32>
    %11 = tpu.concatenate %9, %1, %10 in 1 : vector<16x4xf32>, vector<16x4xf32>, vector<16x4xf32> -> vector<16x12xf32>
    %c0_14 = arith.constant 0 : index
    %c0_15 = arith.constant 0 : index
    %12 = vector.load %arg3[%c0_14, %c0_15] : memref<12x32xf32, #tpu.memory_space<vmem>>, vector<12x32xf32>
    %cst = arith.constant dense<0.000000e+00> : vector<16x32xf32>
    %13 = tpu.matmul %11, %12, %cst {dimension_numbers = #tpu.dot_dimension_numbers<[1], [0], [0], [1], [0, 0, 1, 1], [], []>} : vector<16x12xf32>, vector<12x32xf32>, vector<16x32xf32> -> vector<16x32xf32>
    %c0_16 = arith.constant 0 : index
    %c0_17 = arith.constant 0 : index
    %c0_18 = arith.constant 0 : index
    %14 = vector.load %arg2[%c0_16, %c0_17, %c0_18] : memref<1x16x32xf32, #tpu.memory_space<vmem>>, vector<1x16x32xf32>
    %15 = vector.shape_cast %14 : vector<1x16x32xf32> to vector<16x32xf32>
    %16 = arith.addf %13, %15 : vector<16x32xf32>
    %c0_19 = arith.constant 0 : index
    %c0_20 = arith.constant 0 : index
    %c0_21 = arith.constant 0 : index
    %17 = vector.load %arg4[%c0_19, %c0_20, %c0_21] : memref<1x16x32xf32, #tpu.memory_space<vmem>>, vector<1x16x32xf32>
    %18 = vector.shape_cast %17 : vector<1x16x32xf32> to vector<16x32xf32>
    %19 = vector.shape_cast %16 : vector<16x32xf32> to vector<1x16x32xf32>
    tpu.vector_store %arg4[%c0_19, %c0_20, %c0_21], %19 {strides = array<i32>} : memref<1x16x32xf32, #tpu.memory_space<vmem>>, vector<1x16x32xf32>,
    return
  }
  func.func @transform_0(%arg0: i32) -> (i32, i32, i32) {
    %c0_i32 = arith.constant 0 : i32
    %c0_i32_0 = arith.constant 0 : i32
    %c0_i32_1 = arith.constant 0 : i32
    return %arg0, %c0_i32, %c0_i32_0 : i32, i32, i32
  }
  func.func @transform_1(%arg0: i32) -> (i32, i32, i32) {
    %c0_i32 = arith.constant 0 : i32
    %c0_i32_0 = arith.constant 0 : i32
    %c0_i32_1 = arith.constant 0 : i32
    return %arg0, %c0_i32, %c0_i32_0 : i32, i32, i32
  }
  func.func @transform_2(%arg0: i32) -> (i32, i32) {
    %c0_i32 = arith.constant 0 : i32
    %c0_i32_0 = arith.constant 0 : i32
    %c0_i32_1 = arith.constant 0 : i32
    return %c0_i32, %c0_i32_0 : i32, i32
  }
  func.func @transform_3(%arg0: i32) -> (i32, i32, i32) {
    %c0_i32 = arith.constant 0 : i32
    %c0_i32_0 = arith.constant 0 : i32
    %c0_i32_1 = arith.constant 0 : i32
    return %arg0, %c0_i32, %c0_i32_0 : i32, i32, i32
  }
}

module attributes {stable_mosaic.version = 11 : i64} {
  func.func @_encoder_layer_kernel(%arg0: i32, %arg1: memref<1x16x32xf32, #tpu.memory_space<vmem>>, %arg2: memref<32x96xf32, #tpu.memory_space<vmem>>, %arg3: memref<1x96xf32, #tpu.memory_space<vmem>>, %arg4: memref<32x32xf32, #tpu.memory_space<vmem>>, %arg5: memref<1x32xf32, #tpu.memory_space<vmem>>, %arg6: memref<1x32xf32, #tpu.memory_space<vmem>>, %arg7: memref<1x32xf32, #tpu.memory_space<vmem>>, %arg8: memref<32x32xf32, #tpu.memory_space<vmem>>, %arg9: memref<1x32xf32, #tpu.memory_space<vmem>>, %arg10: memref<32x32xf32, #tpu.memory_space<vmem>>, %arg11: memref<1x32xf32, #tpu.memory_space<vmem>>, %arg12: memref<1x32xf32, #tpu.memory_space<vmem>>, %arg13: memref<1x32xf32, #tpu.memory_space<vmem>>, %arg14: memref<1x32xf32, #tpu.memory_space<vmem>>, %arg15: memref<1x32xf32, #tpu.memory_space<vmem>>, %arg16: memref<1x16x32xf32, #tpu.memory_space<vmem>>) attributes {dimension_semantics = [#tpu.dimension_semantics<parallel>], iteration_bounds = array<i64: 2>, scalar_prefetch = 0 : i64, scratch_operands = 0 : i64, tpu.core_type = #tpu.core_type<tc>, window_params = [{transform_indices = @transform_0, window_bounds = array<i64: 1, 16, 32>}, {pipeline_mode = #tpu.pipeline_mode<synchronous>, transform_indices = @transform_1, window_bounds = array<i64: 32, 96>}, {pipeline_mode = #tpu.pipeline_mode<synchronous>, transform_indices = @transform_2, window_bounds = array<i64: 1, 96>}, {pipeline_mode = #tpu.pipeline_mode<synchronous>, transform_indices = @transform_3, window_bounds = array<i64: 32, 32>}, {pipeline_mode = #tpu.pipeline_mode<synchronous>, transform_indices = @transform_4, window_bounds = array<i64: 1, 32>}, {pipeline_mode = #tpu.pipeline_mode<synchronous>, transform_indices = @transform_5, window_bounds = array<i64: 1, 32>}, {pipeline_mode = #tpu.pipeline_mode<synchronous>, transform_indices = @transform_6, window_bounds = array<i64: 1, 32>}, {pipeline_mode = #tpu.pipeline_mode<synchronous>, transform_indices = @transform_7, window_bounds = array<i64: 32, 32>}, {pipeline_mode = #tpu.pipeline_mode<synchronous>, transform_indices = @transform_8, window_bounds = array<i64: 1, 32>}, {pipeline_mode = #tpu.pipeline_mode<synchronous>, transform_indices = @transform_9, window_bounds = array<i64: 32, 32>}, {pipeline_mode = #tpu.pipeline_mode<synchronous>, transform_indices = @transform_10, window_bounds = array<i64: 1, 32>}, {pipeline_mode = #tpu.pipeline_mode<synchronous>, transform_indices = @transform_11, window_bounds = array<i64: 1, 32>}, {pipeline_mode = #tpu.pipeline_mode<synchronous>, transform_indices = @transform_12, window_bounds = array<i64: 1, 32>}, {pipeline_mode = #tpu.pipeline_mode<synchronous>, transform_indices = @transform_13, window_bounds = array<i64: 1, 32>}, {pipeline_mode = #tpu.pipeline_mode<synchronous>, transform_indices = @transform_14, window_bounds = array<i64: 1, 32>}, {transform_indices = @transform_15, window_bounds = array<i64: 1, 16, 32>}]} {
    %c0 = arith.constant 0 : index
    %c0_0 = arith.constant 0 : index
    %c0_1 = arith.constant 0 : index
    %0 = vector.load %arg1[%c0, %c0_0, %c0_1] : memref<1x16x32xf32, #tpu.memory_space<vmem>>, vector<1x16x32xf32>
    %1 = vector.shape_cast %0 : vector<1x16x32xf32> to vector<16x32xf32>
    %c0_2 = arith.constant 0 : index
    %c0_3 = arith.constant 0 : index
    %2 = vector.load %arg2[%c0_2, %c0_3] : memref<32x96xf32, #tpu.memory_space<vmem>>, vector<32x96xf32>
    %cst = arith.constant dense<0.000000e+00> : vector<16x96xf32>
    %3 = tpu.matmul %1, %2, %cst {dimension_numbers = #tpu.dot_dimension_numbers<[1], [0], [0], [1], [0, 0, 1, 1], [], []>} : vector<16x32xf32>, vector<32x96xf32>, vector<16x96xf32> -> vector<16x96xf32>
    %c0_4 = arith.constant 0 : index
    %c0_5 = arith.constant 0 : index
    %4 = vector.load %arg3[%c0_4, %c0_5] : memref<1x96xf32, #tpu.memory_space<vmem>>, vector<1x96xf32>
    %5 = vector.broadcast %4 : vector<1x96xf32> to vector<16x96xf32>
    %6 = arith.addf %3, %5 : vector<16x96xf32>
    %7 = vector.extract_strided_slice %6 {offsets = [0, 0], sizes = [16, 32], strides = [1, 1]} : vector<16x96xf32> to vector<16x32xf32>
    %8 = vector.extract_strided_slice %6 {offsets = [0, 32], sizes = [16, 32], strides = [1, 1]} : vector<16x96xf32> to vector<16x32xf32>
    %9 = vector.extract_strided_slice %6 {offsets = [0, 64], sizes = [16, 32], strides = [1, 1]} : vector<16x96xf32> to vector<16x32xf32>
    %10 = vector.extract_strided_slice %7 {offsets = [0, 0], sizes = [16, 8], strides = [1, 1]} : vector<16x32xf32> to vector<16x8xf32>
    %11 = vector.extract_strided_slice %8 {offsets = [0, 0], sizes = [16, 8], strides = [1, 1]} : vector<16x32xf32> to vector<16x8xf32>
    %12 = vector.extract_strided_slice %9 {offsets = [0, 0], sizes = [16, 8], strides = [1, 1]} : vector<16x32xf32> to vector<16x8xf32>
    %cst_6 = arith.constant dense<0.000000e+00> : vector<16x16xf32>
    %13 = tpu.matmul %10, %11, %cst_6 {dimension_numbers = #tpu.dot_dimension_numbers<[1], [1], [0], [0], [0, 0, 1, 0], [], []>} : vector<16x8xf32>, vector<16x8xf32>, vector<16x16xf32> -> vector<16x16xf32>
    %cst_7 = arith.constant 0.353553385 : f32
    %14 = vector.broadcast %cst_7 : f32 to vector<16x16xf32>
    %15 = arith.mulf %13, %14 : vector<16x16xf32>
    %cst_8 = arith.constant dense<0xFF800000> : vector<16xf32>
    %16 = vector.multi_reduction <maximumf>, %15, %cst_8 [1] : vector<16x16xf32> to vector<16xf32>
    %17 = vector.shape_cast %16 : vector<16xf32> to vector<16x1xf32>
    %18 = vector.broadcast %17 : vector<16x1xf32> to vector<16x16xf32>
    %19 = arith.subf %15, %18 : vector<16x16xf32>
    %20 = math.exp %19 : vector<16x16xf32>
    %cst_9 = arith.constant dense<0.000000e+00> : vector<16xf32>
    %21 = vector.multi_reduction <add>, %20, %cst_9 [1] : vector<16x16xf32> to vector<16xf32>
    %22 = vector.shape_cast %21 : vector<16xf32> to vector<16x1xf32>
    %23 = tpu.reciprocal %22 {approx = true} : vector<16x1xf32> -> vector<16x1xf32>
    %24 = vector.broadcast %23 : vector<16x1xf32> to vector<16x16xf32>
    %25 = arith.mulf %20, %24 : vector<16x16xf32>
    %cst_10 = arith.constant dense<0.000000e+00> : vector<16x8xf32>
    %26 = tpu.matmul %25, %12, %cst_10 {dimension_numbers = #tpu.dot_dimension_numbers<[1], [0], [0], [1], [0, 0, 1, 1], [], []>} : vector<16x16xf32>, vector<16x8xf32>, vector<16x8xf32> -> vector<16x8xf32>
    %27 = vector.extract_strided_slice %7 {offsets = [0, 8], sizes = [16, 8], strides = [1, 1]} : vector<16x32xf32> to vector<16x8xf32>
    %28 = vector.extract_strided_slice %8 {offsets = [0, 8], sizes = [16, 8], strides = [1, 1]} : vector<16x32xf32> to vector<16x8xf32>
    %29 = vector.extract_strided_slice %9 {offsets = [0, 8], sizes = [16, 8], strides = [1, 1]} : vector<16x32xf32> to vector<16x8xf32>
    %cst_11 = arith.constant dense<0.000000e+00> : vector<16x16xf32>
    %30 = tpu.matmul %27, %28, %cst_11 {dimension_numbers = #tpu.dot_dimension_numbers<[1], [1], [0], [0], [0, 0, 1, 0], [], []>} : vector<16x8xf32>, vector<16x8xf32>, vector<16x16xf32> -> vector<16x16xf32>
    %cst_12 = arith.constant 0.353553385 : f32
    %31 = vector.broadcast %cst_12 : f32 to vector<16x16xf32>
    %32 = arith.mulf %30, %31 : vector<16x16xf32>
    %cst_13 = arith.constant dense<0xFF800000> : vector<16xf32>
    %33 = vector.multi_reduction <maximumf>, %32, %cst_13 [1] : vector<16x16xf32> to vector<16xf32>
    %34 = vector.shape_cast %33 : vector<16xf32> to vector<16x1xf32>
    %35 = vector.broadcast %34 : vector<16x1xf32> to vector<16x16xf32>
    %36 = arith.subf %32, %35 : vector<16x16xf32>
    %37 = math.exp %36 : vector<16x16xf32>
    %cst_14 = arith.constant dense<0.000000e+00> : vector<16xf32>
    %38 = vector.multi_reduction <add>, %37, %cst_14 [1] : vector<16x16xf32> to vector<16xf32>
    %39 = vector.shape_cast %38 : vector<16xf32> to vector<16x1xf32>
    %40 = tpu.reciprocal %39 {approx = true} : vector<16x1xf32> -> vector<16x1xf32>
    %41 = vector.broadcast %40 : vector<16x1xf32> to vector<16x16xf32>
    %42 = arith.mulf %37, %41 : vector<16x16xf32>
    %cst_15 = arith.constant dense<0.000000e+00> : vector<16x8xf32>
    %43 = tpu.matmul %42, %29, %cst_15 {dimension_numbers = #tpu.dot_dimension_numbers<[1], [0], [0], [1], [0, 0, 1, 1], [], []>} : vector<16x16xf32>, vector<16x8xf32>, vector<16x8xf32> -> vector<16x8xf32>
    %44 = vector.extract_strided_slice %7 {offsets = [0, 16], sizes = [16, 8], strides = [1, 1]} : vector<16x32xf32> to vector<16x8xf32>
    %45 = vector.extract_strided_slice %8 {offsets = [0, 16], sizes = [16, 8], strides = [1, 1]} : vector<16x32xf32> to vector<16x8xf32>
    %46 = vector.extract_strided_slice %9 {offsets = [0, 16], sizes = [16, 8], strides = [1, 1]} : vector<16x32xf32> to vector<16x8xf32>
    %cst_16 = arith.constant dense<0.000000e+00> : vector<16x16xf32>
    %47 = tpu.matmul %44, %45, %cst_16 {dimension_numbers = #tpu.dot_dimension_numbers<[1], [1], [0], [0], [0, 0, 1, 0], [], []>} : vector<16x8xf32>, vector<16x8xf32>, vector<16x16xf32> -> vector<16x16xf32>
    %cst_17 = arith.constant 0.353553385 : f32
    %48 = vector.broadcast %cst_17 : f32 to vector<16x16xf32>
    %49 = arith.mulf %47, %48 : vector<16x16xf32>
    %cst_18 = arith.constant dense<0xFF800000> : vector<16xf32>
    %50 = vector.multi_reduction <maximumf>, %49, %cst_18 [1] : vector<16x16xf32> to vector<16xf32>
    %51 = vector.shape_cast %50 : vector<16xf32> to vector<16x1xf32>
    %52 = vector.broadcast %51 : vector<16x1xf32> to vector<16x16xf32>
    %53 = arith.subf %49, %52 : vector<16x16xf32>
    %54 = math.exp %53 : vector<16x16xf32>
    %cst_19 = arith.constant dense<0.000000e+00> : vector<16xf32>
    %55 = vector.multi_reduction <add>, %54, %cst_19 [1] : vector<16x16xf32> to vector<16xf32>
    %56 = vector.shape_cast %55 : vector<16xf32> to vector<16x1xf32>
    %57 = tpu.reciprocal %56 {approx = true} : vector<16x1xf32> -> vector<16x1xf32>
    %58 = vector.broadcast %57 : vector<16x1xf32> to vector<16x16xf32>
    %59 = arith.mulf %54, %58 : vector<16x16xf32>
    %cst_20 = arith.constant dense<0.000000e+00> : vector<16x8xf32>
    %60 = tpu.matmul %59, %46, %cst_20 {dimension_numbers = #tpu.dot_dimension_numbers<[1], [0], [0], [1], [0, 0, 1, 1], [], []>} : vector<16x16xf32>, vector<16x8xf32>, vector<16x8xf32> -> vector<16x8xf32>
    %61 = vector.extract_strided_slice %7 {offsets = [0, 24], sizes = [16, 8], strides = [1, 1]} : vector<16x32xf32> to vector<16x8xf32>
    %62 = vector.extract_strided_slice %8 {offsets = [0, 24], sizes = [16, 8], strides = [1, 1]} : vector<16x32xf32> to vector<16x8xf32>
    %63 = vector.extract_strided_slice %9 {offsets = [0, 24], sizes = [16, 8], strides = [1, 1]} : vector<16x32xf32> to vector<16x8xf32>
    %cst_21 = arith.constant dense<0.000000e+00> : vector<16x16xf32>
    %64 = tpu.matmul %61, %62, %cst_21 {dimension_numbers = #tpu.dot_dimension_numbers<[1], [1], [0], [0], [0, 0, 1, 0], [], []>} : vector<16x8xf32>, vector<16x8xf32>, vector<16x16xf32> -> vector<16x16xf32>
    %cst_22 = arith.constant 0.353553385 : f32
    %65 = vector.broadcast %cst_22 : f32 to vector<16x16xf32>
    %66 = arith.mulf %64, %65 : vector<16x16xf32>
    %cst_23 = arith.constant dense<0xFF800000> : vector<16xf32>
    %67 = vector.multi_reduction <maximumf>, %66, %cst_23 [1] : vector<16x16xf32> to vector<16xf32>
    %68 = vector.shape_cast %67 : vector<16xf32> to vector<16x1xf32>
    %69 = vector.broadcast %68 : vector<16x1xf32> to vector<16x16xf32>
    %70 = arith.subf %66, %69 : vector<16x16xf32>
    %71 = math.exp %70 : vector<16x16xf32>
    %cst_24 = arith.constant dense<0.000000e+00> : vector<16xf32>
    %72 = vector.multi_reduction <add>, %71, %cst_24 [1] : vector<16x16xf32> to vector<16xf32>
    %73 = vector.shape_cast %72 : vector<16xf32> to vector<16x1xf32>
    %74 = tpu.reciprocal %73 {approx = true} : vector<16x1xf32> -> vector<16x1xf32>
    %75 = vector.broadcast %74 : vector<16x1xf32> to vector<16x16xf32>
    %76 = arith.mulf %71, %75 : vector<16x16xf32>
    %cst_25 = arith.constant dense<0.000000e+00> : vector<16x8xf32>
    %77 = tpu.matmul %76, %63, %cst_25 {dimension_numbers = #tpu.dot_dimension_numbers<[1], [0], [0], [1], [0, 0, 1, 1], [], []>} : vector<16x16xf32>, vector<16x8xf32>, vector<16x8xf32> -> vector<16x8xf32>
    %78 = tpu.concatenate %26, %43, %60, %77 in 1 : vector<16x8xf32>, vector<16x8xf32>, vector<16x8xf32>, vector<16x8xf32> -> vector<16x32xf32>
    %c0_26 = arith.constant 0 : index
    %c0_27 = arith.constant 0 : index
    %79 = vector.load %arg4[%c0_26, %c0_27] : memref<32x32xf32, #tpu.memory_space<vmem>>, vector<32x32xf32>
    %cst_28 = arith.constant dense<0.000000e+00> : vector<16x32xf32>
    %80 = tpu.matmul %78, %79, %cst_28 {dimension_numbers = #tpu.dot_dimension_numbers<[1], [0], [0], [1], [0, 0, 1, 1], [], []>} : vector<16x32xf32>, vector<32x32xf32>, vector<16x32xf32> -> vector<16x32xf32>
    %c0_29 = arith.constant 0 : index
    %c0_30 = arith.constant 0 : index
    %81 = vector.load %arg5[%c0_29, %c0_30] : memref<1x32xf32, #tpu.memory_space<vmem>>, vector<1x32xf32>
    %82 = vector.broadcast %81 : vector<1x32xf32> to vector<16x32xf32>
    %83 = arith.addf %80, %82 : vector<16x32xf32>
    %84 = arith.addf %1, %83 : vector<16x32xf32>
    %c0_31 = arith.constant 0 : index
    %c0_32 = arith.constant 0 : index
    %85 = vector.load %arg6[%c0_31, %c0_32] : memref<1x32xf32, #tpu.memory_space<vmem>>, vector<1x32xf32>
    %c0_33 = arith.constant 0 : index
    %c0_34 = arith.constant 0 : index
    %86 = vector.load %arg7[%c0_33, %c0_34] : memref<1x32xf32, #tpu.memory_space<vmem>>, vector<1x32xf32>
    %cst_35 = arith.constant dense<0.000000e+00> : vector<16xf32>
    %87 = vector.multi_reduction <add>, %84, %cst_35 [1] : vector<16x32xf32> to vector<16xf32>
    %88 = vector.shape_cast %87 : vector<16xf32> to vector<16x1xf32>
    %cst_36 = arith.constant 3.200000e+01 : f32
    %89 = vector.broadcast %cst_36 : f32 to vector<16x1xf32>
    %90 = arith.divf %88, %89 : vector<16x1xf32>
    %91 = vector.broadcast %90 : vector<16x1xf32> to vector<16x32xf32>
    %92 = arith.subf %84, %91 : vector<16x32xf32>
    %93 = arith.mulf %92, %92 : vector<16x32xf32>
    %cst_37 = arith.constant dense<0.000000e+00> : vector<16xf32>
    %94 = vector.multi_reduction <add>, %93, %cst_37 [1] : vector<16x32xf32> to vector<16xf32>
    %95 = vector.shape_cast %94 : vector<16xf32> to vector<16x1xf32>
    %cst_38 = arith.constant 3.200000e+01 : f32
    %96 = vector.broadcast %cst_38 : f32 to vector<16x1xf32>
    %97 = arith.divf %95, %96 : vector<16x1xf32>
    %98 = vector.broadcast %90 : vector<16x1xf32> to vector<16x32xf32>
    %99 = arith.subf %84, %98 : vector<16x32xf32>
    %cst_39 = arith.constant 9.99999974E-6 : f32
    %100 = vector.broadcast %cst_39 : f32 to vector<16x1xf32>
    %101 = arith.addf %97, %100 : vector<16x1xf32>
    %102 = math.rsqrt %101 : vector<16x1xf32>
    %103 = vector.broadcast %102 : vector<16x1xf32> to vector<16x32xf32>
    %104 = arith.mulf %99, %103 : vector<16x32xf32>
    %105 = vector.broadcast %85 : vector<1x32xf32> to vector<16x32xf32>
    %106 = arith.mulf %104, %105 : vector<16x32xf32>
    %107 = vector.broadcast %86 : vector<1x32xf32> to vector<16x32xf32>
    %108 = arith.addf %106, %107 : vector<16x32xf32>
    %c0_40 = arith.constant 0 : index
    %c0_41 = arith.constant 0 : index
    %109 = vector.load %arg8[%c0_40, %c0_41] : memref<32x32xf32, #tpu.memory_space<vmem>>, vector<32x32xf32>
    %cst_42 = arith.constant dense<0.000000e+00> : vector<16x32xf32>
    %110 = tpu.matmul %108, %109, %cst_42 {dimension_numbers = #tpu.dot_dimension_numbers<[1], [0], [0], [1], [0, 0, 1, 1], [], []>} : vector<16x32xf32>, vector<32x32xf32>, vector<16x32xf32> -> vector<16x32xf32>
    %c0_43 = arith.constant 0 : index
    %c0_44 = arith.constant 0 : index
    %111 = vector.load %arg9[%c0_43, %c0_44] : memref<1x32xf32, #tpu.memory_space<vmem>>, vector<1x32xf32>
    %112 = vector.broadcast %111 : vector<1x32xf32> to vector<16x32xf32>
    %113 = arith.addf %110, %112 : vector<16x32xf32>
    %cst_45 = arith.constant 5.000000e-01 : f32
    %114 = vector.broadcast %cst_45 : f32 to vector<16x32xf32>
    %115 = arith.mulf %114, %113 : vector<16x32xf32>
    %cst_46 = arith.constant 4.471500e-02 : f32
    %116 = vector.broadcast %cst_46 : f32 to vector<16x32xf32>
    %117 = arith.mulf %116, %113 : vector<16x32xf32>
    %118 = arith.mulf %117, %113 : vector<16x32xf32>
    %119 = arith.mulf %118, %113 : vector<16x32xf32>
    %120 = arith.addf %113, %119 : vector<16x32xf32>
    %cst_47 = arith.constant 0.797884583 : f32
    %121 = vector.broadcast %cst_47 : f32 to vector<16x32xf32>
    %122 = arith.mulf %121, %120 : vector<16x32xf32>
    %123 = math.tanh %122 : vector<16x32xf32>
    %cst_48 = arith.constant 1.000000e+00 : f32
    %124 = vector.broadcast %cst_48 : f32 to vector<16x32xf32>
    %125 = arith.addf %124, %123 : vector<16x32xf32>
    %126 = arith.mulf %115, %125 : vector<16x32xf32>
    %c0_49 = arith.constant 0 : index
    %c0_50 = arith.constant 0 : index
    %127 = vector.load %arg10[%c0_49, %c0_50] : memref<32x32xf32, #tpu.memory_space<vmem>>, vector<32x32xf32>
    %cst_51 = arith.constant dense<0.000000e+00> : vector<16x32xf32>
    %128 = tpu.matmul %126, %127, %cst_51 {dimension_numbers = #tpu.dot_dimension_numbers<[1], [0], [0], [1], [0, 0, 1, 1], [], []>} : vector<16x32xf32>, vector<32x32xf32>, vector<16x32xf32> -> vector<16x32xf32>
    %c0_52 = arith.constant 0 : index
    %c0_53 = arith.constant 0 : index
    %129 = vector.load %arg11[%c0_52, %c0_53] : memref<1x32xf32, #tpu.memory_space<vmem>>, vector<1x32xf32>
    %130 = vector.broadcast %129 : vector<1x32xf32> to vector<16x32xf32>
    %131 = arith.addf %128, %130 : vector<16x32xf32>
    %132 = arith.addf %108, %131 : vector<16x32xf32>
    %c0_54 = arith.constant 0 : index
    %c0_55 = arith.constant 0 : index
    %133 = vector.load %arg12[%c0_54, %c0_55] : memref<1x32xf32, #tpu.memory_space<vmem>>, vector<1x32xf32>
    %c0_56 = arith.constant 0 : index
    %c0_57 = arith.constant 0 : index
    %134 = vector.load %arg13[%c0_56, %c0_57] : memref<1x32xf32, #tpu.memory_space<vmem>>, vector<1x32xf32>
    %cst_58 = arith.constant dense<0.000000e+00> : vector<16xf32>
    %135 = vector.multi_reduction <add>, %132, %cst_58 [1] : vector<16x32xf32> to vector<16xf32>
    %136 = vector.shape_cast %135 : vector<16xf32> to vector<16x1xf32>
    %cst_59 = arith.constant 3.200000e+01 : f32
    %137 = vector.broadcast %cst_59 : f32 to vector<16x1xf32>
    %138 = arith.divf %136, %137 : vector<16x1xf32>
    %139 = vector.broadcast %138 : vector<16x1xf32> to vector<16x32xf32>
    %140 = arith.subf %132, %139 : vector<16x32xf32>
    %141 = arith.mulf %140, %140 : vector<16x32xf32>
    %cst_60 = arith.constant dense<0.000000e+00> : vector<16xf32>
    %142 = vector.multi_reduction <add>, %141, %cst_60 [1] : vector<16x32xf32> to vector<16xf32>
    %143 = vector.shape_cast %142 : vector<16xf32> to vector<16x1xf32>
    %cst_61 = arith.constant 3.200000e+01 : f32
    %144 = vector.broadcast %cst_61 : f32 to vector<16x1xf32>
    %145 = arith.divf %143, %144 : vector<16x1xf32>
    %146 = vector.broadcast %138 : vector<16x1xf32> to vector<16x32xf32>
    %147 = arith.subf %132, %146 : vector<16x32xf32>
    %cst_62 = arith.constant 9.99999974E-6 : f32
    %148 = vector.broadcast %cst_62 : f32 to vector<16x1xf32>
    %149 = arith.addf %145, %148 : vector<16x1xf32>
    %150 = math.rsqrt %149 : vector<16x1xf32>
    %151 = vector.broadcast %150 : vector<16x1xf32> to vector<16x32xf32>
    %152 = arith.mulf %147, %151 : vector<16x32xf32>
    %153 = vector.broadcast %133 : vector<1x32xf32> to vector<16x32xf32>
    %154 = arith.mulf %152, %153 : vector<16x32xf32>
    %155 = vector.broadcast %134 : vector<1x32xf32> to vector<16x32xf32>
    %156 = arith.addf %154, %155 : vector<16x32xf32>
    %c0_63 = arith.constant 0 : index
    %c0_64 = arith.constant 0 : index
    %c0_65 = arith.constant 0 : index
    %157 = vector.load %arg16[%c0_63, %c0_64, %c0_65] : memref<1x16x32xf32, #tpu.memory_space<vmem>>, vector<1x16x32xf32>
    %158 = vector.shape_cast %157 : vector<1x16x32xf32> to vector<16x32xf32>
    %159 = vector.shape_cast %156 : vector<16x32xf32> to vector<1x16x32xf32>
    tpu.vector_store %arg16[%c0_63, %c0_64, %c0_65], %159 {strides = array<i32>} : memref<1x16x32xf32, #tpu.memory_space<vmem>>, vector<1x16x32xf32>,
    return
  }
  func.func @transform_0(%arg0: i32) -> (i32, i32, i32) {
    %c0_i32 = arith.constant 0 : i32
    %c0_i32_0 = arith.constant 0 : i32
    %c0_i32_1 = arith.constant 0 : i32
    return %arg0, %c0_i32, %c0_i32_0 : i32, i32, i32
  }
  func.func @transform_1(%arg0: i32) -> (i32, i32) {
    %c0_i32 = arith.constant 0 : i32
    %c0_i32_0 = arith.constant 0 : i32
    %c0_i32_1 = arith.constant 0 : i32
    return %c0_i32, %c0_i32_0 : i32, i32
  }
  func.func @transform_2(%arg0: i32) -> (i32, i32) {
    %c0_i32 = arith.constant 0 : i32
    %c0_i32_0 = arith.constant 0 : i32
    %c0_i32_1 = arith.constant 0 : i32
    return %c0_i32, %c0_i32_0 : i32, i32
  }
  func.func @transform_3(%arg0: i32) -> (i32, i32) {
    %c0_i32 = arith.constant 0 : i32
    %c0_i32_0 = arith.constant 0 : i32
    %c0_i32_1 = arith.constant 0 : i32
    return %c0_i32, %c0_i32_0 : i32, i32
  }
  func.func @transform_4(%arg0: i32) -> (i32, i32) {
    %c0_i32 = arith.constant 0 : i32
    %c0_i32_0 = arith.constant 0 : i32
    %c0_i32_1 = arith.constant 0 : i32
    return %c0_i32, %c0_i32_0 : i32, i32
  }
  func.func @transform_5(%arg0: i32) -> (i32, i32) {
    %c0_i32 = arith.constant 0 : i32
    %c0_i32_0 = arith.constant 0 : i32
    %c0_i32_1 = arith.constant 0 : i32
    return %c0_i32, %c0_i32_0 : i32, i32
  }
  func.func @transform_6(%arg0: i32) -> (i32, i32) {
    %c0_i32 = arith.constant 0 : i32
    %c0_i32_0 = arith.constant 0 : i32
    %c0_i32_1 = arith.constant 0 : i32
    return %c0_i32, %c0_i32_0 : i32, i32
  }
  func.func @transform_7(%arg0: i32) -> (i32, i32) {
    %c0_i32 = arith.constant 0 : i32
    %c0_i32_0 = arith.constant 0 : i32
    %c0_i32_1 = arith.constant 0 : i32
    return %c0_i32, %c0_i32_0 : i32, i32
  }
  func.func @transform_8(%arg0: i32) -> (i32, i32) {
    %c0_i32 = arith.constant 0 : i32
    %c0_i32_0 = arith.constant 0 : i32
    %c0_i32_1 = arith.constant 0 : i32
    return %c0_i32, %c0_i32_0 : i32, i32
  }
  func.func @transform_9(%arg0: i32) -> (i32, i32) {
    %c0_i32 = arith.constant 0 : i32
    %c0_i32_0 = arith.constant 0 : i32
    %c0_i32_1 = arith.constant 0 : i32
    return %c0_i32, %c0_i32_0 : i32, i32
  }
  func.func @transform_10(%arg0: i32) -> (i32, i32) {
    %c0_i32 = arith.constant 0 : i32
    %c0_i32_0 = arith.constant 0 : i32
    %c0_i32_1 = arith.constant 0 : i32
    return %c0_i32, %c0_i32_0 : i32, i32
  }
  func.func @transform_11(%arg0: i32) -> (i32, i32) {
    %c0_i32 = arith.constant 0 : i32
    %c0_i32_0 = arith.constant 0 : i32
    %c0_i32_1 = arith.constant 0 : i32
    return %c0_i32, %c0_i32_0 : i32, i32
  }
  func.func @transform_12(%arg0: i32) -> (i32, i32) {
    %c0_i32 = arith.constant 0 : i32
    %c0_i32_0 = arith.constant 0 : i32
    %c0_i32_1 = arith.constant 0 : i32
    return %c0_i32, %c0_i32_0 : i32, i32
  }
  func.func @transform_13(%arg0: i32) -> (i32, i32) {
    %c0_i32 = arith.constant 0 : i32
    %c0_i32_0 = arith.constant 0 : i32
    %c0_i32_1 = arith.constant 0 : i32
    return %c0_i32, %c0_i32_0 : i32, i32
  }
  func.func @transform_14(%arg0: i32) -> (i32, i32) {
    %c0_i32 = arith.constant 0 : i32
    %c0_i32_0 = arith.constant 0 : i32
    %c0_i32_1 = arith.constant 0 : i32
    return %c0_i32, %c0_i32_0 : i32, i32
  }
  func.func @transform_15(%arg0: i32) -> (i32, i32, i32) {
    %c0_i32 = arith.constant 0 : i32
    %c0_i32_0 = arith.constant 0 : i32
    %c0_i32_1 = arith.constant 0 : i32
    return %arg0, %c0_i32, %c0_i32_0 : i32, i32, i32
  }
}

module attributes {stable_mosaic.version = 11 : i64} {
  func.func @_distil_conv_kernel(%arg0: i32, %arg1: memref<1x16x32xf32, #tpu.memory_space<vmem>>, %arg2: memref<96x32xf32, #tpu.memory_space<vmem>>, %arg3: memref<1x32xf32, #tpu.memory_space<vmem>>, %arg4: memref<1x16x32xf32, #tpu.memory_space<vmem>>, %arg5: memref<18x32xf32, #tpu.memory_space<vmem>>) attributes {dimension_semantics = [#tpu.dimension_semantics<parallel>], iteration_bounds = array<i64: 2>, scalar_prefetch = 0 : i64, scratch_operands = 1 : i64, tpu.core_type = #tpu.core_type<tc>, window_params = [{transform_indices = @transform_0, window_bounds = array<i64: 1, 16, 32>}, {pipeline_mode = #tpu.pipeline_mode<synchronous>, transform_indices = @transform_1, window_bounds = array<i64: 96, 32>}, {pipeline_mode = #tpu.pipeline_mode<synchronous>, transform_indices = @transform_2, window_bounds = array<i64: 1, 32>}, {transform_indices = @transform_3, window_bounds = array<i64: 1, 16, 32>}]} {
    %c0 = arith.constant 0 : index
    %c0_0 = arith.constant 0 : index
    %c0_1 = arith.constant 0 : index
    %0 = vector.load %arg1[%c0, %c0_0, %c0_1] : memref<1x16x32xf32, #tpu.memory_space<vmem>>, vector<1x16x32xf32>
    %1 = vector.shape_cast %0 : vector<1x16x32xf32> to vector<16x32xf32>
    %c1 = arith.constant 1 : index
    %c0_2 = arith.constant 0 : index
    %2 = vector.load %arg5[%c1, %c0_2] : memref<18x32xf32, #tpu.memory_space<vmem>>, vector<16x32xf32>
    tpu.vector_store %arg5[%c1, %c0_2], %1 {strides = array<i32>} : memref<18x32xf32, #tpu.memory_space<vmem>>, vector<16x32xf32>,
    %c0_3 = arith.constant 0 : index
    %c15 = arith.constant 15 : index
    %c0_4 = arith.constant 0 : index
    %3 = vector.load %arg1[%c0_3, %c15, %c0_4] : memref<1x16x32xf32, #tpu.memory_space<vmem>>, vector<1x1x32xf32>
    %4 = vector.shape_cast %3 : vector<1x1x32xf32> to vector<1x32xf32>
    %c0_5 = arith.constant 0 : index
    %c0_6 = arith.constant 0 : index
    %5 = vector.load %arg5[%c0_5, %c0_6] : memref<18x32xf32, #tpu.memory_space<vmem>>, vector<1x32xf32>
    tpu.vector_store %arg5[%c0_5, %c0_6], %4 {strides = array<i32>} : memref<18x32xf32, #tpu.memory_space<vmem>>, vector<1x32xf32>,
    %c0_7 = arith.constant 0 : index
    %c0_8 = arith.constant 0 : index
    %c0_9 = arith.constant 0 : index
    %6 = vector.load %arg1[%c0_7, %c0_8, %c0_9] : memref<1x16x32xf32, #tpu.memory_space<vmem>>, vector<1x1x32xf32>
    %7 = vector.shape_cast %6 : vector<1x1x32xf32> to vector<1x32xf32>
    %c17 = arith.constant 17 : index
    %c0_10 = arith.constant 0 : index
    %8 = vector.load %arg5[%c17, %c0_10] : memref<18x32xf32, #tpu.memory_space<vmem>>, vector<1x32xf32>
    tpu.vector_store %arg5[%c17, %c0_10], %7 {strides = array<i32>} : memref<18x32xf32, #tpu.memory_space<vmem>>, vector<1x32xf32>,
    %c0_11 = arith.constant 0 : index
    %c0_12 = arith.constant 0 : index
    %9 = vector.load %arg5[%c0_11, %c0_12] : memref<18x32xf32, #tpu.memory_space<vmem>>, vector<16x32xf32>
    %c2 = arith.constant 2 : index
    %c0_13 = arith.constant 0 : index
    %10 = vector.load %arg5[%c2, %c0_13] : memref<18x32xf32, #tpu.memory_space<vmem>>, vector<16x32xf32>
    %11 = tpu.concatenate %9, %1, %10 in 1 : vector<16x32xf32>, vector<16x32xf32>, vector<16x32xf32> -> vector<16x96xf32>
    %c0_14 = arith.constant 0 : index
    %c0_15 = arith.constant 0 : index
    %12 = vector.load %arg2[%c0_14, %c0_15] : memref<96x32xf32, #tpu.memory_space<vmem>>, vector<96x32xf32>
    %cst = arith.constant dense<0.000000e+00> : vector<16x32xf32>
    %13 = tpu.matmul %11, %12, %cst {dimension_numbers = #tpu.dot_dimension_numbers<[1], [0], [0], [1], [0, 0, 1, 1], [], []>} : vector<16x96xf32>, vector<96x32xf32>, vector<16x32xf32> -> vector<16x32xf32>
    %c0_16 = arith.constant 0 : index
    %c0_17 = arith.constant 0 : index
    %14 = vector.load %arg3[%c0_16, %c0_17] : memref<1x32xf32, #tpu.memory_space<vmem>>, vector<1x32xf32>
    %15 = vector.broadcast %14 : vector<1x32xf32> to vector<16x32xf32>
    %16 = arith.addf %13, %15 : vector<16x32xf32>
    %c0_18 = arith.constant 0 : index
    %c0_19 = arith.constant 0 : index
    %c0_20 = arith.constant 0 : index
    %17 = vector.load %arg4[%c0_18, %c0_19, %c0_20] : memref<1x16x32xf32, #tpu.memory_space<vmem>>, vector<1x16x32xf32>
    %18 = vector.shape_cast %17 : vector<1x16x32xf32> to vector<16x32xf32>
    %19 = vector.shape_cast %16 : vector<16x32xf32> to vector<1x16x32xf32>
    tpu.vector_store %arg4[%c0_18, %c0_19, %c0_20], %19 {strides = array<i32>} : memref<1x16x32xf32, #tpu.memory_space<vmem>>, vector<1x16x32xf32>,
    return
  }
  func.func @transform_0(%arg0: i32) -> (i32, i32, i32) {
    %c0_i32 = arith.constant 0 : i32
    %c0_i32_0 = arith.constant 0 : i32
    %c0_i32_1 = arith.constant 0 : i32
    return %arg0, %c0_i32, %c0_i32_0 : i32, i32, i32
  }
  func.func @transform_1(%arg0: i32) -> (i32, i32) {
    %c0_i32 = arith.constant 0 : i32
    %c0_i32_0 = arith.constant 0 : i32
    %c0_i32_1 = arith.constant 0 : i32
    return %c0_i32, %c0_i32_0 : i32, i32
  }
  func.func @transform_2(%arg0: i32) -> (i32, i32) {
    %c0_i32 = arith.constant 0 : i32
    %c0_i32_0 = arith.constant 0 : i32
    %c0_i32_1 = arith.constant 0 : i32
    return %c0_i32, %c0_i32_0 : i32, i32
  }
  func.func @transform_3(%arg0: i32) -> (i32, i32, i32) {
    %c0_i32 = arith.constant 0 : i32
    %c0_i32_0 = arith.constant 0 : i32
    %c0_i32_1 = arith.constant 0 : i32
    return %arg0, %c0_i32, %c0_i32_0 : i32, i32, i32
  }
}

module attributes {stable_mosaic.version = 11 : i64} {
  func.func @_distil_bn_pool_kernel(%arg0: i32, %arg1: memref<1x16x32xf32, #tpu.memory_space<vmem>>, %arg2: memref<1x32xf32, #tpu.memory_space<vmem>>, %arg3: memref<1x32xf32, #tpu.memory_space<vmem>>, %arg4: memref<1x8x32xf32, #tpu.memory_space<vmem>>, %arg5: memref<18x32xf32, #tpu.memory_space<vmem>>) attributes {dimension_semantics = [#tpu.dimension_semantics<parallel>], iteration_bounds = array<i64: 2>, scalar_prefetch = 0 : i64, scratch_operands = 1 : i64, tpu.core_type = #tpu.core_type<tc>, window_params = [{transform_indices = @transform_0, window_bounds = array<i64: 1, 16, 32>}, {pipeline_mode = #tpu.pipeline_mode<synchronous>, transform_indices = @transform_1, window_bounds = array<i64: 1, 32>}, {pipeline_mode = #tpu.pipeline_mode<synchronous>, transform_indices = @transform_2, window_bounds = array<i64: 1, 32>}, {transform_indices = @transform_3, window_bounds = array<i64: 1, 8, 32>}]} {
    %c0 = arith.constant 0 : index
    %c0_0 = arith.constant 0 : index
    %c0_1 = arith.constant 0 : index
    %0 = vector.load %arg1[%c0, %c0_0, %c0_1] : memref<1x16x32xf32, #tpu.memory_space<vmem>>, vector<1x16x32xf32>
    %1 = vector.shape_cast %0 : vector<1x16x32xf32> to vector<16x32xf32>
    %c0_2 = arith.constant 0 : index
    %c0_3 = arith.constant 0 : index
    %2 = vector.load %arg2[%c0_2, %c0_3] : memref<1x32xf32, #tpu.memory_space<vmem>>, vector<1x32xf32>
    %3 = vector.broadcast %2 : vector<1x32xf32> to vector<16x32xf32>
    %4 = arith.mulf %1, %3 : vector<16x32xf32>
    %c0_4 = arith.constant 0 : index
    %c0_5 = arith.constant 0 : index
    %5 = vector.load %arg3[%c0_4, %c0_5] : memref<1x32xf32, #tpu.memory_space<vmem>>, vector<1x32xf32>
    %6 = vector.broadcast %5 : vector<1x32xf32> to vector<16x32xf32>
    %7 = arith.addf %4, %6 : vector<16x32xf32>
    %cst = arith.constant 0.000000e+00 : f32
    %8 = vector.broadcast %cst : f32 to vector<16x32xf32>
    %9 = arith.cmpf ogt, %7, %8 : vector<16x32xf32>
    %cst_6 = arith.constant 0.000000e+00 : f32
    %10 = vector.broadcast %cst_6 : f32 to vector<16x32xf32>
    %11 = arith.minimumf %7, %10 : vector<16x32xf32>
    %12 = math.exp %11 : vector<16x32xf32>
    %cst_7 = arith.constant 1.000000e+00 : f32
    %13 = vector.broadcast %cst_7 : f32 to vector<16x32xf32>
    %14 = arith.subf %12, %13 : vector<16x32xf32>
    %15 = arith.select %9, %7, %14 : vector<16x32xi1>, vector<16x32xf32>
    %c1 = arith.constant 1 : index
    %c0_8 = arith.constant 0 : index
    %16 = vector.load %arg5[%c1, %c0_8] : memref<18x32xf32, #tpu.memory_space<vmem>>, vector<16x32xf32>
    tpu.vector_store %arg5[%c1, %c0_8], %15 {strides = array<i32>} : memref<18x32xf32, #tpu.memory_space<vmem>>, vector<16x32xf32>,
    %c1_9 = arith.constant 1 : index
    %c0_10 = arith.constant 0 : index
    %17 = vector.load %arg5[%c1_9, %c0_10] : memref<18x32xf32, #tpu.memory_space<vmem>>, vector<1x32xf32>
    %c0_11 = arith.constant 0 : index
    %c0_12 = arith.constant 0 : index
    %18 = vector.load %arg5[%c0_11, %c0_12] : memref<18x32xf32, #tpu.memory_space<vmem>>, vector<1x32xf32>
    tpu.vector_store %arg5[%c0_11, %c0_12], %17 {strides = array<i32>} : memref<18x32xf32, #tpu.memory_space<vmem>>, vector<1x32xf32>,
    %c16 = arith.constant 16 : index
    %c0_13 = arith.constant 0 : index
    %19 = vector.load %arg5[%c16, %c0_13] : memref<18x32xf32, #tpu.memory_space<vmem>>, vector<1x32xf32>
    %c17 = arith.constant 17 : index
    %c0_14 = arith.constant 0 : index
    %20 = vector.load %arg5[%c17, %c0_14] : memref<18x32xf32, #tpu.memory_space<vmem>>, vector<1x32xf32>
    tpu.vector_store %arg5[%c17, %c0_14], %19 {strides = array<i32>} : memref<18x32xf32, #tpu.memory_space<vmem>>, vector<1x32xf32>,
    %c0_15 = arith.constant 0 : index
    %c0_16 = arith.constant 0 : index
    %21 = vector.load %arg5[%c0_15, %c0_16] : memref<18x32xf32, #tpu.memory_space<vmem>>, vector<16x32xf32>
    %22 = arith.maximumf %21, %15 : vector<16x32xf32>
    %c2 = arith.constant 2 : index
    %c0_17 = arith.constant 0 : index
    %23 = vector.load %arg5[%c2, %c0_17] : memref<18x32xf32, #tpu.memory_space<vmem>>, vector<16x32xf32>
    %24 = arith.maximumf %22, %23 : vector<16x32xf32>
    %c0_18 = arith.constant 0 : index
    %c0_19 = arith.constant 0 : index
    %25 = vector.load %arg5[%c0_18, %c0_19] : memref<18x32xf32, #tpu.memory_space<vmem>>, vector<16x32xf32>
    tpu.vector_store %arg5[%c0_18, %c0_19], %24 {strides = array<i32>} : memref<18x32xf32, #tpu.memory_space<vmem>>, vector<16x32xf32>,
    %c0_20 = arith.constant 0 : index
    %c0_21 = arith.constant 0 : index
    %26 = tpu.strided_load %arg5[%c0_20, %c0_21] {strides = array<i32: 2, 1>} : memref<18x32xf32, #tpu.memory_space<vmem>>, vector<8x32xf32>
    %c0_22 = arith.constant 0 : index
    %c0_23 = arith.constant 0 : index
    %c0_24 = arith.constant 0 : index
    %27 = vector.load %arg4[%c0_22, %c0_23, %c0_24] : memref<1x8x32xf32, #tpu.memory_space<vmem>>, vector<1x8x32xf32>
    %28 = vector.shape_cast %27 : vector<1x8x32xf32> to vector<8x32xf32>
    %29 = vector.shape_cast %26 : vector<8x32xf32> to vector<1x8x32xf32>
    tpu.vector_store %arg4[%c0_22, %c0_23, %c0_24], %29 {strides = array<i32>} : memref<1x8x32xf32, #tpu.memory_space<vmem>>, vector<1x8x32xf32>,
    return
  }
  func.func @transform_0(%arg0: i32) -> (i32, i32, i32) {
    %c0_i32 = arith.constant 0 : i32
    %c0_i32_0 = arith.constant 0 : i32
    %c0_i32_1 = arith.constant 0 : i32
    return %arg0, %c0_i32, %c0_i32_0 : i32, i32, i32
  }
  func.func @transform_1(%arg0: i32) -> (i32, i32) {
    %c0_i32 = arith.constant 0 : i32
    %c0_i32_0 = arith.constant 0 : i32
    %c0_i32_1 = arith.constant 0 : i32
    return %c0_i32, %c0_i32_0 : i32, i32
  }
  func.func @transform_2(%arg0: i32) -> (i32, i32) {
    %c0_i32 = arith.constant 0 : i32
    %c0_i32_0 = arith.constant 0 : i32
    %c0_i32_1 = arith.constant 0 : i32
    return %c0_i32, %c0_i32_0 : i32, i32
  }
  func.func @transform_3(%arg0: i32) -> (i32, i32, i32) {
    %c0_i32 = arith.constant 0 : i32
    %c0_i32_0 = arith.constant 0 : i32
    %c0_i32_1 = arith.constant 0 : i32
    return %arg0, %c0_i32, %c0_i32_0 : i32, i32, i32
  }
}

module attributes {stable_mosaic.version = 11 : i64} {
  func.func @_distil_conv_kernel(%arg0: i32, %arg1: memref<1x8x32xf32, #tpu.memory_space<vmem>>, %arg2: memref<96x32xf32, #tpu.memory_space<vmem>>, %arg3: memref<1x32xf32, #tpu.memory_space<vmem>>, %arg4: memref<1x8x32xf32, #tpu.memory_space<vmem>>, %arg5: memref<10x32xf32, #tpu.memory_space<vmem>>) attributes {dimension_semantics = [#tpu.dimension_semantics<parallel>], iteration_bounds = array<i64: 2>, scalar_prefetch = 0 : i64, scratch_operands = 1 : i64, tpu.core_type = #tpu.core_type<tc>, window_params = [{transform_indices = @transform_0, window_bounds = array<i64: 1, 8, 32>}, {pipeline_mode = #tpu.pipeline_mode<synchronous>, transform_indices = @transform_1, window_bounds = array<i64: 96, 32>}, {pipeline_mode = #tpu.pipeline_mode<synchronous>, transform_indices = @transform_2, window_bounds = array<i64: 1, 32>}, {transform_indices = @transform_3, window_bounds = array<i64: 1, 8, 32>}]} {
    %c0 = arith.constant 0 : index
    %c0_0 = arith.constant 0 : index
    %c0_1 = arith.constant 0 : index
    %0 = vector.load %arg1[%c0, %c0_0, %c0_1] : memref<1x8x32xf32, #tpu.memory_space<vmem>>, vector<1x8x32xf32>
    %1 = vector.shape_cast %0 : vector<1x8x32xf32> to vector<8x32xf32>
    %c1 = arith.constant 1 : index
    %c0_2 = arith.constant 0 : index
    %2 = vector.load %arg5[%c1, %c0_2] : memref<10x32xf32, #tpu.memory_space<vmem>>, vector<8x32xf32>
    tpu.vector_store %arg5[%c1, %c0_2], %1 {strides = array<i32>} : memref<10x32xf32, #tpu.memory_space<vmem>>, vector<8x32xf32>,
    %c0_3 = arith.constant 0 : index
    %c7 = arith.constant 7 : index
    %c0_4 = arith.constant 0 : index
    %3 = vector.load %arg1[%c0_3, %c7, %c0_4] : memref<1x8x32xf32, #tpu.memory_space<vmem>>, vector<1x1x32xf32>
    %4 = vector.shape_cast %3 : vector<1x1x32xf32> to vector<1x32xf32>
    %c0_5 = arith.constant 0 : index
    %c0_6 = arith.constant 0 : index
    %5 = vector.load %arg5[%c0_5, %c0_6] : memref<10x32xf32, #tpu.memory_space<vmem>>, vector<1x32xf32>
    tpu.vector_store %arg5[%c0_5, %c0_6], %4 {strides = array<i32>} : memref<10x32xf32, #tpu.memory_space<vmem>>, vector<1x32xf32>,
    %c0_7 = arith.constant 0 : index
    %c0_8 = arith.constant 0 : index
    %c0_9 = arith.constant 0 : index
    %6 = vector.load %arg1[%c0_7, %c0_8, %c0_9] : memref<1x8x32xf32, #tpu.memory_space<vmem>>, vector<1x1x32xf32>
    %7 = vector.shape_cast %6 : vector<1x1x32xf32> to vector<1x32xf32>
    %c9 = arith.constant 9 : index
    %c0_10 = arith.constant 0 : index
    %8 = vector.load %arg5[%c9, %c0_10] : memref<10x32xf32, #tpu.memory_space<vmem>>, vector<1x32xf32>
    tpu.vector_store %arg5[%c9, %c0_10], %7 {strides = array<i32>} : memref<10x32xf32, #tpu.memory_space<vmem>>, vector<1x32xf32>,
    %c0_11 = arith.constant 0 : index
    %c0_12 = arith.constant 0 : index
    %9 = vector.load %arg5[%c0_11, %c0_12] : memref<10x32xf32, #tpu.memory_space<vmem>>, vector<8x32xf32>
    %c2 = arith.constant 2 : index
    %c0_13 = arith.constant 0 : index
    %10 = vector.load %arg5[%c2, %c0_13] : memref<10x32xf32, #tpu.memory_space<vmem>>, vector<8x32xf32>
    %11 = tpu.concatenate %9, %1, %10 in 1 : vector<8x32xf32>, vector<8x32xf32>, vector<8x32xf32> -> vector<8x96xf32>
    %c0_14 = arith.constant 0 : index
    %c0_15 = arith.constant 0 : index
    %12 = vector.load %arg2[%c0_14, %c0_15] : memref<96x32xf32, #tpu.memory_space<vmem>>, vector<96x32xf32>
    %cst = arith.constant dense<0.000000e+00> : vector<8x32xf32>
    %13 = tpu.matmul %11, %12, %cst {dimension_numbers = #tpu.dot_dimension_numbers<[1], [0], [0], [1], [0, 0, 1, 1], [], []>} : vector<8x96xf32>, vector<96x32xf32>, vector<8x32xf32> -> vector<8x32xf32>
    %c0_16 = arith.constant 0 : index
    %c0_17 = arith.constant 0 : index
    %14 = vector.load %arg3[%c0_16, %c0_17] : memref<1x32xf32, #tpu.memory_space<vmem>>, vector<1x32xf32>
    %15 = vector.broadcast %14 : vector<1x32xf32> to vector<8x32xf32>
    %16 = arith.addf %13, %15 : vector<8x32xf32>
    %c0_18 = arith.constant 0 : index
    %c0_19 = arith.constant 0 : index
    %c0_20 = arith.constant 0 : index
    %17 = vector.load %arg4[%c0_18, %c0_19, %c0_20] : memref<1x8x32xf32, #tpu.memory_space<vmem>>, vector<1x8x32xf32>
    %18 = vector.shape_cast %17 : vector<1x8x32xf32> to vector<8x32xf32>
    %19 = vector.shape_cast %16 : vector<8x32xf32> to vector<1x8x32xf32>
    tpu.vector_store %arg4[%c0_18, %c0_19, %c0_20], %19 {strides = array<i32>} : memref<1x8x32xf32, #tpu.memory_space<vmem>>, vector<1x8x32xf32>,
    return
  }
  func.func @transform_0(%arg0: i32) -> (i32, i32, i32) {
    %c0_i32 = arith.constant 0 : i32
    %c0_i32_0 = arith.constant 0 : i32
    %c0_i32_1 = arith.constant 0 : i32
    return %arg0, %c0_i32, %c0_i32_0 : i32, i32, i32
  }
  func.func @transform_1(%arg0: i32) -> (i32, i32) {
    %c0_i32 = arith.constant 0 : i32
    %c0_i32_0 = arith.constant 0 : i32
    %c0_i32_1 = arith.constant 0 : i32
    return %c0_i32, %c0_i32_0 : i32, i32
  }
  func.func @transform_2(%arg0: i32) -> (i32, i32) {
    %c0_i32 = arith.constant 0 : i32
    %c0_i32_0 = arith.constant 0 : i32
    %c0_i32_1 = arith.constant 0 : i32
    return %c0_i32, %c0_i32_0 : i32, i32
  }
  func.func @transform_3(%arg0: i32) -> (i32, i32, i32) {
    %c0_i32 = arith.constant 0 : i32
    %c0_i32_0 = arith.constant 0 : i32
    %c0_i32_1 = arith.constant 0 : i32
    return %arg0, %c0_i32, %c0_i32_0 : i32, i32, i32
  }
}

module attributes {stable_mosaic.version = 11 : i64} {
  func.func @_encoder_layer_kernel(%arg0: i32, %arg1: memref<1x8x32xf32, #tpu.memory_space<vmem>>, %arg2: memref<32x96xf32, #tpu.memory_space<vmem>>, %arg3: memref<1x96xf32, #tpu.memory_space<vmem>>, %arg4: memref<32x32xf32, #tpu.memory_space<vmem>>, %arg5: memref<1x32xf32, #tpu.memory_space<vmem>>, %arg6: memref<1x32xf32, #tpu.memory_space<vmem>>, %arg7: memref<1x32xf32, #tpu.memory_space<vmem>>, %arg8: memref<32x32xf32, #tpu.memory_space<vmem>>, %arg9: memref<1x32xf32, #tpu.memory_space<vmem>>, %arg10: memref<32x32xf32, #tpu.memory_space<vmem>>, %arg11: memref<1x32xf32, #tpu.memory_space<vmem>>, %arg12: memref<1x32xf32, #tpu.memory_space<vmem>>, %arg13: memref<1x32xf32, #tpu.memory_space<vmem>>, %arg14: memref<1x32xf32, #tpu.memory_space<vmem>>, %arg15: memref<1x32xf32, #tpu.memory_space<vmem>>, %arg16: memref<1x8x32xf32, #tpu.memory_space<vmem>>) attributes {dimension_semantics = [#tpu.dimension_semantics<parallel>], iteration_bounds = array<i64: 2>, scalar_prefetch = 0 : i64, scratch_operands = 0 : i64, tpu.core_type = #tpu.core_type<tc>, window_params = [{transform_indices = @transform_0, window_bounds = array<i64: 1, 8, 32>}, {pipeline_mode = #tpu.pipeline_mode<synchronous>, transform_indices = @transform_1, window_bounds = array<i64: 32, 96>}, {pipeline_mode = #tpu.pipeline_mode<synchronous>, transform_indices = @transform_2, window_bounds = array<i64: 1, 96>}, {pipeline_mode = #tpu.pipeline_mode<synchronous>, transform_indices = @transform_3, window_bounds = array<i64: 32, 32>}, {pipeline_mode = #tpu.pipeline_mode<synchronous>, transform_indices = @transform_4, window_bounds = array<i64: 1, 32>}, {pipeline_mode = #tpu.pipeline_mode<synchronous>, transform_indices = @transform_5, window_bounds = array<i64: 1, 32>}, {pipeline_mode = #tpu.pipeline_mode<synchronous>, transform_indices = @transform_6, window_bounds = array<i64: 1, 32>}, {pipeline_mode = #tpu.pipeline_mode<synchronous>, transform_indices = @transform_7, window_bounds = array<i64: 32, 32>}, {pipeline_mode = #tpu.pipeline_mode<synchronous>, transform_indices = @transform_8, window_bounds = array<i64: 1, 32>}, {pipeline_mode = #tpu.pipeline_mode<synchronous>, transform_indices = @transform_9, window_bounds = array<i64: 32, 32>}, {pipeline_mode = #tpu.pipeline_mode<synchronous>, transform_indices = @transform_10, window_bounds = array<i64: 1, 32>}, {pipeline_mode = #tpu.pipeline_mode<synchronous>, transform_indices = @transform_11, window_bounds = array<i64: 1, 32>}, {pipeline_mode = #tpu.pipeline_mode<synchronous>, transform_indices = @transform_12, window_bounds = array<i64: 1, 32>}, {pipeline_mode = #tpu.pipeline_mode<synchronous>, transform_indices = @transform_13, window_bounds = array<i64: 1, 32>}, {pipeline_mode = #tpu.pipeline_mode<synchronous>, transform_indices = @transform_14, window_bounds = array<i64: 1, 32>}, {transform_indices = @transform_15, window_bounds = array<i64: 1, 8, 32>}]} {
    %c0 = arith.constant 0 : index
    %c0_0 = arith.constant 0 : index
    %c0_1 = arith.constant 0 : index
    %0 = vector.load %arg1[%c0, %c0_0, %c0_1] : memref<1x8x32xf32, #tpu.memory_space<vmem>>, vector<1x8x32xf32>
    %1 = vector.shape_cast %0 : vector<1x8x32xf32> to vector<8x32xf32>
    %c0_2 = arith.constant 0 : index
    %c0_3 = arith.constant 0 : index
    %2 = vector.load %arg2[%c0_2, %c0_3] : memref<32x96xf32, #tpu.memory_space<vmem>>, vector<32x96xf32>
    %cst = arith.constant dense<0.000000e+00> : vector<8x96xf32>
    %3 = tpu.matmul %1, %2, %cst {dimension_numbers = #tpu.dot_dimension_numbers<[1], [0], [0], [1], [0, 0, 1, 1], [], []>} : vector<8x32xf32>, vector<32x96xf32>, vector<8x96xf32> -> vector<8x96xf32>
    %c0_4 = arith.constant 0 : index
    %c0_5 = arith.constant 0 : index
    %4 = vector.load %arg3[%c0_4, %c0_5] : memref<1x96xf32, #tpu.memory_space<vmem>>, vector<1x96xf32>
    %5 = vector.broadcast %4 : vector<1x96xf32> to vector<8x96xf32>
    %6 = arith.addf %3, %5 : vector<8x96xf32>
    %7 = vector.extract_strided_slice %6 {offsets = [0, 0], sizes = [8, 32], strides = [1, 1]} : vector<8x96xf32> to vector<8x32xf32>
    %8 = vector.extract_strided_slice %6 {offsets = [0, 32], sizes = [8, 32], strides = [1, 1]} : vector<8x96xf32> to vector<8x32xf32>
    %9 = vector.extract_strided_slice %6 {offsets = [0, 64], sizes = [8, 32], strides = [1, 1]} : vector<8x96xf32> to vector<8x32xf32>
    %10 = vector.extract_strided_slice %7 {offsets = [0, 0], sizes = [8, 8], strides = [1, 1]} : vector<8x32xf32> to vector<8x8xf32>
    %11 = vector.extract_strided_slice %8 {offsets = [0, 0], sizes = [8, 8], strides = [1, 1]} : vector<8x32xf32> to vector<8x8xf32>
    %12 = vector.extract_strided_slice %9 {offsets = [0, 0], sizes = [8, 8], strides = [1, 1]} : vector<8x32xf32> to vector<8x8xf32>
    %cst_6 = arith.constant dense<0.000000e+00> : vector<8x8xf32>
    %13 = tpu.matmul %10, %11, %cst_6 {dimension_numbers = #tpu.dot_dimension_numbers<[1], [1], [0], [0], [0, 0, 1, 0], [], []>} : vector<8x8xf32>, vector<8x8xf32>, vector<8x8xf32> -> vector<8x8xf32>
    %cst_7 = arith.constant 0.353553385 : f32
    %14 = vector.broadcast %cst_7 : f32 to vector<8x8xf32>
    %15 = arith.mulf %13, %14 : vector<8x8xf32>
    %cst_8 = arith.constant dense<0xFF800000> : vector<8xf32>
    %16 = vector.multi_reduction <maximumf>, %15, %cst_8 [1] : vector<8x8xf32> to vector<8xf32>
    %17 = vector.shape_cast %16 : vector<8xf32> to vector<8x1xf32>
    %18 = vector.broadcast %17 : vector<8x1xf32> to vector<8x8xf32>
    %19 = arith.subf %15, %18 : vector<8x8xf32>
    %20 = math.exp %19 : vector<8x8xf32>
    %cst_9 = arith.constant dense<0.000000e+00> : vector<8xf32>
    %21 = vector.multi_reduction <add>, %20, %cst_9 [1] : vector<8x8xf32> to vector<8xf32>
    %22 = vector.shape_cast %21 : vector<8xf32> to vector<8x1xf32>
    %23 = tpu.reciprocal %22 {approx = true} : vector<8x1xf32> -> vector<8x1xf32>
    %24 = vector.broadcast %23 : vector<8x1xf32> to vector<8x8xf32>
    %25 = arith.mulf %20, %24 : vector<8x8xf32>
    %cst_10 = arith.constant dense<0.000000e+00> : vector<8x8xf32>
    %26 = tpu.matmul %25, %12, %cst_10 {dimension_numbers = #tpu.dot_dimension_numbers<[1], [0], [0], [1], [0, 0, 1, 1], [], []>} : vector<8x8xf32>, vector<8x8xf32>, vector<8x8xf32> -> vector<8x8xf32>
    %27 = vector.extract_strided_slice %7 {offsets = [0, 8], sizes = [8, 8], strides = [1, 1]} : vector<8x32xf32> to vector<8x8xf32>
    %28 = vector.extract_strided_slice %8 {offsets = [0, 8], sizes = [8, 8], strides = [1, 1]} : vector<8x32xf32> to vector<8x8xf32>
    %29 = vector.extract_strided_slice %9 {offsets = [0, 8], sizes = [8, 8], strides = [1, 1]} : vector<8x32xf32> to vector<8x8xf32>
    %cst_11 = arith.constant dense<0.000000e+00> : vector<8x8xf32>
    %30 = tpu.matmul %27, %28, %cst_11 {dimension_numbers = #tpu.dot_dimension_numbers<[1], [1], [0], [0], [0, 0, 1, 0], [], []>} : vector<8x8xf32>, vector<8x8xf32>, vector<8x8xf32> -> vector<8x8xf32>
    %cst_12 = arith.constant 0.353553385 : f32
    %31 = vector.broadcast %cst_12 : f32 to vector<8x8xf32>
    %32 = arith.mulf %30, %31 : vector<8x8xf32>
    %cst_13 = arith.constant dense<0xFF800000> : vector<8xf32>
    %33 = vector.multi_reduction <maximumf>, %32, %cst_13 [1] : vector<8x8xf32> to vector<8xf32>
    %34 = vector.shape_cast %33 : vector<8xf32> to vector<8x1xf32>
    %35 = vector.broadcast %34 : vector<8x1xf32> to vector<8x8xf32>
    %36 = arith.subf %32, %35 : vector<8x8xf32>
    %37 = math.exp %36 : vector<8x8xf32>
    %cst_14 = arith.constant dense<0.000000e+00> : vector<8xf32>
    %38 = vector.multi_reduction <add>, %37, %cst_14 [1] : vector<8x8xf32> to vector<8xf32>
    %39 = vector.shape_cast %38 : vector<8xf32> to vector<8x1xf32>
    %40 = tpu.reciprocal %39 {approx = true} : vector<8x1xf32> -> vector<8x1xf32>
    %41 = vector.broadcast %40 : vector<8x1xf32> to vector<8x8xf32>
    %42 = arith.mulf %37, %41 : vector<8x8xf32>
    %cst_15 = arith.constant dense<0.000000e+00> : vector<8x8xf32>
    %43 = tpu.matmul %42, %29, %cst_15 {dimension_numbers = #tpu.dot_dimension_numbers<[1], [0], [0], [1], [0, 0, 1, 1], [], []>} : vector<8x8xf32>, vector<8x8xf32>, vector<8x8xf32> -> vector<8x8xf32>
    %44 = vector.extract_strided_slice %7 {offsets = [0, 16], sizes = [8, 8], strides = [1, 1]} : vector<8x32xf32> to vector<8x8xf32>
    %45 = vector.extract_strided_slice %8 {offsets = [0, 16], sizes = [8, 8], strides = [1, 1]} : vector<8x32xf32> to vector<8x8xf32>
    %46 = vector.extract_strided_slice %9 {offsets = [0, 16], sizes = [8, 8], strides = [1, 1]} : vector<8x32xf32> to vector<8x8xf32>
    %cst_16 = arith.constant dense<0.000000e+00> : vector<8x8xf32>
    %47 = tpu.matmul %44, %45, %cst_16 {dimension_numbers = #tpu.dot_dimension_numbers<[1], [1], [0], [0], [0, 0, 1, 0], [], []>} : vector<8x8xf32>, vector<8x8xf32>, vector<8x8xf32> -> vector<8x8xf32>
    %cst_17 = arith.constant 0.353553385 : f32
    %48 = vector.broadcast %cst_17 : f32 to vector<8x8xf32>
    %49 = arith.mulf %47, %48 : vector<8x8xf32>
    %cst_18 = arith.constant dense<0xFF800000> : vector<8xf32>
    %50 = vector.multi_reduction <maximumf>, %49, %cst_18 [1] : vector<8x8xf32> to vector<8xf32>
    %51 = vector.shape_cast %50 : vector<8xf32> to vector<8x1xf32>
    %52 = vector.broadcast %51 : vector<8x1xf32> to vector<8x8xf32>
    %53 = arith.subf %49, %52 : vector<8x8xf32>
    %54 = math.exp %53 : vector<8x8xf32>
    %cst_19 = arith.constant dense<0.000000e+00> : vector<8xf32>
    %55 = vector.multi_reduction <add>, %54, %cst_19 [1] : vector<8x8xf32> to vector<8xf32>
    %56 = vector.shape_cast %55 : vector<8xf32> to vector<8x1xf32>
    %57 = tpu.reciprocal %56 {approx = true} : vector<8x1xf32> -> vector<8x1xf32>
    %58 = vector.broadcast %57 : vector<8x1xf32> to vector<8x8xf32>
    %59 = arith.mulf %54, %58 : vector<8x8xf32>
    %cst_20 = arith.constant dense<0.000000e+00> : vector<8x8xf32>
    %60 = tpu.matmul %59, %46, %cst_20 {dimension_numbers = #tpu.dot_dimension_numbers<[1], [0], [0], [1], [0, 0, 1, 1], [], []>} : vector<8x8xf32>, vector<8x8xf32>, vector<8x8xf32> -> vector<8x8xf32>
    %61 = vector.extract_strided_slice %7 {offsets = [0, 24], sizes = [8, 8], strides = [1, 1]} : vector<8x32xf32> to vector<8x8xf32>
    %62 = vector.extract_strided_slice %8 {offsets = [0, 24], sizes = [8, 8], strides = [1, 1]} : vector<8x32xf32> to vector<8x8xf32>
    %63 = vector.extract_strided_slice %9 {offsets = [0, 24], sizes = [8, 8], strides = [1, 1]} : vector<8x32xf32> to vector<8x8xf32>
    %cst_21 = arith.constant dense<0.000000e+00> : vector<8x8xf32>
    %64 = tpu.matmul %61, %62, %cst_21 {dimension_numbers = #tpu.dot_dimension_numbers<[1], [1], [0], [0], [0, 0, 1, 0], [], []>} : vector<8x8xf32>, vector<8x8xf32>, vector<8x8xf32> -> vector<8x8xf32>
    %cst_22 = arith.constant 0.353553385 : f32
    %65 = vector.broadcast %cst_22 : f32 to vector<8x8xf32>
    %66 = arith.mulf %64, %65 : vector<8x8xf32>
    %cst_23 = arith.constant dense<0xFF800000> : vector<8xf32>
    %67 = vector.multi_reduction <maximumf>, %66, %cst_23 [1] : vector<8x8xf32> to vector<8xf32>
    %68 = vector.shape_cast %67 : vector<8xf32> to vector<8x1xf32>
    %69 = vector.broadcast %68 : vector<8x1xf32> to vector<8x8xf32>
    %70 = arith.subf %66, %69 : vector<8x8xf32>
    %71 = math.exp %70 : vector<8x8xf32>
    %cst_24 = arith.constant dense<0.000000e+00> : vector<8xf32>
    %72 = vector.multi_reduction <add>, %71, %cst_24 [1] : vector<8x8xf32> to vector<8xf32>
    %73 = vector.shape_cast %72 : vector<8xf32> to vector<8x1xf32>
    %74 = tpu.reciprocal %73 {approx = true} : vector<8x1xf32> -> vector<8x1xf32>
    %75 = vector.broadcast %74 : vector<8x1xf32> to vector<8x8xf32>
    %76 = arith.mulf %71, %75 : vector<8x8xf32>
    %cst_25 = arith.constant dense<0.000000e+00> : vector<8x8xf32>
    %77 = tpu.matmul %76, %63, %cst_25 {dimension_numbers = #tpu.dot_dimension_numbers<[1], [0], [0], [1], [0, 0, 1, 1], [], []>} : vector<8x8xf32>, vector<8x8xf32>, vector<8x8xf32> -> vector<8x8xf32>
    %78 = tpu.concatenate %26, %43, %60, %77 in 1 : vector<8x8xf32>, vector<8x8xf32>, vector<8x8xf32>, vector<8x8xf32> -> vector<8x32xf32>
    %c0_26 = arith.constant 0 : index
    %c0_27 = arith.constant 0 : index
    %79 = vector.load %arg4[%c0_26, %c0_27] : memref<32x32xf32, #tpu.memory_space<vmem>>, vector<32x32xf32>
    %cst_28 = arith.constant dense<0.000000e+00> : vector<8x32xf32>
    %80 = tpu.matmul %78, %79, %cst_28 {dimension_numbers = #tpu.dot_dimension_numbers<[1], [0], [0], [1], [0, 0, 1, 1], [], []>} : vector<8x32xf32>, vector<32x32xf32>, vector<8x32xf32> -> vector<8x32xf32>
    %c0_29 = arith.constant 0 : index
    %c0_30 = arith.constant 0 : index
    %81 = vector.load %arg5[%c0_29, %c0_30] : memref<1x32xf32, #tpu.memory_space<vmem>>, vector<1x32xf32>
    %82 = vector.broadcast %81 : vector<1x32xf32> to vector<8x32xf32>
    %83 = arith.addf %80, %82 : vector<8x32xf32>
    %84 = arith.addf %1, %83 : vector<8x32xf32>
    %c0_31 = arith.constant 0 : index
    %c0_32 = arith.constant 0 : index
    %85 = vector.load %arg6[%c0_31, %c0_32] : memref<1x32xf32, #tpu.memory_space<vmem>>, vector<1x32xf32>
    %c0_33 = arith.constant 0 : index
    %c0_34 = arith.constant 0 : index
    %86 = vector.load %arg7[%c0_33, %c0_34] : memref<1x32xf32, #tpu.memory_space<vmem>>, vector<1x32xf32>
    %cst_35 = arith.constant dense<0.000000e+00> : vector<8xf32>
    %87 = vector.multi_reduction <add>, %84, %cst_35 [1] : vector<8x32xf32> to vector<8xf32>
    %88 = vector.shape_cast %87 : vector<8xf32> to vector<8x1xf32>
    %cst_36 = arith.constant 3.200000e+01 : f32
    %89 = vector.broadcast %cst_36 : f32 to vector<8x1xf32>
    %90 = arith.divf %88, %89 : vector<8x1xf32>
    %91 = vector.broadcast %90 : vector<8x1xf32> to vector<8x32xf32>
    %92 = arith.subf %84, %91 : vector<8x32xf32>
    %93 = arith.mulf %92, %92 : vector<8x32xf32>
    %cst_37 = arith.constant dense<0.000000e+00> : vector<8xf32>
    %94 = vector.multi_reduction <add>, %93, %cst_37 [1] : vector<8x32xf32> to vector<8xf32>
    %95 = vector.shape_cast %94 : vector<8xf32> to vector<8x1xf32>
    %cst_38 = arith.constant 3.200000e+01 : f32
    %96 = vector.broadcast %cst_38 : f32 to vector<8x1xf32>
    %97 = arith.divf %95, %96 : vector<8x1xf32>
    %98 = vector.broadcast %90 : vector<8x1xf32> to vector<8x32xf32>
    %99 = arith.subf %84, %98 : vector<8x32xf32>
    %cst_39 = arith.constant 9.99999974E-6 : f32
    %100 = vector.broadcast %cst_39 : f32 to vector<8x1xf32>
    %101 = arith.addf %97, %100 : vector<8x1xf32>
    %102 = math.rsqrt %101 : vector<8x1xf32>
    %103 = vector.broadcast %102 : vector<8x1xf32> to vector<8x32xf32>
    %104 = arith.mulf %99, %103 : vector<8x32xf32>
    %105 = vector.broadcast %85 : vector<1x32xf32> to vector<8x32xf32>
    %106 = arith.mulf %104, %105 : vector<8x32xf32>
    %107 = vector.broadcast %86 : vector<1x32xf32> to vector<8x32xf32>
    %108 = arith.addf %106, %107 : vector<8x32xf32>
    %c0_40 = arith.constant 0 : index
    %c0_41 = arith.constant 0 : index
    %109 = vector.load %arg8[%c0_40, %c0_41] : memref<32x32xf32, #tpu.memory_space<vmem>>, vector<32x32xf32>
    %cst_42 = arith.constant dense<0.000000e+00> : vector<8x32xf32>
    %110 = tpu.matmul %108, %109, %cst_42 {dimension_numbers = #tpu.dot_dimension_numbers<[1], [0], [0], [1], [0, 0, 1, 1], [], []>} : vector<8x32xf32>, vector<32x32xf32>, vector<8x32xf32> -> vector<8x32xf32>
    %c0_43 = arith.constant 0 : index
    %c0_44 = arith.constant 0 : index
    %111 = vector.load %arg9[%c0_43, %c0_44] : memref<1x32xf32, #tpu.memory_space<vmem>>, vector<1x32xf32>
    %112 = vector.broadcast %111 : vector<1x32xf32> to vector<8x32xf32>
    %113 = arith.addf %110, %112 : vector<8x32xf32>
    %cst_45 = arith.constant 5.000000e-01 : f32
    %114 = vector.broadcast %cst_45 : f32 to vector<8x32xf32>
    %115 = arith.mulf %114, %113 : vector<8x32xf32>
    %cst_46 = arith.constant 4.471500e-02 : f32
    %116 = vector.broadcast %cst_46 : f32 to vector<8x32xf32>
    %117 = arith.mulf %116, %113 : vector<8x32xf32>
    %118 = arith.mulf %117, %113 : vector<8x32xf32>
    %119 = arith.mulf %118, %113 : vector<8x32xf32>
    %120 = arith.addf %113, %119 : vector<8x32xf32>
    %cst_47 = arith.constant 0.797884583 : f32
    %121 = vector.broadcast %cst_47 : f32 to vector<8x32xf32>
    %122 = arith.mulf %121, %120 : vector<8x32xf32>
    %123 = math.tanh %122 : vector<8x32xf32>
    %cst_48 = arith.constant 1.000000e+00 : f32
    %124 = vector.broadcast %cst_48 : f32 to vector<8x32xf32>
    %125 = arith.addf %124, %123 : vector<8x32xf32>
    %126 = arith.mulf %115, %125 : vector<8x32xf32>
    %c0_49 = arith.constant 0 : index
    %c0_50 = arith.constant 0 : index
    %127 = vector.load %arg10[%c0_49, %c0_50] : memref<32x32xf32, #tpu.memory_space<vmem>>, vector<32x32xf32>
    %cst_51 = arith.constant dense<0.000000e+00> : vector<8x32xf32>
    %128 = tpu.matmul %126, %127, %cst_51 {dimension_numbers = #tpu.dot_dimension_numbers<[1], [0], [0], [1], [0, 0, 1, 1], [], []>} : vector<8x32xf32>, vector<32x32xf32>, vector<8x32xf32> -> vector<8x32xf32>
    %c0_52 = arith.constant 0 : index
    %c0_53 = arith.constant 0 : index
    %129 = vector.load %arg11[%c0_52, %c0_53] : memref<1x32xf32, #tpu.memory_space<vmem>>, vector<1x32xf32>
    %130 = vector.broadcast %129 : vector<1x32xf32> to vector<8x32xf32>
    %131 = arith.addf %128, %130 : vector<8x32xf32>
    %132 = arith.addf %108, %131 : vector<8x32xf32>
    %c0_54 = arith.constant 0 : index
    %c0_55 = arith.constant 0 : index
    %133 = vector.load %arg12[%c0_54, %c0_55] : memref<1x32xf32, #tpu.memory_space<vmem>>, vector<1x32xf32>
    %c0_56 = arith.constant 0 : index
    %c0_57 = arith.constant 0 : index
    %134 = vector.load %arg13[%c0_56, %c0_57] : memref<1x32xf32, #tpu.memory_space<vmem>>, vector<1x32xf32>
    %cst_58 = arith.constant dense<0.000000e+00> : vector<8xf32>
    %135 = vector.multi_reduction <add>, %132, %cst_58 [1] : vector<8x32xf32> to vector<8xf32>
    %136 = vector.shape_cast %135 : vector<8xf32> to vector<8x1xf32>
    %cst_59 = arith.constant 3.200000e+01 : f32
    %137 = vector.broadcast %cst_59 : f32 to vector<8x1xf32>
    %138 = arith.divf %136, %137 : vector<8x1xf32>
    %139 = vector.broadcast %138 : vector<8x1xf32> to vector<8x32xf32>
    %140 = arith.subf %132, %139 : vector<8x32xf32>
    %141 = arith.mulf %140, %140 : vector<8x32xf32>
    %cst_60 = arith.constant dense<0.000000e+00> : vector<8xf32>
    %142 = vector.multi_reduction <add>, %141, %cst_60 [1] : vector<8x32xf32> to vector<8xf32>
    %143 = vector.shape_cast %142 : vector<8xf32> to vector<8x1xf32>
    %cst_61 = arith.constant 3.200000e+01 : f32
    %144 = vector.broadcast %cst_61 : f32 to vector<8x1xf32>
    %145 = arith.divf %143, %144 : vector<8x1xf32>
    %146 = vector.broadcast %138 : vector<8x1xf32> to vector<8x32xf32>
    %147 = arith.subf %132, %146 : vector<8x32xf32>
    %cst_62 = arith.constant 9.99999974E-6 : f32
    %148 = vector.broadcast %cst_62 : f32 to vector<8x1xf32>
    %149 = arith.addf %145, %148 : vector<8x1xf32>
    %150 = math.rsqrt %149 : vector<8x1xf32>
    %151 = vector.broadcast %150 : vector<8x1xf32> to vector<8x32xf32>
    %152 = arith.mulf %147, %151 : vector<8x32xf32>
    %153 = vector.broadcast %133 : vector<1x32xf32> to vector<8x32xf32>
    %154 = arith.mulf %152, %153 : vector<8x32xf32>
    %155 = vector.broadcast %134 : vector<1x32xf32> to vector<8x32xf32>
    %156 = arith.addf %154, %155 : vector<8x32xf32>
    %c0_63 = arith.constant 0 : index
    %c0_64 = arith.constant 0 : index
    %c0_65 = arith.constant 0 : index
    %157 = vector.load %arg16[%c0_63, %c0_64, %c0_65] : memref<1x8x32xf32, #tpu.memory_space<vmem>>, vector<1x8x32xf32>
    %158 = vector.shape_cast %157 : vector<1x8x32xf32> to vector<8x32xf32>
    %159 = vector.shape_cast %156 : vector<8x32xf32> to vector<1x8x32xf32>
    tpu.vector_store %arg16[%c0_63, %c0_64, %c0_65], %159 {strides = array<i32>} : memref<1x8x32xf32, #tpu.memory_space<vmem>>, vector<1x8x32xf32>,
    return
  }
  func.func @transform_0(%arg0: i32) -> (i32, i32, i32) {
    %c0_i32 = arith.constant 0 : i32
    %c0_i32_0 = arith.constant 0 : i32
    %c0_i32_1 = arith.constant 0 : i32
    return %arg0, %c0_i32, %c0_i32_0 : i32, i32, i32
  }
  func.func @transform_1(%arg0: i32) -> (i32, i32) {
    %c0_i32 = arith.constant 0 : i32
    %c0_i32_0 = arith.constant 0 : i32
    %c0_i32_1 = arith.constant 0 : i32
    return %c0_i32, %c0_i32_0 : i32, i32
  }
  func.func @transform_2(%arg0: i32) -> (i32, i32) {
    %c0_i32 = arith.constant 0 : i32
    %c0_i32_0 = arith.constant 0 : i32
    %c0_i32_1 = arith.constant 0 : i32
    return %c0_i32, %c0_i32_0 : i32, i32
  }
  func.func @transform_3(%arg0: i32) -> (i32, i32) {
    %c0_i32 = arith.constant 0 : i32
    %c0_i32_0 = arith.constant 0 : i32
    %c0_i32_1 = arith.constant 0 : i32
    return %c0_i32, %c0_i32_0 : i32, i32
  }
  func.func @transform_4(%arg0: i32) -> (i32, i32) {
    %c0_i32 = arith.constant 0 : i32
    %c0_i32_0 = arith.constant 0 : i32
    %c0_i32_1 = arith.constant 0 : i32
    return %c0_i32, %c0_i32_0 : i32, i32
  }
  func.func @transform_5(%arg0: i32) -> (i32, i32) {
    %c0_i32 = arith.constant 0 : i32
    %c0_i32_0 = arith.constant 0 : i32
    %c0_i32_1 = arith.constant 0 : i32
    return %c0_i32, %c0_i32_0 : i32, i32
  }
  func.func @transform_6(%arg0: i32) -> (i32, i32) {
    %c0_i32 = arith.constant 0 : i32
    %c0_i32_0 = arith.constant 0 : i32
    %c0_i32_1 = arith.constant 0 : i32
    return %c0_i32, %c0_i32_0 : i32, i32
  }
  func.func @transform_7(%arg0: i32) -> (i32, i32) {
    %c0_i32 = arith.constant 0 : i32
    %c0_i32_0 = arith.constant 0 : i32
    %c0_i32_1 = arith.constant 0 : i32
    return %c0_i32, %c0_i32_0 : i32, i32
  }
  func.func @transform_8(%arg0: i32) -> (i32, i32) {
    %c0_i32 = arith.constant 0 : i32
    %c0_i32_0 = arith.constant 0 : i32
    %c0_i32_1 = arith.constant 0 : i32
    return %c0_i32, %c0_i32_0 : i32, i32
  }
  func.func @transform_9(%arg0: i32) -> (i32, i32) {
    %c0_i32 = arith.constant 0 : i32
    %c0_i32_0 = arith.constant 0 : i32
    %c0_i32_1 = arith.constant 0 : i32
    return %c0_i32, %c0_i32_0 : i32, i32
  }
  func.func @transform_10(%arg0: i32) -> (i32, i32) {
    %c0_i32 = arith.constant 0 : i32
    %c0_i32_0 = arith.constant 0 : i32
    %c0_i32_1 = arith.constant 0 : i32
    return %c0_i32, %c0_i32_0 : i32, i32
  }
  func.func @transform_11(%arg0: i32) -> (i32, i32) {
    %c0_i32 = arith.constant 0 : i32
    %c0_i32_0 = arith.constant 0 : i32
    %c0_i32_1 = arith.constant 0 : i32
    return %c0_i32, %c0_i32_0 : i32, i32
  }
  func.func @transform_12(%arg0: i32) -> (i32, i32) {
    %c0_i32 = arith.constant 0 : i32
    %c0_i32_0 = arith.constant 0 : i32
    %c0_i32_1 = arith.constant 0 : i32
    return %c0_i32, %c0_i32_0 : i32, i32
  }
  func.func @transform_13(%arg0: i32) -> (i32, i32) {
    %c0_i32 = arith.constant 0 : i32
    %c0_i32_0 = arith.constant 0 : i32
    %c0_i32_1 = arith.constant 0 : i32
    return %c0_i32, %c0_i32_0 : i32, i32
  }
  func.func @transform_14(%arg0: i32) -> (i32, i32) {
    %c0_i32 = arith.constant 0 : i32
    %c0_i32_0 = arith.constant 0 : i32
    %c0_i32_1 = arith.constant 0 : i32
    return %c0_i32, %c0_i32_0 : i32, i32
  }
  func.func @transform_15(%arg0: i32) -> (i32, i32, i32) {
    %c0_i32 = arith.constant 0 : i32
    %c0_i32_0 = arith.constant 0 : i32
    %c0_i32_1 = arith.constant 0 : i32
    return %arg0, %c0_i32, %c0_i32_0 : i32, i32, i32
  }
}

module attributes {stable_mosaic.version = 11 : i64} {
  func.func @_distil_bn_pool_kernel(%arg0: i32, %arg1: memref<1x8x32xf32, #tpu.memory_space<vmem>>, %arg2: memref<1x32xf32, #tpu.memory_space<vmem>>, %arg3: memref<1x32xf32, #tpu.memory_space<vmem>>, %arg4: memref<1x4x32xf32, #tpu.memory_space<vmem>>, %arg5: memref<10x32xf32, #tpu.memory_space<vmem>>) attributes {dimension_semantics = [#tpu.dimension_semantics<parallel>], iteration_bounds = array<i64: 2>, scalar_prefetch = 0 : i64, scratch_operands = 1 : i64, tpu.core_type = #tpu.core_type<tc>, window_params = [{transform_indices = @transform_0, window_bounds = array<i64: 1, 8, 32>}, {pipeline_mode = #tpu.pipeline_mode<synchronous>, transform_indices = @transform_1, window_bounds = array<i64: 1, 32>}, {pipeline_mode = #tpu.pipeline_mode<synchronous>, transform_indices = @transform_2, window_bounds = array<i64: 1, 32>}, {transform_indices = @transform_3, window_bounds = array<i64: 1, 4, 32>}]} {
    %c0 = arith.constant 0 : index
    %c0_0 = arith.constant 0 : index
    %c0_1 = arith.constant 0 : index
    %0 = vector.load %arg1[%c0, %c0_0, %c0_1] : memref<1x8x32xf32, #tpu.memory_space<vmem>>, vector<1x8x32xf32>
    %1 = vector.shape_cast %0 : vector<1x8x32xf32> to vector<8x32xf32>
    %c0_2 = arith.constant 0 : index
    %c0_3 = arith.constant 0 : index
    %2 = vector.load %arg2[%c0_2, %c0_3] : memref<1x32xf32, #tpu.memory_space<vmem>>, vector<1x32xf32>
    %3 = vector.broadcast %2 : vector<1x32xf32> to vector<8x32xf32>
    %4 = arith.mulf %1, %3 : vector<8x32xf32>
    %c0_4 = arith.constant 0 : index
    %c0_5 = arith.constant 0 : index
    %5 = vector.load %arg3[%c0_4, %c0_5] : memref<1x32xf32, #tpu.memory_space<vmem>>, vector<1x32xf32>
    %6 = vector.broadcast %5 : vector<1x32xf32> to vector<8x32xf32>
    %7 = arith.addf %4, %6 : vector<8x32xf32>
    %cst = arith.constant 0.000000e+00 : f32
    %8 = vector.broadcast %cst : f32 to vector<8x32xf32>
    %9 = arith.cmpf ogt, %7, %8 : vector<8x32xf32>
    %cst_6 = arith.constant 0.000000e+00 : f32
    %10 = vector.broadcast %cst_6 : f32 to vector<8x32xf32>
    %11 = arith.minimumf %7, %10 : vector<8x32xf32>
    %12 = math.exp %11 : vector<8x32xf32>
    %cst_7 = arith.constant 1.000000e+00 : f32
    %13 = vector.broadcast %cst_7 : f32 to vector<8x32xf32>
    %14 = arith.subf %12, %13 : vector<8x32xf32>
    %15 = arith.select %9, %7, %14 : vector<8x32xi1>, vector<8x32xf32>
    %c1 = arith.constant 1 : index
    %c0_8 = arith.constant 0 : index
    %16 = vector.load %arg5[%c1, %c0_8] : memref<10x32xf32, #tpu.memory_space<vmem>>, vector<8x32xf32>
    tpu.vector_store %arg5[%c1, %c0_8], %15 {strides = array<i32>} : memref<10x32xf32, #tpu.memory_space<vmem>>, vector<8x32xf32>,
    %c1_9 = arith.constant 1 : index
    %c0_10 = arith.constant 0 : index
    %17 = vector.load %arg5[%c1_9, %c0_10] : memref<10x32xf32, #tpu.memory_space<vmem>>, vector<1x32xf32>
    %c0_11 = arith.constant 0 : index
    %c0_12 = arith.constant 0 : index
    %18 = vector.load %arg5[%c0_11, %c0_12] : memref<10x32xf32, #tpu.memory_space<vmem>>, vector<1x32xf32>
    tpu.vector_store %arg5[%c0_11, %c0_12], %17 {strides = array<i32>} : memref<10x32xf32, #tpu.memory_space<vmem>>, vector<1x32xf32>,
    %c8 = arith.constant 8 : index
    %c0_13 = arith.constant 0 : index
    %19 = vector.load %arg5[%c8, %c0_13] : memref<10x32xf32, #tpu.memory_space<vmem>>, vector<1x32xf32>
    %c9 = arith.constant 9 : index
    %c0_14 = arith.constant 0 : index
    %20 = vector.load %arg5[%c9, %c0_14] : memref<10x32xf32, #tpu.memory_space<vmem>>, vector<1x32xf32>
    tpu.vector_store %arg5[%c9, %c0_14], %19 {strides = array<i32>} : memref<10x32xf32, #tpu.memory_space<vmem>>, vector<1x32xf32>,
    %c0_15 = arith.constant 0 : index
    %c0_16 = arith.constant 0 : index
    %21 = vector.load %arg5[%c0_15, %c0_16] : memref<10x32xf32, #tpu.memory_space<vmem>>, vector<8x32xf32>
    %22 = arith.maximumf %21, %15 : vector<8x32xf32>
    %c2 = arith.constant 2 : index
    %c0_17 = arith.constant 0 : index
    %23 = vector.load %arg5[%c2, %c0_17] : memref<10x32xf32, #tpu.memory_space<vmem>>, vector<8x32xf32>
    %24 = arith.maximumf %22, %23 : vector<8x32xf32>
    %c0_18 = arith.constant 0 : index
    %c0_19 = arith.constant 0 : index
    %25 = vector.load %arg5[%c0_18, %c0_19] : memref<10x32xf32, #tpu.memory_space<vmem>>, vector<8x32xf32>
    tpu.vector_store %arg5[%c0_18, %c0_19], %24 {strides = array<i32>} : memref<10x32xf32, #tpu.memory_space<vmem>>, vector<8x32xf32>,
    %c0_20 = arith.constant 0 : index
    %c0_21 = arith.constant 0 : index
    %26 = tpu.strided_load %arg5[%c0_20, %c0_21] {strides = array<i32: 2, 1>} : memref<10x32xf32, #tpu.memory_space<vmem>>, vector<4x32xf32>
    %c0_22 = arith.constant 0 : index
    %c0_23 = arith.constant 0 : index
    %c0_24 = arith.constant 0 : index
    %27 = vector.load %arg4[%c0_22, %c0_23, %c0_24] : memref<1x4x32xf32, #tpu.memory_space<vmem>>, vector<1x4x32xf32>
    %28 = vector.shape_cast %27 : vector<1x4x32xf32> to vector<4x32xf32>
    %29 = vector.shape_cast %26 : vector<4x32xf32> to vector<1x4x32xf32>
    tpu.vector_store %arg4[%c0_22, %c0_23, %c0_24], %29 {strides = array<i32>} : memref<1x4x32xf32, #tpu.memory_space<vmem>>, vector<1x4x32xf32>,
    return
  }
  func.func @transform_0(%arg0: i32) -> (i32, i32, i32) {
    %c0_i32 = arith.constant 0 : i32
    %c0_i32_0 = arith.constant 0 : i32
    %c0_i32_1 = arith.constant 0 : i32
    return %arg0, %c0_i32, %c0_i32_0 : i32, i32, i32
  }
  func.func @transform_1(%arg0: i32) -> (i32, i32) {
    %c0_i32 = arith.constant 0 : i32
    %c0_i32_0 = arith.constant 0 : i32
    %c0_i32_1 = arith.constant 0 : i32
    return %c0_i32, %c0_i32_0 : i32, i32
  }
  func.func @transform_2(%arg0: i32) -> (i32, i32) {
    %c0_i32 = arith.constant 0 : i32
    %c0_i32_0 = arith.constant 0 : i32
    %c0_i32_1 = arith.constant 0 : i32
    return %c0_i32, %c0_i32_0 : i32, i32
  }
  func.func @transform_3(%arg0: i32) -> (i32, i32, i32) {
    %c0_i32 = arith.constant 0 : i32
    %c0_i32_0 = arith.constant 0 : i32
    %c0_i32_1 = arith.constant 0 : i32
    return %arg0, %c0_i32, %c0_i32_0 : i32, i32, i32
  }
}

module attributes {stable_mosaic.version = 11 : i64} {
  func.func @_encoder_layer_kernel(%arg0: i32, %arg1: memref<1x4x32xf32, #tpu.memory_space<vmem>>, %arg2: memref<32x96xf32, #tpu.memory_space<vmem>>, %arg3: memref<1x96xf32, #tpu.memory_space<vmem>>, %arg4: memref<32x32xf32, #tpu.memory_space<vmem>>, %arg5: memref<1x32xf32, #tpu.memory_space<vmem>>, %arg6: memref<1x32xf32, #tpu.memory_space<vmem>>, %arg7: memref<1x32xf32, #tpu.memory_space<vmem>>, %arg8: memref<32x32xf32, #tpu.memory_space<vmem>>, %arg9: memref<1x32xf32, #tpu.memory_space<vmem>>, %arg10: memref<32x32xf32, #tpu.memory_space<vmem>>, %arg11: memref<1x32xf32, #tpu.memory_space<vmem>>, %arg12: memref<1x32xf32, #tpu.memory_space<vmem>>, %arg13: memref<1x32xf32, #tpu.memory_space<vmem>>, %arg14: memref<1x32xf32, #tpu.memory_space<vmem>>, %arg15: memref<1x32xf32, #tpu.memory_space<vmem>>, %arg16: memref<1x4x32xf32, #tpu.memory_space<vmem>>) attributes {dimension_semantics = [#tpu.dimension_semantics<parallel>], iteration_bounds = array<i64: 2>, scalar_prefetch = 0 : i64, scratch_operands = 0 : i64, tpu.core_type = #tpu.core_type<tc>, window_params = [{transform_indices = @transform_0, window_bounds = array<i64: 1, 4, 32>}, {pipeline_mode = #tpu.pipeline_mode<synchronous>, transform_indices = @transform_1, window_bounds = array<i64: 32, 96>}, {pipeline_mode = #tpu.pipeline_mode<synchronous>, transform_indices = @transform_2, window_bounds = array<i64: 1, 96>}, {pipeline_mode = #tpu.pipeline_mode<synchronous>, transform_indices = @transform_3, window_bounds = array<i64: 32, 32>}, {pipeline_mode = #tpu.pipeline_mode<synchronous>, transform_indices = @transform_4, window_bounds = array<i64: 1, 32>}, {pipeline_mode = #tpu.pipeline_mode<synchronous>, transform_indices = @transform_5, window_bounds = array<i64: 1, 32>}, {pipeline_mode = #tpu.pipeline_mode<synchronous>, transform_indices = @transform_6, window_bounds = array<i64: 1, 32>}, {pipeline_mode = #tpu.pipeline_mode<synchronous>, transform_indices = @transform_7, window_bounds = array<i64: 32, 32>}, {pipeline_mode = #tpu.pipeline_mode<synchronous>, transform_indices = @transform_8, window_bounds = array<i64: 1, 32>}, {pipeline_mode = #tpu.pipeline_mode<synchronous>, transform_indices = @transform_9, window_bounds = array<i64: 32, 32>}, {pipeline_mode = #tpu.pipeline_mode<synchronous>, transform_indices = @transform_10, window_bounds = array<i64: 1, 32>}, {pipeline_mode = #tpu.pipeline_mode<synchronous>, transform_indices = @transform_11, window_bounds = array<i64: 1, 32>}, {pipeline_mode = #tpu.pipeline_mode<synchronous>, transform_indices = @transform_12, window_bounds = array<i64: 1, 32>}, {pipeline_mode = #tpu.pipeline_mode<synchronous>, transform_indices = @transform_13, window_bounds = array<i64: 1, 32>}, {pipeline_mode = #tpu.pipeline_mode<synchronous>, transform_indices = @transform_14, window_bounds = array<i64: 1, 32>}, {transform_indices = @transform_15, window_bounds = array<i64: 1, 4, 32>}]} {
    %c0 = arith.constant 0 : index
    %c0_0 = arith.constant 0 : index
    %c0_1 = arith.constant 0 : index
    %0 = vector.load %arg1[%c0, %c0_0, %c0_1] : memref<1x4x32xf32, #tpu.memory_space<vmem>>, vector<1x4x32xf32>
    %1 = vector.shape_cast %0 : vector<1x4x32xf32> to vector<4x32xf32>
    %c0_2 = arith.constant 0 : index
    %c0_3 = arith.constant 0 : index
    %2 = vector.load %arg2[%c0_2, %c0_3] : memref<32x96xf32, #tpu.memory_space<vmem>>, vector<32x96xf32>
    %cst = arith.constant dense<0.000000e+00> : vector<4x96xf32>
    %3 = tpu.matmul %1, %2, %cst {dimension_numbers = #tpu.dot_dimension_numbers<[1], [0], [0], [1], [0, 0, 1, 1], [], []>} : vector<4x32xf32>, vector<32x96xf32>, vector<4x96xf32> -> vector<4x96xf32>
    %c0_4 = arith.constant 0 : index
    %c0_5 = arith.constant 0 : index
    %4 = vector.load %arg3[%c0_4, %c0_5] : memref<1x96xf32, #tpu.memory_space<vmem>>, vector<1x96xf32>
    %5 = vector.broadcast %4 : vector<1x96xf32> to vector<4x96xf32>
    %6 = arith.addf %3, %5 : vector<4x96xf32>
    %7 = vector.extract_strided_slice %6 {offsets = [0, 0], sizes = [4, 32], strides = [1, 1]} : vector<4x96xf32> to vector<4x32xf32>
    %8 = vector.extract_strided_slice %6 {offsets = [0, 32], sizes = [4, 32], strides = [1, 1]} : vector<4x96xf32> to vector<4x32xf32>
    %9 = vector.extract_strided_slice %6 {offsets = [0, 64], sizes = [4, 32], strides = [1, 1]} : vector<4x96xf32> to vector<4x32xf32>
    %10 = vector.extract_strided_slice %7 {offsets = [0, 0], sizes = [4, 8], strides = [1, 1]} : vector<4x32xf32> to vector<4x8xf32>
    %11 = vector.extract_strided_slice %8 {offsets = [0, 0], sizes = [4, 8], strides = [1, 1]} : vector<4x32xf32> to vector<4x8xf32>
    %12 = vector.extract_strided_slice %9 {offsets = [0, 0], sizes = [4, 8], strides = [1, 1]} : vector<4x32xf32> to vector<4x8xf32>
    %cst_6 = arith.constant dense<0.000000e+00> : vector<4x4xf32>
    %13 = tpu.matmul %10, %11, %cst_6 {dimension_numbers = #tpu.dot_dimension_numbers<[1], [1], [0], [0], [0, 0, 1, 0], [], []>} : vector<4x8xf32>, vector<4x8xf32>, vector<4x4xf32> -> vector<4x4xf32>
    %cst_7 = arith.constant 0.353553385 : f32
    %14 = vector.broadcast %cst_7 : f32 to vector<4x4xf32>
    %15 = arith.mulf %13, %14 : vector<4x4xf32>
    %cst_8 = arith.constant dense<0xFF800000> : vector<4xf32>
    %16 = vector.multi_reduction <maximumf>, %15, %cst_8 [1] : vector<4x4xf32> to vector<4xf32>
    %17 = vector.shape_cast %16 : vector<4xf32> to vector<4x1xf32>
    %18 = vector.broadcast %17 : vector<4x1xf32> to vector<4x4xf32>
    %19 = arith.subf %15, %18 : vector<4x4xf32>
    %20 = math.exp %19 : vector<4x4xf32>
    %cst_9 = arith.constant dense<0.000000e+00> : vector<4xf32>
    %21 = vector.multi_reduction <add>, %20, %cst_9 [1] : vector<4x4xf32> to vector<4xf32>
    %22 = vector.shape_cast %21 : vector<4xf32> to vector<4x1xf32>
    %23 = tpu.reciprocal %22 {approx = true} : vector<4x1xf32> -> vector<4x1xf32>
    %24 = vector.broadcast %23 : vector<4x1xf32> to vector<4x4xf32>
    %25 = arith.mulf %20, %24 : vector<4x4xf32>
    %cst_10 = arith.constant dense<0.000000e+00> : vector<4x8xf32>
    %26 = tpu.matmul %25, %12, %cst_10 {dimension_numbers = #tpu.dot_dimension_numbers<[1], [0], [0], [1], [0, 0, 1, 1], [], []>} : vector<4x4xf32>, vector<4x8xf32>, vector<4x8xf32> -> vector<4x8xf32>
    %27 = vector.extract_strided_slice %7 {offsets = [0, 8], sizes = [4, 8], strides = [1, 1]} : vector<4x32xf32> to vector<4x8xf32>
    %28 = vector.extract_strided_slice %8 {offsets = [0, 8], sizes = [4, 8], strides = [1, 1]} : vector<4x32xf32> to vector<4x8xf32>
    %29 = vector.extract_strided_slice %9 {offsets = [0, 8], sizes = [4, 8], strides = [1, 1]} : vector<4x32xf32> to vector<4x8xf32>
    %cst_11 = arith.constant dense<0.000000e+00> : vector<4x4xf32>
    %30 = tpu.matmul %27, %28, %cst_11 {dimension_numbers = #tpu.dot_dimension_numbers<[1], [1], [0], [0], [0, 0, 1, 0], [], []>} : vector<4x8xf32>, vector<4x8xf32>, vector<4x4xf32> -> vector<4x4xf32>
    %cst_12 = arith.constant 0.353553385 : f32
    %31 = vector.broadcast %cst_12 : f32 to vector<4x4xf32>
    %32 = arith.mulf %30, %31 : vector<4x4xf32>
    %cst_13 = arith.constant dense<0xFF800000> : vector<4xf32>
    %33 = vector.multi_reduction <maximumf>, %32, %cst_13 [1] : vector<4x4xf32> to vector<4xf32>
    %34 = vector.shape_cast %33 : vector<4xf32> to vector<4x1xf32>
    %35 = vector.broadcast %34 : vector<4x1xf32> to vector<4x4xf32>
    %36 = arith.subf %32, %35 : vector<4x4xf32>
    %37 = math.exp %36 : vector<4x4xf32>
    %cst_14 = arith.constant dense<0.000000e+00> : vector<4xf32>
    %38 = vector.multi_reduction <add>, %37, %cst_14 [1] : vector<4x4xf32> to vector<4xf32>
    %39 = vector.shape_cast %38 : vector<4xf32> to vector<4x1xf32>
    %40 = tpu.reciprocal %39 {approx = true} : vector<4x1xf32> -> vector<4x1xf32>
    %41 = vector.broadcast %40 : vector<4x1xf32> to vector<4x4xf32>
    %42 = arith.mulf %37, %41 : vector<4x4xf32>
    %cst_15 = arith.constant dense<0.000000e+00> : vector<4x8xf32>
    %43 = tpu.matmul %42, %29, %cst_15 {dimension_numbers = #tpu.dot_dimension_numbers<[1], [0], [0], [1], [0, 0, 1, 1], [], []>} : vector<4x4xf32>, vector<4x8xf32>, vector<4x8xf32> -> vector<4x8xf32>
    %44 = vector.extract_strided_slice %7 {offsets = [0, 16], sizes = [4, 8], strides = [1, 1]} : vector<4x32xf32> to vector<4x8xf32>
    %45 = vector.extract_strided_slice %8 {offsets = [0, 16], sizes = [4, 8], strides = [1, 1]} : vector<4x32xf32> to vector<4x8xf32>
    %46 = vector.extract_strided_slice %9 {offsets = [0, 16], sizes = [4, 8], strides = [1, 1]} : vector<4x32xf32> to vector<4x8xf32>
    %cst_16 = arith.constant dense<0.000000e+00> : vector<4x4xf32>
    %47 = tpu.matmul %44, %45, %cst_16 {dimension_numbers = #tpu.dot_dimension_numbers<[1], [1], [0], [0], [0, 0, 1, 0], [], []>} : vector<4x8xf32>, vector<4x8xf32>, vector<4x4xf32> -> vector<4x4xf32>
    %cst_17 = arith.constant 0.353553385 : f32
    %48 = vector.broadcast %cst_17 : f32 to vector<4x4xf32>
    %49 = arith.mulf %47, %48 : vector<4x4xf32>
    %cst_18 = arith.constant dense<0xFF800000> : vector<4xf32>
    %50 = vector.multi_reduction <maximumf>, %49, %cst_18 [1] : vector<4x4xf32> to vector<4xf32>
    %51 = vector.shape_cast %50 : vector<4xf32> to vector<4x1xf32>
    %52 = vector.broadcast %51 : vector<4x1xf32> to vector<4x4xf32>
    %53 = arith.subf %49, %52 : vector<4x4xf32>
    %54 = math.exp %53 : vector<4x4xf32>
    %cst_19 = arith.constant dense<0.000000e+00> : vector<4xf32>
    %55 = vector.multi_reduction <add>, %54, %cst_19 [1] : vector<4x4xf32> to vector<4xf32>
    %56 = vector.shape_cast %55 : vector<4xf32> to vector<4x1xf32>
    %57 = tpu.reciprocal %56 {approx = true} : vector<4x1xf32> -> vector<4x1xf32>
    %58 = vector.broadcast %57 : vector<4x1xf32> to vector<4x4xf32>
    %59 = arith.mulf %54, %58 : vector<4x4xf32>
    %cst_20 = arith.constant dense<0.000000e+00> : vector<4x8xf32>
    %60 = tpu.matmul %59, %46, %cst_20 {dimension_numbers = #tpu.dot_dimension_numbers<[1], [0], [0], [1], [0, 0, 1, 1], [], []>} : vector<4x4xf32>, vector<4x8xf32>, vector<4x8xf32> -> vector<4x8xf32>
    %61 = vector.extract_strided_slice %7 {offsets = [0, 24], sizes = [4, 8], strides = [1, 1]} : vector<4x32xf32> to vector<4x8xf32>
    %62 = vector.extract_strided_slice %8 {offsets = [0, 24], sizes = [4, 8], strides = [1, 1]} : vector<4x32xf32> to vector<4x8xf32>
    %63 = vector.extract_strided_slice %9 {offsets = [0, 24], sizes = [4, 8], strides = [1, 1]} : vector<4x32xf32> to vector<4x8xf32>
    %cst_21 = arith.constant dense<0.000000e+00> : vector<4x4xf32>
    %64 = tpu.matmul %61, %62, %cst_21 {dimension_numbers = #tpu.dot_dimension_numbers<[1], [1], [0], [0], [0, 0, 1, 0], [], []>} : vector<4x8xf32>, vector<4x8xf32>, vector<4x4xf32> -> vector<4x4xf32>
    %cst_22 = arith.constant 0.353553385 : f32
    %65 = vector.broadcast %cst_22 : f32 to vector<4x4xf32>
    %66 = arith.mulf %64, %65 : vector<4x4xf32>
    %cst_23 = arith.constant dense<0xFF800000> : vector<4xf32>
    %67 = vector.multi_reduction <maximumf>, %66, %cst_23 [1] : vector<4x4xf32> to vector<4xf32>
    %68 = vector.shape_cast %67 : vector<4xf32> to vector<4x1xf32>
    %69 = vector.broadcast %68 : vector<4x1xf32> to vector<4x4xf32>
    %70 = arith.subf %66, %69 : vector<4x4xf32>
    %71 = math.exp %70 : vector<4x4xf32>
    %cst_24 = arith.constant dense<0.000000e+00> : vector<4xf32>
    %72 = vector.multi_reduction <add>, %71, %cst_24 [1] : vector<4x4xf32> to vector<4xf32>
    %73 = vector.shape_cast %72 : vector<4xf32> to vector<4x1xf32>
    %74 = tpu.reciprocal %73 {approx = true} : vector<4x1xf32> -> vector<4x1xf32>
    %75 = vector.broadcast %74 : vector<4x1xf32> to vector<4x4xf32>
    %76 = arith.mulf %71, %75 : vector<4x4xf32>
    %cst_25 = arith.constant dense<0.000000e+00> : vector<4x8xf32>
    %77 = tpu.matmul %76, %63, %cst_25 {dimension_numbers = #tpu.dot_dimension_numbers<[1], [0], [0], [1], [0, 0, 1, 1], [], []>} : vector<4x4xf32>, vector<4x8xf32>, vector<4x8xf32> -> vector<4x8xf32>
    %78 = tpu.concatenate %26, %43, %60, %77 in 1 : vector<4x8xf32>, vector<4x8xf32>, vector<4x8xf32>, vector<4x8xf32> -> vector<4x32xf32>
    %c0_26 = arith.constant 0 : index
    %c0_27 = arith.constant 0 : index
    %79 = vector.load %arg4[%c0_26, %c0_27] : memref<32x32xf32, #tpu.memory_space<vmem>>, vector<32x32xf32>
    %cst_28 = arith.constant dense<0.000000e+00> : vector<4x32xf32>
    %80 = tpu.matmul %78, %79, %cst_28 {dimension_numbers = #tpu.dot_dimension_numbers<[1], [0], [0], [1], [0, 0, 1, 1], [], []>} : vector<4x32xf32>, vector<32x32xf32>, vector<4x32xf32> -> vector<4x32xf32>
    %c0_29 = arith.constant 0 : index
    %c0_30 = arith.constant 0 : index
    %81 = vector.load %arg5[%c0_29, %c0_30] : memref<1x32xf32, #tpu.memory_space<vmem>>, vector<1x32xf32>
    %82 = vector.broadcast %81 : vector<1x32xf32> to vector<4x32xf32>
    %83 = arith.addf %80, %82 : vector<4x32xf32>
    %84 = arith.addf %1, %83 : vector<4x32xf32>
    %c0_31 = arith.constant 0 : index
    %c0_32 = arith.constant 0 : index
    %85 = vector.load %arg6[%c0_31, %c0_32] : memref<1x32xf32, #tpu.memory_space<vmem>>, vector<1x32xf32>
    %c0_33 = arith.constant 0 : index
    %c0_34 = arith.constant 0 : index
    %86 = vector.load %arg7[%c0_33, %c0_34] : memref<1x32xf32, #tpu.memory_space<vmem>>, vector<1x32xf32>
    %cst_35 = arith.constant dense<0.000000e+00> : vector<4xf32>
    %87 = vector.multi_reduction <add>, %84, %cst_35 [1] : vector<4x32xf32> to vector<4xf32>
    %88 = vector.shape_cast %87 : vector<4xf32> to vector<4x1xf32>
    %cst_36 = arith.constant 3.200000e+01 : f32
    %89 = vector.broadcast %cst_36 : f32 to vector<4x1xf32>
    %90 = arith.divf %88, %89 : vector<4x1xf32>
    %91 = vector.broadcast %90 : vector<4x1xf32> to vector<4x32xf32>
    %92 = arith.subf %84, %91 : vector<4x32xf32>
    %93 = arith.mulf %92, %92 : vector<4x32xf32>
    %cst_37 = arith.constant dense<0.000000e+00> : vector<4xf32>
    %94 = vector.multi_reduction <add>, %93, %cst_37 [1] : vector<4x32xf32> to vector<4xf32>
    %95 = vector.shape_cast %94 : vector<4xf32> to vector<4x1xf32>
    %cst_38 = arith.constant 3.200000e+01 : f32
    %96 = vector.broadcast %cst_38 : f32 to vector<4x1xf32>
    %97 = arith.divf %95, %96 : vector<4x1xf32>
    %98 = vector.broadcast %90 : vector<4x1xf32> to vector<4x32xf32>
    %99 = arith.subf %84, %98 : vector<4x32xf32>
    %cst_39 = arith.constant 9.99999974E-6 : f32
    %100 = vector.broadcast %cst_39 : f32 to vector<4x1xf32>
    %101 = arith.addf %97, %100 : vector<4x1xf32>
    %102 = math.rsqrt %101 : vector<4x1xf32>
    %103 = vector.broadcast %102 : vector<4x1xf32> to vector<4x32xf32>
    %104 = arith.mulf %99, %103 : vector<4x32xf32>
    %105 = vector.broadcast %85 : vector<1x32xf32> to vector<4x32xf32>
    %106 = arith.mulf %104, %105 : vector<4x32xf32>
    %107 = vector.broadcast %86 : vector<1x32xf32> to vector<4x32xf32>
    %108 = arith.addf %106, %107 : vector<4x32xf32>
    %c0_40 = arith.constant 0 : index
    %c0_41 = arith.constant 0 : index
    %109 = vector.load %arg8[%c0_40, %c0_41] : memref<32x32xf32, #tpu.memory_space<vmem>>, vector<32x32xf32>
    %cst_42 = arith.constant dense<0.000000e+00> : vector<4x32xf32>
    %110 = tpu.matmul %108, %109, %cst_42 {dimension_numbers = #tpu.dot_dimension_numbers<[1], [0], [0], [1], [0, 0, 1, 1], [], []>} : vector<4x32xf32>, vector<32x32xf32>, vector<4x32xf32> -> vector<4x32xf32>
    %c0_43 = arith.constant 0 : index
    %c0_44 = arith.constant 0 : index
    %111 = vector.load %arg9[%c0_43, %c0_44] : memref<1x32xf32, #tpu.memory_space<vmem>>, vector<1x32xf32>
    %112 = vector.broadcast %111 : vector<1x32xf32> to vector<4x32xf32>
    %113 = arith.addf %110, %112 : vector<4x32xf32>
    %cst_45 = arith.constant 5.000000e-01 : f32
    %114 = vector.broadcast %cst_45 : f32 to vector<4x32xf32>
    %115 = arith.mulf %114, %113 : vector<4x32xf32>
    %cst_46 = arith.constant 4.471500e-02 : f32
    %116 = vector.broadcast %cst_46 : f32 to vector<4x32xf32>
    %117 = arith.mulf %116, %113 : vector<4x32xf32>
    %118 = arith.mulf %117, %113 : vector<4x32xf32>
    %119 = arith.mulf %118, %113 : vector<4x32xf32>
    %120 = arith.addf %113, %119 : vector<4x32xf32>
    %cst_47 = arith.constant 0.797884583 : f32
    %121 = vector.broadcast %cst_47 : f32 to vector<4x32xf32>
    %122 = arith.mulf %121, %120 : vector<4x32xf32>
    %123 = math.tanh %122 : vector<4x32xf32>
    %cst_48 = arith.constant 1.000000e+00 : f32
    %124 = vector.broadcast %cst_48 : f32 to vector<4x32xf32>
    %125 = arith.addf %124, %123 : vector<4x32xf32>
    %126 = arith.mulf %115, %125 : vector<4x32xf32>
    %c0_49 = arith.constant 0 : index
    %c0_50 = arith.constant 0 : index
    %127 = vector.load %arg10[%c0_49, %c0_50] : memref<32x32xf32, #tpu.memory_space<vmem>>, vector<32x32xf32>
    %cst_51 = arith.constant dense<0.000000e+00> : vector<4x32xf32>
    %128 = tpu.matmul %126, %127, %cst_51 {dimension_numbers = #tpu.dot_dimension_numbers<[1], [0], [0], [1], [0, 0, 1, 1], [], []>} : vector<4x32xf32>, vector<32x32xf32>, vector<4x32xf32> -> vector<4x32xf32>
    %c0_52 = arith.constant 0 : index
    %c0_53 = arith.constant 0 : index
    %129 = vector.load %arg11[%c0_52, %c0_53] : memref<1x32xf32, #tpu.memory_space<vmem>>, vector<1x32xf32>
    %130 = vector.broadcast %129 : vector<1x32xf32> to vector<4x32xf32>
    %131 = arith.addf %128, %130 : vector<4x32xf32>
    %132 = arith.addf %108, %131 : vector<4x32xf32>
    %c0_54 = arith.constant 0 : index
    %c0_55 = arith.constant 0 : index
    %133 = vector.load %arg12[%c0_54, %c0_55] : memref<1x32xf32, #tpu.memory_space<vmem>>, vector<1x32xf32>
    %c0_56 = arith.constant 0 : index
    %c0_57 = arith.constant 0 : index
    %134 = vector.load %arg13[%c0_56, %c0_57] : memref<1x32xf32, #tpu.memory_space<vmem>>, vector<1x32xf32>
    %cst_58 = arith.constant dense<0.000000e+00> : vector<4xf32>
    %135 = vector.multi_reduction <add>, %132, %cst_58 [1] : vector<4x32xf32> to vector<4xf32>
    %136 = vector.shape_cast %135 : vector<4xf32> to vector<4x1xf32>
    %cst_59 = arith.constant 3.200000e+01 : f32
    %137 = vector.broadcast %cst_59 : f32 to vector<4x1xf32>
    %138 = arith.divf %136, %137 : vector<4x1xf32>
    %139 = vector.broadcast %138 : vector<4x1xf32> to vector<4x32xf32>
    %140 = arith.subf %132, %139 : vector<4x32xf32>
    %141 = arith.mulf %140, %140 : vector<4x32xf32>
    %cst_60 = arith.constant dense<0.000000e+00> : vector<4xf32>
    %142 = vector.multi_reduction <add>, %141, %cst_60 [1] : vector<4x32xf32> to vector<4xf32>
    %143 = vector.shape_cast %142 : vector<4xf32> to vector<4x1xf32>
    %cst_61 = arith.constant 3.200000e+01 : f32
    %144 = vector.broadcast %cst_61 : f32 to vector<4x1xf32>
    %145 = arith.divf %143, %144 : vector<4x1xf32>
    %146 = vector.broadcast %138 : vector<4x1xf32> to vector<4x32xf32>
    %147 = arith.subf %132, %146 : vector<4x32xf32>
    %cst_62 = arith.constant 9.99999974E-6 : f32
    %148 = vector.broadcast %cst_62 : f32 to vector<4x1xf32>
    %149 = arith.addf %145, %148 : vector<4x1xf32>
    %150 = math.rsqrt %149 : vector<4x1xf32>
    %151 = vector.broadcast %150 : vector<4x1xf32> to vector<4x32xf32>
    %152 = arith.mulf %147, %151 : vector<4x32xf32>
    %153 = vector.broadcast %133 : vector<1x32xf32> to vector<4x32xf32>
    %154 = arith.mulf %152, %153 : vector<4x32xf32>
    %155 = vector.broadcast %134 : vector<1x32xf32> to vector<4x32xf32>
    %156 = arith.addf %154, %155 : vector<4x32xf32>
    %c0_63 = arith.constant 0 : index
    %c0_64 = arith.constant 0 : index
    %157 = vector.load %arg14[%c0_63, %c0_64] : memref<1x32xf32, #tpu.memory_space<vmem>>, vector<1x32xf32>
    %c0_65 = arith.constant 0 : index
    %c0_66 = arith.constant 0 : index
    %158 = vector.load %arg15[%c0_65, %c0_66] : memref<1x32xf32, #tpu.memory_space<vmem>>, vector<1x32xf32>
    %cst_67 = arith.constant dense<0.000000e+00> : vector<4xf32>
    %159 = vector.multi_reduction <add>, %156, %cst_67 [1] : vector<4x32xf32> to vector<4xf32>
    %160 = vector.shape_cast %159 : vector<4xf32> to vector<4x1xf32>
    %cst_68 = arith.constant 3.200000e+01 : f32
    %161 = vector.broadcast %cst_68 : f32 to vector<4x1xf32>
    %162 = arith.divf %160, %161 : vector<4x1xf32>
    %163 = vector.broadcast %162 : vector<4x1xf32> to vector<4x32xf32>
    %164 = arith.subf %156, %163 : vector<4x32xf32>
    %165 = arith.mulf %164, %164 : vector<4x32xf32>
    %cst_69 = arith.constant dense<0.000000e+00> : vector<4xf32>
    %166 = vector.multi_reduction <add>, %165, %cst_69 [1] : vector<4x32xf32> to vector<4xf32>
    %167 = vector.shape_cast %166 : vector<4xf32> to vector<4x1xf32>
    %cst_70 = arith.constant 3.200000e+01 : f32
    %168 = vector.broadcast %cst_70 : f32 to vector<4x1xf32>
    %169 = arith.divf %167, %168 : vector<4x1xf32>
    %170 = vector.broadcast %162 : vector<4x1xf32> to vector<4x32xf32>
    %171 = arith.subf %156, %170 : vector<4x32xf32>
    %cst_71 = arith.constant 9.99999974E-6 : f32
    %172 = vector.broadcast %cst_71 : f32 to vector<4x1xf32>
    %173 = arith.addf %169, %172 : vector<4x1xf32>
    %174 = math.rsqrt %173 : vector<4x1xf32>
    %175 = vector.broadcast %174 : vector<4x1xf32> to vector<4x32xf32>
    %176 = arith.mulf %171, %175 : vector<4x32xf32>
    %177 = vector.broadcast %157 : vector<1x32xf32> to vector<4x32xf32>
    %178 = arith.mulf %176, %177 : vector<4x32xf32>
    %179 = vector.broadcast %158 : vector<1x32xf32> to vector<4x32xf32>
    %180 = arith.addf %178, %179 : vector<4x32xf32>
    %c0_72 = arith.constant 0 : index
    %c0_73 = arith.constant 0 : index
    %c0_74 = arith.constant 0 : index
    %181 = vector.load %arg16[%c0_72, %c0_73, %c0_74] : memref<1x4x32xf32, #tpu.memory_space<vmem>>, vector<1x4x32xf32>
    %182 = vector.shape_cast %181 : vector<1x4x32xf32> to vector<4x32xf32>
    %183 = vector.shape_cast %180 : vector<4x32xf32> to vector<1x4x32xf32>
    tpu.vector_store %arg16[%c0_72, %c0_73, %c0_74], %183 {strides = array<i32>} : memref<1x4x32xf32, #tpu.memory_space<vmem>>, vector<1x4x32xf32>,
    return
  }
  func.func @transform_0(%arg0: i32) -> (i32, i32, i32) {
    %c0_i32 = arith.constant 0 : i32
    %c0_i32_0 = arith.constant 0 : i32
    %c0_i32_1 = arith.constant 0 : i32
    return %arg0, %c0_i32, %c0_i32_0 : i32, i32, i32
  }
  func.func @transform_1(%arg0: i32) -> (i32, i32) {
    %c0_i32 = arith.constant 0 : i32
    %c0_i32_0 = arith.constant 0 : i32
    %c0_i32_1 = arith.constant 0 : i32
    return %c0_i32, %c0_i32_0 : i32, i32
  }
  func.func @transform_2(%arg0: i32) -> (i32, i32) {
    %c0_i32 = arith.constant 0 : i32
    %c0_i32_0 = arith.constant 0 : i32
    %c0_i32_1 = arith.constant 0 : i32
    return %c0_i32, %c0_i32_0 : i32, i32
  }
  func.func @transform_3(%arg0: i32) -> (i32, i32) {
    %c0_i32 = arith.constant 0 : i32
    %c0_i32_0 = arith.constant 0 : i32
    %c0_i32_1 = arith.constant 0 : i32
    return %c0_i32, %c0_i32_0 : i32, i32
  }
  func.func @transform_4(%arg0: i32) -> (i32, i32) {
    %c0_i32 = arith.constant 0 : i32
    %c0_i32_0 = arith.constant 0 : i32
    %c0_i32_1 = arith.constant 0 : i32
    return %c0_i32, %c0_i32_0 : i32, i32
  }
  func.func @transform_5(%arg0: i32) -> (i32, i32) {
    %c0_i32 = arith.constant 0 : i32
    %c0_i32_0 = arith.constant 0 : i32
    %c0_i32_1 = arith.constant 0 : i32
    return %c0_i32, %c0_i32_0 : i32, i32
  }
  func.func @transform_6(%arg0: i32) -> (i32, i32) {
    %c0_i32 = arith.constant 0 : i32
    %c0_i32_0 = arith.constant 0 : i32
    %c0_i32_1 = arith.constant 0 : i32
    return %c0_i32, %c0_i32_0 : i32, i32
  }
  func.func @transform_7(%arg0: i32) -> (i32, i32) {
    %c0_i32 = arith.constant 0 : i32
    %c0_i32_0 = arith.constant 0 : i32
    %c0_i32_1 = arith.constant 0 : i32
    return %c0_i32, %c0_i32_0 : i32, i32
  }
  func.func @transform_8(%arg0: i32) -> (i32, i32) {
    %c0_i32 = arith.constant 0 : i32
    %c0_i32_0 = arith.constant 0 : i32
    %c0_i32_1 = arith.constant 0 : i32
    return %c0_i32, %c0_i32_0 : i32, i32
  }
  func.func @transform_9(%arg0: i32) -> (i32, i32) {
    %c0_i32 = arith.constant 0 : i32
    %c0_i32_0 = arith.constant 0 : i32
    %c0_i32_1 = arith.constant 0 : i32
    return %c0_i32, %c0_i32_0 : i32, i32
  }
  func.func @transform_10(%arg0: i32) -> (i32, i32) {
    %c0_i32 = arith.constant 0 : i32
    %c0_i32_0 = arith.constant 0 : i32
    %c0_i32_1 = arith.constant 0 : i32
    return %c0_i32, %c0_i32_0 : i32, i32
  }
  func.func @transform_11(%arg0: i32) -> (i32, i32) {
    %c0_i32 = arith.constant 0 : i32
    %c0_i32_0 = arith.constant 0 : i32
    %c0_i32_1 = arith.constant 0 : i32
    return %c0_i32, %c0_i32_0 : i32, i32
  }
  func.func @transform_12(%arg0: i32) -> (i32, i32) {
    %c0_i32 = arith.constant 0 : i32
    %c0_i32_0 = arith.constant 0 : i32
    %c0_i32_1 = arith.constant 0 : i32
    return %c0_i32, %c0_i32_0 : i32, i32
  }
  func.func @transform_13(%arg0: i32) -> (i32, i32) {
    %c0_i32 = arith.constant 0 : i32
    %c0_i32_0 = arith.constant 0 : i32
    %c0_i32_1 = arith.constant 0 : i32
    return %c0_i32, %c0_i32_0 : i32, i32
  }
  func.func @transform_14(%arg0: i32) -> (i32, i32) {
    %c0_i32 = arith.constant 0 : i32
    %c0_i32_0 = arith.constant 0 : i32
    %c0_i32_1 = arith.constant 0 : i32
    return %c0_i32, %c0_i32_0 : i32, i32
  }
  func.func @transform_15(%arg0: i32) -> (i32, i32, i32) {
    %c0_i32 = arith.constant 0 : i32
    %c0_i32_0 = arith.constant 0 : i32
    %c0_i32_1 = arith.constant 0 : i32
    return %arg0, %c0_i32, %c0_i32_0 : i32, i32, i32
  }
}

module attributes {stable_mosaic.version = 11 : i64} {
  func.func @_decoder_layer_kernel(%arg0: i32, %arg1: memref<1x16x32xf32, #tpu.memory_space<vmem>>, %arg2: memref<1x12x32xf32, #tpu.memory_space<vmem>>, %arg3: memref<32x96xf32, #tpu.memory_space<vmem>>, %arg4: memref<1x96xf32, #tpu.memory_space<vmem>>, %arg5: memref<32x32xf32, #tpu.memory_space<vmem>>, %arg6: memref<1x32xf32, #tpu.memory_space<vmem>>, %arg7: memref<1x32xf32, #tpu.memory_space<vmem>>, %arg8: memref<1x32xf32, #tpu.memory_space<vmem>>, %arg9: memref<32x32xf32, #tpu.memory_space<vmem>>, %arg10: memref<1x32xf32, #tpu.memory_space<vmem>>, %arg11: memref<32x64xf32, #tpu.memory_space<vmem>>, %arg12: memref<1x64xf32, #tpu.memory_space<vmem>>, %arg13: memref<32x32xf32, #tpu.memory_space<vmem>>, %arg14: memref<1x32xf32, #tpu.memory_space<vmem>>, %arg15: memref<1x32xf32, #tpu.memory_space<vmem>>, %arg16: memref<1x32xf32, #tpu.memory_space<vmem>>, %arg17: memref<32x32xf32, #tpu.memory_space<vmem>>, %arg18: memref<1x32xf32, #tpu.memory_space<vmem>>, %arg19: memref<32x32xf32, #tpu.memory_space<vmem>>, %arg20: memref<1x32xf32, #tpu.memory_space<vmem>>, %arg21: memref<1x32xf32, #tpu.memory_space<vmem>>, %arg22: memref<1x32xf32, #tpu.memory_space<vmem>>, %arg23: memref<1x32xf32, #tpu.memory_space<vmem>>, %arg24: memref<1x32xf32, #tpu.memory_space<vmem>>, %arg25: memref<1x16x32xf32, #tpu.memory_space<vmem>>, %arg26: memref<16x32xf32, #tpu.memory_space<vmem>>) attributes {dimension_semantics = [#tpu.dimension_semantics<parallel>], iteration_bounds = array<i64: 2>, scalar_prefetch = 0 : i64, scratch_operands = 1 : i64, tpu.core_type = #tpu.core_type<tc>, window_params = [{transform_indices = @transform_0, window_bounds = array<i64: 1, 16, 32>}, {transform_indices = @transform_1, window_bounds = array<i64: 1, 12, 32>}, {pipeline_mode = #tpu.pipeline_mode<synchronous>, transform_indices = @transform_2, window_bounds = array<i64: 32, 96>}, {pipeline_mode = #tpu.pipeline_mode<synchronous>, transform_indices = @transform_3, window_bounds = array<i64: 1, 96>}, {pipeline_mode = #tpu.pipeline_mode<synchronous>, transform_indices = @transform_4, window_bounds = array<i64: 32, 32>}, {pipeline_mode = #tpu.pipeline_mode<synchronous>, transform_indices = @transform_5, window_bounds = array<i64: 1, 32>}, {pipeline_mode = #tpu.pipeline_mode<synchronous>, transform_indices = @transform_6, window_bounds = array<i64: 1, 32>}, {pipeline_mode = #tpu.pipeline_mode<synchronous>, transform_indices = @transform_7, window_bounds = array<i64: 1, 32>}, {pipeline_mode = #tpu.pipeline_mode<synchronous>, transform_indices = @transform_8, window_bounds = array<i64: 32, 32>}, {pipeline_mode = #tpu.pipeline_mode<synchronous>, transform_indices = @transform_9, window_bounds = array<i64: 1, 32>}, {pipeline_mode = #tpu.pipeline_mode<synchronous>, transform_indices = @transform_10, window_bounds = array<i64: 32, 64>}, {pipeline_mode = #tpu.pipeline_mode<synchronous>, transform_indices = @transform_11, window_bounds = array<i64: 1, 64>}, {pipeline_mode = #tpu.pipeline_mode<synchronous>, transform_indices = @transform_12, window_bounds = array<i64: 32, 32>}, {pipeline_mode = #tpu.pipeline_mode<synchronous>, transform_indices = @transform_13, window_bounds = array<i64: 1, 32>}, {pipeline_mode = #tpu.pipeline_mode<synchronous>, transform_indices = @transform_14, window_bounds = array<i64: 1, 32>}, {pipeline_mode = #tpu.pipeline_mode<synchronous>, transform_indices = @transform_15, window_bounds = array<i64: 1, 32>}, {pipeline_mode = #tpu.pipeline_mode<synchronous>, transform_indices = @transform_16, window_bounds = array<i64: 32, 32>}, {pipeline_mode = #tpu.pipeline_mode<synchronous>, transform_indices = @transform_17, window_bounds = array<i64: 1, 32>}, {pipeline_mode = #tpu.pipeline_mode<synchronous>, transform_indices = @transform_18, window_bounds = array<i64: 32, 32>}, {pipeline_mode = #tpu.pipeline_mode<synchronous>, transform_indices = @transform_19, window_bounds = array<i64: 1, 32>}, {pipeline_mode = #tpu.pipeline_mode<synchronous>, transform_indices = @transform_20, window_bounds = array<i64: 1, 32>}, {pipeline_mode = #tpu.pipeline_mode<synchronous>, transform_indices = @transform_21, window_bounds = array<i64: 1, 32>}, {pipeline_mode = #tpu.pipeline_mode<synchronous>, transform_indices = @transform_22, window_bounds = array<i64: 1, 32>}, {pipeline_mode = #tpu.pipeline_mode<synchronous>, transform_indices = @transform_23, window_bounds = array<i64: 1, 32>}, {transform_indices = @transform_24, window_bounds = array<i64: 1, 16, 32>}]} {
    %c0 = arith.constant 0 : index
    %c0_0 = arith.constant 0 : index
    %c0_1 = arith.constant 0 : index
    %0 = vector.load %arg1[%c0, %c0_0, %c0_1] : memref<1x16x32xf32, #tpu.memory_space<vmem>>, vector<1x16x32xf32>
    %1 = vector.shape_cast %0 : vector<1x16x32xf32> to vector<16x32xf32>
    %c0_2 = arith.constant 0 : index
    %c0_3 = arith.constant 0 : index
    %c0_4 = arith.constant 0 : index
    %2 = vector.load %arg2[%c0_2, %c0_3, %c0_4] : memref<1x12x32xf32, #tpu.memory_space<vmem>>, vector<1x12x32xf32>
    %3 = vector.shape_cast %2 : vector<1x12x32xf32> to vector<12x32xf32>
    %c0_5 = arith.constant 0 : index
    %c0_6 = arith.constant 0 : index
    %4 = vector.load %arg3[%c0_5, %c0_6] : memref<32x96xf32, #tpu.memory_space<vmem>>, vector<32x96xf32>
    %cst = arith.constant dense<0.000000e+00> : vector<16x96xf32>
    %5 = tpu.matmul %1, %4, %cst {dimension_numbers = #tpu.dot_dimension_numbers<[1], [0], [0], [1], [0, 0, 1, 1], [], []>} : vector<16x32xf32>, vector<32x96xf32>, vector<16x96xf32> -> vector<16x96xf32>
    %c0_7 = arith.constant 0 : index
    %c0_8 = arith.constant 0 : index
    %6 = vector.load %arg4[%c0_7, %c0_8] : memref<1x96xf32, #tpu.memory_space<vmem>>, vector<1x96xf32>
    %7 = vector.broadcast %6 : vector<1x96xf32> to vector<16x96xf32>
    %8 = arith.addf %5, %7 : vector<16x96xf32>
    %9 = vector.extract_strided_slice %8 {offsets = [0, 0], sizes = [16, 32], strides = [1, 1]} : vector<16x96xf32> to vector<16x32xf32>
    %10 = vector.extract_strided_slice %8 {offsets = [0, 32], sizes = [16, 32], strides = [1, 1]} : vector<16x96xf32> to vector<16x32xf32>
    %11 = vector.extract_strided_slice %8 {offsets = [0, 64], sizes = [16, 32], strides = [1, 1]} : vector<16x96xf32> to vector<16x32xf32>
    %12 = tpu.iota {dimensions = array<i32: 0>} : vector<16x16xi32>
    %13 = tpu.iota {dimensions = array<i32: 1>} : vector<16x16xi32>
    %14 = arith.cmpi sgt, %13, %12 : vector<16x16xi32>
    %15 = vector.extract_strided_slice %9 {offsets = [0, 0], sizes = [16, 8], strides = [1, 1]} : vector<16x32xf32> to vector<16x8xf32>
    %16 = vector.extract_strided_slice %10 {offsets = [0, 0], sizes = [16, 8], strides = [1, 1]} : vector<16x32xf32> to vector<16x8xf32>
    %17 = vector.extract_strided_slice %11 {offsets = [0, 0], sizes = [16, 8], strides = [1, 1]} : vector<16x32xf32> to vector<16x8xf32>
    %cst_9 = arith.constant dense<0.000000e+00> : vector<16x16xf32>
    %18 = tpu.matmul %15, %16, %cst_9 {dimension_numbers = #tpu.dot_dimension_numbers<[1], [1], [0], [0], [0, 0, 1, 0], [], []>} : vector<16x8xf32>, vector<16x8xf32>, vector<16x16xf32> -> vector<16x16xf32>
    %cst_10 = arith.constant 0.353553385 : f32
    %19 = vector.broadcast %cst_10 : f32 to vector<16x16xf32>
    %20 = arith.mulf %18, %19 : vector<16x16xf32>
    %cst_11 = arith.constant -1.000000e+30 : f32
    %21 = vector.broadcast %cst_11 : f32 to vector<16x16xf32>
    %22 = arith.select %14, %21, %20 : vector<16x16xi1>, vector<16x16xf32>
    %cst_12 = arith.constant dense<0xFF800000> : vector<16xf32>
    %23 = vector.multi_reduction <maximumf>, %22, %cst_12 [1] : vector<16x16xf32> to vector<16xf32>
    %24 = vector.shape_cast %23 : vector<16xf32> to vector<16x1xf32>
    %25 = vector.broadcast %24 : vector<16x1xf32> to vector<16x16xf32>
    %26 = arith.subf %22, %25 : vector<16x16xf32>
    %27 = math.exp %26 : vector<16x16xf32>
    %cst_13 = arith.constant dense<0.000000e+00> : vector<16xf32>
    %28 = vector.multi_reduction <add>, %27, %cst_13 [1] : vector<16x16xf32> to vector<16xf32>
    %29 = vector.shape_cast %28 : vector<16xf32> to vector<16x1xf32>
    %30 = tpu.reciprocal %29 {approx = true} : vector<16x1xf32> -> vector<16x1xf32>
    %31 = vector.broadcast %30 : vector<16x1xf32> to vector<16x16xf32>
    %32 = arith.mulf %27, %31 : vector<16x16xf32>
    %cst_14 = arith.constant dense<0.000000e+00> : vector<16x8xf32>
    %33 = tpu.matmul %32, %17, %cst_14 {dimension_numbers = #tpu.dot_dimension_numbers<[1], [0], [0], [1], [0, 0, 1, 1], [], []>} : vector<16x16xf32>, vector<16x8xf32>, vector<16x8xf32> -> vector<16x8xf32>
    %34 = vector.extract_strided_slice %9 {offsets = [0, 8], sizes = [16, 8], strides = [1, 1]} : vector<16x32xf32> to vector<16x8xf32>
    %35 = vector.extract_strided_slice %10 {offsets = [0, 8], sizes = [16, 8], strides = [1, 1]} : vector<16x32xf32> to vector<16x8xf32>
    %36 = vector.extract_strided_slice %11 {offsets = [0, 8], sizes = [16, 8], strides = [1, 1]} : vector<16x32xf32> to vector<16x8xf32>
    %cst_15 = arith.constant dense<0.000000e+00> : vector<16x16xf32>
    %37 = tpu.matmul %34, %35, %cst_15 {dimension_numbers = #tpu.dot_dimension_numbers<[1], [1], [0], [0], [0, 0, 1, 0], [], []>} : vector<16x8xf32>, vector<16x8xf32>, vector<16x16xf32> -> vector<16x16xf32>
    %cst_16 = arith.constant 0.353553385 : f32
    %38 = vector.broadcast %cst_16 : f32 to vector<16x16xf32>
    %39 = arith.mulf %37, %38 : vector<16x16xf32>
    %cst_17 = arith.constant -1.000000e+30 : f32
    %40 = vector.broadcast %cst_17 : f32 to vector<16x16xf32>
    %41 = arith.select %14, %40, %39 : vector<16x16xi1>, vector<16x16xf32>
    %cst_18 = arith.constant dense<0xFF800000> : vector<16xf32>
    %42 = vector.multi_reduction <maximumf>, %41, %cst_18 [1] : vector<16x16xf32> to vector<16xf32>
    %43 = vector.shape_cast %42 : vector<16xf32> to vector<16x1xf32>
    %44 = vector.broadcast %43 : vector<16x1xf32> to vector<16x16xf32>
    %45 = arith.subf %41, %44 : vector<16x16xf32>
    %46 = math.exp %45 : vector<16x16xf32>
    %cst_19 = arith.constant dense<0.000000e+00> : vector<16xf32>
    %47 = vector.multi_reduction <add>, %46, %cst_19 [1] : vector<16x16xf32> to vector<16xf32>
    %48 = vector.shape_cast %47 : vector<16xf32> to vector<16x1xf32>
    %49 = tpu.reciprocal %48 {approx = true} : vector<16x1xf32> -> vector<16x1xf32>
    %50 = vector.broadcast %49 : vector<16x1xf32> to vector<16x16xf32>
    %51 = arith.mulf %46, %50 : vector<16x16xf32>
    %cst_20 = arith.constant dense<0.000000e+00> : vector<16x8xf32>
    %52 = tpu.matmul %51, %36, %cst_20 {dimension_numbers = #tpu.dot_dimension_numbers<[1], [0], [0], [1], [0, 0, 1, 1], [], []>} : vector<16x16xf32>, vector<16x8xf32>, vector<16x8xf32> -> vector<16x8xf32>
    %53 = vector.extract_strided_slice %9 {offsets = [0, 16], sizes = [16, 8], strides = [1, 1]} : vector<16x32xf32> to vector<16x8xf32>
    %54 = vector.extract_strided_slice %10 {offsets = [0, 16], sizes = [16, 8], strides = [1, 1]} : vector<16x32xf32> to vector<16x8xf32>
    %55 = vector.extract_strided_slice %11 {offsets = [0, 16], sizes = [16, 8], strides = [1, 1]} : vector<16x32xf32> to vector<16x8xf32>
    %cst_21 = arith.constant dense<0.000000e+00> : vector<16x16xf32>
    %56 = tpu.matmul %53, %54, %cst_21 {dimension_numbers = #tpu.dot_dimension_numbers<[1], [1], [0], [0], [0, 0, 1, 0], [], []>} : vector<16x8xf32>, vector<16x8xf32>, vector<16x16xf32> -> vector<16x16xf32>
    %cst_22 = arith.constant 0.353553385 : f32
    %57 = vector.broadcast %cst_22 : f32 to vector<16x16xf32>
    %58 = arith.mulf %56, %57 : vector<16x16xf32>
    %cst_23 = arith.constant -1.000000e+30 : f32
    %59 = vector.broadcast %cst_23 : f32 to vector<16x16xf32>
    %60 = arith.select %14, %59, %58 : vector<16x16xi1>, vector<16x16xf32>
    %cst_24 = arith.constant dense<0xFF800000> : vector<16xf32>
    %61 = vector.multi_reduction <maximumf>, %60, %cst_24 [1] : vector<16x16xf32> to vector<16xf32>
    %62 = vector.shape_cast %61 : vector<16xf32> to vector<16x1xf32>
    %63 = vector.broadcast %62 : vector<16x1xf32> to vector<16x16xf32>
    %64 = arith.subf %60, %63 : vector<16x16xf32>
    %65 = math.exp %64 : vector<16x16xf32>
    %cst_25 = arith.constant dense<0.000000e+00> : vector<16xf32>
    %66 = vector.multi_reduction <add>, %65, %cst_25 [1] : vector<16x16xf32> to vector<16xf32>
    %67 = vector.shape_cast %66 : vector<16xf32> to vector<16x1xf32>
    %68 = tpu.reciprocal %67 {approx = true} : vector<16x1xf32> -> vector<16x1xf32>
    %69 = vector.broadcast %68 : vector<16x1xf32> to vector<16x16xf32>
    %70 = arith.mulf %65, %69 : vector<16x16xf32>
    %cst_26 = arith.constant dense<0.000000e+00> : vector<16x8xf32>
    %71 = tpu.matmul %70, %55, %cst_26 {dimension_numbers = #tpu.dot_dimension_numbers<[1], [0], [0], [1], [0, 0, 1, 1], [], []>} : vector<16x16xf32>, vector<16x8xf32>, vector<16x8xf32> -> vector<16x8xf32>
    %72 = vector.extract_strided_slice %9 {offsets = [0, 24], sizes = [16, 8], strides = [1, 1]} : vector<16x32xf32> to vector<16x8xf32>
    %73 = vector.extract_strided_slice %10 {offsets = [0, 24], sizes = [16, 8], strides = [1, 1]} : vector<16x32xf32> to vector<16x8xf32>
    %74 = vector.extract_strided_slice %11 {offsets = [0, 24], sizes = [16, 8], strides = [1, 1]} : vector<16x32xf32> to vector<16x8xf32>
    %cst_27 = arith.constant dense<0.000000e+00> : vector<16x16xf32>
    %75 = tpu.matmul %72, %73, %cst_27 {dimension_numbers = #tpu.dot_dimension_numbers<[1], [1], [0], [0], [0, 0, 1, 0], [], []>} : vector<16x8xf32>, vector<16x8xf32>, vector<16x16xf32> -> vector<16x16xf32>
    %cst_28 = arith.constant 0.353553385 : f32
    %76 = vector.broadcast %cst_28 : f32 to vector<16x16xf32>
    %77 = arith.mulf %75, %76 : vector<16x16xf32>
    %cst_29 = arith.constant -1.000000e+30 : f32
    %78 = vector.broadcast %cst_29 : f32 to vector<16x16xf32>
    %79 = arith.select %14, %78, %77 : vector<16x16xi1>, vector<16x16xf32>
    %cst_30 = arith.constant dense<0xFF800000> : vector<16xf32>
    %80 = vector.multi_reduction <maximumf>, %79, %cst_30 [1] : vector<16x16xf32> to vector<16xf32>
    %81 = vector.shape_cast %80 : vector<16xf32> to vector<16x1xf32>
    %82 = vector.broadcast %81 : vector<16x1xf32> to vector<16x16xf32>
    %83 = arith.subf %79, %82 : vector<16x16xf32>
    %84 = math.exp %83 : vector<16x16xf32>
    %cst_31 = arith.constant dense<0.000000e+00> : vector<16xf32>
    %85 = vector.multi_reduction <add>, %84, %cst_31 [1] : vector<16x16xf32> to vector<16xf32>
    %86 = vector.shape_cast %85 : vector<16xf32> to vector<16x1xf32>
    %87 = tpu.reciprocal %86 {approx = true} : vector<16x1xf32> -> vector<16x1xf32>
    %88 = vector.broadcast %87 : vector<16x1xf32> to vector<16x16xf32>
    %89 = arith.mulf %84, %88 : vector<16x16xf32>
    %cst_32 = arith.constant dense<0.000000e+00> : vector<16x8xf32>
    %90 = tpu.matmul %89, %74, %cst_32 {dimension_numbers = #tpu.dot_dimension_numbers<[1], [0], [0], [1], [0, 0, 1, 1], [], []>} : vector<16x16xf32>, vector<16x8xf32>, vector<16x8xf32> -> vector<16x8xf32>
    %91 = tpu.concatenate %33, %52, %71, %90 in 1 : vector<16x8xf32>, vector<16x8xf32>, vector<16x8xf32>, vector<16x8xf32> -> vector<16x32xf32>
    %c0_33 = arith.constant 0 : index
    %c0_34 = arith.constant 0 : index
    %92 = vector.load %arg26[%c0_33, %c0_34] : memref<16x32xf32, #tpu.memory_space<vmem>>, vector<16x32xf32>
    tpu.vector_store %arg26[%c0_33, %c0_34], %91 {strides = array<i32>} : memref<16x32xf32, #tpu.memory_space<vmem>>, vector<16x32xf32>,
    %c0_35 = arith.constant 0 : index
    %c0_36 = arith.constant 0 : index
    %93 = tpu.strided_load %arg26[%c0_35, %c0_36] {strides = array<i32: 4, 1>} : memref<16x32xf32, #tpu.memory_space<vmem>>, vector<4x32xf32>
    %c1 = arith.constant 1 : index
    %c0_37 = arith.constant 0 : index
    %94 = tpu.strided_load %arg26[%c1, %c0_37] {strides = array<i32: 4, 1>} : memref<16x32xf32, #tpu.memory_space<vmem>>, vector<4x32xf32>
    %c2 = arith.constant 2 : index
    %c0_38 = arith.constant 0 : index
    %95 = tpu.strided_load %arg26[%c2, %c0_38] {strides = array<i32: 4, 1>} : memref<16x32xf32, #tpu.memory_space<vmem>>, vector<4x32xf32>
    %c3 = arith.constant 3 : index
    %c0_39 = arith.constant 0 : index
    %96 = tpu.strided_load %arg26[%c3, %c0_39] {strides = array<i32: 4, 1>} : memref<16x32xf32, #tpu.memory_space<vmem>>, vector<4x32xf32>
    %97 = vector.extract_strided_slice %93 {offsets = [0, 0], sizes = [4, 8], strides = [1, 1]} : vector<4x32xf32> to vector<4x8xf32>
    %98 = vector.extract_strided_slice %94 {offsets = [0, 0], sizes = [4, 8], strides = [1, 1]} : vector<4x32xf32> to vector<4x8xf32>
    %99 = vector.extract_strided_slice %95 {offsets = [0, 0], sizes = [4, 8], strides = [1, 1]} : vector<4x32xf32> to vector<4x8xf32>
    %100 = vector.extract_strided_slice %96 {offsets = [0, 0], sizes = [4, 8], strides = [1, 1]} : vector<4x32xf32> to vector<4x8xf32>
    %101 = tpu.concatenate %97, %98, %99, %100 in 1 : vector<4x8xf32>, vector<4x8xf32>, vector<4x8xf32>, vector<4x8xf32> -> vector<4x32xf32>
    %102 = vector.extract_strided_slice %93 {offsets = [0, 8], sizes = [4, 8], strides = [1, 1]} : vector<4x32xf32> to vector<4x8xf32>
    %103 = vector.extract_strided_slice %94 {offsets = [0, 8], sizes = [4, 8], strides = [1, 1]} : vector<4x32xf32> to vector<4x8xf32>
    %104 = vector.extract_strided_slice %95 {offsets = [0, 8], sizes = [4, 8], strides = [1, 1]} : vector<4x32xf32> to vector<4x8xf32>
    %105 = vector.extract_strided_slice %96 {offsets = [0, 8], sizes = [4, 8], strides = [1, 1]} : vector<4x32xf32> to vector<4x8xf32>
    %106 = tpu.concatenate %102, %103, %104, %105 in 1 : vector<4x8xf32>, vector<4x8xf32>, vector<4x8xf32>, vector<4x8xf32> -> vector<4x32xf32>
    %107 = vector.extract_strided_slice %93 {offsets = [0, 16], sizes = [4, 8], strides = [1, 1]} : vector<4x32xf32> to vector<4x8xf32>
    %108 = vector.extract_strided_slice %94 {offsets = [0, 16], sizes = [4, 8], strides = [1, 1]} : vector<4x32xf32> to vector<4x8xf32>
    %109 = vector.extract_strided_slice %95 {offsets = [0, 16], sizes = [4, 8], strides = [1, 1]} : vector<4x32xf32> to vector<4x8xf32>
    %110 = vector.extract_strided_slice %96 {offsets = [0, 16], sizes = [4, 8], strides = [1, 1]} : vector<4x32xf32> to vector<4x8xf32>
    %111 = tpu.concatenate %107, %108, %109, %110 in 1 : vector<4x8xf32>, vector<4x8xf32>, vector<4x8xf32>, vector<4x8xf32> -> vector<4x32xf32>
    %112 = vector.extract_strided_slice %93 {offsets = [0, 24], sizes = [4, 8], strides = [1, 1]} : vector<4x32xf32> to vector<4x8xf32>
    %113 = vector.extract_strided_slice %94 {offsets = [0, 24], sizes = [4, 8], strides = [1, 1]} : vector<4x32xf32> to vector<4x8xf32>
    %114 = vector.extract_strided_slice %95 {offsets = [0, 24], sizes = [4, 8], strides = [1, 1]} : vector<4x32xf32> to vector<4x8xf32>
    %115 = vector.extract_strided_slice %96 {offsets = [0, 24], sizes = [4, 8], strides = [1, 1]} : vector<4x32xf32> to vector<4x8xf32>
    %116 = tpu.concatenate %112, %113, %114, %115 in 1 : vector<4x8xf32>, vector<4x8xf32>, vector<4x8xf32>, vector<4x8xf32> -> vector<4x32xf32>
    %117 = tpu.concatenate %101, %106, %111, %116 in 0 : vector<4x32xf32>, vector<4x32xf32>, vector<4x32xf32>, vector<4x32xf32> -> vector<16x32xf32>
    %c0_40 = arith.constant 0 : index
    %c0_41 = arith.constant 0 : index
    %118 = vector.load %arg5[%c0_40, %c0_41] : memref<32x32xf32, #tpu.memory_space<vmem>>, vector<32x32xf32>
    %cst_42 = arith.constant dense<0.000000e+00> : vector<16x32xf32>
    %119 = tpu.matmul %117, %118, %cst_42 {dimension_numbers = #tpu.dot_dimension_numbers<[1], [0], [0], [1], [0, 0, 1, 1], [], []>} : vector<16x32xf32>, vector<32x32xf32>, vector<16x32xf32> -> vector<16x32xf32>
    %c0_43 = arith.constant 0 : index
    %c0_44 = arith.constant 0 : index
    %120 = vector.load %arg6[%c0_43, %c0_44] : memref<1x32xf32, #tpu.memory_space<vmem>>, vector<1x32xf32>
    %121 = vector.broadcast %120 : vector<1x32xf32> to vector<16x32xf32>
    %122 = arith.addf %119, %121 : vector<16x32xf32>
    %123 = arith.addf %1, %122 : vector<16x32xf32>
    %c0_45 = arith.constant 0 : index
    %c0_46 = arith.constant 0 : index
    %124 = vector.load %arg7[%c0_45, %c0_46] : memref<1x32xf32, #tpu.memory_space<vmem>>, vector<1x32xf32>
    %c0_47 = arith.constant 0 : index
    %c0_48 = arith.constant 0 : index
    %125 = vector.load %arg8[%c0_47, %c0_48] : memref<1x32xf32, #tpu.memory_space<vmem>>, vector<1x32xf32>
    %cst_49 = arith.constant dense<0.000000e+00> : vector<16xf32>
    %126 = vector.multi_reduction <add>, %123, %cst_49 [1] : vector<16x32xf32> to vector<16xf32>
    %127 = vector.shape_cast %126 : vector<16xf32> to vector<16x1xf32>
    %cst_50 = arith.constant 3.200000e+01 : f32
    %128 = vector.broadcast %cst_50 : f32 to vector<16x1xf32>
    %129 = arith.divf %127, %128 : vector<16x1xf32>
    %130 = vector.broadcast %129 : vector<16x1xf32> to vector<16x32xf32>
    %131 = arith.subf %123, %130 : vector<16x32xf32>
    %132 = arith.mulf %131, %131 : vector<16x32xf32>
    %cst_51 = arith.constant dense<0.000000e+00> : vector<16xf32>
    %133 = vector.multi_reduction <add>, %132, %cst_51 [1] : vector<16x32xf32> to vector<16xf32>
    %134 = vector.shape_cast %133 : vector<16xf32> to vector<16x1xf32>
    %cst_52 = arith.constant 3.200000e+01 : f32
    %135 = vector.broadcast %cst_52 : f32 to vector<16x1xf32>
    %136 = arith.divf %134, %135 : vector<16x1xf32>
    %137 = vector.broadcast %129 : vector<16x1xf32> to vector<16x32xf32>
    %138 = arith.subf %123, %137 : vector<16x32xf32>
    %cst_53 = arith.constant 9.99999974E-6 : f32
    %139 = vector.broadcast %cst_53 : f32 to vector<16x1xf32>
    %140 = arith.addf %136, %139 : vector<16x1xf32>
    %141 = math.rsqrt %140 : vector<16x1xf32>
    %142 = vector.broadcast %141 : vector<16x1xf32> to vector<16x32xf32>
    %143 = arith.mulf %138, %142 : vector<16x32xf32>
    %144 = vector.broadcast %124 : vector<1x32xf32> to vector<16x32xf32>
    %145 = arith.mulf %143, %144 : vector<16x32xf32>
    %146 = vector.broadcast %125 : vector<1x32xf32> to vector<16x32xf32>
    %147 = arith.addf %145, %146 : vector<16x32xf32>
    %c0_54 = arith.constant 0 : index
    %c0_55 = arith.constant 0 : index
    %148 = vector.load %arg9[%c0_54, %c0_55] : memref<32x32xf32, #tpu.memory_space<vmem>>, vector<32x32xf32>
    %cst_56 = arith.constant dense<0.000000e+00> : vector<16x32xf32>
    %149 = tpu.matmul %147, %148, %cst_56 {dimension_numbers = #tpu.dot_dimension_numbers<[1], [0], [0], [1], [0, 0, 1, 1], [], []>} : vector<16x32xf32>, vector<32x32xf32>, vector<16x32xf32> -> vector<16x32xf32>
    %c0_57 = arith.constant 0 : index
    %c0_58 = arith.constant 0 : index
    %150 = vector.load %arg10[%c0_57, %c0_58] : memref<1x32xf32, #tpu.memory_space<vmem>>, vector<1x32xf32>
    %151 = vector.broadcast %150 : vector<1x32xf32> to vector<16x32xf32>
    %152 = arith.addf %149, %151 : vector<16x32xf32>
    %c0_59 = arith.constant 0 : index
    %c0_60 = arith.constant 0 : index
    %153 = vector.load %arg11[%c0_59, %c0_60] : memref<32x64xf32, #tpu.memory_space<vmem>>, vector<32x64xf32>
    %cst_61 = arith.constant dense<0.000000e+00> : vector<12x64xf32>
    %154 = tpu.matmul %3, %153, %cst_61 {dimension_numbers = #tpu.dot_dimension_numbers<[1], [0], [0], [1], [0, 0, 1, 1], [], []>} : vector<12x32xf32>, vector<32x64xf32>, vector<12x64xf32> -> vector<12x64xf32>
    %c0_62 = arith.constant 0 : index
    %c0_63 = arith.constant 0 : index
    %155 = vector.load %arg12[%c0_62, %c0_63] : memref<1x64xf32, #tpu.memory_space<vmem>>, vector<1x64xf32>
    %156 = vector.broadcast %155 : vector<1x64xf32> to vector<12x64xf32>
    %157 = arith.addf %154, %156 : vector<12x64xf32>
    %158 = vector.extract_strided_slice %157 {offsets = [0, 0], sizes = [12, 32], strides = [1, 1]} : vector<12x64xf32> to vector<12x32xf32>
    %159 = vector.extract_strided_slice %157 {offsets = [0, 32], sizes = [12, 32], strides = [1, 1]} : vector<12x64xf32> to vector<12x32xf32>
    %160 = vector.extract_strided_slice %152 {offsets = [0, 0], sizes = [16, 8], strides = [1, 1]} : vector<16x32xf32> to vector<16x8xf32>
    %161 = vector.extract_strided_slice %158 {offsets = [0, 0], sizes = [12, 8], strides = [1, 1]} : vector<12x32xf32> to vector<12x8xf32>
    %162 = vector.extract_strided_slice %159 {offsets = [0, 0], sizes = [12, 8], strides = [1, 1]} : vector<12x32xf32> to vector<12x8xf32>
    %cst_64 = arith.constant dense<0.000000e+00> : vector<16x12xf32>
    %163 = tpu.matmul %160, %161, %cst_64 {dimension_numbers = #tpu.dot_dimension_numbers<[1], [1], [0], [0], [0, 0, 1, 0], [], []>} : vector<16x8xf32>, vector<12x8xf32>, vector<16x12xf32> -> vector<16x12xf32>
    %cst_65 = arith.constant 0.353553385 : f32
    %164 = vector.broadcast %cst_65 : f32 to vector<16x12xf32>
    %165 = arith.mulf %163, %164 : vector<16x12xf32>
    %cst_66 = arith.constant dense<0xFF800000> : vector<16xf32>
    %166 = vector.multi_reduction <maximumf>, %165, %cst_66 [1] : vector<16x12xf32> to vector<16xf32>
    %167 = vector.shape_cast %166 : vector<16xf32> to vector<16x1xf32>
    %168 = vector.broadcast %167 : vector<16x1xf32> to vector<16x12xf32>
    %169 = arith.subf %165, %168 : vector<16x12xf32>
    %170 = math.exp %169 : vector<16x12xf32>
    %cst_67 = arith.constant dense<0.000000e+00> : vector<16xf32>
    %171 = vector.multi_reduction <add>, %170, %cst_67 [1] : vector<16x12xf32> to vector<16xf32>
    %172 = vector.shape_cast %171 : vector<16xf32> to vector<16x1xf32>
    %173 = tpu.reciprocal %172 {approx = true} : vector<16x1xf32> -> vector<16x1xf32>
    %174 = vector.broadcast %173 : vector<16x1xf32> to vector<16x12xf32>
    %175 = arith.mulf %170, %174 : vector<16x12xf32>
    %cst_68 = arith.constant dense<0.000000e+00> : vector<16x8xf32>
    %176 = tpu.matmul %175, %162, %cst_68 {dimension_numbers = #tpu.dot_dimension_numbers<[1], [0], [0], [1], [0, 0, 1, 1], [], []>} : vector<16x12xf32>, vector<12x8xf32>, vector<16x8xf32> -> vector<16x8xf32>
    %177 = vector.extract_strided_slice %152 {offsets = [0, 8], sizes = [16, 8], strides = [1, 1]} : vector<16x32xf32> to vector<16x8xf32>
    %178 = vector.extract_strided_slice %158 {offsets = [0, 8], sizes = [12, 8], strides = [1, 1]} : vector<12x32xf32> to vector<12x8xf32>
    %179 = vector.extract_strided_slice %159 {offsets = [0, 8], sizes = [12, 8], strides = [1, 1]} : vector<12x32xf32> to vector<12x8xf32>
    %cst_69 = arith.constant dense<0.000000e+00> : vector<16x12xf32>
    %180 = tpu.matmul %177, %178, %cst_69 {dimension_numbers = #tpu.dot_dimension_numbers<[1], [1], [0], [0], [0, 0, 1, 0], [], []>} : vector<16x8xf32>, vector<12x8xf32>, vector<16x12xf32> -> vector<16x12xf32>
    %cst_70 = arith.constant 0.353553385 : f32
    %181 = vector.broadcast %cst_70 : f32 to vector<16x12xf32>
    %182 = arith.mulf %180, %181 : vector<16x12xf32>
    %cst_71 = arith.constant dense<0xFF800000> : vector<16xf32>
    %183 = vector.multi_reduction <maximumf>, %182, %cst_71 [1] : vector<16x12xf32> to vector<16xf32>
    %184 = vector.shape_cast %183 : vector<16xf32> to vector<16x1xf32>
    %185 = vector.broadcast %184 : vector<16x1xf32> to vector<16x12xf32>
    %186 = arith.subf %182, %185 : vector<16x12xf32>
    %187 = math.exp %186 : vector<16x12xf32>
    %cst_72 = arith.constant dense<0.000000e+00> : vector<16xf32>
    %188 = vector.multi_reduction <add>, %187, %cst_72 [1] : vector<16x12xf32> to vector<16xf32>
    %189 = vector.shape_cast %188 : vector<16xf32> to vector<16x1xf32>
    %190 = tpu.reciprocal %189 {approx = true} : vector<16x1xf32> -> vector<16x1xf32>
    %191 = vector.broadcast %190 : vector<16x1xf32> to vector<16x12xf32>
    %192 = arith.mulf %187, %191 : vector<16x12xf32>
    %cst_73 = arith.constant dense<0.000000e+00> : vector<16x8xf32>
    %193 = tpu.matmul %192, %179, %cst_73 {dimension_numbers = #tpu.dot_dimension_numbers<[1], [0], [0], [1], [0, 0, 1, 1], [], []>} : vector<16x12xf32>, vector<12x8xf32>, vector<16x8xf32> -> vector<16x8xf32>
    %194 = vector.extract_strided_slice %152 {offsets = [0, 16], sizes = [16, 8], strides = [1, 1]} : vector<16x32xf32> to vector<16x8xf32>
    %195 = vector.extract_strided_slice %158 {offsets = [0, 16], sizes = [12, 8], strides = [1, 1]} : vector<12x32xf32> to vector<12x8xf32>
    %196 = vector.extract_strided_slice %159 {offsets = [0, 16], sizes = [12, 8], strides = [1, 1]} : vector<12x32xf32> to vector<12x8xf32>
    %cst_74 = arith.constant dense<0.000000e+00> : vector<16x12xf32>
    %197 = tpu.matmul %194, %195, %cst_74 {dimension_numbers = #tpu.dot_dimension_numbers<[1], [1], [0], [0], [0, 0, 1, 0], [], []>} : vector<16x8xf32>, vector<12x8xf32>, vector<16x12xf32> -> vector<16x12xf32>
    %cst_75 = arith.constant 0.353553385 : f32
    %198 = vector.broadcast %cst_75 : f32 to vector<16x12xf32>
    %199 = arith.mulf %197, %198 : vector<16x12xf32>
    %cst_76 = arith.constant dense<0xFF800000> : vector<16xf32>
    %200 = vector.multi_reduction <maximumf>, %199, %cst_76 [1] : vector<16x12xf32> to vector<16xf32>
    %201 = vector.shape_cast %200 : vector<16xf32> to vector<16x1xf32>
    %202 = vector.broadcast %201 : vector<16x1xf32> to vector<16x12xf32>
    %203 = arith.subf %199, %202 : vector<16x12xf32>
    %204 = math.exp %203 : vector<16x12xf32>
    %cst_77 = arith.constant dense<0.000000e+00> : vector<16xf32>
    %205 = vector.multi_reduction <add>, %204, %cst_77 [1] : vector<16x12xf32> to vector<16xf32>
    %206 = vector.shape_cast %205 : vector<16xf32> to vector<16x1xf32>
    %207 = tpu.reciprocal %206 {approx = true} : vector<16x1xf32> -> vector<16x1xf32>
    %208 = vector.broadcast %207 : vector<16x1xf32> to vector<16x12xf32>
    %209 = arith.mulf %204, %208 : vector<16x12xf32>
    %cst_78 = arith.constant dense<0.000000e+00> : vector<16x8xf32>
    %210 = tpu.matmul %209, %196, %cst_78 {dimension_numbers = #tpu.dot_dimension_numbers<[1], [0], [0], [1], [0, 0, 1, 1], [], []>} : vector<16x12xf32>, vector<12x8xf32>, vector<16x8xf32> -> vector<16x8xf32>
    %211 = vector.extract_strided_slice %152 {offsets = [0, 24], sizes = [16, 8], strides = [1, 1]} : vector<16x32xf32> to vector<16x8xf32>
    %212 = vector.extract_strided_slice %158 {offsets = [0, 24], sizes = [12, 8], strides = [1, 1]} : vector<12x32xf32> to vector<12x8xf32>
    %213 = vector.extract_strided_slice %159 {offsets = [0, 24], sizes = [12, 8], strides = [1, 1]} : vector<12x32xf32> to vector<12x8xf32>
    %cst_79 = arith.constant dense<0.000000e+00> : vector<16x12xf32>
    %214 = tpu.matmul %211, %212, %cst_79 {dimension_numbers = #tpu.dot_dimension_numbers<[1], [1], [0], [0], [0, 0, 1, 0], [], []>} : vector<16x8xf32>, vector<12x8xf32>, vector<16x12xf32> -> vector<16x12xf32>
    %cst_80 = arith.constant 0.353553385 : f32
    %215 = vector.broadcast %cst_80 : f32 to vector<16x12xf32>
    %216 = arith.mulf %214, %215 : vector<16x12xf32>
    %cst_81 = arith.constant dense<0xFF800000> : vector<16xf32>
    %217 = vector.multi_reduction <maximumf>, %216, %cst_81 [1] : vector<16x12xf32> to vector<16xf32>
    %218 = vector.shape_cast %217 : vector<16xf32> to vector<16x1xf32>
    %219 = vector.broadcast %218 : vector<16x1xf32> to vector<16x12xf32>
    %220 = arith.subf %216, %219 : vector<16x12xf32>
    %221 = math.exp %220 : vector<16x12xf32>
    %cst_82 = arith.constant dense<0.000000e+00> : vector<16xf32>
    %222 = vector.multi_reduction <add>, %221, %cst_82 [1] : vector<16x12xf32> to vector<16xf32>
    %223 = vector.shape_cast %222 : vector<16xf32> to vector<16x1xf32>
    %224 = tpu.reciprocal %223 {approx = true} : vector<16x1xf32> -> vector<16x1xf32>
    %225 = vector.broadcast %224 : vector<16x1xf32> to vector<16x12xf32>
    %226 = arith.mulf %221, %225 : vector<16x12xf32>
    %cst_83 = arith.constant dense<0.000000e+00> : vector<16x8xf32>
    %227 = tpu.matmul %226, %213, %cst_83 {dimension_numbers = #tpu.dot_dimension_numbers<[1], [0], [0], [1], [0, 0, 1, 1], [], []>} : vector<16x12xf32>, vector<12x8xf32>, vector<16x8xf32> -> vector<16x8xf32>
    %228 = tpu.concatenate %176, %193, %210, %227 in 1 : vector<16x8xf32>, vector<16x8xf32>, vector<16x8xf32>, vector<16x8xf32> -> vector<16x32xf32>
    %c0_84 = arith.constant 0 : index
    %c0_85 = arith.constant 0 : index
    %229 = vector.load %arg13[%c0_84, %c0_85] : memref<32x32xf32, #tpu.memory_space<vmem>>, vector<32x32xf32>
    %cst_86 = arith.constant dense<0.000000e+00> : vector<16x32xf32>
    %230 = tpu.matmul %228, %229, %cst_86 {dimension_numbers = #tpu.dot_dimension_numbers<[1], [0], [0], [1], [0, 0, 1, 1], [], []>} : vector<16x32xf32>, vector<32x32xf32>, vector<16x32xf32> -> vector<16x32xf32>
    %c0_87 = arith.constant 0 : index
    %c0_88 = arith.constant 0 : index
    %231 = vector.load %arg14[%c0_87, %c0_88] : memref<1x32xf32, #tpu.memory_space<vmem>>, vector<1x32xf32>
    %232 = vector.broadcast %231 : vector<1x32xf32> to vector<16x32xf32>
    %233 = arith.addf %230, %232 : vector<16x32xf32>
    %234 = arith.addf %147, %233 : vector<16x32xf32>
    %c0_89 = arith.constant 0 : index
    %c0_90 = arith.constant 0 : index
    %235 = vector.load %arg15[%c0_89, %c0_90] : memref<1x32xf32, #tpu.memory_space<vmem>>, vector<1x32xf32>
    %c0_91 = arith.constant 0 : index
    %c0_92 = arith.constant 0 : index
    %236 = vector.load %arg16[%c0_91, %c0_92] : memref<1x32xf32, #tpu.memory_space<vmem>>, vector<1x32xf32>
    %cst_93 = arith.constant dense<0.000000e+00> : vector<16xf32>
    %237 = vector.multi_reduction <add>, %234, %cst_93 [1] : vector<16x32xf32> to vector<16xf32>
    %238 = vector.shape_cast %237 : vector<16xf32> to vector<16x1xf32>
    %cst_94 = arith.constant 3.200000e+01 : f32
    %239 = vector.broadcast %cst_94 : f32 to vector<16x1xf32>
    %240 = arith.divf %238, %239 : vector<16x1xf32>
    %241 = vector.broadcast %240 : vector<16x1xf32> to vector<16x32xf32>
    %242 = arith.subf %234, %241 : vector<16x32xf32>
    %243 = arith.mulf %242, %242 : vector<16x32xf32>
    %cst_95 = arith.constant dense<0.000000e+00> : vector<16xf32>
    %244 = vector.multi_reduction <add>, %243, %cst_95 [1] : vector<16x32xf32> to vector<16xf32>
    %245 = vector.shape_cast %244 : vector<16xf32> to vector<16x1xf32>
    %cst_96 = arith.constant 3.200000e+01 : f32
    %246 = vector.broadcast %cst_96 : f32 to vector<16x1xf32>
    %247 = arith.divf %245, %246 : vector<16x1xf32>
    %248 = vector.broadcast %240 : vector<16x1xf32> to vector<16x32xf32>
    %249 = arith.subf %234, %248 : vector<16x32xf32>
    %cst_97 = arith.constant 9.99999974E-6 : f32
    %250 = vector.broadcast %cst_97 : f32 to vector<16x1xf32>
    %251 = arith.addf %247, %250 : vector<16x1xf32>
    %252 = math.rsqrt %251 : vector<16x1xf32>
    %253 = vector.broadcast %252 : vector<16x1xf32> to vector<16x32xf32>
    %254 = arith.mulf %249, %253 : vector<16x32xf32>
    %255 = vector.broadcast %235 : vector<1x32xf32> to vector<16x32xf32>
    %256 = arith.mulf %254, %255 : vector<16x32xf32>
    %257 = vector.broadcast %236 : vector<1x32xf32> to vector<16x32xf32>
    %258 = arith.addf %256, %257 : vector<16x32xf32>
    %c0_98 = arith.constant 0 : index
    %c0_99 = arith.constant 0 : index
    %259 = vector.load %arg17[%c0_98, %c0_99] : memref<32x32xf32, #tpu.memory_space<vmem>>, vector<32x32xf32>
    %cst_100 = arith.constant dense<0.000000e+00> : vector<16x32xf32>
    %260 = tpu.matmul %258, %259, %cst_100 {dimension_numbers = #tpu.dot_dimension_numbers<[1], [0], [0], [1], [0, 0, 1, 1], [], []>} : vector<16x32xf32>, vector<32x32xf32>, vector<16x32xf32> -> vector<16x32xf32>
    %c0_101 = arith.constant 0 : index
    %c0_102 = arith.constant 0 : index
    %261 = vector.load %arg18[%c0_101, %c0_102] : memref<1x32xf32, #tpu.memory_space<vmem>>, vector<1x32xf32>
    %262 = vector.broadcast %261 : vector<1x32xf32> to vector<16x32xf32>
    %263 = arith.addf %260, %262 : vector<16x32xf32>
    %cst_103 = arith.constant 5.000000e-01 : f32
    %264 = vector.broadcast %cst_103 : f32 to vector<16x32xf32>
    %265 = arith.mulf %264, %263 : vector<16x32xf32>
    %cst_104 = arith.constant 4.471500e-02 : f32
    %266 = vector.broadcast %cst_104 : f32 to vector<16x32xf32>
    %267 = arith.mulf %266, %263 : vector<16x32xf32>
    %268 = arith.mulf %267, %263 : vector<16x32xf32>
    %269 = arith.mulf %268, %263 : vector<16x32xf32>
    %270 = arith.addf %263, %269 : vector<16x32xf32>
    %cst_105 = arith.constant 0.797884583 : f32
    %271 = vector.broadcast %cst_105 : f32 to vector<16x32xf32>
    %272 = arith.mulf %271, %270 : vector<16x32xf32>
    %273 = math.tanh %272 : vector<16x32xf32>
    %cst_106 = arith.constant 1.000000e+00 : f32
    %274 = vector.broadcast %cst_106 : f32 to vector<16x32xf32>
    %275 = arith.addf %274, %273 : vector<16x32xf32>
    %276 = arith.mulf %265, %275 : vector<16x32xf32>
    %c0_107 = arith.constant 0 : index
    %c0_108 = arith.constant 0 : index
    %277 = vector.load %arg19[%c0_107, %c0_108] : memref<32x32xf32, #tpu.memory_space<vmem>>, vector<32x32xf32>
    %cst_109 = arith.constant dense<0.000000e+00> : vector<16x32xf32>
    %278 = tpu.matmul %276, %277, %cst_109 {dimension_numbers = #tpu.dot_dimension_numbers<[1], [0], [0], [1], [0, 0, 1, 1], [], []>} : vector<16x32xf32>, vector<32x32xf32>, vector<16x32xf32> -> vector<16x32xf32>
    %c0_110 = arith.constant 0 : index
    %c0_111 = arith.constant 0 : index
    %279 = vector.load %arg20[%c0_110, %c0_111] : memref<1x32xf32, #tpu.memory_space<vmem>>, vector<1x32xf32>
    %280 = vector.broadcast %279 : vector<1x32xf32> to vector<16x32xf32>
    %281 = arith.addf %278, %280 : vector<16x32xf32>
    %282 = arith.addf %258, %281 : vector<16x32xf32>
    %c0_112 = arith.constant 0 : index
    %c0_113 = arith.constant 0 : index
    %283 = vector.load %arg21[%c0_112, %c0_113] : memref<1x32xf32, #tpu.memory_space<vmem>>, vector<1x32xf32>
    %c0_114 = arith.constant 0 : index
    %c0_115 = arith.constant 0 : index
    %284 = vector.load %arg22[%c0_114, %c0_115] : memref<1x32xf32, #tpu.memory_space<vmem>>, vector<1x32xf32>
    %cst_116 = arith.constant dense<0.000000e+00> : vector<16xf32>
    %285 = vector.multi_reduction <add>, %282, %cst_116 [1] : vector<16x32xf32> to vector<16xf32>
    %286 = vector.shape_cast %285 : vector<16xf32> to vector<16x1xf32>
    %cst_117 = arith.constant 3.200000e+01 : f32
    %287 = vector.broadcast %cst_117 : f32 to vector<16x1xf32>
    %288 = arith.divf %286, %287 : vector<16x1xf32>
    %289 = vector.broadcast %288 : vector<16x1xf32> to vector<16x32xf32>
    %290 = arith.subf %282, %289 : vector<16x32xf32>
    %291 = arith.mulf %290, %290 : vector<16x32xf32>
    %cst_118 = arith.constant dense<0.000000e+00> : vector<16xf32>
    %292 = vector.multi_reduction <add>, %291, %cst_118 [1] : vector<16x32xf32> to vector<16xf32>
    %293 = vector.shape_cast %292 : vector<16xf32> to vector<16x1xf32>
    %cst_119 = arith.constant 3.200000e+01 : f32
    %294 = vector.broadcast %cst_119 : f32 to vector<16x1xf32>
    %295 = arith.divf %293, %294 : vector<16x1xf32>
    %296 = vector.broadcast %288 : vector<16x1xf32> to vector<16x32xf32>
    %297 = arith.subf %282, %296 : vector<16x32xf32>
    %cst_120 = arith.constant 9.99999974E-6 : f32
    %298 = vector.broadcast %cst_120 : f32 to vector<16x1xf32>
    %299 = arith.addf %295, %298 : vector<16x1xf32>
    %300 = math.rsqrt %299 : vector<16x1xf32>
    %301 = vector.broadcast %300 : vector<16x1xf32> to vector<16x32xf32>
    %302 = arith.mulf %297, %301 : vector<16x32xf32>
    %303 = vector.broadcast %283 : vector<1x32xf32> to vector<16x32xf32>
    %304 = arith.mulf %302, %303 : vector<16x32xf32>
    %305 = vector.broadcast %284 : vector<1x32xf32> to vector<16x32xf32>
    %306 = arith.addf %304, %305 : vector<16x32xf32>
    %c0_121 = arith.constant 0 : index
    %c0_122 = arith.constant 0 : index
    %307 = vector.load %arg23[%c0_121, %c0_122] : memref<1x32xf32, #tpu.memory_space<vmem>>, vector<1x32xf32>
    %c0_123 = arith.constant 0 : index
    %c0_124 = arith.constant 0 : index
    %308 = vector.load %arg24[%c0_123, %c0_124] : memref<1x32xf32, #tpu.memory_space<vmem>>, vector<1x32xf32>
    %cst_125 = arith.constant dense<0.000000e+00> : vector<16xf32>
    %309 = vector.multi_reduction <add>, %306, %cst_125 [1] : vector<16x32xf32> to vector<16xf32>
    %310 = vector.shape_cast %309 : vector<16xf32> to vector<16x1xf32>
    %cst_126 = arith.constant 3.200000e+01 : f32
    %311 = vector.broadcast %cst_126 : f32 to vector<16x1xf32>
    %312 = arith.divf %310, %311 : vector<16x1xf32>
    %313 = vector.broadcast %312 : vector<16x1xf32> to vector<16x32xf32>
    %314 = arith.subf %306, %313 : vector<16x32xf32>
    %315 = arith.mulf %314, %314 : vector<16x32xf32>
    %cst_127 = arith.constant dense<0.000000e+00> : vector<16xf32>
    %316 = vector.multi_reduction <add>, %315, %cst_127 [1] : vector<16x32xf32> to vector<16xf32>
    %317 = vector.shape_cast %316 : vector<16xf32> to vector<16x1xf32>
    %cst_128 = arith.constant 3.200000e+01 : f32
    %318 = vector.broadcast %cst_128 : f32 to vector<16x1xf32>
    %319 = arith.divf %317, %318 : vector<16x1xf32>
    %320 = vector.broadcast %312 : vector<16x1xf32> to vector<16x32xf32>
    %321 = arith.subf %306, %320 : vector<16x32xf32>
    %cst_129 = arith.constant 9.99999974E-6 : f32
    %322 = vector.broadcast %cst_129 : f32 to vector<16x1xf32>
    %323 = arith.addf %319, %322 : vector<16x1xf32>
    %324 = math.rsqrt %323 : vector<16x1xf32>
    %325 = vector.broadcast %324 : vector<16x1xf32> to vector<16x32xf32>
    %326 = arith.mulf %321, %325 : vector<16x32xf32>
    %327 = vector.broadcast %307 : vector<1x32xf32> to vector<16x32xf32>
    %328 = arith.mulf %326, %327 : vector<16x32xf32>
    %329 = vector.broadcast %308 : vector<1x32xf32> to vector<16x32xf32>
    %330 = arith.addf %328, %329 : vector<16x32xf32>
    %c0_130 = arith.constant 0 : index
    %c0_131 = arith.constant 0 : index
    %c0_132 = arith.constant 0 : index
    %331 = vector.load %arg25[%c0_130, %c0_131, %c0_132] : memref<1x16x32xf32, #tpu.memory_space<vmem>>, vector<1x16x32xf32>
    %332 = vector.shape_cast %331 : vector<1x16x32xf32> to vector<16x32xf32>
    %333 = vector.shape_cast %330 : vector<16x32xf32> to vector<1x16x32xf32>
    tpu.vector_store %arg25[%c0_130, %c0_131, %c0_132], %333 {strides = array<i32>} : memref<1x16x32xf32, #tpu.memory_space<vmem>>, vector<1x16x32xf32>,
    return
  }
  func.func @transform_0(%arg0: i32) -> (i32, i32, i32) {
    %c0_i32 = arith.constant 0 : i32
    %c0_i32_0 = arith.constant 0 : i32
    %c0_i32_1 = arith.constant 0 : i32
    return %arg0, %c0_i32, %c0_i32_0 : i32, i32, i32
  }
  func.func @transform_1(%arg0: i32) -> (i32, i32, i32) {
    %c0_i32 = arith.constant 0 : i32
    %c0_i32_0 = arith.constant 0 : i32
    %c0_i32_1 = arith.constant 0 : i32
    return %arg0, %c0_i32, %c0_i32_0 : i32, i32, i32
  }
  func.func @transform_2(%arg0: i32) -> (i32, i32) {
    %c0_i32 = arith.constant 0 : i32
    %c0_i32_0 = arith.constant 0 : i32
    %c0_i32_1 = arith.constant 0 : i32
    return %c0_i32, %c0_i32_0 : i32, i32
  }
  func.func @transform_3(%arg0: i32) -> (i32, i32) {
    %c0_i32 = arith.constant 0 : i32
    %c0_i32_0 = arith.constant 0 : i32
    %c0_i32_1 = arith.constant 0 : i32
    return %c0_i32, %c0_i32_0 : i32, i32
  }
  func.func @transform_4(%arg0: i32) -> (i32, i32) {
    %c0_i32 = arith.constant 0 : i32
    %c0_i32_0 = arith.constant 0 : i32
    %c0_i32_1 = arith.constant 0 : i32
    return %c0_i32, %c0_i32_0 : i32, i32
  }
  func.func @transform_5(%arg0: i32) -> (i32, i32) {
    %c0_i32 = arith.constant 0 : i32
    %c0_i32_0 = arith.constant 0 : i32
    %c0_i32_1 = arith.constant 0 : i32
    return %c0_i32, %c0_i32_0 : i32, i32
  }
  func.func @transform_6(%arg0: i32) -> (i32, i32) {
    %c0_i32 = arith.constant 0 : i32
    %c0_i32_0 = arith.constant 0 : i32
    %c0_i32_1 = arith.constant 0 : i32
    return %c0_i32, %c0_i32_0 : i32, i32
  }
  func.func @transform_7(%arg0: i32) -> (i32, i32) {
    %c0_i32 = arith.constant 0 : i32
    %c0_i32_0 = arith.constant 0 : i32
    %c0_i32_1 = arith.constant 0 : i32
    return %c0_i32, %c0_i32_0 : i32, i32
  }
  func.func @transform_8(%arg0: i32) -> (i32, i32) {
    %c0_i32 = arith.constant 0 : i32
    %c0_i32_0 = arith.constant 0 : i32
    %c0_i32_1 = arith.constant 0 : i32
    return %c0_i32, %c0_i32_0 : i32, i32
  }
  func.func @transform_9(%arg0: i32) -> (i32, i32) {
    %c0_i32 = arith.constant 0 : i32
    %c0_i32_0 = arith.constant 0 : i32
    %c0_i32_1 = arith.constant 0 : i32
    return %c0_i32, %c0_i32_0 : i32, i32
  }
  func.func @transform_10(%arg0: i32) -> (i32, i32) {
    %c0_i32 = arith.constant 0 : i32
    %c0_i32_0 = arith.constant 0 : i32
    %c0_i32_1 = arith.constant 0 : i32
    return %c0_i32, %c0_i32_0 : i32, i32
  }
  func.func @transform_11(%arg0: i32) -> (i32, i32) {
    %c0_i32 = arith.constant 0 : i32
    %c0_i32_0 = arith.constant 0 : i32
    %c0_i32_1 = arith.constant 0 : i32
    return %c0_i32, %c0_i32_0 : i32, i32
  }
  func.func @transform_12(%arg0: i32) -> (i32, i32) {
    %c0_i32 = arith.constant 0 : i32
    %c0_i32_0 = arith.constant 0 : i32
    %c0_i32_1 = arith.constant 0 : i32
    return %c0_i32, %c0_i32_0 : i32, i32
  }
  func.func @transform_13(%arg0: i32) -> (i32, i32) {
    %c0_i32 = arith.constant 0 : i32
    %c0_i32_0 = arith.constant 0 : i32
    %c0_i32_1 = arith.constant 0 : i32
    return %c0_i32, %c0_i32_0 : i32, i32
  }
  func.func @transform_14(%arg0: i32) -> (i32, i32) {
    %c0_i32 = arith.constant 0 : i32
    %c0_i32_0 = arith.constant 0 : i32
    %c0_i32_1 = arith.constant 0 : i32
    return %c0_i32, %c0_i32_0 : i32, i32
  }
  func.func @transform_15(%arg0: i32) -> (i32, i32) {
    %c0_i32 = arith.constant 0 : i32
    %c0_i32_0 = arith.constant 0 : i32
    %c0_i32_1 = arith.constant 0 : i32
    return %c0_i32, %c0_i32_0 : i32, i32
  }
  func.func @transform_16(%arg0: i32) -> (i32, i32) {
    %c0_i32 = arith.constant 0 : i32
    %c0_i32_0 = arith.constant 0 : i32
    %c0_i32_1 = arith.constant 0 : i32
    return %c0_i32, %c0_i32_0 : i32, i32
  }
  func.func @transform_17(%arg0: i32) -> (i32, i32) {
    %c0_i32 = arith.constant 0 : i32
    %c0_i32_0 = arith.constant 0 : i32
    %c0_i32_1 = arith.constant 0 : i32
    return %c0_i32, %c0_i32_0 : i32, i32
  }
  func.func @transform_18(%arg0: i32) -> (i32, i32) {
    %c0_i32 = arith.constant 0 : i32
    %c0_i32_0 = arith.constant 0 : i32
    %c0_i32_1 = arith.constant 0 : i32
    return %c0_i32, %c0_i32_0 : i32, i32
  }
  func.func @transform_19(%arg0: i32) -> (i32, i32) {
    %c0_i32 = arith.constant 0 : i32
    %c0_i32_0 = arith.constant 0 : i32
    %c0_i32_1 = arith.constant 0 : i32
    return %c0_i32, %c0_i32_0 : i32, i32
  }
  func.func @transform_20(%arg0: i32) -> (i32, i32) {
    %c0_i32 = arith.constant 0 : i32
    %c0_i32_0 = arith.constant 0 : i32
    %c0_i32_1 = arith.constant 0 : i32
    return %c0_i32, %c0_i32_0 : i32, i32
  }
  func.func @transform_21(%arg0: i32) -> (i32, i32) {
    %c0_i32 = arith.constant 0 : i32
    %c0_i32_0 = arith.constant 0 : i32
    %c0_i32_1 = arith.constant 0 : i32
    return %c0_i32, %c0_i32_0 : i32, i32
  }
  func.func @transform_22(%arg0: i32) -> (i32, i32) {
    %c0_i32 = arith.constant 0 : i32
    %c0_i32_0 = arith.constant 0 : i32
    %c0_i32_1 = arith.constant 0 : i32
    return %c0_i32, %c0_i32_0 : i32, i32
  }
  func.func @transform_23(%arg0: i32) -> (i32, i32) {
    %c0_i32 = arith.constant 0 : i32
    %c0_i32_0 = arith.constant 0 : i32
    %c0_i32_1 = arith.constant 0 : i32
    return %c0_i32, %c0_i32_0 : i32, i32
  }
  func.func @transform_24(%arg0: i32) -> (i32, i32, i32) {
    %c0_i32 = arith.constant 0 : i32
    %c0_i32_0 = arith.constant 0 : i32
    %c0_i32_1 = arith.constant 0 : i32
    return %arg0, %c0_i32, %c0_i32_0 : i32, i32, i32
  }
}

module attributes {stable_mosaic.version = 11 : i64} {
  func.func @_decoder_layer_kernel(%arg0: i32, %arg1: memref<1x16x32xf32, #tpu.memory_space<vmem>>, %arg2: memref<1x12x32xf32, #tpu.memory_space<vmem>>, %arg3: memref<32x96xf32, #tpu.memory_space<vmem>>, %arg4: memref<1x96xf32, #tpu.memory_space<vmem>>, %arg5: memref<32x32xf32, #tpu.memory_space<vmem>>, %arg6: memref<1x32xf32, #tpu.memory_space<vmem>>, %arg7: memref<1x32xf32, #tpu.memory_space<vmem>>, %arg8: memref<1x32xf32, #tpu.memory_space<vmem>>, %arg9: memref<32x32xf32, #tpu.memory_space<vmem>>, %arg10: memref<1x32xf32, #tpu.memory_space<vmem>>, %arg11: memref<32x64xf32, #tpu.memory_space<vmem>>, %arg12: memref<1x64xf32, #tpu.memory_space<vmem>>, %arg13: memref<32x32xf32, #tpu.memory_space<vmem>>, %arg14: memref<1x32xf32, #tpu.memory_space<vmem>>, %arg15: memref<1x32xf32, #tpu.memory_space<vmem>>, %arg16: memref<1x32xf32, #tpu.memory_space<vmem>>, %arg17: memref<32x32xf32, #tpu.memory_space<vmem>>, %arg18: memref<1x32xf32, #tpu.memory_space<vmem>>, %arg19: memref<32x32xf32, #tpu.memory_space<vmem>>, %arg20: memref<1x32xf32, #tpu.memory_space<vmem>>, %arg21: memref<1x32xf32, #tpu.memory_space<vmem>>, %arg22: memref<1x32xf32, #tpu.memory_space<vmem>>, %arg23: memref<1x32xf32, #tpu.memory_space<vmem>>, %arg24: memref<1x32xf32, #tpu.memory_space<vmem>>, %arg25: memref<1x16x32xf32, #tpu.memory_space<vmem>>, %arg26: memref<16x32xf32, #tpu.memory_space<vmem>>) attributes {dimension_semantics = [#tpu.dimension_semantics<parallel>], iteration_bounds = array<i64: 2>, scalar_prefetch = 0 : i64, scratch_operands = 1 : i64, tpu.core_type = #tpu.core_type<tc>, window_params = [{transform_indices = @transform_0, window_bounds = array<i64: 1, 16, 32>}, {transform_indices = @transform_1, window_bounds = array<i64: 1, 12, 32>}, {pipeline_mode = #tpu.pipeline_mode<synchronous>, transform_indices = @transform_2, window_bounds = array<i64: 32, 96>}, {pipeline_mode = #tpu.pipeline_mode<synchronous>, transform_indices = @transform_3, window_bounds = array<i64: 1, 96>}, {pipeline_mode = #tpu.pipeline_mode<synchronous>, transform_indices = @transform_4, window_bounds = array<i64: 32, 32>}, {pipeline_mode = #tpu.pipeline_mode<synchronous>, transform_indices = @transform_5, window_bounds = array<i64: 1, 32>}, {pipeline_mode = #tpu.pipeline_mode<synchronous>, transform_indices = @transform_6, window_bounds = array<i64: 1, 32>}, {pipeline_mode = #tpu.pipeline_mode<synchronous>, transform_indices = @transform_7, window_bounds = array<i64: 1, 32>}, {pipeline_mode = #tpu.pipeline_mode<synchronous>, transform_indices = @transform_8, window_bounds = array<i64: 32, 32>}, {pipeline_mode = #tpu.pipeline_mode<synchronous>, transform_indices = @transform_9, window_bounds = array<i64: 1, 32>}, {pipeline_mode = #tpu.pipeline_mode<synchronous>, transform_indices = @transform_10, window_bounds = array<i64: 32, 64>}, {pipeline_mode = #tpu.pipeline_mode<synchronous>, transform_indices = @transform_11, window_bounds = array<i64: 1, 64>}, {pipeline_mode = #tpu.pipeline_mode<synchronous>, transform_indices = @transform_12, window_bounds = array<i64: 32, 32>}, {pipeline_mode = #tpu.pipeline_mode<synchronous>, transform_indices = @transform_13, window_bounds = array<i64: 1, 32>}, {pipeline_mode = #tpu.pipeline_mode<synchronous>, transform_indices = @transform_14, window_bounds = array<i64: 1, 32>}, {pipeline_mode = #tpu.pipeline_mode<synchronous>, transform_indices = @transform_15, window_bounds = array<i64: 1, 32>}, {pipeline_mode = #tpu.pipeline_mode<synchronous>, transform_indices = @transform_16, window_bounds = array<i64: 32, 32>}, {pipeline_mode = #tpu.pipeline_mode<synchronous>, transform_indices = @transform_17, window_bounds = array<i64: 1, 32>}, {pipeline_mode = #tpu.pipeline_mode<synchronous>, transform_indices = @transform_18, window_bounds = array<i64: 32, 32>}, {pipeline_mode = #tpu.pipeline_mode<synchronous>, transform_indices = @transform_19, window_bounds = array<i64: 1, 32>}, {pipeline_mode = #tpu.pipeline_mode<synchronous>, transform_indices = @transform_20, window_bounds = array<i64: 1, 32>}, {pipeline_mode = #tpu.pipeline_mode<synchronous>, transform_indices = @transform_21, window_bounds = array<i64: 1, 32>}, {pipeline_mode = #tpu.pipeline_mode<synchronous>, transform_indices = @transform_22, window_bounds = array<i64: 1, 32>}, {pipeline_mode = #tpu.pipeline_mode<synchronous>, transform_indices = @transform_23, window_bounds = array<i64: 1, 32>}, {transform_indices = @transform_24, window_bounds = array<i64: 1, 16, 32>}]} {
    %c0 = arith.constant 0 : index
    %c0_0 = arith.constant 0 : index
    %c0_1 = arith.constant 0 : index
    %0 = vector.load %arg1[%c0, %c0_0, %c0_1] : memref<1x16x32xf32, #tpu.memory_space<vmem>>, vector<1x16x32xf32>
    %1 = vector.shape_cast %0 : vector<1x16x32xf32> to vector<16x32xf32>
    %c0_2 = arith.constant 0 : index
    %c0_3 = arith.constant 0 : index
    %c0_4 = arith.constant 0 : index
    %2 = vector.load %arg2[%c0_2, %c0_3, %c0_4] : memref<1x12x32xf32, #tpu.memory_space<vmem>>, vector<1x12x32xf32>
    %3 = vector.shape_cast %2 : vector<1x12x32xf32> to vector<12x32xf32>
    %c0_5 = arith.constant 0 : index
    %c0_6 = arith.constant 0 : index
    %4 = vector.load %arg3[%c0_5, %c0_6] : memref<32x96xf32, #tpu.memory_space<vmem>>, vector<32x96xf32>
    %cst = arith.constant dense<0.000000e+00> : vector<16x96xf32>
    %5 = tpu.matmul %1, %4, %cst {dimension_numbers = #tpu.dot_dimension_numbers<[1], [0], [0], [1], [0, 0, 1, 1], [], []>} : vector<16x32xf32>, vector<32x96xf32>, vector<16x96xf32> -> vector<16x96xf32>
    %c0_7 = arith.constant 0 : index
    %c0_8 = arith.constant 0 : index
    %6 = vector.load %arg4[%c0_7, %c0_8] : memref<1x96xf32, #tpu.memory_space<vmem>>, vector<1x96xf32>
    %7 = vector.broadcast %6 : vector<1x96xf32> to vector<16x96xf32>
    %8 = arith.addf %5, %7 : vector<16x96xf32>
    %9 = vector.extract_strided_slice %8 {offsets = [0, 0], sizes = [16, 32], strides = [1, 1]} : vector<16x96xf32> to vector<16x32xf32>
    %10 = vector.extract_strided_slice %8 {offsets = [0, 32], sizes = [16, 32], strides = [1, 1]} : vector<16x96xf32> to vector<16x32xf32>
    %11 = vector.extract_strided_slice %8 {offsets = [0, 64], sizes = [16, 32], strides = [1, 1]} : vector<16x96xf32> to vector<16x32xf32>
    %12 = tpu.iota {dimensions = array<i32: 0>} : vector<16x16xi32>
    %13 = tpu.iota {dimensions = array<i32: 1>} : vector<16x16xi32>
    %14 = arith.cmpi sgt, %13, %12 : vector<16x16xi32>
    %15 = vector.extract_strided_slice %9 {offsets = [0, 0], sizes = [16, 8], strides = [1, 1]} : vector<16x32xf32> to vector<16x8xf32>
    %16 = vector.extract_strided_slice %10 {offsets = [0, 0], sizes = [16, 8], strides = [1, 1]} : vector<16x32xf32> to vector<16x8xf32>
    %17 = vector.extract_strided_slice %11 {offsets = [0, 0], sizes = [16, 8], strides = [1, 1]} : vector<16x32xf32> to vector<16x8xf32>
    %cst_9 = arith.constant dense<0.000000e+00> : vector<16x16xf32>
    %18 = tpu.matmul %15, %16, %cst_9 {dimension_numbers = #tpu.dot_dimension_numbers<[1], [1], [0], [0], [0, 0, 1, 0], [], []>} : vector<16x8xf32>, vector<16x8xf32>, vector<16x16xf32> -> vector<16x16xf32>
    %cst_10 = arith.constant 0.353553385 : f32
    %19 = vector.broadcast %cst_10 : f32 to vector<16x16xf32>
    %20 = arith.mulf %18, %19 : vector<16x16xf32>
    %cst_11 = arith.constant -1.000000e+30 : f32
    %21 = vector.broadcast %cst_11 : f32 to vector<16x16xf32>
    %22 = arith.select %14, %21, %20 : vector<16x16xi1>, vector<16x16xf32>
    %cst_12 = arith.constant dense<0xFF800000> : vector<16xf32>
    %23 = vector.multi_reduction <maximumf>, %22, %cst_12 [1] : vector<16x16xf32> to vector<16xf32>
    %24 = vector.shape_cast %23 : vector<16xf32> to vector<16x1xf32>
    %25 = vector.broadcast %24 : vector<16x1xf32> to vector<16x16xf32>
    %26 = arith.subf %22, %25 : vector<16x16xf32>
    %27 = math.exp %26 : vector<16x16xf32>
    %cst_13 = arith.constant dense<0.000000e+00> : vector<16xf32>
    %28 = vector.multi_reduction <add>, %27, %cst_13 [1] : vector<16x16xf32> to vector<16xf32>
    %29 = vector.shape_cast %28 : vector<16xf32> to vector<16x1xf32>
    %30 = tpu.reciprocal %29 {approx = true} : vector<16x1xf32> -> vector<16x1xf32>
    %31 = vector.broadcast %30 : vector<16x1xf32> to vector<16x16xf32>
    %32 = arith.mulf %27, %31 : vector<16x16xf32>
    %cst_14 = arith.constant dense<0.000000e+00> : vector<16x8xf32>
    %33 = tpu.matmul %32, %17, %cst_14 {dimension_numbers = #tpu.dot_dimension_numbers<[1], [0], [0], [1], [0, 0, 1, 1], [], []>} : vector<16x16xf32>, vector<16x8xf32>, vector<16x8xf32> -> vector<16x8xf32>
    %34 = vector.extract_strided_slice %9 {offsets = [0, 8], sizes = [16, 8], strides = [1, 1]} : vector<16x32xf32> to vector<16x8xf32>
    %35 = vector.extract_strided_slice %10 {offsets = [0, 8], sizes = [16, 8], strides = [1, 1]} : vector<16x32xf32> to vector<16x8xf32>
    %36 = vector.extract_strided_slice %11 {offsets = [0, 8], sizes = [16, 8], strides = [1, 1]} : vector<16x32xf32> to vector<16x8xf32>
    %cst_15 = arith.constant dense<0.000000e+00> : vector<16x16xf32>
    %37 = tpu.matmul %34, %35, %cst_15 {dimension_numbers = #tpu.dot_dimension_numbers<[1], [1], [0], [0], [0, 0, 1, 0], [], []>} : vector<16x8xf32>, vector<16x8xf32>, vector<16x16xf32> -> vector<16x16xf32>
    %cst_16 = arith.constant 0.353553385 : f32
    %38 = vector.broadcast %cst_16 : f32 to vector<16x16xf32>
    %39 = arith.mulf %37, %38 : vector<16x16xf32>
    %cst_17 = arith.constant -1.000000e+30 : f32
    %40 = vector.broadcast %cst_17 : f32 to vector<16x16xf32>
    %41 = arith.select %14, %40, %39 : vector<16x16xi1>, vector<16x16xf32>
    %cst_18 = arith.constant dense<0xFF800000> : vector<16xf32>
    %42 = vector.multi_reduction <maximumf>, %41, %cst_18 [1] : vector<16x16xf32> to vector<16xf32>
    %43 = vector.shape_cast %42 : vector<16xf32> to vector<16x1xf32>
    %44 = vector.broadcast %43 : vector<16x1xf32> to vector<16x16xf32>
    %45 = arith.subf %41, %44 : vector<16x16xf32>
    %46 = math.exp %45 : vector<16x16xf32>
    %cst_19 = arith.constant dense<0.000000e+00> : vector<16xf32>
    %47 = vector.multi_reduction <add>, %46, %cst_19 [1] : vector<16x16xf32> to vector<16xf32>
    %48 = vector.shape_cast %47 : vector<16xf32> to vector<16x1xf32>
    %49 = tpu.reciprocal %48 {approx = true} : vector<16x1xf32> -> vector<16x1xf32>
    %50 = vector.broadcast %49 : vector<16x1xf32> to vector<16x16xf32>
    %51 = arith.mulf %46, %50 : vector<16x16xf32>
    %cst_20 = arith.constant dense<0.000000e+00> : vector<16x8xf32>
    %52 = tpu.matmul %51, %36, %cst_20 {dimension_numbers = #tpu.dot_dimension_numbers<[1], [0], [0], [1], [0, 0, 1, 1], [], []>} : vector<16x16xf32>, vector<16x8xf32>, vector<16x8xf32> -> vector<16x8xf32>
    %53 = vector.extract_strided_slice %9 {offsets = [0, 16], sizes = [16, 8], strides = [1, 1]} : vector<16x32xf32> to vector<16x8xf32>
    %54 = vector.extract_strided_slice %10 {offsets = [0, 16], sizes = [16, 8], strides = [1, 1]} : vector<16x32xf32> to vector<16x8xf32>
    %55 = vector.extract_strided_slice %11 {offsets = [0, 16], sizes = [16, 8], strides = [1, 1]} : vector<16x32xf32> to vector<16x8xf32>
    %cst_21 = arith.constant dense<0.000000e+00> : vector<16x16xf32>
    %56 = tpu.matmul %53, %54, %cst_21 {dimension_numbers = #tpu.dot_dimension_numbers<[1], [1], [0], [0], [0, 0, 1, 0], [], []>} : vector<16x8xf32>, vector<16x8xf32>, vector<16x16xf32> -> vector<16x16xf32>
    %cst_22 = arith.constant 0.353553385 : f32
    %57 = vector.broadcast %cst_22 : f32 to vector<16x16xf32>
    %58 = arith.mulf %56, %57 : vector<16x16xf32>
    %cst_23 = arith.constant -1.000000e+30 : f32
    %59 = vector.broadcast %cst_23 : f32 to vector<16x16xf32>
    %60 = arith.select %14, %59, %58 : vector<16x16xi1>, vector<16x16xf32>
    %cst_24 = arith.constant dense<0xFF800000> : vector<16xf32>
    %61 = vector.multi_reduction <maximumf>, %60, %cst_24 [1] : vector<16x16xf32> to vector<16xf32>
    %62 = vector.shape_cast %61 : vector<16xf32> to vector<16x1xf32>
    %63 = vector.broadcast %62 : vector<16x1xf32> to vector<16x16xf32>
    %64 = arith.subf %60, %63 : vector<16x16xf32>
    %65 = math.exp %64 : vector<16x16xf32>
    %cst_25 = arith.constant dense<0.000000e+00> : vector<16xf32>
    %66 = vector.multi_reduction <add>, %65, %cst_25 [1] : vector<16x16xf32> to vector<16xf32>
    %67 = vector.shape_cast %66 : vector<16xf32> to vector<16x1xf32>
    %68 = tpu.reciprocal %67 {approx = true} : vector<16x1xf32> -> vector<16x1xf32>
    %69 = vector.broadcast %68 : vector<16x1xf32> to vector<16x16xf32>
    %70 = arith.mulf %65, %69 : vector<16x16xf32>
    %cst_26 = arith.constant dense<0.000000e+00> : vector<16x8xf32>
    %71 = tpu.matmul %70, %55, %cst_26 {dimension_numbers = #tpu.dot_dimension_numbers<[1], [0], [0], [1], [0, 0, 1, 1], [], []>} : vector<16x16xf32>, vector<16x8xf32>, vector<16x8xf32> -> vector<16x8xf32>
    %72 = vector.extract_strided_slice %9 {offsets = [0, 24], sizes = [16, 8], strides = [1, 1]} : vector<16x32xf32> to vector<16x8xf32>
    %73 = vector.extract_strided_slice %10 {offsets = [0, 24], sizes = [16, 8], strides = [1, 1]} : vector<16x32xf32> to vector<16x8xf32>
    %74 = vector.extract_strided_slice %11 {offsets = [0, 24], sizes = [16, 8], strides = [1, 1]} : vector<16x32xf32> to vector<16x8xf32>
    %cst_27 = arith.constant dense<0.000000e+00> : vector<16x16xf32>
    %75 = tpu.matmul %72, %73, %cst_27 {dimension_numbers = #tpu.dot_dimension_numbers<[1], [1], [0], [0], [0, 0, 1, 0], [], []>} : vector<16x8xf32>, vector<16x8xf32>, vector<16x16xf32> -> vector<16x16xf32>
    %cst_28 = arith.constant 0.353553385 : f32
    %76 = vector.broadcast %cst_28 : f32 to vector<16x16xf32>
    %77 = arith.mulf %75, %76 : vector<16x16xf32>
    %cst_29 = arith.constant -1.000000e+30 : f32
    %78 = vector.broadcast %cst_29 : f32 to vector<16x16xf32>
    %79 = arith.select %14, %78, %77 : vector<16x16xi1>, vector<16x16xf32>
    %cst_30 = arith.constant dense<0xFF800000> : vector<16xf32>
    %80 = vector.multi_reduction <maximumf>, %79, %cst_30 [1] : vector<16x16xf32> to vector<16xf32>
    %81 = vector.shape_cast %80 : vector<16xf32> to vector<16x1xf32>
    %82 = vector.broadcast %81 : vector<16x1xf32> to vector<16x16xf32>
    %83 = arith.subf %79, %82 : vector<16x16xf32>
    %84 = math.exp %83 : vector<16x16xf32>
    %cst_31 = arith.constant dense<0.000000e+00> : vector<16xf32>
    %85 = vector.multi_reduction <add>, %84, %cst_31 [1] : vector<16x16xf32> to vector<16xf32>
    %86 = vector.shape_cast %85 : vector<16xf32> to vector<16x1xf32>
    %87 = tpu.reciprocal %86 {approx = true} : vector<16x1xf32> -> vector<16x1xf32>
    %88 = vector.broadcast %87 : vector<16x1xf32> to vector<16x16xf32>
    %89 = arith.mulf %84, %88 : vector<16x16xf32>
    %cst_32 = arith.constant dense<0.000000e+00> : vector<16x8xf32>
    %90 = tpu.matmul %89, %74, %cst_32 {dimension_numbers = #tpu.dot_dimension_numbers<[1], [0], [0], [1], [0, 0, 1, 1], [], []>} : vector<16x16xf32>, vector<16x8xf32>, vector<16x8xf32> -> vector<16x8xf32>
    %91 = tpu.concatenate %33, %52, %71, %90 in 1 : vector<16x8xf32>, vector<16x8xf32>, vector<16x8xf32>, vector<16x8xf32> -> vector<16x32xf32>
    %c0_33 = arith.constant 0 : index
    %c0_34 = arith.constant 0 : index
    %92 = vector.load %arg26[%c0_33, %c0_34] : memref<16x32xf32, #tpu.memory_space<vmem>>, vector<16x32xf32>
    tpu.vector_store %arg26[%c0_33, %c0_34], %91 {strides = array<i32>} : memref<16x32xf32, #tpu.memory_space<vmem>>, vector<16x32xf32>,
    %c0_35 = arith.constant 0 : index
    %c0_36 = arith.constant 0 : index
    %93 = tpu.strided_load %arg26[%c0_35, %c0_36] {strides = array<i32: 4, 1>} : memref<16x32xf32, #tpu.memory_space<vmem>>, vector<4x32xf32>
    %c1 = arith.constant 1 : index
    %c0_37 = arith.constant 0 : index
    %94 = tpu.strided_load %arg26[%c1, %c0_37] {strides = array<i32: 4, 1>} : memref<16x32xf32, #tpu.memory_space<vmem>>, vector<4x32xf32>
    %c2 = arith.constant 2 : index
    %c0_38 = arith.constant 0 : index
    %95 = tpu.strided_load %arg26[%c2, %c0_38] {strides = array<i32: 4, 1>} : memref<16x32xf32, #tpu.memory_space<vmem>>, vector<4x32xf32>
    %c3 = arith.constant 3 : index
    %c0_39 = arith.constant 0 : index
    %96 = tpu.strided_load %arg26[%c3, %c0_39] {strides = array<i32: 4, 1>} : memref<16x32xf32, #tpu.memory_space<vmem>>, vector<4x32xf32>
    %97 = vector.extract_strided_slice %93 {offsets = [0, 0], sizes = [4, 8], strides = [1, 1]} : vector<4x32xf32> to vector<4x8xf32>
    %98 = vector.extract_strided_slice %94 {offsets = [0, 0], sizes = [4, 8], strides = [1, 1]} : vector<4x32xf32> to vector<4x8xf32>
    %99 = vector.extract_strided_slice %95 {offsets = [0, 0], sizes = [4, 8], strides = [1, 1]} : vector<4x32xf32> to vector<4x8xf32>
    %100 = vector.extract_strided_slice %96 {offsets = [0, 0], sizes = [4, 8], strides = [1, 1]} : vector<4x32xf32> to vector<4x8xf32>
    %101 = tpu.concatenate %97, %98, %99, %100 in 1 : vector<4x8xf32>, vector<4x8xf32>, vector<4x8xf32>, vector<4x8xf32> -> vector<4x32xf32>
    %102 = vector.extract_strided_slice %93 {offsets = [0, 8], sizes = [4, 8], strides = [1, 1]} : vector<4x32xf32> to vector<4x8xf32>
    %103 = vector.extract_strided_slice %94 {offsets = [0, 8], sizes = [4, 8], strides = [1, 1]} : vector<4x32xf32> to vector<4x8xf32>
    %104 = vector.extract_strided_slice %95 {offsets = [0, 8], sizes = [4, 8], strides = [1, 1]} : vector<4x32xf32> to vector<4x8xf32>
    %105 = vector.extract_strided_slice %96 {offsets = [0, 8], sizes = [4, 8], strides = [1, 1]} : vector<4x32xf32> to vector<4x8xf32>
    %106 = tpu.concatenate %102, %103, %104, %105 in 1 : vector<4x8xf32>, vector<4x8xf32>, vector<4x8xf32>, vector<4x8xf32> -> vector<4x32xf32>
    %107 = vector.extract_strided_slice %93 {offsets = [0, 16], sizes = [4, 8], strides = [1, 1]} : vector<4x32xf32> to vector<4x8xf32>
    %108 = vector.extract_strided_slice %94 {offsets = [0, 16], sizes = [4, 8], strides = [1, 1]} : vector<4x32xf32> to vector<4x8xf32>
    %109 = vector.extract_strided_slice %95 {offsets = [0, 16], sizes = [4, 8], strides = [1, 1]} : vector<4x32xf32> to vector<4x8xf32>
    %110 = vector.extract_strided_slice %96 {offsets = [0, 16], sizes = [4, 8], strides = [1, 1]} : vector<4x32xf32> to vector<4x8xf32>
    %111 = tpu.concatenate %107, %108, %109, %110 in 1 : vector<4x8xf32>, vector<4x8xf32>, vector<4x8xf32>, vector<4x8xf32> -> vector<4x32xf32>
    %112 = vector.extract_strided_slice %93 {offsets = [0, 24], sizes = [4, 8], strides = [1, 1]} : vector<4x32xf32> to vector<4x8xf32>
    %113 = vector.extract_strided_slice %94 {offsets = [0, 24], sizes = [4, 8], strides = [1, 1]} : vector<4x32xf32> to vector<4x8xf32>
    %114 = vector.extract_strided_slice %95 {offsets = [0, 24], sizes = [4, 8], strides = [1, 1]} : vector<4x32xf32> to vector<4x8xf32>
    %115 = vector.extract_strided_slice %96 {offsets = [0, 24], sizes = [4, 8], strides = [1, 1]} : vector<4x32xf32> to vector<4x8xf32>
    %116 = tpu.concatenate %112, %113, %114, %115 in 1 : vector<4x8xf32>, vector<4x8xf32>, vector<4x8xf32>, vector<4x8xf32> -> vector<4x32xf32>
    %117 = tpu.concatenate %101, %106, %111, %116 in 0 : vector<4x32xf32>, vector<4x32xf32>, vector<4x32xf32>, vector<4x32xf32> -> vector<16x32xf32>
    %c0_40 = arith.constant 0 : index
    %c0_41 = arith.constant 0 : index
    %118 = vector.load %arg5[%c0_40, %c0_41] : memref<32x32xf32, #tpu.memory_space<vmem>>, vector<32x32xf32>
    %cst_42 = arith.constant dense<0.000000e+00> : vector<16x32xf32>
    %119 = tpu.matmul %117, %118, %cst_42 {dimension_numbers = #tpu.dot_dimension_numbers<[1], [0], [0], [1], [0, 0, 1, 1], [], []>} : vector<16x32xf32>, vector<32x32xf32>, vector<16x32xf32> -> vector<16x32xf32>
    %c0_43 = arith.constant 0 : index
    %c0_44 = arith.constant 0 : index
    %120 = vector.load %arg6[%c0_43, %c0_44] : memref<1x32xf32, #tpu.memory_space<vmem>>, vector<1x32xf32>
    %121 = vector.broadcast %120 : vector<1x32xf32> to vector<16x32xf32>
    %122 = arith.addf %119, %121 : vector<16x32xf32>
    %123 = arith.addf %1, %122 : vector<16x32xf32>
    %c0_45 = arith.constant 0 : index
    %c0_46 = arith.constant 0 : index
    %124 = vector.load %arg7[%c0_45, %c0_46] : memref<1x32xf32, #tpu.memory_space<vmem>>, vector<1x32xf32>
    %c0_47 = arith.constant 0 : index
    %c0_48 = arith.constant 0 : index
    %125 = vector.load %arg8[%c0_47, %c0_48] : memref<1x32xf32, #tpu.memory_space<vmem>>, vector<1x32xf32>
    %cst_49 = arith.constant dense<0.000000e+00> : vector<16xf32>
    %126 = vector.multi_reduction <add>, %123, %cst_49 [1] : vector<16x32xf32> to vector<16xf32>
    %127 = vector.shape_cast %126 : vector<16xf32> to vector<16x1xf32>
    %cst_50 = arith.constant 3.200000e+01 : f32
    %128 = vector.broadcast %cst_50 : f32 to vector<16x1xf32>
    %129 = arith.divf %127, %128 : vector<16x1xf32>
    %130 = vector.broadcast %129 : vector<16x1xf32> to vector<16x32xf32>
    %131 = arith.subf %123, %130 : vector<16x32xf32>
    %132 = arith.mulf %131, %131 : vector<16x32xf32>
    %cst_51 = arith.constant dense<0.000000e+00> : vector<16xf32>
    %133 = vector.multi_reduction <add>, %132, %cst_51 [1] : vector<16x32xf32> to vector<16xf32>
    %134 = vector.shape_cast %133 : vector<16xf32> to vector<16x1xf32>
    %cst_52 = arith.constant 3.200000e+01 : f32
    %135 = vector.broadcast %cst_52 : f32 to vector<16x1xf32>
    %136 = arith.divf %134, %135 : vector<16x1xf32>
    %137 = vector.broadcast %129 : vector<16x1xf32> to vector<16x32xf32>
    %138 = arith.subf %123, %137 : vector<16x32xf32>
    %cst_53 = arith.constant 9.99999974E-6 : f32
    %139 = vector.broadcast %cst_53 : f32 to vector<16x1xf32>
    %140 = arith.addf %136, %139 : vector<16x1xf32>
    %141 = math.rsqrt %140 : vector<16x1xf32>
    %142 = vector.broadcast %141 : vector<16x1xf32> to vector<16x32xf32>
    %143 = arith.mulf %138, %142 : vector<16x32xf32>
    %144 = vector.broadcast %124 : vector<1x32xf32> to vector<16x32xf32>
    %145 = arith.mulf %143, %144 : vector<16x32xf32>
    %146 = vector.broadcast %125 : vector<1x32xf32> to vector<16x32xf32>
    %147 = arith.addf %145, %146 : vector<16x32xf32>
    %c0_54 = arith.constant 0 : index
    %c0_55 = arith.constant 0 : index
    %148 = vector.load %arg9[%c0_54, %c0_55] : memref<32x32xf32, #tpu.memory_space<vmem>>, vector<32x32xf32>
    %cst_56 = arith.constant dense<0.000000e+00> : vector<16x32xf32>
    %149 = tpu.matmul %147, %148, %cst_56 {dimension_numbers = #tpu.dot_dimension_numbers<[1], [0], [0], [1], [0, 0, 1, 1], [], []>} : vector<16x32xf32>, vector<32x32xf32>, vector<16x32xf32> -> vector<16x32xf32>
    %c0_57 = arith.constant 0 : index
    %c0_58 = arith.constant 0 : index
    %150 = vector.load %arg10[%c0_57, %c0_58] : memref<1x32xf32, #tpu.memory_space<vmem>>, vector<1x32xf32>
    %151 = vector.broadcast %150 : vector<1x32xf32> to vector<16x32xf32>
    %152 = arith.addf %149, %151 : vector<16x32xf32>
    %c0_59 = arith.constant 0 : index
    %c0_60 = arith.constant 0 : index
    %153 = vector.load %arg11[%c0_59, %c0_60] : memref<32x64xf32, #tpu.memory_space<vmem>>, vector<32x64xf32>
    %cst_61 = arith.constant dense<0.000000e+00> : vector<12x64xf32>
    %154 = tpu.matmul %3, %153, %cst_61 {dimension_numbers = #tpu.dot_dimension_numbers<[1], [0], [0], [1], [0, 0, 1, 1], [], []>} : vector<12x32xf32>, vector<32x64xf32>, vector<12x64xf32> -> vector<12x64xf32>
    %c0_62 = arith.constant 0 : index
    %c0_63 = arith.constant 0 : index
    %155 = vector.load %arg12[%c0_62, %c0_63] : memref<1x64xf32, #tpu.memory_space<vmem>>, vector<1x64xf32>
    %156 = vector.broadcast %155 : vector<1x64xf32> to vector<12x64xf32>
    %157 = arith.addf %154, %156 : vector<12x64xf32>
    %158 = vector.extract_strided_slice %157 {offsets = [0, 0], sizes = [12, 32], strides = [1, 1]} : vector<12x64xf32> to vector<12x32xf32>
    %159 = vector.extract_strided_slice %157 {offsets = [0, 32], sizes = [12, 32], strides = [1, 1]} : vector<12x64xf32> to vector<12x32xf32>
    %160 = vector.extract_strided_slice %152 {offsets = [0, 0], sizes = [16, 8], strides = [1, 1]} : vector<16x32xf32> to vector<16x8xf32>
    %161 = vector.extract_strided_slice %158 {offsets = [0, 0], sizes = [12, 8], strides = [1, 1]} : vector<12x32xf32> to vector<12x8xf32>
    %162 = vector.extract_strided_slice %159 {offsets = [0, 0], sizes = [12, 8], strides = [1, 1]} : vector<12x32xf32> to vector<12x8xf32>
    %cst_64 = arith.constant dense<0.000000e+00> : vector<16x12xf32>
    %163 = tpu.matmul %160, %161, %cst_64 {dimension_numbers = #tpu.dot_dimension_numbers<[1], [1], [0], [0], [0, 0, 1, 0], [], []>} : vector<16x8xf32>, vector<12x8xf32>, vector<16x12xf32> -> vector<16x12xf32>
    %cst_65 = arith.constant 0.353553385 : f32
    %164 = vector.broadcast %cst_65 : f32 to vector<16x12xf32>
    %165 = arith.mulf %163, %164 : vector<16x12xf32>
    %cst_66 = arith.constant dense<0xFF800000> : vector<16xf32>
    %166 = vector.multi_reduction <maximumf>, %165, %cst_66 [1] : vector<16x12xf32> to vector<16xf32>
    %167 = vector.shape_cast %166 : vector<16xf32> to vector<16x1xf32>
    %168 = vector.broadcast %167 : vector<16x1xf32> to vector<16x12xf32>
    %169 = arith.subf %165, %168 : vector<16x12xf32>
    %170 = math.exp %169 : vector<16x12xf32>
    %cst_67 = arith.constant dense<0.000000e+00> : vector<16xf32>
    %171 = vector.multi_reduction <add>, %170, %cst_67 [1] : vector<16x12xf32> to vector<16xf32>
    %172 = vector.shape_cast %171 : vector<16xf32> to vector<16x1xf32>
    %173 = tpu.reciprocal %172 {approx = true} : vector<16x1xf32> -> vector<16x1xf32>
    %174 = vector.broadcast %173 : vector<16x1xf32> to vector<16x12xf32>
    %175 = arith.mulf %170, %174 : vector<16x12xf32>
    %cst_68 = arith.constant dense<0.000000e+00> : vector<16x8xf32>
    %176 = tpu.matmul %175, %162, %cst_68 {dimension_numbers = #tpu.dot_dimension_numbers<[1], [0], [0], [1], [0, 0, 1, 1], [], []>} : vector<16x12xf32>, vector<12x8xf32>, vector<16x8xf32> -> vector<16x8xf32>
    %177 = vector.extract_strided_slice %152 {offsets = [0, 8], sizes = [16, 8], strides = [1, 1]} : vector<16x32xf32> to vector<16x8xf32>
    %178 = vector.extract_strided_slice %158 {offsets = [0, 8], sizes = [12, 8], strides = [1, 1]} : vector<12x32xf32> to vector<12x8xf32>
    %179 = vector.extract_strided_slice %159 {offsets = [0, 8], sizes = [12, 8], strides = [1, 1]} : vector<12x32xf32> to vector<12x8xf32>
    %cst_69 = arith.constant dense<0.000000e+00> : vector<16x12xf32>
    %180 = tpu.matmul %177, %178, %cst_69 {dimension_numbers = #tpu.dot_dimension_numbers<[1], [1], [0], [0], [0, 0, 1, 0], [], []>} : vector<16x8xf32>, vector<12x8xf32>, vector<16x12xf32> -> vector<16x12xf32>
    %cst_70 = arith.constant 0.353553385 : f32
    %181 = vector.broadcast %cst_70 : f32 to vector<16x12xf32>
    %182 = arith.mulf %180, %181 : vector<16x12xf32>
    %cst_71 = arith.constant dense<0xFF800000> : vector<16xf32>
    %183 = vector.multi_reduction <maximumf>, %182, %cst_71 [1] : vector<16x12xf32> to vector<16xf32>
    %184 = vector.shape_cast %183 : vector<16xf32> to vector<16x1xf32>
    %185 = vector.broadcast %184 : vector<16x1xf32> to vector<16x12xf32>
    %186 = arith.subf %182, %185 : vector<16x12xf32>
    %187 = math.exp %186 : vector<16x12xf32>
    %cst_72 = arith.constant dense<0.000000e+00> : vector<16xf32>
    %188 = vector.multi_reduction <add>, %187, %cst_72 [1] : vector<16x12xf32> to vector<16xf32>
    %189 = vector.shape_cast %188 : vector<16xf32> to vector<16x1xf32>
    %190 = tpu.reciprocal %189 {approx = true} : vector<16x1xf32> -> vector<16x1xf32>
    %191 = vector.broadcast %190 : vector<16x1xf32> to vector<16x12xf32>
    %192 = arith.mulf %187, %191 : vector<16x12xf32>
    %cst_73 = arith.constant dense<0.000000e+00> : vector<16x8xf32>
    %193 = tpu.matmul %192, %179, %cst_73 {dimension_numbers = #tpu.dot_dimension_numbers<[1], [0], [0], [1], [0, 0, 1, 1], [], []>} : vector<16x12xf32>, vector<12x8xf32>, vector<16x8xf32> -> vector<16x8xf32>
    %194 = vector.extract_strided_slice %152 {offsets = [0, 16], sizes = [16, 8], strides = [1, 1]} : vector<16x32xf32> to vector<16x8xf32>
    %195 = vector.extract_strided_slice %158 {offsets = [0, 16], sizes = [12, 8], strides = [1, 1]} : vector<12x32xf32> to vector<12x8xf32>
    %196 = vector.extract_strided_slice %159 {offsets = [0, 16], sizes = [12, 8], strides = [1, 1]} : vector<12x32xf32> to vector<12x8xf32>
    %cst_74 = arith.constant dense<0.000000e+00> : vector<16x12xf32>
    %197 = tpu.matmul %194, %195, %cst_74 {dimension_numbers = #tpu.dot_dimension_numbers<[1], [1], [0], [0], [0, 0, 1, 0], [], []>} : vector<16x8xf32>, vector<12x8xf32>, vector<16x12xf32> -> vector<16x12xf32>
    %cst_75 = arith.constant 0.353553385 : f32
    %198 = vector.broadcast %cst_75 : f32 to vector<16x12xf32>
    %199 = arith.mulf %197, %198 : vector<16x12xf32>
    %cst_76 = arith.constant dense<0xFF800000> : vector<16xf32>
    %200 = vector.multi_reduction <maximumf>, %199, %cst_76 [1] : vector<16x12xf32> to vector<16xf32>
    %201 = vector.shape_cast %200 : vector<16xf32> to vector<16x1xf32>
    %202 = vector.broadcast %201 : vector<16x1xf32> to vector<16x12xf32>
    %203 = arith.subf %199, %202 : vector<16x12xf32>
    %204 = math.exp %203 : vector<16x12xf32>
    %cst_77 = arith.constant dense<0.000000e+00> : vector<16xf32>
    %205 = vector.multi_reduction <add>, %204, %cst_77 [1] : vector<16x12xf32> to vector<16xf32>
    %206 = vector.shape_cast %205 : vector<16xf32> to vector<16x1xf32>
    %207 = tpu.reciprocal %206 {approx = true} : vector<16x1xf32> -> vector<16x1xf32>
    %208 = vector.broadcast %207 : vector<16x1xf32> to vector<16x12xf32>
    %209 = arith.mulf %204, %208 : vector<16x12xf32>
    %cst_78 = arith.constant dense<0.000000e+00> : vector<16x8xf32>
    %210 = tpu.matmul %209, %196, %cst_78 {dimension_numbers = #tpu.dot_dimension_numbers<[1], [0], [0], [1], [0, 0, 1, 1], [], []>} : vector<16x12xf32>, vector<12x8xf32>, vector<16x8xf32> -> vector<16x8xf32>
    %211 = vector.extract_strided_slice %152 {offsets = [0, 24], sizes = [16, 8], strides = [1, 1]} : vector<16x32xf32> to vector<16x8xf32>
    %212 = vector.extract_strided_slice %158 {offsets = [0, 24], sizes = [12, 8], strides = [1, 1]} : vector<12x32xf32> to vector<12x8xf32>
    %213 = vector.extract_strided_slice %159 {offsets = [0, 24], sizes = [12, 8], strides = [1, 1]} : vector<12x32xf32> to vector<12x8xf32>
    %cst_79 = arith.constant dense<0.000000e+00> : vector<16x12xf32>
    %214 = tpu.matmul %211, %212, %cst_79 {dimension_numbers = #tpu.dot_dimension_numbers<[1], [1], [0], [0], [0, 0, 1, 0], [], []>} : vector<16x8xf32>, vector<12x8xf32>, vector<16x12xf32> -> vector<16x12xf32>
    %cst_80 = arith.constant 0.353553385 : f32
    %215 = vector.broadcast %cst_80 : f32 to vector<16x12xf32>
    %216 = arith.mulf %214, %215 : vector<16x12xf32>
    %cst_81 = arith.constant dense<0xFF800000> : vector<16xf32>
    %217 = vector.multi_reduction <maximumf>, %216, %cst_81 [1] : vector<16x12xf32> to vector<16xf32>
    %218 = vector.shape_cast %217 : vector<16xf32> to vector<16x1xf32>
    %219 = vector.broadcast %218 : vector<16x1xf32> to vector<16x12xf32>
    %220 = arith.subf %216, %219 : vector<16x12xf32>
    %221 = math.exp %220 : vector<16x12xf32>
    %cst_82 = arith.constant dense<0.000000e+00> : vector<16xf32>
    %222 = vector.multi_reduction <add>, %221, %cst_82 [1] : vector<16x12xf32> to vector<16xf32>
    %223 = vector.shape_cast %222 : vector<16xf32> to vector<16x1xf32>
    %224 = tpu.reciprocal %223 {approx = true} : vector<16x1xf32> -> vector<16x1xf32>
    %225 = vector.broadcast %224 : vector<16x1xf32> to vector<16x12xf32>
    %226 = arith.mulf %221, %225 : vector<16x12xf32>
    %cst_83 = arith.constant dense<0.000000e+00> : vector<16x8xf32>
    %227 = tpu.matmul %226, %213, %cst_83 {dimension_numbers = #tpu.dot_dimension_numbers<[1], [0], [0], [1], [0, 0, 1, 1], [], []>} : vector<16x12xf32>, vector<12x8xf32>, vector<16x8xf32> -> vector<16x8xf32>
    %228 = tpu.concatenate %176, %193, %210, %227 in 1 : vector<16x8xf32>, vector<16x8xf32>, vector<16x8xf32>, vector<16x8xf32> -> vector<16x32xf32>
    %c0_84 = arith.constant 0 : index
    %c0_85 = arith.constant 0 : index
    %229 = vector.load %arg13[%c0_84, %c0_85] : memref<32x32xf32, #tpu.memory_space<vmem>>, vector<32x32xf32>
    %cst_86 = arith.constant dense<0.000000e+00> : vector<16x32xf32>
    %230 = tpu.matmul %228, %229, %cst_86 {dimension_numbers = #tpu.dot_dimension_numbers<[1], [0], [0], [1], [0, 0, 1, 1], [], []>} : vector<16x32xf32>, vector<32x32xf32>, vector<16x32xf32> -> vector<16x32xf32>
    %c0_87 = arith.constant 0 : index
    %c0_88 = arith.constant 0 : index
    %231 = vector.load %arg14[%c0_87, %c0_88] : memref<1x32xf32, #tpu.memory_space<vmem>>, vector<1x32xf32>
    %232 = vector.broadcast %231 : vector<1x32xf32> to vector<16x32xf32>
    %233 = arith.addf %230, %232 : vector<16x32xf32>
    %234 = arith.addf %147, %233 : vector<16x32xf32>
    %c0_89 = arith.constant 0 : index
    %c0_90 = arith.constant 0 : index
    %235 = vector.load %arg15[%c0_89, %c0_90] : memref<1x32xf32, #tpu.memory_space<vmem>>, vector<1x32xf32>
    %c0_91 = arith.constant 0 : index
    %c0_92 = arith.constant 0 : index
    %236 = vector.load %arg16[%c0_91, %c0_92] : memref<1x32xf32, #tpu.memory_space<vmem>>, vector<1x32xf32>
    %cst_93 = arith.constant dense<0.000000e+00> : vector<16xf32>
    %237 = vector.multi_reduction <add>, %234, %cst_93 [1] : vector<16x32xf32> to vector<16xf32>
    %238 = vector.shape_cast %237 : vector<16xf32> to vector<16x1xf32>
    %cst_94 = arith.constant 3.200000e+01 : f32
    %239 = vector.broadcast %cst_94 : f32 to vector<16x1xf32>
    %240 = arith.divf %238, %239 : vector<16x1xf32>
    %241 = vector.broadcast %240 : vector<16x1xf32> to vector<16x32xf32>
    %242 = arith.subf %234, %241 : vector<16x32xf32>
    %243 = arith.mulf %242, %242 : vector<16x32xf32>
    %cst_95 = arith.constant dense<0.000000e+00> : vector<16xf32>
    %244 = vector.multi_reduction <add>, %243, %cst_95 [1] : vector<16x32xf32> to vector<16xf32>
    %245 = vector.shape_cast %244 : vector<16xf32> to vector<16x1xf32>
    %cst_96 = arith.constant 3.200000e+01 : f32
    %246 = vector.broadcast %cst_96 : f32 to vector<16x1xf32>
    %247 = arith.divf %245, %246 : vector<16x1xf32>
    %248 = vector.broadcast %240 : vector<16x1xf32> to vector<16x32xf32>
    %249 = arith.subf %234, %248 : vector<16x32xf32>
    %cst_97 = arith.constant 9.99999974E-6 : f32
    %250 = vector.broadcast %cst_97 : f32 to vector<16x1xf32>
    %251 = arith.addf %247, %250 : vector<16x1xf32>
    %252 = math.rsqrt %251 : vector<16x1xf32>
    %253 = vector.broadcast %252 : vector<16x1xf32> to vector<16x32xf32>
    %254 = arith.mulf %249, %253 : vector<16x32xf32>
    %255 = vector.broadcast %235 : vector<1x32xf32> to vector<16x32xf32>
    %256 = arith.mulf %254, %255 : vector<16x32xf32>
    %257 = vector.broadcast %236 : vector<1x32xf32> to vector<16x32xf32>
    %258 = arith.addf %256, %257 : vector<16x32xf32>
    %c0_98 = arith.constant 0 : index
    %c0_99 = arith.constant 0 : index
    %259 = vector.load %arg17[%c0_98, %c0_99] : memref<32x32xf32, #tpu.memory_space<vmem>>, vector<32x32xf32>
    %cst_100 = arith.constant dense<0.000000e+00> : vector<16x32xf32>
    %260 = tpu.matmul %258, %259, %cst_100 {dimension_numbers = #tpu.dot_dimension_numbers<[1], [0], [0], [1], [0, 0, 1, 1], [], []>} : vector<16x32xf32>, vector<32x32xf32>, vector<16x32xf32> -> vector<16x32xf32>
    %c0_101 = arith.constant 0 : index
    %c0_102 = arith.constant 0 : index
    %261 = vector.load %arg18[%c0_101, %c0_102] : memref<1x32xf32, #tpu.memory_space<vmem>>, vector<1x32xf32>
    %262 = vector.broadcast %261 : vector<1x32xf32> to vector<16x32xf32>
    %263 = arith.addf %260, %262 : vector<16x32xf32>
    %cst_103 = arith.constant 5.000000e-01 : f32
    %264 = vector.broadcast %cst_103 : f32 to vector<16x32xf32>
    %265 = arith.mulf %264, %263 : vector<16x32xf32>
    %cst_104 = arith.constant 4.471500e-02 : f32
    %266 = vector.broadcast %cst_104 : f32 to vector<16x32xf32>
    %267 = arith.mulf %266, %263 : vector<16x32xf32>
    %268 = arith.mulf %267, %263 : vector<16x32xf32>
    %269 = arith.mulf %268, %263 : vector<16x32xf32>
    %270 = arith.addf %263, %269 : vector<16x32xf32>
    %cst_105 = arith.constant 0.797884583 : f32
    %271 = vector.broadcast %cst_105 : f32 to vector<16x32xf32>
    %272 = arith.mulf %271, %270 : vector<16x32xf32>
    %273 = math.tanh %272 : vector<16x32xf32>
    %cst_106 = arith.constant 1.000000e+00 : f32
    %274 = vector.broadcast %cst_106 : f32 to vector<16x32xf32>
    %275 = arith.addf %274, %273 : vector<16x32xf32>
    %276 = arith.mulf %265, %275 : vector<16x32xf32>
    %c0_107 = arith.constant 0 : index
    %c0_108 = arith.constant 0 : index
    %277 = vector.load %arg19[%c0_107, %c0_108] : memref<32x32xf32, #tpu.memory_space<vmem>>, vector<32x32xf32>
    %cst_109 = arith.constant dense<0.000000e+00> : vector<16x32xf32>
    %278 = tpu.matmul %276, %277, %cst_109 {dimension_numbers = #tpu.dot_dimension_numbers<[1], [0], [0], [1], [0, 0, 1, 1], [], []>} : vector<16x32xf32>, vector<32x32xf32>, vector<16x32xf32> -> vector<16x32xf32>
    %c0_110 = arith.constant 0 : index
    %c0_111 = arith.constant 0 : index
    %279 = vector.load %arg20[%c0_110, %c0_111] : memref<1x32xf32, #tpu.memory_space<vmem>>, vector<1x32xf32>
    %280 = vector.broadcast %279 : vector<1x32xf32> to vector<16x32xf32>
    %281 = arith.addf %278, %280 : vector<16x32xf32>
    %282 = arith.addf %258, %281 : vector<16x32xf32>
    %c0_112 = arith.constant 0 : index
    %c0_113 = arith.constant 0 : index
    %283 = vector.load %arg21[%c0_112, %c0_113] : memref<1x32xf32, #tpu.memory_space<vmem>>, vector<1x32xf32>
    %c0_114 = arith.constant 0 : index
    %c0_115 = arith.constant 0 : index
    %284 = vector.load %arg22[%c0_114, %c0_115] : memref<1x32xf32, #tpu.memory_space<vmem>>, vector<1x32xf32>
    %cst_116 = arith.constant dense<0.000000e+00> : vector<16xf32>
    %285 = vector.multi_reduction <add>, %282, %cst_116 [1] : vector<16x32xf32> to vector<16xf32>
    %286 = vector.shape_cast %285 : vector<16xf32> to vector<16x1xf32>
    %cst_117 = arith.constant 3.200000e+01 : f32
    %287 = vector.broadcast %cst_117 : f32 to vector<16x1xf32>
    %288 = arith.divf %286, %287 : vector<16x1xf32>
    %289 = vector.broadcast %288 : vector<16x1xf32> to vector<16x32xf32>
    %290 = arith.subf %282, %289 : vector<16x32xf32>
    %291 = arith.mulf %290, %290 : vector<16x32xf32>
    %cst_118 = arith.constant dense<0.000000e+00> : vector<16xf32>
    %292 = vector.multi_reduction <add>, %291, %cst_118 [1] : vector<16x32xf32> to vector<16xf32>
    %293 = vector.shape_cast %292 : vector<16xf32> to vector<16x1xf32>
    %cst_119 = arith.constant 3.200000e+01 : f32
    %294 = vector.broadcast %cst_119 : f32 to vector<16x1xf32>
    %295 = arith.divf %293, %294 : vector<16x1xf32>
    %296 = vector.broadcast %288 : vector<16x1xf32> to vector<16x32xf32>
    %297 = arith.subf %282, %296 : vector<16x32xf32>
    %cst_120 = arith.constant 9.99999974E-6 : f32
    %298 = vector.broadcast %cst_120 : f32 to vector<16x1xf32>
    %299 = arith.addf %295, %298 : vector<16x1xf32>
    %300 = math.rsqrt %299 : vector<16x1xf32>
    %301 = vector.broadcast %300 : vector<16x1xf32> to vector<16x32xf32>
    %302 = arith.mulf %297, %301 : vector<16x32xf32>
    %303 = vector.broadcast %283 : vector<1x32xf32> to vector<16x32xf32>
    %304 = arith.mulf %302, %303 : vector<16x32xf32>
    %305 = vector.broadcast %284 : vector<1x32xf32> to vector<16x32xf32>
    %306 = arith.addf %304, %305 : vector<16x32xf32>
    %c0_121 = arith.constant 0 : index
    %c0_122 = arith.constant 0 : index
    %c0_123 = arith.constant 0 : index
    %307 = vector.load %arg25[%c0_121, %c0_122, %c0_123] : memref<1x16x32xf32, #tpu.memory_space<vmem>>, vector<1x16x32xf32>
    %308 = vector.shape_cast %307 : vector<1x16x32xf32> to vector<16x32xf32>
    %309 = vector.shape_cast %306 : vector<16x32xf32> to vector<1x16x32xf32>
    tpu.vector_store %arg25[%c0_121, %c0_122, %c0_123], %309 {strides = array<i32>} : memref<1x16x32xf32, #tpu.memory_space<vmem>>, vector<1x16x32xf32>,
    return
  }
  func.func @transform_0(%arg0: i32) -> (i32, i32, i32) {
    %c0_i32 = arith.constant 0 : i32
    %c0_i32_0 = arith.constant 0 : i32
    %c0_i32_1 = arith.constant 0 : i32
    return %arg0, %c0_i32, %c0_i32_0 : i32, i32, i32
  }
  func.func @transform_1(%arg0: i32) -> (i32, i32, i32) {
    %c0_i32 = arith.constant 0 : i32
    %c0_i32_0 = arith.constant 0 : i32
    %c0_i32_1 = arith.constant 0 : i32
    return %arg0, %c0_i32, %c0_i32_0 : i32, i32, i32
  }
  func.func @transform_2(%arg0: i32) -> (i32, i32) {
    %c0_i32 = arith.constant 0 : i32
    %c0_i32_0 = arith.constant 0 : i32
    %c0_i32_1 = arith.constant 0 : i32
    return %c0_i32, %c0_i32_0 : i32, i32
  }
  func.func @transform_3(%arg0: i32) -> (i32, i32) {
    %c0_i32 = arith.constant 0 : i32
    %c0_i32_0 = arith.constant 0 : i32
    %c0_i32_1 = arith.constant 0 : i32
    return %c0_i32, %c0_i32_0 : i32, i32
  }
  func.func @transform_4(%arg0: i32) -> (i32, i32) {
    %c0_i32 = arith.constant 0 : i32
    %c0_i32_0 = arith.constant 0 : i32
    %c0_i32_1 = arith.constant 0 : i32
    return %c0_i32, %c0_i32_0 : i32, i32
  }
  func.func @transform_5(%arg0: i32) -> (i32, i32) {
    %c0_i32 = arith.constant 0 : i32
    %c0_i32_0 = arith.constant 0 : i32
    %c0_i32_1 = arith.constant 0 : i32
    return %c0_i32, %c0_i32_0 : i32, i32
  }
  func.func @transform_6(%arg0: i32) -> (i32, i32) {
    %c0_i32 = arith.constant 0 : i32
    %c0_i32_0 = arith.constant 0 : i32
    %c0_i32_1 = arith.constant 0 : i32
    return %c0_i32, %c0_i32_0 : i32, i32
  }
  func.func @transform_7(%arg0: i32) -> (i32, i32) {
    %c0_i32 = arith.constant 0 : i32
    %c0_i32_0 = arith.constant 0 : i32
    %c0_i32_1 = arith.constant 0 : i32
    return %c0_i32, %c0_i32_0 : i32, i32
  }
  func.func @transform_8(%arg0: i32) -> (i32, i32) {
    %c0_i32 = arith.constant 0 : i32
    %c0_i32_0 = arith.constant 0 : i32
    %c0_i32_1 = arith.constant 0 : i32
    return %c0_i32, %c0_i32_0 : i32, i32
  }
  func.func @transform_9(%arg0: i32) -> (i32, i32) {
    %c0_i32 = arith.constant 0 : i32
    %c0_i32_0 = arith.constant 0 : i32
    %c0_i32_1 = arith.constant 0 : i32
    return %c0_i32, %c0_i32_0 : i32, i32
  }
  func.func @transform_10(%arg0: i32) -> (i32, i32) {
    %c0_i32 = arith.constant 0 : i32
    %c0_i32_0 = arith.constant 0 : i32
    %c0_i32_1 = arith.constant 0 : i32
    return %c0_i32, %c0_i32_0 : i32, i32
  }
  func.func @transform_11(%arg0: i32) -> (i32, i32) {
    %c0_i32 = arith.constant 0 : i32
    %c0_i32_0 = arith.constant 0 : i32
    %c0_i32_1 = arith.constant 0 : i32
    return %c0_i32, %c0_i32_0 : i32, i32
  }
  func.func @transform_12(%arg0: i32) -> (i32, i32) {
    %c0_i32 = arith.constant 0 : i32
    %c0_i32_0 = arith.constant 0 : i32
    %c0_i32_1 = arith.constant 0 : i32
    return %c0_i32, %c0_i32_0 : i32, i32
  }
  func.func @transform_13(%arg0: i32) -> (i32, i32) {
    %c0_i32 = arith.constant 0 : i32
    %c0_i32_0 = arith.constant 0 : i32
    %c0_i32_1 = arith.constant 0 : i32
    return %c0_i32, %c0_i32_0 : i32, i32
  }
  func.func @transform_14(%arg0: i32) -> (i32, i32) {
    %c0_i32 = arith.constant 0 : i32
    %c0_i32_0 = arith.constant 0 : i32
    %c0_i32_1 = arith.constant 0 : i32
    return %c0_i32, %c0_i32_0 : i32, i32
  }
  func.func @transform_15(%arg0: i32) -> (i32, i32) {
    %c0_i32 = arith.constant 0 : i32
    %c0_i32_0 = arith.constant 0 : i32
    %c0_i32_1 = arith.constant 0 : i32
    return %c0_i32, %c0_i32_0 : i32, i32
  }
  func.func @transform_16(%arg0: i32) -> (i32, i32) {
    %c0_i32 = arith.constant 0 : i32
    %c0_i32_0 = arith.constant 0 : i32
    %c0_i32_1 = arith.constant 0 : i32
    return %c0_i32, %c0_i32_0 : i32, i32
  }
  func.func @transform_17(%arg0: i32) -> (i32, i32) {
    %c0_i32 = arith.constant 0 : i32
    %c0_i32_0 = arith.constant 0 : i32
    %c0_i32_1 = arith.constant 0 : i32
    return %c0_i32, %c0_i32_0 : i32, i32
  }
  func.func @transform_18(%arg0: i32) -> (i32, i32) {
    %c0_i32 = arith.constant 0 : i32
    %c0_i32_0 = arith.constant 0 : i32
    %c0_i32_1 = arith.constant 0 : i32
    return %c0_i32, %c0_i32_0 : i32, i32
  }
  func.func @transform_19(%arg0: i32) -> (i32, i32) {
    %c0_i32 = arith.constant 0 : i32
    %c0_i32_0 = arith.constant 0 : i32
    %c0_i32_1 = arith.constant 0 : i32
    return %c0_i32, %c0_i32_0 : i32, i32
  }
  func.func @transform_20(%arg0: i32) -> (i32, i32) {
    %c0_i32 = arith.constant 0 : i32
    %c0_i32_0 = arith.constant 0 : i32
    %c0_i32_1 = arith.constant 0 : i32
    return %c0_i32, %c0_i32_0 : i32, i32
  }
  func.func @transform_21(%arg0: i32) -> (i32, i32) {
    %c0_i32 = arith.constant 0 : i32
    %c0_i32_0 = arith.constant 0 : i32
    %c0_i32_1 = arith.constant 0 : i32
    return %c0_i32, %c0_i32_0 : i32, i32
  }
  func.func @transform_22(%arg0: i32) -> (i32, i32) {
    %c0_i32 = arith.constant 0 : i32
    %c0_i32_0 = arith.constant 0 : i32
    %c0_i32_1 = arith.constant 0 : i32
    return %c0_i32, %c0_i32_0 : i32, i32
  }
  func.func @transform_23(%arg0: i32) -> (i32, i32) {
    %c0_i32 = arith.constant 0 : i32
    %c0_i32_0 = arith.constant 0 : i32
    %c0_i32_1 = arith.constant 0 : i32
    return %c0_i32, %c0_i32_0 : i32, i32
  }
  func.func @transform_24(%arg0: i32) -> (i32, i32, i32) {
    %c0_i32 = arith.constant 0 : i32
    %c0_i32_0 = arith.constant 0 : i32
    %c0_i32_1 = arith.constant 0 : i32
    return %arg0, %c0_i32, %c0_i32_0 : i32, i32, i32
  }
}

module attributes {stable_mosaic.version = 11 : i64} {
  func.func @_linear_kernel(%arg0: i32, %arg1: memref<1x8x32xf32, #tpu.memory_space<vmem>>, %arg2: memref<32x128xf32, #tpu.memory_space<vmem>>, %arg3: memref<1x128xf32, #tpu.memory_space<vmem>>, %arg4: memref<1x8x128xf32, #tpu.memory_space<vmem>>) attributes {dimension_semantics = [#tpu.dimension_semantics<parallel>], iteration_bounds = array<i64: 2>, scalar_prefetch = 0 : i64, scratch_operands = 0 : i64, tpu.core_type = #tpu.core_type<tc>, window_params = [{transform_indices = @transform_0, window_bounds = array<i64: 1, 8, 32>}, {pipeline_mode = #tpu.pipeline_mode<synchronous>, transform_indices = @transform_1, window_bounds = array<i64: 32, 128>}, {pipeline_mode = #tpu.pipeline_mode<synchronous>, transform_indices = @transform_2, window_bounds = array<i64: 1, 128>}, {transform_indices = @transform_3, window_bounds = array<i64: 1, 8, 128>}]} {
    %c0 = arith.constant 0 : index
    %c0_0 = arith.constant 0 : index
    %c0_1 = arith.constant 0 : index
    %0 = vector.load %arg1[%c0, %c0_0, %c0_1] : memref<1x8x32xf32, #tpu.memory_space<vmem>>, vector<1x8x32xf32>
    %1 = vector.shape_cast %0 : vector<1x8x32xf32> to vector<8x32xf32>
    %c0_2 = arith.constant 0 : index
    %c0_3 = arith.constant 0 : index
    %2 = vector.load %arg2[%c0_2, %c0_3] : memref<32x128xf32, #tpu.memory_space<vmem>>, vector<32x128xf32>
    %cst = arith.constant dense<0.000000e+00> : vector<8x128xf32>
    %3 = tpu.matmul %1, %2, %cst {dimension_numbers = #tpu.dot_dimension_numbers<[1], [0], [0], [1], [0, 0, 1, 1], [], []>} : vector<8x32xf32>, vector<32x128xf32>, vector<8x128xf32> -> vector<8x128xf32>
    %c0_4 = arith.constant 0 : index
    %c0_5 = arith.constant 0 : index
    %4 = vector.load %arg3[%c0_4, %c0_5] : memref<1x128xf32, #tpu.memory_space<vmem>>, vector<1x128xf32>
    %5 = vector.broadcast %4 : vector<1x128xf32> to vector<8x128xf32>
    %6 = arith.addf %3, %5 : vector<8x128xf32>
    %c0_6 = arith.constant 0 : index
    %c0_7 = arith.constant 0 : index
    %c0_8 = arith.constant 0 : index
    %7 = vector.load %arg4[%c0_6, %c0_7, %c0_8] : memref<1x8x128xf32, #tpu.memory_space<vmem>>, vector<1x8x128xf32>
    %8 = vector.shape_cast %7 : vector<1x8x128xf32> to vector<8x128xf32>
    %9 = vector.shape_cast %6 : vector<8x128xf32> to vector<1x8x128xf32>
    tpu.vector_store %arg4[%c0_6, %c0_7, %c0_8], %9 {strides = array<i32>} : memref<1x8x128xf32, #tpu.memory_space<vmem>>, vector<1x8x128xf32>,
    return
  }
  func.func @transform_0(%arg0: i32) -> (i32, i32, i32) {
    %c0_i32 = arith.constant 0 : i32
    %c0_i32_0 = arith.constant 0 : i32
    %c0_i32_1 = arith.constant 0 : i32
    return %arg0, %c0_i32, %c0_i32_0 : i32, i32, i32
  }
  func.func @transform_1(%arg0: i32) -> (i32, i32) {
    %c0_i32 = arith.constant 0 : i32
    %c0_i32_0 = arith.constant 0 : i32
    %c0_i32_1 = arith.constant 0 : i32
    return %c0_i32, %c0_i32_0 : i32, i32
  }
  func.func @transform_2(%arg0: i32) -> (i32, i32) {
    %c0_i32 = arith.constant 0 : i32
    %c0_i32_0 = arith.constant 0 : i32
    %c0_i32_1 = arith.constant 0 : i32
    return %c0_i32, %c0_i32_0 : i32, i32
  }
  func.func @transform_3(%arg0: i32) -> (i32, i32, i32) {
    %c0_i32 = arith.constant 0 : i32
    %c0_i32_0 = arith.constant 0 : i32
    %c0_i32_1 = arith.constant 0 : i32
    return %arg0, %c0_i32, %c0_i32_0 : i32, i32, i32
  }
}

</mosaic_0001>

<bundles_post_ra>
// kernel: run.17
= control target key start
LH: loop header
LB: loop body
LE: loop exit
PB: predicated region body
PF: predicated region fallthrough
CT: control target
= control target key end

     0   :  { %s464_s12 = smov 0   ;;  %s499_s0 = inlined_call_operand.vmem [shape: f32[2,16,4], index: 0, kind: input, shape index: {}]   ;;  %s500_s1 = inlined_call_operand.vmem [shape: f32[2,16,32], index: 1, kind: input, shape index: {}]   ;;  %s501_s2 = inlined_call_operand.vmem [shape: f32[12,32], index: 2, kind: input, shape index: {}]   ;;  %s502_s3 = inlined_call_operand.vmem [shape: f32[2,16,32], index: 3, kind: output, shape index: {}]  }
   0x1 LB: > { %s386_s13 = sadd.s32 4294967295, %s439_s12   ;;  %p390_p0 = scmp.ge.s32.totalorder %s439_s12, 1  ;;  %s439_s12 = sphi %s464_s12, %s13_s12  }
   0x2   : > { %p147_p1 = scmp.lt.s32.totalorder %s439_s12, 3 }
   0x4   : > { %p148_p2 = pnand %p390_p0, %p147_p1 }
   0x5   : > { %p176_p3 = scmp.lt.s32.totalorder (!%p148_p2), %s386_s13, 1  ;;  %v226_v0 = vld [vmem:[%s501_s2] sm:$0xff] (!%p148_p2)  ;;  %v227_v1 = vld [vmem:[%s501_s2 + $0x8] sm:$0xf] (!%p148_p2)  ;;  %vm237_vm0 = vcmask (!%p148_p2), 1043456   ;;  %vm441_vm1 = vmmov (!%p148_p2), 1  }
   0x6   : > { %151 = sbr.rel (%p148_p2) target bundleno = 361 (0x169), region = 32  ;;  %v416_v2 = vpack.c.bf16 (!%p148_p2), %v227_v1, %v226_v0  ;;  %vm417_vm2 = vmpackc.low (!%p148_p2), %vm237_vm0, %vm441_vm1  ;;  %vm193_vm3 = vcmask (!%p148_p2), 31744   ;;  %vm197_vm4 = vcmask (!%p148_p2), 24576   ;;  %s442_s22 = smov (!%p148_p2), 4   ;;  %vm223_vm5 = vcmask (!%p148_p2), 64512  }
   0x7   : > { %s443_s23 = smov (!%p148_p2), 8   ;;  %vm230_vm6 = vcmask (!%p148_p2), 97280   ;;  %vm316_vm7 = vcmask (!%p148_p2), 261120  }
   0x8   : > { %418 = vmatprep.subr.msk.bf16.mxu0 (!%p148_p2), %vm417_vm2, %v416_v2 }
   0x9   : > { %421 = vmatpush3.bf16.msk.msra.mxu0 (!%p148_p2), %vm417_vm2, %v416_v2 }
   0xd   : > { %s504_s13 = smov (!%p176_p3, %s386_s13), 1 }
   0xe   : > { %s478_s18 = sshll.u32 %s504_s13, 4 }
   0xf   : > { %s180_s21 = scalar_lea.vmem %s499_s0, %s478_s18  ;;  %s185_s26 = scalar_lea.vmem %s500_s1, %s478_s18 }
  0x10   : > { %v191_v3 = vld [vmem:[%s180_s21] sm:$0xff]  ;;  %v192_v4 = vld [vmem:[%s180_s21 + $0x8] sm:$0xff]  ;;  %s190_s29 = scalar_lea.vmem %s502_s3, %s478_s18 }
  0x11   : > { %v196_v5 = vld [vmem:[%s180_s21 + $0xf] sm:$0x1]  ;;  %195 = vst.msk [vmem:[#allocation2 + $0x9] sm:$0xff] %vm193_vm3, %v192_v4  ;;  %v199_v6 = vld [vmem:[%s180_s21] sm:$0x1]  ;;  %207 = vrot.lane.b32.xlu0 %v191_v3, %s442_s22  ;;  %194 = vst.msk [vmem:[#allocation2 + $0x1] sm:$0xff] %vm193_vm3, %v191_v3 }
  0x12   : > { %198 = vst.msk [vmem:[#allocation2] sm:$0x1] %vm197_vm4, %v196_v5  ;;  %200 = vst.msk [vmem:[#allocation2 + $0x11] sm:$0x1] %vm197_vm4, %v199_v6  ;;  %v229_v19 = vld [vmem:[%s185_s26 + $0x8] sm:$0xff]  ;;  %v228_v20 = vld [vmem:[%s185_s26] sm:$0xff] }
  0x15   : > { %209 = vrot.lane.b32.xlu0 %v192_v4, %s442_s22 }
  0x18   : > { %v203_v7 = vld [vmem:[#allocation2 + $0x2] sm:$0xff] }
  0x19   : > { %215 = vrot.lane.b32.xlu1 %v203_v7, %s443_s23  ;;  %v204_v8 = vld [vmem:[#allocation2 + $0xa] sm:$0xff]  ;;  %v201_v10 = vld [vmem:[#allocation2] sm:$0xff] }
  0x1a   : > { %v202_v13 = vld [vmem:[#allocation2 + $0x8] sm:$0xff] }
  0x1d   : > { %217 = vrot.lane.b32.xlu1 %v204_v8, %s443_s23 }
  0x83   : > { %v208_v9 = vpop.permute.xlu0 %207 }
  0x84   : > { %v221_v11 = vsel %vm193_vm3, %v201_v10, %v208_v9 }
  0x87   : > { %v210_v12 = vpop.permute.xlu0 %209 }
  0x88   : > { %v222_v16 = vsel %vm193_vm3, %v202_v13, %v210_v12 }
  0x8b   : > { %v216_v14 = vpop.permute.xlu1 %215 }
  0x8c   : > { %v224_v15 = vsel %vm223_vm5, %v221_v11, %v216_v14 }
  0x8d   : > { %413 = vmatprep.mubr.msk.f32.mxu0 %vm230_vm6, %v224_v15 }
  0x8f   : > { %v218_v17 = vpop.permute.xlu1 %217 }
  0x90   : > { %v225_v18 = vsel %vm223_vm5, %v222_v16, %v218_v17 }
  0x91   : > { %414 = vmatmul.mubr.msk.f32.vlgmr.msra.gmra.mrb[0].mxu0 %vm230_vm6, %v225_v18 }
 0x164   : > { %v415_v21 = vpop.f32.mrb[0].mxu0 }
 0x165   : > { %v313_v22 = vadd.f32 %v415_v21, %v229_v19  ;;  %v307_v23 = vpop.f32.mrb[1].mxu0 }
 0x166   : > { %v308_v24 = vadd.f32 %v307_v23, %v228_v20 }
 0x167   : > { %318 = vst.msk [vmem:[%s190_s29 + $0x8] sm:$0xff] %vm316_vm7, %v313_v22 }
 0x168   : > { %317 = vst.msk [vmem:[%s190_s29] sm:$0xff] %vm316_vm7, %v308_v24 }
 0x169 PF: > { %s13_s12 = sadd.s32 1, %s439_s12  }
 0x16a   : > { %p10_p4 = scmp.ge.s32.totalorder %s13_s12, 4  }
 0x16c   :  { %12 = sbr.rel (!%p10_p4) target bundleno = 1 (0x1), region = 65 }

// kernel: run.20
= control target key start
LH: loop header
LB: loop body
LE: loop exit
PB: predicated region body
PF: predicated region fallthrough
CT: control target
= control target key end

     0   :  { %s485_s12 = smov 0   ;;  %s554_s0 = inlined_call_operand.vmem [shape: f32[2,16,32], index: 0, kind: input, shape index: {}]   ;;  %s555_s1 = inlined_call_operand.vmem [shape: f32[96,32], index: 1, kind: input, shape index: {}]   ;;  %s556_s2 = inlined_call_operand.vmem [shape: f32[1,32], index: 2, kind: input, shape index: {}]   ;;  %s557_s3 = inlined_call_operand.vmem [shape: f32[2,16,32], index: 3, kind: output, shape index: {}]  }
   0x1 LB: > { %s364_s13 = sadd.s32 4294967295, %s461_s12   ;;  %p368_p0 = scmp.ge.s32.totalorder %s461_s12, 1  ;;  %s461_s12 = sphi %s485_s12, %s13_s12  }
   0x2   : > { %p137_p1 = scmp.lt.s32.totalorder %s461_s12, 3 }
   0x4   : > { %p138_p2 = pnand %p368_p0, %p137_p1 }
   0x5   : > { %p161_p3 = scmp.lt.s32.totalorder (!%p138_p2), %s364_s13, 1  ;;  %v206_v0 = vld [vmem:[%s555_s1] sm:$0xff] (!%p138_p2)  ;;  %v207_v1 = vld [vmem:[%s555_s1 + $0x8] sm:$0xff] (!%p138_p2)  ;;  %v208_v3 = vld [vmem:[%s555_s1 + $0x10] sm:$0xff] (!%p138_p2)  ;;  %vm173_vm0 = vcmask (!%p138_p2), 261120   ;;  %vm177_vm1 = vcmask (!%p138_p2), 253952  }
   0x6   : > { %141 = sbr.rel (%p138_p2) target bundleno = 361 (0x169), region = 32  ;;  %v421_v2 = vpack.c.bf16 (!%p138_p2), %v207_v1, %v206_v0  ;;  %v209_v4 = vld [vmem:[%s555_s1 + $0x18] sm:$0xff] (!%p138_p2)  ;;  %v210_v6 = vld [vmem:[%s555_s1 + $0x20] sm:$0xff] (!%p138_p2)  ;;  %v211_v7 = vld [vmem:[%s555_s1 + $0x28] sm:$0xff] (!%p138_p2)  ;;  %s463_s7 = smov (!%p138_p2), 32   ;;  %vm203_vm2 = vcmask (!%p138_p2), 523264  }
   0x7   : > { %v425_v5 = vpack.c.bf16 (!%p138_p2), %v209_v4, %v208_v3  ;;  %v429_v8 = vpack.c.bf16 (!%p138_p2), %v211_v7, %v210_v6  ;;  %v212_v9 = vld [vmem:[%s555_s1 + $0x30] sm:$0xff] (!%p138_p2)  ;;  %v213_v10 = vld [vmem:[%s555_s1 + $0x38] sm:$0xff] (!%p138_p2)  ;;  %v214_v16 = vld [vmem:[%s555_s1 + $0x40] sm:$0xff] (!%p138_p2)  ;;  %s464_s18 = smov (!%p138_p2), 64   ;;  %vm225_vm3 = vcmask (!%p138_p2), 785408  }
   0x8   : > { %422 = vmatprep.subr.bf16.mxu0 (!%p138_p2), %v421_v2  ;;  %v433_v15 = vpack.c.bf16 (!%p138_p2), %v213_v10, %v212_v9  ;;  %v215_v17 = vld [vmem:[%s555_s1 + $0x48] sm:$0xff] (!%p138_p2)  ;;  %v216_v20 = vld [vmem:[%s555_s1 + $0x50] sm:$0xff] (!%p138_p2)  ;;  %v217_v21 = vld [vmem:[%s555_s1 + $0x58] sm:$0xff] (!%p138_p2) }
   0x9   : > { %424 = vmatpush3.bf16.msra.mxu0 (!%p138_p2), %v421_v2  ;;  %v437_v18 = vpack.c.bf16 (!%p138_p2), %v215_v17, %v214_v16  ;;  %v441_v23 = vpack.c.bf16 (!%p138_p2), %v217_v21, %v216_v20  ;;  %v373_v34 = vld [vmem:[%s556_s2] ss:$0 sm:$0xff] (!%p138_p2) }
   0xa   : > { %426 = vmatprep.subr.bf16.mxu0 (!%p138_p2), %v425_v5 }
   0xd   : > { %s559_s13 = smov (!%p161_p3, %s364_s13), 1  ;;  %428 = vmatpush3.bf16.msra.mxu0 %v425_v5 }
   0xe   : > { %s378_s26 = sshll.u32 %s559_s13, 4  ;;  %430 = vmatprep.subr.bf16.mxu0 %v429_v8 }
   0xf   : > { %s165_s29 = scalar_lea.vmem %s554_s0, %s378_s26  ;;  %s170_s23 = scalar_lea.vmem %s557_s3, %s378_s26 }
  0x10   : > { %v171_v11 = vld [vmem:[%s165_s29] sm:$0xff]  ;;  %v172_v12 = vld [vmem:[%s165_s29 + $0x8] sm:$0xff] }
  0x11   : > { %v176_v13 = vld [vmem:[%s165_s29 + $0xf] sm:$0x1]  ;;  %175 = vst.msk [vmem:[#allocation2 + $0x9] sm:$0xff] %vm173_vm0, %v172_v12  ;;  %v179_v14 = vld [vmem:[%s165_s29] sm:$0x1]  ;;  %187 = vrot.lane.b32.xlu0 %v171_v11, %s463_s7  ;;  %174 = vst.msk [vmem:[#allocation2 + $0x1] sm:$0xff] %vm173_vm0, %v171_v11  ;;  %432 = vmatpush3.bf16.msra.mxu0 %v429_v8 }
  0x12   : > { %178 = vst.msk [vmem:[#allocation2] sm:$0x1] %vm177_vm1, %v176_v13  ;;  %180 = vst.msk [vmem:[#allocation2 + $0x11] sm:$0x1] %vm177_vm1, %v179_v14  ;;  %434 = vmatprep.subr.bf16.mxu0 %v433_v15 }
  0x15   : > { %189 = vrot.lane.b32.xlu0 %v172_v12, %s463_s7  ;;  %436 = vmatpush3.bf16.msra.mxu0 %v433_v15 }
  0x16   : > { %438 = vmatprep.subr.bf16.mxu0 %v437_v18 }
  0x18   : > { %v183_v19 = vld [vmem:[#allocation2 + $0x2] sm:$0xff] }
  0x19   : > { %195 = vrot.lane.b32.xlu1 %v183_v19, %s464_s18  ;;  %v184_v22 = vld [vmem:[#allocation2 + $0xa] sm:$0xff]  ;;  %440 = vmatpush3.bf16.msra.mxu0 %v437_v18  ;;  %v181_v25 = vld [vmem:[#allocation2] sm:$0xff] }
  0x1a   : > { %442 = vmatprep.subr.bf16.mxu0 %v441_v23  ;;  %v182_v28 = vld [vmem:[#allocation2 + $0x8] sm:$0xff] }
  0x1d   : > { %197 = vrot.lane.b32.xlu1 %v184_v22, %s464_s18  ;;  %444 = vmatpush3.bf16.msra.mxu0 %v441_v23 }
  0x83   : > { %v188_v24 = vpop.permute.xlu0 %187 }
  0x84   : > { %v201_v26 = vsel %vm173_vm0, %v181_v25, %v188_v24 }
  0x87   : > { %v190_v27 = vpop.permute.xlu0 %189 }
  0x88   : > { %v202_v31 = vsel %vm173_vm0, %v182_v28, %v190_v27 }
  0x8b   : > { %v196_v29 = vpop.permute.xlu1 %195 }
  0x8c   : > { %v204_v30 = vsel %vm203_vm2, %v201_v26, %v196_v29 }
  0x8d   : > { %418 = vmatprep.mubr.msk.f32.mxu0 %vm225_vm3, %v204_v30 }
  0x8f   : > { %v198_v32 = vpop.permute.xlu1 %197 }
  0x90   : > { %v205_v33 = vsel %vm203_vm2, %v202_v31, %v198_v32 }
  0x91   : > { %419 = vmatmul.mubr.msk.f32.vlgmr.msra.gmra.mrb[0].mxu0 %vm225_vm3, %v205_v33 }
 0x164   : > { %v420_v35 = vpop.f32.mrb[0].mxu0 }
 0x165   : > { %v304_v36 = vadd.f32 %v420_v35, %v373_v34  ;;  %v298_v37 = vpop.f32.mrb[1].mxu0 }
 0x166   : > { %v299_v38 = vadd.f32 %v373_v34, %v298_v37 }
 0x167   : > { %308 = vst.msk [vmem:[%s170_s23 + $0x8] sm:$0xff] %vm173_vm0, %v304_v36 }
 0x168   : > { %307 = vst.msk [vmem:[%s170_s23] sm:$0xff] %vm173_vm0, %v299_v38 }
 0x169 PF: > { %s13_s12 = sadd.s32 1, %s461_s12  }
 0x16a   : > { %p10_p4 = scmp.ge.s32.totalorder %s13_s12, 4  }
 0x16c   :  { %12 = sbr.rel (!%p10_p4) target bundleno = 1 (0x1), region = 62 }

// kernel: run.21
= control target key start
LH: loop header
LB: loop body
LE: loop exit
PB: predicated region body
PF: predicated region fallthrough
CT: control target
= control target key end

     0   :  { %s329_s12 = smov 0   ;;  %s361_s0 = inlined_call_operand.vmem [shape: f32[2,16,32], index: 0, kind: input, shape index: {}]   ;;  %s362_s1 = inlined_call_operand.vmem [shape: f32[1,32], index: 1, kind: input, shape index: {}]   ;;  %s363_s2 = inlined_call_operand.vmem [shape: f32[1,32], index: 2, kind: input, shape index: {}]   ;;  %s364_s3 = inlined_call_operand.vmem [shape: f32[2,8,32], index: 3, kind: output, shape index: {}]  }
   0x1 LB: > { %s274_s13 = sadd.s32 4294967295, %s307_s12   ;;  %p278_p0 = scmp.ge.s32.totalorder %s307_s12, 1  ;;  %s307_s12 = sphi %s329_s12, %s13_s12  }
   0x2   : > { %p137_p1 = scmp.lt.s32.totalorder %s307_s12, 3 }
   0x4   : > { %p138_p2 = pnand %p278_p0, %p137_p1 }
   0x5   : > { %p160_p3 = scmp.lt.s32.totalorder (!%p138_p2), %s274_s13, 1  ;;  %v282_v0 = vld [vmem:[%s362_s1] ss:$0 sm:$0xff] (!%p138_p2)  ;;  %vm201_vm1 = vcmask (!%p138_p2), 261120   ;;  %vm205_vm3 = vcmask (!%p138_p2), 253952  }
   0x6   : > { %141 = sbr.rel (%p138_p2) target bundleno = 68 (0x44), region = 32  ;;  %v283_v2 = vld [vmem:[%s363_s2] ss:$0 sm:$0xff] (!%p138_p2) }
   0xd   : > { %s366_s13 = smov (!%p160_p3, %s274_s13), 1 }
   0xe   : > { %s288_s14 = sshll.u32 %s366_s13, 4  ;;  %s281_s22 = sshll.u32 %s366_s13, 3 }
   0xf   : > { %s164_s19 = scalar_lea.vmem %s361_s0, %s288_s14  ;;  %s168_s25 = scalar_lea.vmem %s364_s3, %s281_s22 }
  0x10   : > { %v169_v1 = vld [vmem:[%s164_s19] sm:$0xff]  ;;  %v170_v3 = vld [vmem:[%s164_s19 + $0x8] sm:$0xff] }
  0x11   : > { %v178_v4 = vmul.f32 %v282_v0, %v169_v1  ;;  %v179_v5 = vmul.f32 %v282_v0, %v170_v3 }
  0x13   : > { %v187_v6 = vadd.f32 %v283_v2, %v178_v4  ;;  %v188_v7 = vadd.f32 %v283_v2, %v179_v5 }
  0x15   : > { %v191_v8 = vmin.f32 %v187_v6, 0.0  ;;  %v192_v9 = vmin.f32 %v188_v7, 0.0  ;;  %vm189_vm0 = vcmp.gt.f32.partialorder %v187_v6, 0.0  ;;  %vm190_vm2 = vcmp.gt.f32.partialorder %v188_v7, 0.0 }
  0x17   : > { %v193_v10 = vmul.f32 1.442695, %v191_v8  ;;  %v195_v11 = vmul.f32 1.442695, %v192_v9 }
  0x19   : > { %297 = vpow2.f32 %v193_v10 }
  0x1a   : > { %299 = vpow2.f32 %v195_v11 }
  0x23   : > { %v298_v12 = vpop.eup %297 }
  0x24   : > { %v300_v13 = vpop.eup %299  ;;  %v284_v14 = vadd.f32 -1.0, %v298_v12 }
  0x25   : > { %v285_v15 = vadd.f32 -1.0, %v300_v13 }
  0x26   : > { %v199_v16 = vsel %vm189_vm0, %v187_v6, %v284_v14 }
  0x27   : > { %202 = vst.msk [vmem:[#allocation2 + $0x1] sm:$0xff] %vm201_vm1, %v199_v16  ;;  %v200_v17 = vsel %vm190_vm2, %v188_v7, %v285_v15 }
  0x28   : > { %203 = vst.msk [vmem:[#allocation2 + $0x9] sm:$0xff] %vm201_vm1, %v200_v17 }
  0x2e   : > { %v204_v18 = vld [vmem:[#allocation2 + $0x1] sm:$0x1] }
  0x2f   : > { %206 = vst.msk [vmem:[#allocation2] sm:$0x1] %vm205_vm3, %v204_v18  ;;  %v207_v19 = vld [vmem:[#allocation2 + $0x10] sm:$0x1]  ;;  %v210_v20 = vld [vmem:[#allocation2 + $0x8] sm:$0xff] }
  0x30   : > { %208 = vst.msk [vmem:[#allocation2 + $0x11] sm:$0x1] %vm205_vm3, %v207_v19  ;;  %v212_v21 = vmax.f32 %v210_v20, %v200_v17  ;;  %v213_v25 = vld [vmem:[#allocation2 + $0x2] sm:$0xff] }
  0x36   : > { %v209_v22 = vld [vmem:[#allocation2] sm:$0xff] }
  0x37   : > { %v214_v23 = vld [vmem:[#allocation2 + $0xa] sm:$0xff]  ;;  %v211_v24 = vmax.f32 %v209_v22, %v199_v16 }
  0x38   : > { %v216_v26 = vmax.f32 %v212_v21, %v214_v23 }
  0x39   : > { %v215_v27 = vmax.f32 %v211_v24, %v213_v25 }
  0x3a   : > { %218 = vst.msk [vmem:[#allocation2 + $0x8] sm:$0xff] %vm201_vm1, %v216_v26 }
  0x3b   : > { %217 = vst.msk [vmem:[#allocation2] sm:$0xff] %vm201_vm1, %v215_v27 }
  0x42   : > { %v219_v28 = vld [vmem:[#allocation2] ss:$2 sm:$0xff] }
  0x43   : > { %220 = vst.msk [vmem:[%s168_s25] sm:$0xff] %vm201_vm1, %v219_v28 }
  0x44 PF: > { %s13_s12 = sadd.s32 1, %s307_s12  }
  0x45   : > { %p10_p4 = scmp.ge.s32.totalorder %s13_s12, 4  }
  0x47   :  { %12 = sbr.rel (!%p10_p4) target bundleno = 1 (0x1), region = 62 }

// kernel: run.19
= control target key start
LH: loop header
LB: loop body
LE: loop exit
PB: predicated region body
PF: predicated region fallthrough
CT: control target
= control target key end

     0   :  { %s2362_s18 = smov 0   ;;  %s2578_s0 = inlined_call_operand.vmem [shape: f32[2,16,32], index: 0, kind: input, shape index: {}]   ;;  %s2579_s1 = inlined_call_operand.vmem [shape: f32[32,96], index: 1, kind: input, shape index: {}]   ;;  %s2580_s2 = inlined_call_operand.vmem [shape: f32[1,96], index: 2, kind: input, shape index: {}]   ;;  %s2581_s3 = inlined_call_operand.vmem [shape: f32[32,32], index: 3, kind: input, shape index: {}]   ;;  %s2582_s4 = inlined_call_operand.vmem [shape: f32[1,32], index: 4, kind: input, shape index: {}]   ;;  %s2583_s5 = inlined_call_operand.vmem [shape: f32[1,32], index: 5, kind: input, shape index: {}]   ;;  %s2584_s6 = inlined_call_operand.vmem [shape: f32[1,32], index: 6, kind: input, shape index: {}]   ;;  %s2585_s7 = inlined_call_operand.vmem [shape: f32[32,32], index: 7, kind: input, shape index: {}]   ;;  %s2586_s8 = inlined_call_operand.vmem [shape: f32[1,32], index: 8, kind: input, shape index: {}]   ;;  %s2587_s9 = inlined_call_operand.vmem [shape: f32[32,32], index: 9, kind: input, shape index: {}]   ;;  %s2588_s10 = inlined_call_operand.vmem [shape: f32[1,32], index: 10, kind: input, shape index: {}]   ;;  %s2589_s11 = inlined_call_operand.vmem [shape: f32[1,32], index: 11, kind: input, shape index: {}, may-alias: {11,13}]   ;;  %s2590_s12 = inlined_call_operand.vmem [shape: f32[1,32], index: 12, kind: input, shape index: {}, may-alias: {12,14}]   ;;  %s2591_s13 = inlined_call_operand.vmem [shape: f32[1,32], index: 13, kind: input, shape index: {}, may-alias: {11,13}]   ;;  %s2592_s14 = inlined_call_operand.vmem [shape: f32[1,32], index: 14, kind: input, shape index: {}, may-alias: {12,14}]   ;;  %s2593_s15 = inlined_call_operand.vmem [shape: f32[2,16,32], index: 15, kind: output, shape index: {}]  }
   0x1 LB: > { %s1873_s19 = sadd.s32 4294967295, %s2266_s18   ;;  %p1877_p0 = scmp.ge.s32.totalorder %s2266_s18, 1  ;;  %s2266_s18 = sphi %s2362_s18, %s25_s18  }
   0x2   : > { %p437_p1 = scmp.lt.s32.totalorder %s2266_s18, 3 }
   0x4   : > { %p438_p2 = pnand %p1877_p0, %p437_p1 }
   0x5   : > { %v497_v0 = vld [vmem:[%s2579_s1] sm:$0xff] (!%p438_p2)  ;;  %v498_v1 = vld [vmem:[%s2579_s1 + $0x8] sm:$0xff] (!%p438_p2)  ;;  %v499_v2 = vld [vmem:[%s2579_s1 + $0x10] sm:$0xff] (!%p438_p2)  ;;  %p485_p3 = scmp.lt.s32.totalorder (!%p438_p2), %s1873_s19, 1  ;;  %vm508_vm0 = vcmask (!%p438_p2), 261120   ;;  %vm596_vm1 = vcmask (!%p438_p2), 64512  }
   0x6   : > { %441 = sbr.rel (%p438_p2) target bundleno = 4151 (0x1037), region = 80  ;;  %v2082_v3 = vpack.c.bf16 (!%p438_p2), %v498_v1, %v497_v0  ;;  %v500_v4 = vld [vmem:[%s2579_s1 + $0x18] sm:$0xff] (!%p438_p2)  ;;  %v1882_v8 = vld [vmem:[%s2580_s2] ss:$0 sm:$0xff] (!%p438_p2)  ;;  %s2268_s17 = smov (!%p438_p2), 96   ;;  %vm2414_vm2 = vmpackc.low (!%p438_p2), %vm596_vm1, %vm596_vm1  ;;  %vm682_vm3 = vcmask (!%p438_p2), 130048  }
   0x7   : > { %v2086_v5 = vpack.c.bf16 (!%p438_p2), %v500_v4, %v499_v2  ;;  %s2269_s13 = smov (!%p438_p2), 64   ;;  %s2270_s14 = smov (!%p438_p2), 88   ;;  %vm1426_vm4 = vcmask (!%p438_p2), 195584  }
   0x8   : > { %2083 = vmatprep.subr.bf16.mxu0 (!%p438_p2), %v2082_v3  ;;  %s2271_s20 = smov (!%p438_p2), 120   ;;  %s2272_s21 = smov (!%p438_p2), 56  }
   0x9   : > { %2085 = vmatpush3.bf16.msra.mxu0 (!%p438_p2), %v2082_v3  ;;  %s2273_s22 = smov (!%p438_p2), 80   ;;  %s2274_s23 = smov (!%p438_p2), 112  }
   0xa   : > { %2087 = vmatprep.subr.bf16.mxu0 (!%p438_p2), %v2086_v5  ;;  %s2275_s24 = smov (!%p438_p2), 72   ;;  %s2276_s25 = smov (!%p438_p2), 104  }
   0xb   : > { %s2277_s27 = smov (!%p438_p2), 48   ;;  %s2278_s28 = smov (!%p438_p2), 8  }
   0xc   : > { %s2280_s30 = smov (!%p438_p2), 16  }
   0xd   : > { %s2597_s19 = smov (!%p485_p3, %s1873_s19), 1  ;;  %2089 = vmatpush3.bf16.msra.mxu0 %v2086_v5 }
   0xe   : > { %s1924_s26 = sshll.u32 %s2597_s19, 4 }
   0xf   : > { %s489_s29 = scalar_lea.vmem %s2578_s0, %s1924_s26 }
  0x10   : > { %v2390_v6 = vld [vmem:[%s489_s29] sm:$0xff]  ;;  %v2394_v7 = vld [vmem:[%s489_s29 + $0x8] sm:$0xff]  ;;  %s2279_s29 = smov 40  }
  0x11   : > { %1990 = vmatprep.mubr.msk.f32.mxu0 %vm508_vm0, %v2390_v6 }
  0x12   : > { %1991 = vmatmul.mubr.msk.f32.vlgmr.msra.gmra.mrb[0].mxu0 %vm508_vm0, %v2394_v7 }
  0xe5   : > { %v1992_v9 = vpop.f32.mrb[0].mxu0 }
  0xe6   : > { %v2401_v10 = vadd.f32 %v1992_v9, %v1882_v8  ;;  %v581_v11 = vpop.f32.mrb[1].mxu0 }
  0xe7   : > { %v2403_v12 = vadd.f32 %v1882_v8, %v581_v11 }
  0xe9   : > { %1997 = vmatprep.mubr.msk.f32.mxu1 %vm596_vm1, %v2403_v12  ;;  %v2409_v13 = vpack.i.bf16 %v2401_v10, %v2403_v12 }
  0xeb   : > { %2177 = vrot.lane.b32.xlu0 %v2409_v13, %s2268_s17 }
 0x15d   : > { %v2178_v14 = vpop.permute.xlu0 %2177 }
 0x15e   : > { %v2180_v15 = vunpack.i.h.bf16 %v2178_v14  ;;  %v2179_v16 = vunpack.i.l.bf16 %v2178_v14 }
 0x160   : > { %v2090_v18 = vpack.c.bf16 %v2180_v15, %v2179_v16 }
 0x162   : > { %2092 = vmatprep.subr.msk.bf16.mxu1 %vm2414_vm2, %v2090_v18 }
 0x163   : > { %2095 = vmatpush3.bf16.xpose.msk.msra.mxu1 %vm2414_vm2, %v2090_v18 }
 0x16a   : > { %1998 = vmatmul.mubr.msk.f32.vlgmr.msra.gmra.mrb[0].mxu1 %vm596_vm1, %v2401_v10 }
 0x23d   : > { %v1999_v19 = vpop.f32.mrb[0].mxu1 }
 0x23e   : > { %v681_v20 = vmul.f32 0.35355338, %v1999_v19  ;;  %v671_v21 = vpop.f32.mrb[1].mxu1 }
 0x23f   : > { %v680_v22 = vmul.f32 0.35355338, %v671_v21 }
 0x240   : > { %v686_v23 = vsel %vm682_vm3, %v681_v20, -inf }
 0x241   : > { %687 = vmax.xlane.f32.xlu1 %v686_v23  ;;  %v683_v24 = vsel %vm682_vm3, %v680_v22, -inf }
 0x242   : > { %684 = vmax.xlane.f32.xlu0 %v683_v24 }
 0x252   : > { %2182 = vrot.lane.b32.xlu1 %v2409_v13, %s2269_s13 }
 0x256   : > { %2187 = vrot.lane.b32.xlu1 %v2409_v13, %s2270_s14 }
 0x258   : > { %794 = vrot.lane.b32.xlu0 %v2401_v10, %s2271_s20 }
 0x2ce   : > { %v688_v25 = vpop.xlane.xlu1 %687 }
 0x2cf   : > { %v690_v26 = vsub.f32 %v681_v20, %v688_v25  ;;  %v685_v27 = vpop.xlane.xlu0 %684 }
 0x2d0   : > { %v689_v28 = vsub.f32 %v680_v22, %v685_v27 }
 0x2d1   : > { %v693_v29 = vmul.f32 1.442695, %v690_v26 }
 0x2d2   : > { %v691_v30 = vmul.f32 1.442695, %v689_v28  ;;  %v2183_v31 = vpop.permute.xlu1 %2182 }
 0x2d3   : > { %2216 = vpow2.f32 %v693_v29  ;;  %v2185_v32 = vunpack.i.h.bf16 %v2183_v31  ;;  %v2184_v33 = vunpack.i.l.bf16 %v2183_v31  ;;  %v795_v50 = vpop.permute.xlu0 %794 }
 0x2d4   : > { %2218 = vpow2.f32 %v691_v30 }
 0x2d5   : > { %v2096_v34 = vpack.c.bf16 %v2185_v32, %v2184_v33 }
 0x2d6   : > { %v2188_v35 = vpop.permute.xlu1 %2187 }
 0x2d7   : > { %v2190_v36 = vunpack.i.h.bf16 %v2188_v35  ;;  %v2189_v37 = vunpack.i.l.bf16 %v2188_v35  ;;  %2097 = vmatprep.subr.bf16.mxu1 %v2096_v34 }
 0x2d8   : > { %2099 = vmatpush3.bf16.msra.mxu1 %v2096_v34 }
 0x2d9   : > { %v2100_v38 = vpack.c.bf16 %v2190_v36, %v2189_v37 }
 0x2db   : > { %2102 = vmatprep.subr.msk.bf16.mxu1 %vm2414_vm2, %v2100_v38 }
 0x2dd   : > { %v2217_v39 = vpop.eup %2216 }
 0x2de   : > { %v698_v40 = vsel %vm682_vm3, %v2217_v39, 0.0  ;;  %v2219_v41 = vpop.eup %2218 }
 0x2df   : > { %699 = vadd.xlane.f32.xlu1 %v698_v40  ;;  %v695_v42 = vsel %vm682_vm3, %v2219_v41, 0.0 }
 0x2e3   : > { %696 = vadd.xlane.f32.xlu1 %v695_v42 }
 0x2f4   : > { %792 = vrot.lane.b32.xlu1 %v2403_v12, %s2271_s20 }
 0x36c   : > { %v700_v43 = vpop.xlane.xlu1 %699 }
 0x36d   : > { %2220 = vrcp.f32 %v700_v43 }
 0x370   : > { %v697_v44 = vpop.xlane.xlu1 %696 }
 0x371   : > { %2222 = vrcp.f32 %v697_v44 }
 0x374   : > { %v793_v49 = vpop.permute.xlu1 %792 }
 0x377   : > { %v2221_v45 = vpop.eup %2220 }
 0x378   : > { %v704_v48 = vmul.f32 %v2221_v45, %v2217_v39 }
 0x37b   : > { %v2223_v46 = vpop.eup %2222 }
 0x37c   : > { %v703_v47 = vmul.f32 %v2223_v46, %v2219_v41 }
 0x37e   : > { %2004 = vmatprep.mubr.msk.f32.mxu1 %vm682_vm3, %v703_v47 }
 0x37f   : > { %2005 = vmatmul.mubr.msk.f32.vlgmr.msra.gmra.mrb[2].mxu1 %vm682_vm3, %v704_v48 }
 0x380   : > { %2105 = vmatpush3.bf16.xpose.msk.msra.mxu1 %vm2414_vm2, %v2100_v38  ;;  %2011 = vmatprep.mubr.msk.f32.mxu1 %vm596_vm1, %v793_v49 }
 0x387   : > { %2012 = vmatmul.mubr.msk.f32.vlgmr.msra.gmra.mrb[4].mxu1 %vm596_vm1, %v795_v50 }
 0x452   : > { %v2440_v51 = vpop.f32.mrb[2].mxu1 }
 0x453   : > { %v2442_v52 = vpop.f32.mrb[3].mxu1 }
 0x45a   : > { %v2013_v53 = vpop.f32.mrb[4].mxu1 }
 0x45b   : > { %v884_v54 = vmul.f32 0.35355338, %v2013_v53  ;;  %v874_v55 = vpop.f32.mrb[5].mxu1 }
 0x45c   : > { %v883_v56 = vmul.f32 0.35355338, %v874_v55 }
 0x45d   : > { %v888_v57 = vsel %vm682_vm3, %v884_v54, -inf }
 0x45e   : > { %889 = vmax.xlane.f32.xlu0 %v888_v57  ;;  %v885_v58 = vsel %vm682_vm3, %v883_v56, -inf }
 0x45f   : > { %886 = vmax.xlane.f32.xlu1 %v885_v58 }
 0x470   : > { %2192 = vrot.lane.b32.xlu1 %v2409_v13, %s2272_s21 }
 0x474   : > { %2197 = vrot.lane.b32.xlu0 %v2409_v13, %s2273_s22  ;;  %994 = vrot.lane.b32.xlu1 %v2403_v12, %s2274_s23 }
 0x4eb   : > { %v890_v59 = vpop.xlane.xlu0 %889 }
 0x4ec   : > { %v892_v60 = vsub.f32 %v884_v54, %v890_v59  ;;  %v887_v61 = vpop.xlane.xlu1 %886 }
 0x4ed   : > { %v891_v62 = vsub.f32 %v883_v56, %v887_v61 }
 0x4ee   : > { %v895_v63 = vmul.f32 1.442695, %v892_v60 }
 0x4ef   : > { %v893_v0 = vmul.f32 1.442695, %v891_v62  ;;  %v2198_v1 = vpop.permute.xlu0 %2197 }
 0x4f0   : > { %2224 = vpow2.f32 %v895_v63  ;;  %v2193_v2 = vpop.permute.xlu1 %2192  ;;  %v2200_v3 = vunpack.i.h.bf16 %v2198_v1  ;;  %v2199_v4 = vunpack.i.l.bf16 %v2198_v1 }
 0x4f1   : > { %v2195_v5 = vunpack.i.h.bf16 %v2193_v2  ;;  %v2194_v8 = vunpack.i.l.bf16 %v2193_v2  ;;  %2226 = vpow2.f32 %v893_v0 }
 0x4f2   : > { %v2110_v11 = vpack.c.bf16 %v2200_v3, %v2199_v4 }
 0x4f3   : > { %v2106_v9 = vpack.c.bf16 %v2195_v5, %v2194_v8 }
 0x4f4   : > { %v995_v19 = vpop.permute.xlu1 %994 }
 0x4f5   : > { %2107 = vmatprep.subr.bf16.mxu0 %v2106_v9 }
 0x4f6   : > { %2109 = vmatpush3.bf16.msra.mxu0 %v2106_v9 }
 0x4f7   : > { %2112 = vmatprep.subr.msk.bf16.mxu0 %vm2414_vm2, %v2110_v11 }
 0x4fa   : > { %v2225_v14 = vpop.eup %2224 }
 0x4fb   : > { %v900_v15 = vsel %vm682_vm3, %v2225_v14, 0.0  ;;  %v2227_v16 = vpop.eup %2226 }
 0x4fc   : > { %901 = vadd.xlane.f32.xlu1 %v900_v15  ;;  %v897_v18 = vsel %vm682_vm3, %v2227_v16, 0.0 }
 0x500   : > { %898 = vadd.xlane.f32.xlu1 %v897_v18 }
 0x511   : > { %996 = vrot.lane.b32.xlu1 %v2401_v10, %s2274_s23 }
 0x589   : > { %v902_v20 = vpop.xlane.xlu1 %901 }
 0x58a   : > { %2228 = vrcp.f32 %v902_v20 }
 0x58d   : > { %v899_v21 = vpop.xlane.xlu1 %898 }
 0x58e   : > { %2230 = vrcp.f32 %v899_v21 }
 0x591   : > { %v997_v26 = vpop.permute.xlu1 %996 }
 0x594   : > { %v2229_v22 = vpop.eup %2228 }
 0x595   : > { %v906_v25 = vmul.f32 %v2229_v22, %v2225_v14 }
 0x598   : > { %v2231_v23 = vpop.eup %2230 }
 0x599   : > { %v905_v24 = vmul.f32 %v2231_v23, %v2227_v16 }
 0x59b   : > { %2018 = vmatprep.mubr.msk.f32.mxu0 %vm682_vm3, %v905_v24 }
 0x59c   : > { %2019 = vmatmul.mubr.msk.f32.vlgmr.msra.gmra.mrb[2].mxu0 %vm682_vm3, %v906_v25 }
 0x59d   : > { %2115 = vmatpush3.bf16.xpose.msk.msra.mxu0 %vm2414_vm2, %v2110_v11  ;;  %2025 = vmatprep.mubr.msk.f32.mxu0 %vm596_vm1, %v995_v19 }
 0x5a4   : > { %2026 = vmatmul.mubr.msk.f32.vlgmr.msra.gmra.mrb[4].mxu0 %vm596_vm1, %v997_v26 }
 0x66f   : > { %v2460_v27 = vpop.f32.mrb[2].mxu0 }
 0x670   : > { %v2462_v28 = vpop.f32.mrb[3].mxu0 }
 0x677   : > { %v2027_v29 = vpop.f32.mrb[4].mxu0 }
 0x678   : > { %v1086_v30 = vmul.f32 0.35355338, %v2027_v29  ;;  %v1076_v31 = vpop.f32.mrb[5].mxu0 }
 0x679   : > { %v1085_v32 = vmul.f32 0.35355338, %v1076_v31  ;;  %v1431_v31 = vld [vmem:[%s2581_s3 + $0x10] sm:$0xff] }
 0x67a   : > { %v1090_v33 = vsel %vm682_vm3, %v1086_v30, -inf }
 0x67b   : > { %1091 = vmax.xlane.f32.xlu0 %v1090_v33  ;;  %v1087_v34 = vsel %vm682_vm3, %v1085_v32, -inf  ;;  %v1432_v33 = vld [vmem:[%s2581_s3 + $0x18] sm:$0xff] }
 0x67c   : > { %1088 = vmax.xlane.f32.xlu1 %v1087_v34  ;;  %v2134_v34 = vpack.c.bf16 %v1432_v33, %v1431_v31 }
 0x708   : > { %v1092_v35 = vpop.xlane.xlu0 %1091 }
 0x709   : > { %v1094_v36 = vsub.f32 %v1086_v30, %v1092_v35  ;;  %v1089_v37 = vpop.xlane.xlu1 %1088  ;;  %v1430_v30 = vld [vmem:[%s2581_s3 + $0x8] sm:$0xff] }
 0x70a   : > { %v1093_v38 = vsub.f32 %v1085_v32, %v1089_v37 }
 0x70b   : > { %v1097_v39 = vmul.f32 1.442695, %v1094_v36 }
 0x70c   : > { %v1095_v40 = vmul.f32 1.442695, %v1093_v38 }
 0x70d   : > { %2232 = vpow2.f32 %v1097_v39 }
 0x70e   : > { %2234 = vpow2.f32 %v1095_v40 }
 0x717   : > { %v2233_v41 = vpop.eup %2232 }
 0x718   : > { %v2235_v42 = vpop.eup %2234  ;;  %v1102_v43 = vsel %vm682_vm3, %v2233_v41, 0.0 }
 0x719   : > { %1103 = vadd.xlane.f32.xlu1 %v1102_v43  ;;  %v1099_v44 = vsel %vm682_vm3, %v2235_v42, 0.0 }
 0x71a   : > { %1100 = vadd.xlane.f32.xlu0 %v1099_v44 }
 0x72a   : > { %2207 = vrot.lane.b32.xlu1 %v2409_v13, %s2275_s24  ;;  %s2281_s24 = smov 24  }
 0x72e   : > { %1196 = vrot.lane.b32.xlu1 %v2403_v12, %s2276_s25 }
 0x730   : > { %2202 = vrot.lane.b32.xlu0 %v2409_v13, %s2277_s27 }
 0x734   : > { %1198 = vrot.lane.b32.xlu0 %v2401_v10, %s2276_s25 }
 0x7a6   : > { %v1104_v45 = vpop.xlane.xlu1 %1103 }
 0x7a7   : > { %2236 = vrcp.f32 %v1104_v45  ;;  %v1101_v46 = vpop.xlane.xlu0 %1100 }
 0x7a8   : > { %2238 = vrcp.f32 %v1101_v46 }
 0x7aa   : > { %v2208_v47 = vpop.permute.xlu1 %2207 }
 0x7ab   : > { %v2203_v48 = vpop.permute.xlu0 %2202  ;;  %v2210_v49 = vunpack.i.h.bf16 %v2208_v47  ;;  %v2209_v50 = vunpack.i.l.bf16 %v2208_v47 }
 0x7ac   : > { %v2205_v53 = vunpack.i.h.bf16 %v2203_v48  ;;  %v2204_v54 = vunpack.i.l.bf16 %v2203_v48 }
 0x7ad   : > { %v2120_v56 = vpack.c.bf16 %v2210_v49, %v2209_v50  ;;  %v1909_v49 = vld [vmem:[%s2582_s4] ss:$0 sm:$0xff] }
 0x7ae   : > { %v2116_v55 = vpack.c.bf16 %v2205_v53, %v2204_v54  ;;  %v1197_v59 = vpop.permute.xlu1 %1196 }
 0x7af   : > { %v1199_v60 = vpop.permute.xlu0 %1198 }
 0x7b0   : > { %2117 = vmatprep.subr.bf16.mxu1 %v2116_v55 }
 0x7b1   : > { %v2237_v57 = vpop.eup %2236  ;;  %2119 = vmatpush3.bf16.msra.mxu1 %v2116_v55 }
 0x7b2   : > { %v2239_v12 = vpop.eup %2238  ;;  %2122 = vmatprep.subr.msk.bf16.mxu1 %vm2414_vm2, %v2120_v56  ;;  %v1108_v58 = vmul.f32 %v2237_v57, %v2233_v41 }
 0x7b3   : > { %v1107_v10 = vmul.f32 %v2239_v12, %v2235_v42 }
 0x7b5   : > { %2032 = vmatprep.mubr.msk.f32.mxu1 %vm682_vm3, %v1107_v10 }
 0x7b6   : > { %2033 = vmatmul.mubr.msk.f32.vlgmr.msra.gmra.mrb[6].mxu1 %vm682_vm3, %v1108_v58 }
 0x7b7   : > { %2039 = vmatprep.mubr.msk.f32.mxu1 %vm596_vm1, %v1197_v59 }
 0x7ba   : > { %2125 = vmatpush3.bf16.xpose.msk.msra.mxu1 %vm2414_vm2, %v2120_v56 }
 0x7c1   : > { %2040 = vmatmul.mubr.msk.f32.vlgmr.msra.gmra.mrb[8].mxu1 %vm596_vm1, %v1199_v60 }
 0x889   : > { %v2034_v61 = vpop.f32.mrb[6].mxu1 }
 0x88a   : > { %v1187_v62 = vpop.f32.mrb[7].mxu1 }
 0x894   : > { %v2041_v63 = vpop.f32.mrb[8].mxu1 }
 0x895   : > { %v1288_v0 = vmul.f32 0.35355338, %v2041_v63  ;;  %v1278_v1 = vpop.f32.mrb[9].mxu1 }
 0x896   : > { %v1287_v2 = vmul.f32 0.35355338, %v1278_v1  ;;  %v1569_v1 = vld [vmem:[%s2585_s7 + $0x8] sm:$0xff] }
 0x897   : > { %v1292_v3 = vsel %vm682_vm3, %v1288_v0, -inf }
 0x898   : > { %1293 = vmax.xlane.f32.xlu0 %v1292_v3  ;;  %v1289_v4 = vsel %vm682_vm3, %v1287_v2, -inf  ;;  %v1570_v3 = vld [vmem:[%s2585_s7 + $0x10] sm:$0xff] }
 0x899   : > { %1290 = vmax.xlane.f32.xlu1 %v1289_v4  ;;  %v1571_v4 = vld [vmem:[%s2585_s7 + $0x18] sm:$0xff] }
 0x925   : > { %v1294_v5 = vpop.xlane.xlu0 %1293 }
 0x926   : > { %v1296_v8 = vsub.f32 %v1288_v0, %v1294_v5  ;;  %v1291_v9 = vpop.xlane.xlu1 %1290  ;;  %v2142_v5 = vpack.c.bf16 %v1571_v4, %v1570_v3 }
 0x927   : > { %v1295_v17 = vsub.f32 %v1287_v2, %v1291_v9 }
 0x928   : > { %v1299_v11 = vmul.f32 1.442695, %v1296_v8 }
 0x929   : > { %v1297_v14 = vmul.f32 1.442695, %v1295_v17 }
 0x92a   : > { %2240 = vpow2.f32 %v1299_v11 }
 0x92b   : > { %2242 = vpow2.f32 %v1297_v14 }
 0x934   : > { %v2241_v15 = vpop.eup %2240 }
 0x935   : > { %v2243_v16 = vpop.eup %2242  ;;  %v1304_v18 = vsel %vm682_vm3, %v2241_v15, 0.0 }
 0x936   : > { %1305 = vadd.xlane.f32.xlu1 %v1304_v18  ;;  %v1301_v19 = vsel %vm682_vm3, %v2243_v16, 0.0  ;;  %v1912_v18 = vld [vmem:[%s2583_s5] ss:$0 sm:$0xff] }
 0x937   : > { %1302 = vadd.xlane.f32.xlu0 %v1301_v19 }
 0x947   : > { %1400 = vrot.lane.b32.xlu1 %v2462_v28, %s2278_s28 }
 0x94b   : > { %1402 = vrot.lane.b32.xlu1 %v2460_v27, %s2278_s28 }
 0x94d   : > { %2212 = vrot.lane.b32.xlu0 %v2409_v13, %s2279_s29  ;;  %v1429_v13 = vld [vmem:[%s2581_s3] sm:$0xff] }
 0x94e   : > { %v2130_v32 = vpack.c.bf16 %v1430_v30, %v1429_v13  ;;  %v1681_v30 = vld [vmem:[%s2587_s9 + $0x18] sm:$0xff] }
 0x94f   : > { %1410 = vrot.lane.b32.xlu1 %v2034_v61, %s2280_s30 }
 0x951   : > { %1408 = vrot.lane.b32.xlu0 %v1187_v62, %s2280_s30  ;;  %s494_s30 = scalar_lea.vmem %s2593_s15, %s1924_s26 }
 0x9c3   : > { %v1306_v20 = vpop.xlane.xlu1 %1305 }
 0x9c4   : > { %2244 = vrcp.f32 %v1306_v20  ;;  %v1303_v21 = vpop.xlane.xlu0 %1302  ;;  %v1913_v20 = vld [vmem:[%s2584_s6] ss:$0 sm:$0xff] }
 0x9c5   : > { %2246 = vrcp.f32 %v1303_v21 }
 0x9c7   : > { %v1401_v37 = vpop.permute.xlu1 %1400 }
 0x9c8   : > { %v2213_v22 = vpop.permute.xlu0 %2212  ;;  %v1422_v41 = vsel %vm596_vm1, %v2442_v52, %v1401_v37 }
 0x9c9   : > { %v2215_v23 = vunpack.i.h.bf16 %v2213_v22  ;;  %v2214_v24 = vunpack.i.l.bf16 %v2213_v22 }
 0x9cb   : > { %v2126_v25 = vpack.c.bf16 %v2215_v23, %v2214_v24  ;;  %v1403_v38 = vpop.permute.xlu1 %1402 }
 0x9cc   : > { %v1409_v40 = vpop.permute.xlu0 %1408  ;;  %v1423_v43 = vsel %vm596_vm1, %v2440_v51, %v1403_v38 }
 0x9cd   : > { %2127 = vmatprep.subr.bf16.mxu0 %v2126_v25  ;;  %v1424_v44 = vsel %vm682_vm3, %v1422_v41, %v1409_v40 }
 0x9ce   : > { %v2245_v26 = vpop.eup %2244  ;;  %2129 = vmatpush3.bf16.msra.mxu0 %v2126_v25 }
 0x9cf   : > { %v2247_v28 = vpop.eup %2246  ;;  %v1310_v27 = vmul.f32 %v2245_v26, %v2241_v15  ;;  %2131 = vmatprep.subr.bf16.mxu0 %v2130_v32  ;;  %v1411_v39 = vpop.permute.xlu1 %1410 }
 0x9d0   : > { %v1309_v29 = vmul.f32 %v2247_v28, %v2243_v16  ;;  %v1425_v46 = vsel %vm682_vm3, %v1423_v43, %v1411_v39  ;;  %v1678_v28 = vld [vmem:[%s2587_s9] sm:$0xff] }
 0x9d2   : > { %2046 = vmatprep.mubr.msk.f32.mxu0 %vm682_vm3, %v1309_v29  ;;  %v1679_v29 = vld [vmem:[%s2587_s9 + $0x8] sm:$0xff] }
 0x9d3   : > { %2047 = vmatmul.mubr.msk.f32.vlgmr.msra.gmra.mrb[6].mxu0 %vm682_vm3, %v1310_v27  ;;  %v1680_v27 = vld [vmem:[%s2587_s9 + $0x10] sm:$0xff]  ;;  %v2146_v13 = vpack.c.bf16 %v1679_v29, %v1678_v28 }
 0x9d4   : > { %2133 = vmatpush3.bf16.msra.mxu0 %v2130_v32  ;;  %v2150_v31 = vpack.c.bf16 %v1681_v30, %v1680_v27  ;;  %v1914_v32 = vld [vmem:[%s2586_s8] ss:$0 sm:$0xff] }
 0x9d5   : > { %2135 = vmatprep.subr.bf16.mxu0 %v2134_v34 }
 0x9d8   : > { %2137 = vmatpush3.bf16.msra.mxu0 %v2134_v34 }
 0x9d9   : > { %2147 = vmatprep.subr.bf16.mxu0 %v2146_v13 }
 0xaa6   : > { %v2048_v35 = vpop.f32.mrb[6].mxu0 }
 0xaa7   : > { %1418 = vrot.lane.b32.xlu1 %v2048_v35, %s2281_s24  ;;  %v1389_v36 = vpop.f32.mrb[7].mxu0 }
 0xaa8   : > { %1416 = vrot.lane.b32.xlu0 %v1389_v36, %s2281_s24 }
 0xb19   : > { %v1419_v42 = vpop.permute.xlu1 %1418 }
 0xb1a   : > { %v1417_v45 = vpop.permute.xlu0 %1416  ;;  %v1428_v48 = vsel %vm1426_vm4, %v1425_v46, %v1419_v42 }
 0xb1b   : > { %v1427_v47 = vsel %vm1426_vm4, %v1424_v44, %v1417_v45 }
 0xb1c   : > { %2057 = vmatprep.mubr.msk.f32.mxu0 %vm508_vm0, %v1427_v47 }
 0xb1d   : > { %2058 = vmatmul.mubr.msk.f32.vlgmr.msra.gmra.mrb[8].mxu0 %vm508_vm0, %v1428_v48 }
 0xb1e   : > { %2149 = vmatpush3.bf16.msra.mxu0 %v2146_v13 }
 0xb1f   : > { %2151 = vmatprep.subr.bf16.mxu0 %v2150_v31 }
 0xb22   : > { %2153 = vmatpush3.bf16.msra.mxu0 %v2150_v31 }
 0xbf0   : > { %v2059_v52 = vpop.f32.mrb[8].mxu0 }
 0xbf1   : > { %v1518_v50 = vadd.f32 %v2059_v52, %v1909_v49  ;;  %v1512_v53 = vpop.f32.mrb[9].mxu0 }
 0xbf2   : > { %v1513_v54 = vadd.f32 %v1909_v49, %v1512_v53 }
 0xbf3   : > { %v1522_v51 = vadd.f32 %v1518_v50, %v2394_v7 }
 0xbf4   : > { %v1521_v55 = vadd.f32 %v1513_v54, %v2390_v6  ;;  %v1568_v6 = vld [vmem:[%s2585_s7] sm:$0xff] }
 0xbf5   : > { %v1528_v56 = vsel %vm508_vm0, %v1522_v51, 0.0  ;;  %v2138_v2 = vpack.c.bf16 %v1569_v1, %v1568_v6 }
 0xbf6   : > { %1529 = vadd.xlane.f32.xlu1 %v1528_v56  ;;  %v1525_v57 = vsel %vm508_vm0, %v1521_v55, 0.0 }
 0xbf7   : > { %1526 = vadd.xlane.f32.xlu0 %v1525_v57  ;;  %2139 = vmatprep.subr.bf16.mxu1 %v2138_v2 }
 0xbf8   : > { %2141 = vmatpush3.bf16.msra.mxu1 %v2138_v2 }
 0xbf9   : > { %2143 = vmatprep.subr.bf16.mxu1 %v2142_v5 }
 0xbfc   : > { %2145 = vmatpush3.bf16.msra.mxu1 %v2142_v5 }
 0xc83   : > { %v1530_v12 = vpop.xlane.xlu1 %1529 }
 0xc84   : > { %v1533_v10 = vmul.f32 0.03125, %v1530_v12  ;;  %v1527_v58 = vpop.xlane.xlu0 %1526 }
 0xc85   : > { %v1532_v59 = vmul.f32 0.03125, %v1527_v58 }
 0xc86   : > { %v1535_v60 = vsub.f32 %v1522_v51, %v1533_v10 }
 0xc87   : > { %v1534_v61 = vsub.f32 %v1521_v55, %v1532_v59  ;;  %v1917_v55 = vld [vmem:[%s2588_s10] ss:$0 sm:$0xff] }
 0xc88   : > { %v1537_v0 = vmul.f32 %v1535_v60, %v1535_v60 }
 0xc89   : > { %v1536_v62 = vmul.f32 %v1534_v61, %v1534_v61 }
 0xc8a   : > { %v1541_v7 = vsel %vm508_vm0, %v1537_v0, 0.0 }
 0xc8b   : > { %v1538_v63 = vsel %vm508_vm0, %v1536_v62, 0.0 }
 0xc8c   : > { %1539 = vadd.xlane.f32.xlu0 %v1538_v63 }
 0xc90   : > { %1542 = vadd.xlane.f32.xlu0 %v1541_v7 }
 0xd19   : > { %v1540_v8 = vpop.xlane.xlu0 %1539 }
 0xd1a   : > { %v1544_v9 = vmul.f32 0.03125, %v1540_v8 }
 0xd1c   : > { %v1546_v17 = vadd.f32 1e-05, %v1544_v9 }
 0xd1d   : > { %v1543_v11 = vpop.xlane.xlu0 %1542 }
 0xd1e   : > { %2248 = vrsqrt.f32 %v1546_v17  ;;  %v1545_v14 = vmul.f32 0.03125, %v1543_v11 }
 0xd20   : > { %v1547_v15 = vadd.f32 1e-05, %v1545_v14 }
 0xd22   : > { %2250 = vrsqrt.f32 %v1547_v15 }
 0xd28   : > { %v2249_v16 = vpop.eup %2248 }
 0xd29   : > { %v1550_v19 = vmul.f32 %v2249_v16, %v1534_v61 }
 0xd2b   : > { %v1558_v21 = vmul.f32 %v1912_v18, %v1550_v19 }
 0xd2c   : > { %v2251_v22 = vpop.eup %2250 }
 0xd2d   : > { %v1551_v23 = vmul.f32 %v2251_v22, %v1535_v60  ;;  %v1566_v24 = vadd.f32 %v1913_v20, %v1558_v21  ;;  %v1921_v21 = vld [vmem:[%s2590_s12] ss:$0 sm:$0xff] }
 0xd2f   : > { %v1559_v25 = vmul.f32 %v1912_v18, %v1551_v23  ;;  %2068 = vmatprep.mubr.msk.f32.mxu1 %vm508_vm0, %v1566_v24  ;;  %v1920_v18 = vld [vmem:[%s2589_s11] ss:$0 sm:$0xff] }
 0xd31   : > { %v1567_v26 = vadd.f32 %v1913_v20, %v1559_v25 }
 0xd33   : > { %2069 = vmatmul.mubr.msk.f32.vlgmr.msra.gmra.mrb[10].mxu1 %vm508_vm0, %v1567_v26 }
 0xe06   : > { %v2070_v33 = vpop.f32.mrb[10].mxu1 }
 0xe07   : > { %v1657_v34 = vadd.f32 %v2070_v33, %v1914_v32  ;;  %v1651_v35 = vpop.f32.mrb[11].mxu1 }
 0xe08   : > { %v1652_v36 = vadd.f32 %v1914_v32, %v1651_v35 }
 0xe09   : > { %v1663_v37 = vmul.f32 0.044715, %v1657_v34  ;;  %v1661_v53 = vmul.f32 0.5, %v1657_v34 }
 0xe0a   : > { %v1662_v38 = vmul.f32 0.044715, %v1652_v36  ;;  %v1660_v52 = vmul.f32 0.5, %v1652_v36 }
 0xe0b   : > { %v1665_v39 = vmul.f32 %v1663_v37, %v1657_v34 }
 0xe0c   : > { %v1664_v40 = vmul.f32 %v1662_v38, %v1652_v36 }
 0xe0d   : > { %v1667_v41 = vmul.f32 %v1665_v39, %v1657_v34 }
 0xe0e   : > { %v1666_v42 = vmul.f32 %v1664_v40, %v1652_v36 }
 0xe0f   : > { %v1669_v43 = vadd.f32 %v1667_v41, %v1657_v34 }
 0xe10   : > { %v1668_v44 = vadd.f32 %v1666_v42, %v1652_v36 }
 0xe11   : > { %v1671_v45 = vmul.f32 0.7978846, %v1669_v43 }
 0xe12   : > { %v1670_v46 = vmul.f32 0.7978846, %v1668_v44 }
 0xe13   : > { %2252 = vtanh.f32 %v1671_v45 }
 0xe14   : > { %2254 = vtanh.f32 %v1670_v46 }
 0xe1d   : > { %v2253_v47 = vpop.eup %2252 }
 0xe1e   : > { %v2255_v48 = vpop.eup %2254  ;;  %v1675_v49 = vadd.f32 1.0, %v2253_v47 }
 0xe1f   : > { %v1674_v50 = vadd.f32 1.0, %v2255_v48 }
 0xe20   : > { %v1677_v51 = vmul.f32 %v1675_v49, %v1661_v53 }
 0xe21   : > { %v1676_v54 = vmul.f32 %v1674_v50, %v1660_v52 }
 0xe23   : > { %2079 = vmatprep.mubr.msk.f32.mxu0 %vm508_vm0, %v1676_v54 }
 0xe24   : > { %2080 = vmatmul.mubr.msk.f32.vlgmr.msra.gmra.mrb[10].mxu0 %vm508_vm0, %v1677_v51 }
 0xef7   : > { %v2081_v56 = vpop.f32.mrb[10].mxu0 }
 0xef8   : > { %v1767_v57 = vadd.f32 %v2081_v56, %v1917_v55  ;;  %v1761_v12 = vpop.f32.mrb[11].mxu0 }
 0xef9   : > { %v1762_v10 = vadd.f32 %v1917_v55, %v1761_v12 }
 0xefa   : > { %v1771_v58 = vadd.f32 %v1767_v57, %v1567_v26 }
 0xefb   : > { %v1770_v59 = vadd.f32 %v1762_v10, %v1566_v24 }
 0xefc   : > { %v1777_v60 = vsel %vm508_vm0, %v1771_v58, 0.0 }
 0xefd   : > { %1778 = vadd.xlane.f32.xlu0 %v1777_v60  ;;  %v1774_v61 = vsel %vm508_vm0, %v1770_v59, 0.0 }
 0xefe   : > { %1775 = vadd.xlane.f32.xlu1 %v1774_v61 }
 0xf8a   : > { %v1779_v62 = vpop.xlane.xlu0 %1778 }
 0xf8b   : > { %v1781_v63 = vmul.f32 0.03125, %v1779_v62  ;;  %v1776_v0 = vpop.xlane.xlu1 %1775 }
 0xf8c   : > { %v1780_v7 = vmul.f32 0.03125, %v1776_v0 }
 0xf8d   : > { %v1783_v6 = vsub.f32 %v1771_v58, %v1781_v63 }
 0xf8e   : > { %v1782_v1 = vsub.f32 %v1770_v59, %v1780_v7 }
 0xf8f   : > { %v1785_v2 = vmul.f32 %v1783_v6, %v1783_v6 }
 0xf90   : > { %v1784_v3 = vmul.f32 %v1782_v1, %v1782_v1 }
 0xf91   : > { %v1789_v4 = vsel %vm508_vm0, %v1785_v2, 0.0 }
 0xf92   : > { %1790 = vadd.xlane.f32.xlu0 %v1789_v4  ;;  %v1786_v5 = vsel %vm508_vm0, %v1784_v3, 0.0 }
 0xf93   : > { %1787 = vadd.xlane.f32.xlu1 %v1786_v5 }
0x101f   : > { %v1791_v8 = vpop.xlane.xlu0 %1790 }
0x1020   : > { %v1793_v9 = vmul.f32 0.03125, %v1791_v8  ;;  %v1788_v17 = vpop.xlane.xlu1 %1787 }
0x1021   : > { %v1792_v11 = vmul.f32 0.03125, %v1788_v17 }
0x1022   : > { %v1795_v14 = vadd.f32 1e-05, %v1793_v9 }
0x1023   : > { %v1794_v15 = vadd.f32 1e-05, %v1792_v11 }
0x1024   : > { %2256 = vrsqrt.f32 %v1795_v14 }
0x1025   : > { %2258 = vrsqrt.f32 %v1794_v15 }
0x102e   : > { %v2257_v16 = vpop.eup %2256 }
0x102f   : > { %v2259_v19 = vpop.eup %2258  ;;  %v1799_v20 = vmul.f32 %v2257_v16, %v1783_v6 }
0x1030   : > { %v1798_v22 = vmul.f32 %v2259_v19, %v1782_v1 }
0x1031   : > { %v1807_v23 = vmul.f32 %v1920_v18, %v1799_v20 }
0x1032   : > { %v1806_v24 = vmul.f32 %v1920_v18, %v1798_v22 }
0x1033   : > { %v1815_v25 = vadd.f32 %v1921_v21, %v1807_v23 }
0x1034   : > { %v1814_v26 = vadd.f32 %v1921_v21, %v1806_v24 }
0x1035   : > { %1817 = vst.msk [vmem:[%s494_s30 + $0x8] sm:$0xff] %vm508_vm0, %v1815_v25 }
0x1036   : > { %1816 = vst.msk [vmem:[%s494_s30] sm:$0xff] %vm508_vm0, %v1814_v26 }
0x1037 PF: > { %s25_s18 = sadd.s32 1, %s2266_s18  }
0x1038   : > { %p22_p4 = scmp.ge.s32.totalorder %s25_s18, 4  }
0x103a   :  { %24 = sbr.rel (!%p22_p4) target bundleno = 1 (0x1), region = 110 }

// kernel: run.23
= control target key start
LH: loop header
LB: loop body
LE: loop exit
PB: predicated region body
PF: predicated region fallthrough
CT: control target
= control target key end

     0   :  { %s449_s12 = smov 0   ;;  %s515_s0 = inlined_call_operand.vmem [shape: f32[2,8,32], index: 0, kind: input, shape index: {}]   ;;  %s516_s1 = inlined_call_operand.vmem [shape: f32[96,32], index: 1, kind: input, shape index: {}]   ;;  %s517_s2 = inlined_call_operand.vmem [shape: f32[1,32], index: 2, kind: input, shape index: {}]   ;;  %s518_s3 = inlined_call_operand.vmem [shape: f32[2,8,32], index: 3, kind: output, shape index: {}]  }
   0x1 LB: > { %s334_s13 = sadd.s32 4294967295, %s422_s12   ;;  %p338_p0 = scmp.ge.s32.totalorder %s422_s12, 1  ;;  %s422_s12 = sphi %s449_s12, %s13_s12  }
   0x2   : > { %p136_p1 = scmp.lt.s32.totalorder %s422_s12, 3 }
   0x4   : > { %p137_p2 = pnand %p338_p0, %p136_p1 }
   0x5   : > { %p158_p3 = scmp.lt.s32.totalorder (!%p137_p2), %s334_s13, 1  ;;  %v187_v0 = vld [vmem:[%s516_s1] sm:$0xff] (!%p137_p2)  ;;  %v424_v1 = vmov (!%p137_p2), 0.0|0.0   ;;  %v188_v2 = vld [vmem:[%s516_s1 + $0x8] sm:$0xff] (!%p137_p2)  ;;  %v189_v3 = vld [vmem:[%s516_s1 + $0x10] sm:$0xff] (!%p137_p2)  ;;  %vm425_vm0 = vmmov (!%p137_p2), 0  }
   0x6   : > { %140 = sbr.rel (%p137_p2) target bundleno = 357 (0x165), region = 32  ;;  %385 = vmatprep.subr.bf16.mxu0 (!%p137_p2), %v424_v1  ;;  %v190_v4 = vld [vmem:[%s516_s1 + $0x18] sm:$0xff] (!%p137_p2)  ;;  %v386_v5 = vpack.c.bf16 (!%p137_p2), %v188_v2, %v187_v0  ;;  %v426_v6 = vmov (!%p137_p2), 0.0   ;;  %vm167_vm1 = vcmask (!%p137_p2), 261120   ;;  %vm170_vm2 = vcmask (!%p137_p2), 253952   ;;  %v191_v8 = vld [vmem:[%s516_s1 + $0x20] sm:$0xff] (!%p137_p2) }
   0x7   : > { %382 = vmatprep.mubr.msk.f32.mxu0 (!%p137_p2), %vm425_vm0, %v426_v6  ;;  %v389_v7 = vpack.c.bf16 (!%p137_p2), %v190_v4, %v189_v3  ;;  %v192_v9 = vld [vmem:[%s516_s1 + $0x28] sm:$0xff] (!%p137_p2)  ;;  %s427_s30 = smov (!%p137_p2), 32   ;;  %v193_v14 = vld [vmem:[%s516_s1 + $0x30] sm:$0xff] (!%p137_p2)  ;;  %v194_v15 = vld [vmem:[%s516_s1 + $0x38] sm:$0xff] (!%p137_p2)  ;;  %s428_s14 = smov (!%p137_p2), 64   ;;  %vm185_vm3 = vcmask (!%p137_p2), 523264  }
   0x8   : > { %387 = vmatpush3.bf16.msra.mxu0 (!%p137_p2), %v386_v5  ;;  %v392_v13 = vpack.c.bf16 (!%p137_p2), %v192_v9, %v191_v8  ;;  %v395_v16 = vpack.c.bf16 (!%p137_p2), %v194_v15, %v193_v14  ;;  %v195_v17 = vld [vmem:[%s516_s1 + $0x40] sm:$0xff] (!%p137_p2)  ;;  %v196_v18 = vld [vmem:[%s516_s1 + $0x48] sm:$0xff] (!%p137_p2)  ;;  %v197_v21 = vld [vmem:[%s516_s1 + $0x50] sm:$0xff] (!%p137_p2)  ;;  %vm206_vm4 = vcmask (!%p137_p2), 785408  }
   0x9   : > { %388 = vmatprep.subr.bf16.mxu0 (!%p137_p2), %v424_v1  ;;  %v398_v20 = vpack.c.bf16 (!%p137_p2), %v196_v18, %v195_v17  ;;  %v198_v22 = vld [vmem:[%s516_s1 + $0x58] sm:$0xff] (!%p137_p2)  ;;  %v341_v29 = vld [vmem:[%s517_s2] ss:$0 sm:$0xff] (!%p137_p2) }
   0xa   : > { %v401_v23 = vpack.c.bf16 (!%p137_p2), %v198_v22, %v197_v21 }
   0xc   : > { %390 = vmatpush3.bf16.msra.mxu0 (!%p137_p2), %v389_v7 }
   0xd   : > { %s520_s13 = smov (!%p158_p3, %s334_s13), 1  ;;  %391 = vmatprep.subr.bf16.mxu0 %v424_v1 }
   0xe   : > { %s339_s22 = sshll.u32 %s520_s13, 3 }
   0xf   : > { %s161_s25 = scalar_lea.vmem %s515_s0, %s339_s22  ;;  %s165_s24 = scalar_lea.vmem %s518_s3, %s339_s22 }
  0x10   : > { %v166_v10 = vld [vmem:[%s161_s25] sm:$0xff]  ;;  %393 = vmatpush3.bf16.msra.mxu0 %v392_v13 }
  0x11   : > { %v169_v11 = vld [vmem:[%s161_s25 + $0x7] sm:$0x1]  ;;  %v172_v12 = vld [vmem:[%s161_s25] sm:$0x1]  ;;  %177 = vrot.lane.b32.xlu0 %v166_v10, %s427_s30  ;;  %168 = vst.msk [vmem:[#allocation2 + $0x1] sm:$0xff] %vm167_vm1, %v166_v10  ;;  %394 = vmatprep.subr.bf16.mxu0 %v424_v1 }
  0x12   : > { %171 = vst.msk [vmem:[#allocation2] sm:$0x1] %vm170_vm2, %v169_v11  ;;  %173 = vst.msk [vmem:[#allocation2 + $0x9] sm:$0x1] %vm170_vm2, %v172_v12 }
  0x14   : > { %396 = vmatpush3.bf16.msra.mxu0 %v395_v16 }
  0x15   : > { %397 = vmatprep.subr.bf16.mxu0 %v424_v1 }
  0x18   : > { %399 = vmatpush3.bf16.msra.mxu0 %v398_v20 }
  0x19   : > { %v175_v19 = vld [vmem:[#allocation2 + $0x2] sm:$0xff]  ;;  %400 = vmatprep.subr.bf16.mxu0 %v424_v1 }
  0x1a   : > { %181 = vrot.lane.b32.xlu0 %v175_v19, %s428_s14  ;;  %v174_v25 = vld [vmem:[#allocation2] sm:$0xff] }
  0x1c   : > { %402 = vmatpush3.bf16.msra.mxu0 %v401_v23 }
  0x83   : > { %v178_v24 = vpop.permute.xlu0 %177 }
  0x84   : > { %v184_v26 = vsel %vm167_vm1, %v174_v25, %v178_v24 }
  0x8c   : > { %v182_v27 = vpop.permute.xlu0 %181 }
  0x8d   : > { %v186_v28 = vsel %vm185_vm3, %v184_v26, %v182_v27 }
  0x8e   : > { %383 = vmatmul.mubr.msk.f32.vlgmr.msra.gmra.mrb[0].mxu0 %vm206_vm4, %v186_v28 }
 0x161   : > { %v276_v30 = vpop.f32.mrb[0].mxu0 }
 0x162   : > { %v277_v31 = vadd.f32 %v341_v29, %v276_v30  ;;  %v384_v32 = vpop.f32.mrb[1].mxu0 }
 0x164   : > { %280 = vst.msk [vmem:[%s165_s24] sm:$0xff] %vm167_vm1, %v277_v31 }
 0x165 PF: > { %s13_s12 = sadd.s32 1, %s422_s12  }
 0x166   : > { %p10_p4 = scmp.ge.s32.totalorder %s13_s12, 4  }
 0x168   :  { %12 = sbr.rel (!%p10_p4) target bundleno = 1 (0x1), region = 62 }

// kernel: run.24
= control target key start
LH: loop header
LB: loop body
LE: loop exit
PB: predicated region body
PF: predicated region fallthrough
CT: control target
= control target key end

     0   :  { %s307_s12 = smov 0   ;;  %s334_s0 = inlined_call_operand.vmem [shape: f32[2,8,32], index: 0, kind: input, shape index: {}]   ;;  %s335_s1 = inlined_call_operand.vmem [shape: f32[1,32], index: 1, kind: input, shape index: {}]   ;;  %s336_s2 = inlined_call_operand.vmem [shape: f32[1,32], index: 2, kind: input, shape index: {}]   ;;  %s337_s3 = inlined_call_operand.vmem [shape: f32[2,4,32], index: 3, kind: output, shape index: {}]  }
   0x1 LB: > { %s257_s13 = sadd.s32 4294967295, %s285_s12   ;;  %p261_p0 = scmp.ge.s32.totalorder %s285_s12, 1  ;;  %s285_s12 = sphi %s307_s12, %s13_s12  }
   0x2   : > { %p136_p1 = scmp.lt.s32.totalorder %s285_s12, 3 }
   0x4   : > { %p137_p2 = pnand %p261_p0, %p136_p1 }
   0x5   : > { %p158_p3 = scmp.lt.s32.totalorder (!%p137_p2), %s257_s13, 1  ;;  %v264_v0 = vld [vmem:[%s335_s1] ss:$0 sm:$0xff] (!%p137_p2)  ;;  %vm189_vm1 = vcmask (!%p137_p2), 261120   ;;  %vm192_vm2 = vcmask (!%p137_p2), 253952   ;;  %vm202_vm3 = vcmask (!%p137_p2), 257024  }
   0x6   : > { %140 = sbr.rel (%p137_p2) target bundleno = 68 (0x44), region = 32  ;;  %v265_v2 = vld [vmem:[%s336_s2] ss:$0 sm:$0xff] (!%p137_p2) }
   0xd   : > { %s339_s13 = smov (!%p158_p3, %s257_s13), 1 }
   0xe   : > { %s262_s14 = sshll.u32 %s339_s13, 3  ;;  %s263_s22 = sshll.u32 %s339_s13, 2 }
   0xf   : > { %s161_s19 = scalar_lea.vmem %s334_s0, %s262_s14  ;;  %s165_s25 = scalar_lea.vmem %s337_s3, %s263_s22 }
  0x10   : > { %v166_v1 = vld [vmem:[%s161_s19] sm:$0xff] }
  0x11   : > { %v174_v3 = vmul.f32 %v264_v0, %v166_v1 }
  0x13   : > { %v182_v4 = vadd.f32 %v265_v2, %v174_v3 }
  0x15   : > { %v184_v5 = vmin.f32 %v182_v4, 0.0  ;;  %vm183_vm0 = vcmp.gt.f32.partialorder %v182_v4, 0.0 }
  0x17   : > { %v185_v6 = vmul.f32 1.442695, %v184_v5 }
  0x19   : > { %277 = vpow2.f32 %v185_v6 }
  0x23   : > { %v278_v7 = vpop.eup %277 }
  0x24   : > { %v266_v8 = vadd.f32 -1.0, %v278_v7 }
  0x26   : > { %v188_v9 = vsel %vm183_vm0, %v182_v4, %v266_v8 }
  0x27   : > { %190 = vst.msk [vmem:[#allocation2 + $0x1] sm:$0xff] %vm189_vm1, %v188_v9 }
  0x2e   : > { %v191_v10 = vld [vmem:[#allocation2 + $0x1] sm:$0x1]  ;;  %v194_v11 = vld [vmem:[#allocation2 + $0x8] sm:$0x1] }
  0x2f   : > { %193 = vst.msk [vmem:[#allocation2] sm:$0x1] %vm192_vm2, %v191_v10  ;;  %195 = vst.msk [vmem:[#allocation2 + $0x9] sm:$0x1] %vm192_vm2, %v194_v11 }
  0x36   : > { %v196_v12 = vld [vmem:[#allocation2] sm:$0xff] }
  0x37   : > { %v197_v13 = vmax.f32 %v196_v12, %v188_v9  ;;  %v198_v14 = vld [vmem:[#allocation2 + $0x2] sm:$0xff] }
  0x39   : > { %v199_v15 = vmax.f32 %v197_v13, %v198_v14 }
  0x3b   : > { %200 = vst.msk [vmem:[#allocation2] sm:$0xff] %vm189_vm1, %v199_v15 }
  0x42   : > { %v201_v16 = vld [vmem:[#allocation2] ss:$2 sm:$0xf] }
  0x43   : > { %203 = vst.msk [vmem:[%s165_s25] sm:$0xf] %vm202_vm3, %v201_v16 }
  0x44 PF: > { %s13_s12 = sadd.s32 1, %s285_s12  }
  0x45   : > { %p10_p4 = scmp.ge.s32.totalorder %s13_s12, 4  }
  0x47   :  { %12 = sbr.rel (!%p10_p4) target bundleno = 1 (0x1), region = 62 }

// kernel: run.22
= control target key start
LH: loop header
LB: loop body
LE: loop exit
PB: predicated region body
PF: predicated region fallthrough
CT: control target
= control target key end

     0   :  { %s1962_s18 = smov 0   ;;  %s2149_s0 = inlined_call_operand.vmem [shape: f32[2,8,32], index: 0, kind: input, shape index: {}]   ;;  %s2150_s1 = inlined_call_operand.vmem [shape: f32[32,96], index: 1, kind: input, shape index: {}]   ;;  %s2151_s2 = inlined_call_operand.vmem [shape: f32[1,96], index: 2, kind: input, shape index: {}]   ;;  %s2152_s3 = inlined_call_operand.vmem [shape: f32[32,32], index: 3, kind: input, shape index: {}]   ;;  %s2153_s4 = inlined_call_operand.vmem [shape: f32[1,32], index: 4, kind: input, shape index: {}]   ;;  %s2154_s5 = inlined_call_operand.vmem [shape: f32[1,32], index: 5, kind: input, shape index: {}]   ;;  %s2155_s6 = inlined_call_operand.vmem [shape: f32[1,32], index: 6, kind: input, shape index: {}]   ;;  %s2156_s7 = inlined_call_operand.vmem [shape: f32[32,32], index: 7, kind: input, shape index: {}]   ;;  %s2157_s8 = inlined_call_operand.vmem [shape: f32[1,32], index: 8, kind: input, shape index: {}]   ;;  %s2158_s9 = inlined_call_operand.vmem [shape: f32[32,32], index: 9, kind: input, shape index: {}]   ;;  %s2159_s10 = inlined_call_operand.vmem [shape: f32[1,32], index: 10, kind: input, shape index: {}]   ;;  %s2160_s11 = inlined_call_operand.vmem [shape: f32[1,32], index: 11, kind: input, shape index: {}, may-alias: {11,13}]   ;;  %s2161_s12 = inlined_call_operand.vmem [shape: f32[1,32], index: 12, kind: input, shape index: {}, may-alias: {12,14}]   ;;  %s2162_s13 = inlined_call_operand.vmem [shape: f32[1,32], index: 13, kind: input, shape index: {}, may-alias: {11,13}]   ;;  %s2163_s14 = inlined_call_operand.vmem [shape: f32[1,32], index: 14, kind: input, shape index: {}, may-alias: {12,14}]   ;;  %s2164_s15 = inlined_call_operand.vmem [shape: f32[2,8,32], index: 15, kind: output, shape index: {}]  }
   0x1 LB: > { %s1633_s19 = sadd.s32 4294967295, %s1863_s18   ;;  %p1637_p0 = scmp.ge.s32.totalorder %s1863_s18, 1  ;;  %s1863_s18 = sphi %s1962_s18, %s25_s18  }
   0x2   : > { %p436_p1 = scmp.lt.s32.totalorder %s1863_s18, 3 }
   0x4   : > { %p437_p2 = pnand %p1637_p0, %p436_p1 }
   0x5   : > { %v491_v0 = vld [vmem:[%s2150_s1] sm:$0xff] (!%p437_p2)  ;;  %v492_v1 = vld [vmem:[%s2150_s1 + $0x8] sm:$0xff] (!%p437_p2)  ;;  %v493_v2 = vld [vmem:[%s2150_s1 + $0x10] sm:$0xff] (!%p437_p2)  ;;  %v1865_v3 = vmov (!%p437_p2), 0.0|0.0   ;;  %vm1866_vm0 = vmmov (!%p437_p2), 0   ;;  %v1867_v6 = vmov (!%p437_p2), 0.0  }
   0x6   : > { %440 = sbr.rel (%p437_p2) target bundleno = 3083 (0xc0b), region = 80  ;;  %1786 = vmatprep.subr.bf16.mxu0 (!%p437_p2), %v1865_v3  ;;  %v1787_v4 = vpack.c.bf16 (!%p437_p2), %v492_v1, %v491_v0  ;;  %v494_v5 = vld [vmem:[%s2150_s1 + $0x18] sm:$0xff] (!%p437_p2)  ;;  %1710 = vmatprep.mubr.msk.f32.mxu0 (!%p437_p2), %vm1866_vm0, %v1867_v6  ;;  %p482_p3 = scmp.lt.s32.totalorder (!%p437_p2), %s1633_s19, 1  ;;  %vm502_vm1 = vcmask (!%p437_p2), 261120   ;;  %v1640_v9 = vld [vmem:[%s2151_s2] ss:$0 sm:$0xff] (!%p437_p2) }
   0x7   : > { %1713 = vmatprep.subr.mxu1 (!%p437_p2), %v1867_v6  ;;  %1715 = vmatprep.mubr.msk.f32.mxu1 (!%p437_p2), %vm1866_vm0, %v1867_v6  ;;  %v1790_v7 = vpack.c.bf16 (!%p437_p2), %v494_v5, %v493_v2  ;;  %s1868_s17 = smov (!%p437_p2), 64   ;;  %s1869_s13 = smov (!%p437_p2), 96   ;;  %vm579_vm2 = vcmask (!%p437_p2), 64512   ;;  %vm1253_vm3 = vcmask (!%p437_p2), 130048   ;;  %vm1255_vm4 = vcmask (!%p437_p2), 195584  }
   0x8   : > { %1788 = vmatpush3.bf16.msra.mxu0 (!%p437_p2), %v1787_v4  ;;  %s1870_s14 = smov (!%p437_p2), 88   ;;  %s1871_s20 = smov (!%p437_p2), 120  }
   0x9   : > { %1789 = vmatprep.subr.bf16.mxu0 (!%p437_p2), %v1865_v3  ;;  %s1872_s21 = smov (!%p437_p2), 80   ;;  %s1873_s22 = smov (!%p437_p2), 72  }
   0xa   : > { %s1874_s23 = smov (!%p437_p2), 112   ;;  %s1875_s24 = smov (!%p437_p2), 104  }
   0xb   : > { %s1876_s25 = smov (!%p437_p2), 56   ;;  %s1877_s27 = smov (!%p437_p2), 48  }
   0xc   : > { %1791 = vmatpush3.bf16.msra.mxu0 (!%p437_p2), %v1790_v7  ;;  %s1878_s28 = smov (!%p437_p2), 40  }
   0xd   : > { %s2166_s19 = smov (!%p482_p3, %s1633_s19), 1  ;;  %1733 = vmatprep.subr.mxu0 %v1867_v6 }
   0xe   : > { %s1638_s26 = sshll.u32 %s2166_s19, 3 }
   0xf   : > { %s485_s29 = scalar_lea.vmem %s2149_s0, %s1638_s26  ;;  %s489_s30 = scalar_lea.vmem %s2164_s15, %s1638_s26 }
  0x10   : > { %v1997_v8 = vld [vmem:[%s485_s29] sm:$0xff] }
  0x11   : > { %1711 = vmatmul.mubr.msk.f32.vlgmr.msra.gmra.mrb[0].mxu0 %vm502_vm1, %v1997_v8 }
  0x12   : > { %1735 = vmatprep.mubr.msk.f32.mxu0 %vm1866_vm0, %v1867_v6 }
  0xe4   : > { %v572_v10 = vpop.f32.mrb[0].mxu0 }
  0xe5   : > { %v2007_v11 = vadd.f32 %v1640_v9, %v572_v10  ;;  %v1712_v12 = vpop.f32.mrb[1].mxu0 }
  0xe7   : > { %666 = vrot.lane.b32.xlu1 %v2007_v11, %s1868_s17  ;;  %577 = vrot.lane.b32.xlu0 %v2007_v11, %s1869_s13 }
  0xeb   : > { %744 = vrot.lane.b32.xlu1 %v2007_v11, %s1870_s14 }
  0xef   : > { %742 = vrot.lane.b32.xlu1 %v2007_v11, %s1871_s20 }
  0xf3   : > { %910 = vrot.lane.b32.xlu1 %v2007_v11, %s1872_s21 }
 0x159   : > { %v667_v13 = vpop.permute.xlu1 %666  ;;  %v578_v14 = vpop.permute.xlu0 %577 }
 0x15a   : > { %1714 = vmatpush3.xpose.msk.msra.mxu1 %vm579_vm2, %v578_v14  ;;  %v1258_v14 = vld [vmem:[%s2152_s3 + $0x8] sm:$0xff] }
 0x15b   : > { %1718 = vmatprep.subr.mxu1 %v1867_v6 }
 0x15d   : > { %v745_v15 = vpop.permute.xlu1 %744  ;;  %1716 = vmatmul.mubr.msk.f32.vlgmr.msra.gmra.mrb[0].mxu1 %vm579_vm2, %v2007_v11 }
 0x15e   : > { %1719 = vmatpush3.msra.mxu1 %v667_v13  ;;  %1720 = vmatprep.mubr.msk.f32.mxu1 %vm1866_vm0, %v1867_v6  ;;  %v1257_v13 = vld [vmem:[%s2152_s3] sm:$0xff] }
 0x15f   : > { %1723 = vmatprep.subr.mxu1 %v1867_v6 }
 0x161   : > { %v743_v16 = vpop.permute.xlu1 %742 }
 0x165   : > { %v911_v17 = vpop.permute.xlu1 %910 }
 0x166   : > { %1734 = vmatpush3.xpose.msk.msra.mxu0 %vm579_vm2, %v911_v17  ;;  %v1260_v17 = vld [vmem:[%s2152_s3 + $0x18] sm:$0xff] }
 0x167   : > { %1743 = vmatprep.subr.mxu0 %v1867_v6 }
 0x230   : > { %v650_v18 = vpop.f32.mrb[0].mxu1 }
 0x231   : > { %v654_v19 = vmul.f32 0.35355338, %v650_v18  ;;  %v1717_v20 = vpop.f32.mrb[1].mxu1 }
 0x233   : > { %v655_v21 = vsel %vm579_vm2, %v654_v19, -inf }
 0x234   : > { %656 = vmax.xlane.f32.xlu0 %v655_v21 }
 0x24a   : > { %1076 = vrot.lane.b32.xlu0 %v2007_v11, %s1873_s22  ;;  %s1879_s22 = smov 8  }
 0x2c1   : > { %v657_v22 = vpop.xlane.xlu0 %656 }
 0x2c2   : > { %v658_v23 = vsub.f32 %v654_v19, %v657_v22 }
 0x2c4   : > { %v659_v24 = vmul.f32 1.442695, %v658_v23 }
 0x2c5   : > { %v1077_v29 = vpop.permute.xlu0 %1076 }
 0x2c6   : > { %1835 = vpow2.f32 %v659_v24 }
 0x2d0   : > { %v1836_v25 = vpop.eup %1835 }
 0x2d1   : > { %v661_v26 = vsel %vm579_vm2, %v1836_v25, 0.0 }
 0x2d2   : > { %662 = vadd.xlane.f32.xlu1 %v661_v26 }
 0x2e3   : > { %908 = vrot.lane.b32.xlu1 %v2007_v11, %s1874_s23  ;;  %s1880_s23 = smov 16  }
 0x2e7   : > { %1074 = vrot.lane.b32.xlu1 %v2007_v11, %s1875_s24  ;;  %s1881_s24 = smov 24  }
 0x35f   : > { %v663_v27 = vpop.xlane.xlu1 %662 }
 0x360   : > { %1837 = vrcp.f32 %v663_v27 }
 0x363   : > { %v909_v28 = vpop.permute.xlu1 %908 }
 0x364   : > { %1736 = vmatmul.mubr.msk.f32.vlgmr.msra.gmra.mrb[2].mxu0 %vm579_vm2, %v909_v28 }
 0x365   : > { %1744 = vmatpush3.xpose.msk.msra.mxu0 %vm579_vm2, %v1077_v29  ;;  %1745 = vmatprep.mubr.msk.f32.mxu0 %vm1866_vm0, %v1867_v6 }
 0x366   : > { %1792 = vmatprep.subr.bf16.mxu0 %v1865_v3 }
 0x367   : > { %v1075_v30 = vpop.permute.xlu1 %1074 }
 0x368   : > { %1746 = vmatmul.mubr.msk.f32.vlgmr.msra.gmra.mrb[4].mxu0 %vm579_vm2, %v1075_v30 }
 0x369   : > { %1761 = vmatprep.mubr.msk.f32.mxu0 %vm1866_vm0, %v1867_v6 }
 0x36a   : > { %v1838_v31 = vpop.eup %1837 }
 0x36b   : > { %v665_v32 = vmul.f32 %v1838_v31, %v1836_v25  ;;  %v1654_v31 = vld [vmem:[%s2153_s4] ss:$0 sm:$0xff] }
 0x36d   : > { %1721 = vmatmul.mubr.msk.f32.vlgmr.msra.gmra.mrb[2].mxu1 %vm579_vm2, %v665_v32 }
 0x36e   : > { %1724 = vmatpush3.xpose.msk.msra.mxu1 %vm579_vm2, %v745_v15  ;;  %1725 = vmatprep.mubr.msk.f32.mxu1 %vm1866_vm0, %v1867_v6  ;;  %v1793_v15 = vpack.c.bf16 %v1258_v14, %v1257_v13 }
 0x36f   : > { %1728 = vmatprep.subr.mxu1 %v1867_v6 }
 0x370   : > { %1794 = vmatpush3.bf16.msra.mxu0 %v1793_v15 }
 0x371   : > { %1726 = vmatmul.mubr.msk.f32.vlgmr.msra.gmra.mrb[4].mxu1 %vm579_vm2, %v743_v16  ;;  %1795 = vmatprep.subr.bf16.mxu0 %v1865_v3  ;;  %v1259_v16 = vld [vmem:[%s2152_s3 + $0x10] sm:$0xff] }
 0x372   : > { %1730 = vmatprep.mubr.msk.f32.mxu1 %vm1866_vm0, %v1867_v6  ;;  %v1796_v18 = vpack.c.bf16 %v1260_v17, %v1259_v16 }
 0x374   : > { %1797 = vmatpush3.bf16.msra.mxu0 %v1796_v18 }
 0x375   : > { %1804 = vmatprep.subr.bf16.mxu0 %v1865_v3 }
 0x437   : > { %v982_v33 = vpop.f32.mrb[2].mxu0 }
 0x438   : > { %v986_v34 = vmul.f32 0.35355338, %v982_v33  ;;  %v1737_v35 = vpop.f32.mrb[3].mxu0 }
 0x43a   : > { %v987_v36 = vsel %vm579_vm2, %v986_v34, -inf }
 0x43b   : > { %988 = vmax.xlane.f32.xlu0 %v987_v36  ;;  %v1148_v37 = vpop.f32.mrb[4].mxu0 }
 0x43c   : > { %v1747_v38 = vpop.f32.mrb[5].mxu0  ;;  %v1152_v44 = vmul.f32 0.35355338, %v1148_v37 }
 0x43e   : > { %v1153_v46 = vsel %vm579_vm2, %v1152_v44, -inf }
 0x440   : > { %v2045_v39 = vpop.f32.mrb[2].mxu1 }
 0x441   : > { %v1722_v40 = vpop.f32.mrb[3].mxu1 }
 0x444   : > { %v816_v41 = vpop.f32.mrb[4].mxu1 }
 0x445   : > { %v820_v42 = vmul.f32 0.35355338, %v816_v41  ;;  %v1727_v43 = vpop.f32.mrb[5].mxu1 }
 0x447   : > { %v821_v45 = vsel %vm579_vm2, %v820_v42, -inf }
 0x448   : > { %822 = vmax.xlane.f32.xlu1 %v821_v45 }
 0x44c   : > { %1154 = vmax.xlane.f32.xlu1 %v1153_v46 }
 0x4c8   : > { %v989_v47 = vpop.xlane.xlu0 %988 }
 0x4c9   : > { %v990_v48 = vsub.f32 %v986_v34, %v989_v47 }
 0x4cb   : > { %v991_v49 = vmul.f32 1.442695, %v990_v48 }
 0x4cd   : > { %1839 = vpow2.f32 %v991_v49 }
 0x4d5   : > { %v823_v50 = vpop.xlane.xlu1 %822 }
 0x4d6   : > { %v824_v58 = vsub.f32 %v820_v42, %v823_v50  ;;  %v1373_v42 = vld [vmem:[%s2156_s7 + $0x8] sm:$0xff]  ;;  %v1656_v50 = vld [vmem:[%s2154_s5] ss:$0 sm:$0xff] }
 0x4d7   : > { %v1840_v51 = vpop.eup %1839 }
 0x4d8   : > { %v993_v52 = vsel %vm579_vm2, %v1840_v51, 0.0  ;;  %v825_v59 = vmul.f32 1.442695, %v824_v58 }
 0x4d9   : > { %994 = vadd.xlane.f32.xlu1 %v993_v52  ;;  %v1155_v53 = vpop.xlane.xlu1 %1154  ;;  %v1657_v52 = vld [vmem:[%s2155_s6] ss:$0 sm:$0xff] }
 0x4da   : > { %v1156_v54 = vsub.f32 %v1152_v44, %v1155_v53  ;;  %v1375_v44 = vld [vmem:[%s2156_s7 + $0x18] sm:$0xff] }
 0x4dc   : > { %v1157_v55 = vmul.f32 1.442695, %v1156_v54 }
 0x4de   : > { %1841 = vpow2.f32 %v1157_v55  ;;  %v1465_v55 = vld [vmem:[%s2158_s9] sm:$0xff] }
 0x4df   : > { %1843 = vpow2.f32 %v825_v59  ;;  %v1468_v59 = vld [vmem:[%s2158_s9 + $0x18] sm:$0xff] }
 0x4e8   : > { %v1842_v56 = vpop.eup %1841 }
 0x4e9   : > { %v1159_v57 = vsel %vm579_vm2, %v1842_v56, 0.0  ;;  %v1844_v60 = vpop.eup %1843 }
 0x4ea   : > { %832 = vrot.lane.b32.xlu1 %v2007_v11, %s1876_s25  ;;  %1160 = vadd.xlane.f32.xlu0 %v1159_v57  ;;  %v827_v61 = vsel %vm579_vm2, %v1844_v60, 0.0  ;;  %v1467_v57 = vld [vmem:[%s2158_s9 + $0x10] sm:$0xff] }
 0x500   : > { %998 = vrot.lane.b32.xlu0 %v2007_v11, %s1877_s27 }
 0x50e   : > { %828 = vadd.xlane.f32.xlu1 %v827_v61  ;;  %v1658_v61 = vld [vmem:[%s2157_s8] ss:$0 sm:$0xff] }
 0x51f   : > { %1164 = vrot.lane.b32.xlu1 %v2007_v11, %s1878_s28 }
 0x566   : > { %v995_v62 = vpop.xlane.xlu1 %994 }
 0x56a   : > { %v833_v63 = vpop.permute.xlu1 %832 }
 0x56b   : > { %1729 = vmatpush3.msra.mxu1 %v833_v63 }
 0x56c   : > { %1738 = vmatprep.subr.mxu1 %v1867_v6 }
 0x577   : > { %v1161_v1 = vpop.xlane.xlu0 %1160 }
 0x57b   : > { %v999_v7 = vpop.permute.xlu0 %998 }
 0x59b   : > { %v829_v0 = vpop.xlane.xlu1 %828 }
 0x59c   : > { %1845 = vrcp.f32 %v829_v0 }
 0x59d   : > { %1847 = vrcp.f32 %v995_v62 }
 0x59e   : > { %1849 = vrcp.f32 %v1161_v1 }
 0x59f   : > { %v1165_v11 = vpop.permute.xlu1 %1164 }
 0x5a6   : > { %v1846_v2 = vpop.eup %1845 }
 0x5a7   : > { %v831_v4 = vmul.f32 %v1846_v2, %v1844_v60  ;;  %v1848_v5 = vpop.eup %1847  ;;  %v1808_v60 = vpack.c.bf16 %v1468_v59, %v1467_v57 }
 0x5a8   : > { %v997_v9 = vmul.f32 %v1848_v5, %v1840_v51  ;;  %v1850_v10 = vpop.eup %1849 }
 0x5a9   : > { %1731 = vmatmul.mubr.msk.f32.vlgmr.msra.gmra.mrb[6].mxu1 %vm579_vm2, %v831_v4  ;;  %v1163_v12 = vmul.f32 %v1850_v10, %v1842_v56  ;;  %v1466_v56 = vld [vmem:[%s2158_s9 + $0x8] sm:$0xff] }
 0x5aa   : > { %1739 = vmatpush3.msra.mxu1 %v999_v7  ;;  %1740 = vmatprep.mubr.msk.f32.mxu1 %vm1866_vm0, %v1867_v6  ;;  %v1805_v58 = vpack.c.bf16 %v1466_v56, %v1465_v55 }
 0x5ab   : > { %1748 = vmatprep.subr.mxu1 %v1867_v6 }
 0x5ad   : > { %1741 = vmatmul.mubr.msk.f32.vlgmr.msra.gmra.mrb[8].mxu1 %vm579_vm2, %v997_v9 }
 0x5ae   : > { %1749 = vmatpush3.msra.mxu1 %v1165_v11  ;;  %1750 = vmatprep.mubr.msk.f32.mxu1 %vm1866_vm0, %v1867_v6 }
 0x5af   : > { %1798 = vmatprep.subr.bf16.mxu1 %v1865_v3 }
 0x5b1   : > { %1751 = vmatmul.mubr.msk.f32.vlgmr.msra.gmra.mrb[10].mxu1 %vm579_vm2, %v1163_v12 }
 0x5b2   : > { %1772 = vmatprep.mubr.msk.f32.mxu1 %vm1866_vm0, %v1867_v6 }
 0x67c   : > { %v904_v19 = vpop.f32.mrb[6].mxu1 }
 0x67d   : > { %1241 = vrot.lane.b32.xlu1 %v904_v19, %s1879_s22  ;;  %v1732_v20 = vpop.f32.mrb[7].mxu1 }
 0x680   : > { %v1070_v21 = vpop.f32.mrb[8].mxu1 }
 0x681   : > { %1245 = vrot.lane.b32.xlu0 %v1070_v21, %s1880_s23  ;;  %v1742_v22 = vpop.f32.mrb[9].mxu1 }
 0x684   : > { %v1236_v23 = vpop.f32.mrb[10].mxu1 }
 0x685   : > { %1249 = vrot.lane.b32.xlu1 %v1236_v23, %s1881_s24  ;;  %v1752_v24 = vpop.f32.mrb[11].mxu1 }
 0x6ef   : > { %v1242_v25 = vpop.permute.xlu1 %1241 }
 0x6f0   : > { %v1252_v27 = vsel %vm579_vm2, %v2045_v39, %v1242_v25 }
 0x6f3   : > { %v1246_v26 = vpop.permute.xlu0 %1245 }
 0x6f4   : > { %v1254_v28 = vsel %vm1253_vm3, %v1252_v27, %v1246_v26  ;;  %v1662_v27 = vld [vmem:[%s2160_s11] ss:$0 sm:$0xff] }
 0x6f7   : > { %v1250_v29 = vpop.permute.xlu1 %1249 }
 0x6f8   : > { %v1256_v30 = vsel %vm1255_vm4, %v1254_v28, %v1250_v29  ;;  %v1663_v29 = vld [vmem:[%s2161_s12] ss:$0 sm:$0xff] }
 0x6f9   : > { %1762 = vmatmul.mubr.msk.f32.vlgmr.msra.gmra.mrb[6].mxu0 %vm502_vm1, %v1256_v30 }
 0x6fa   : > { %1783 = vmatprep.mubr.msk.f32.mxu0 %vm1866_vm0, %v1867_v6  ;;  %v1372_v6 = vld [vmem:[%s2156_s7] sm:$0xff]  ;;  %1806 = vmatpush3.bf16.msra.mxu0 %v1805_v58 }
 0x6fb   : > { %v1799_v43 = vpack.c.bf16 %v1373_v42, %v1372_v6  ;;  %1807 = vmatprep.subr.bf16.mxu0 %v1865_v3 }
 0x6fd   : > { %1800 = vmatpush3.bf16.msra.mxu1 %v1799_v43 }
 0x6fe   : > { %1801 = vmatprep.subr.bf16.mxu1 %v1865_v3  ;;  %1809 = vmatpush3.bf16.msra.mxu0 %v1808_v60  ;;  %v1660_v3 = vld [vmem:[%s2159_s10] ss:$0 sm:$0xff] }
 0x7cc   : > { %v1337_v32 = vpop.f32.mrb[6].mxu0 }
 0x7cd   : > { %v1338_v33 = vadd.f32 %v1654_v31, %v1337_v32  ;;  %v1763_v34 = vpop.f32.mrb[7].mxu0 }
 0x7cf   : > { %v1341_v35 = vadd.f32 %v1338_v33, %v1997_v8  ;;  %v1374_v8 = vld [vmem:[%s2156_s7 + $0x10] sm:$0xff] }
 0x7d0   : > { %v1802_v45 = vpack.c.bf16 %v1375_v44, %v1374_v8 }
 0x7d1   : > { %v1344_v36 = vsel %vm502_vm1, %v1341_v35, 0.0 }
 0x7d2   : > { %1345 = vadd.xlane.f32.xlu0 %v1344_v36  ;;  %1803 = vmatpush3.bf16.msra.mxu1 %v1802_v45 }
 0x85f   : > { %v1346_v37 = vpop.xlane.xlu0 %1345 }
 0x860   : > { %v1348_v38 = vmul.f32 0.03125, %v1346_v37 }
 0x862   : > { %v1349_v39 = vsub.f32 %v1341_v35, %v1348_v38 }
 0x864   : > { %v1350_v40 = vmul.f32 %v1349_v39, %v1349_v39 }
 0x866   : > { %v1351_v41 = vsel %vm502_vm1, %v1350_v40, 0.0 }
 0x867   : > { %1352 = vadd.xlane.f32.xlu1 %v1351_v41 }
 0x8f4   : > { %v1353_v46 = vpop.xlane.xlu1 %1352 }
 0x8f5   : > { %v1354_v47 = vmul.f32 0.03125, %v1353_v46 }
 0x8f7   : > { %v1355_v48 = vadd.f32 1e-05, %v1354_v47 }
 0x8f9   : > { %1851 = vrsqrt.f32 %v1355_v48 }
 0x903   : > { %v1852_v49 = vpop.eup %1851 }
 0x904   : > { %v1357_v51 = vmul.f32 %v1852_v49, %v1349_v39 }
 0x906   : > { %v1364_v53 = vmul.f32 %v1656_v50, %v1357_v51 }
 0x908   : > { %v1371_v54 = vadd.f32 %v1657_v52, %v1364_v53 }
 0x90a   : > { %1773 = vmatmul.mubr.msk.f32.vlgmr.msra.gmra.mrb[12].mxu1 %vm502_vm1, %v1371_v54 }
 0x9dd   : > { %v1452_v62 = vpop.f32.mrb[12].mxu1 }
 0x9de   : > { %v1453_v63 = vadd.f32 %v1658_v61, %v1452_v62  ;;  %v1774_v0 = vpop.f32.mrb[13].mxu1 }
 0x9e0   : > { %v1457_v1 = vmul.f32 0.044715, %v1453_v63  ;;  %v1456_v10 = vmul.f32 0.5, %v1453_v63 }
 0x9e2   : > { %v1458_v2 = vmul.f32 %v1457_v1, %v1453_v63 }
 0x9e4   : > { %v1459_v4 = vmul.f32 %v1458_v2, %v1453_v63 }
 0x9e6   : > { %v1460_v5 = vadd.f32 %v1459_v4, %v1453_v63 }
 0x9e8   : > { %v1461_v7 = vmul.f32 0.7978846, %v1460_v5 }
 0x9ea   : > { %1853 = vtanh.f32 %v1461_v7 }
 0x9f4   : > { %v1854_v9 = vpop.eup %1853 }
 0x9f5   : > { %v1463_v11 = vadd.f32 1.0, %v1854_v9 }
 0x9f7   : > { %v1464_v12 = vmul.f32 %v1463_v11, %v1456_v10 }
 0x9f9   : > { %1784 = vmatmul.mubr.msk.f32.vlgmr.msra.gmra.mrb[8].mxu0 %vm502_vm1, %v1464_v12 }
 0xacc   : > { %v1545_v13 = vpop.f32.mrb[8].mxu0 }
 0xacd   : > { %v1546_v14 = vadd.f32 %v1660_v3, %v1545_v13  ;;  %v1785_v15 = vpop.f32.mrb[9].mxu0 }
 0xacf   : > { %v1549_v16 = vadd.f32 %v1546_v14, %v1371_v54 }
 0xad1   : > { %v1552_v17 = vsel %vm502_vm1, %v1549_v16, 0.0 }
 0xad2   : > { %1553 = vadd.xlane.f32.xlu0 %v1552_v17 }
 0xb5f   : > { %v1554_v18 = vpop.xlane.xlu0 %1553 }
 0xb60   : > { %v1555_v19 = vmul.f32 0.03125, %v1554_v18 }
 0xb62   : > { %v1556_v20 = vsub.f32 %v1549_v16, %v1555_v19 }
 0xb64   : > { %v1557_v21 = vmul.f32 %v1556_v20, %v1556_v20 }
 0xb66   : > { %v1558_v22 = vsel %vm502_vm1, %v1557_v21, 0.0 }
 0xb67   : > { %1559 = vadd.xlane.f32.xlu0 %v1558_v22 }
 0xbf4   : > { %v1560_v23 = vpop.xlane.xlu0 %1559 }
 0xbf5   : > { %v1561_v24 = vmul.f32 0.03125, %v1560_v23 }
 0xbf7   : > { %v1562_v25 = vadd.f32 1e-05, %v1561_v24 }
 0xbf9   : > { %1855 = vrsqrt.f32 %v1562_v25 }
 0xc03   : > { %v1856_v26 = vpop.eup %1855 }
 0xc04   : > { %v1564_v28 = vmul.f32 %v1856_v26, %v1556_v20 }
 0xc06   : > { %v1571_v30 = vmul.f32 %v1662_v27, %v1564_v28 }
 0xc08   : > { %v1578_v31 = vadd.f32 %v1663_v29, %v1571_v30 }
 0xc0a   : > { %1579 = vst.msk [vmem:[%s489_s30] sm:$0xff] %vm502_vm1, %v1578_v31 }
 0xc0b PF: > { %s25_s18 = sadd.s32 1, %s1863_s18  }
 0xc0c   : > { %p22_p4 = scmp.ge.s32.totalorder %s25_s18, 4  }
 0xc0e   :  { %24 = sbr.rel (!%p22_p4) target bundleno = 1 (0x1), region = 110 }

// kernel: run.25
= control target key start
LH: loop header
LB: loop body
LE: loop exit
PB: predicated region body
PF: predicated region fallthrough
CT: control target
= control target key end

     0   :  { %s2007_s18 = smov 0   ;;  %s2206_s0 = inlined_call_operand.vmem [shape: f32[2,4,32], index: 0, kind: input, shape index: {}]   ;;  %s2207_s1 = inlined_call_operand.vmem [shape: f32[32,96], index: 1, kind: input, shape index: {}]   ;;  %s2208_s2 = inlined_call_operand.vmem [shape: f32[1,96], index: 2, kind: input, shape index: {}]   ;;  %s2209_s3 = inlined_call_operand.vmem [shape: f32[32,32], index: 3, kind: input, shape index: {}]   ;;  %s2210_s4 = inlined_call_operand.vmem [shape: f32[1,32], index: 4, kind: input, shape index: {}]   ;;  %s2211_s5 = inlined_call_operand.vmem [shape: f32[1,32], index: 5, kind: input, shape index: {}]   ;;  %s2212_s6 = inlined_call_operand.vmem [shape: f32[1,32], index: 6, kind: input, shape index: {}]   ;;  %s2213_s7 = inlined_call_operand.vmem [shape: f32[32,32], index: 7, kind: input, shape index: {}]   ;;  %s2214_s8 = inlined_call_operand.vmem [shape: f32[1,32], index: 8, kind: input, shape index: {}]   ;;  %s2215_s9 = inlined_call_operand.vmem [shape: f32[32,32], index: 9, kind: input, shape index: {}]   ;;  %s2216_s10 = inlined_call_operand.vmem [shape: f32[1,32], index: 10, kind: input, shape index: {}]   ;;  %s2217_s11 = inlined_call_operand.vmem [shape: f32[1,32], index: 11, kind: input, shape index: {}]   ;;  %s2218_s12 = inlined_call_operand.vmem [shape: f32[1,32], index: 12, kind: input, shape index: {}]   ;;  %s2219_s13 = inlined_call_operand.vmem [shape: f32[1,32], index: 13, kind: input, shape index: {}]   ;;  %s2220_s14 = inlined_call_operand.vmem [shape: f32[1,32], index: 14, kind: input, shape index: {}]   ;;  %s2221_s15 = inlined_call_operand.vmem [shape: f32[2,4,32], index: 15, kind: output, shape index: {}]  }
   0x1 LB: > { %s1670_s19 = sadd.s32 4294967295, %s1908_s18   ;;  %p1674_p0 = scmp.ge.s32.totalorder %s1908_s18, 1  ;;  %s1908_s18 = sphi %s2007_s18, %s25_s18  }
   0x2   : > { %p436_p1 = scmp.lt.s32.totalorder %s1908_s18, 3 }
   0x4   : > { %p437_p2 = pnand %p1674_p0, %p436_p1 }
   0x5   : > { %v491_v0 = vld [vmem:[%s2207_s1] sm:$0xff] (!%p437_p2)  ;;  %v492_v1 = vld [vmem:[%s2207_s1 + $0x8] sm:$0xff] (!%p437_p2)  ;;  %v493_v2 = vld [vmem:[%s2207_s1 + $0x10] sm:$0xff] (!%p437_p2)  ;;  %v1910_v3 = vmov (!%p437_p2), 0.0|0.0   ;;  %vm1911_vm0 = vmmov (!%p437_p2), 0   ;;  %v1912_v6 = vmov (!%p437_p2), 0.0  }
   0x6   : > { %440 = sbr.rel (%p437_p2) target bundleno = 3396 (0xd44), region = 80  ;;  %1829 = vmatprep.subr.bf16.mxu0 (!%p437_p2), %v1910_v3  ;;  %v1830_v4 = vpack.c.bf16 (!%p437_p2), %v492_v1, %v491_v0  ;;  %v494_v5 = vld [vmem:[%s2207_s1 + $0x18] sm:$0xff] (!%p437_p2)  ;;  %1753 = vmatprep.mubr.msk.f32.mxu0 (!%p437_p2), %vm1911_vm0, %v1912_v6  ;;  %p482_p3 = scmp.lt.s32.totalorder (!%p437_p2), %s1670_s19, 1  ;;  %vm502_vm1 = vcmask (!%p437_p2), 261120   ;;  %v1677_v9 = vld [vmem:[%s2208_s2] ss:$0 sm:$0xff] (!%p437_p2) }
   0x7   : > { %1756 = vmatprep.subr.mxu1 (!%p437_p2), %v1912_v6  ;;  %1758 = vmatprep.mubr.msk.f32.mxu1 (!%p437_p2), %vm1911_vm0, %v1912_v6  ;;  %v1833_v7 = vpack.c.bf16 (!%p437_p2), %v494_v5, %v493_v2  ;;  %s1913_s21 = smov (!%p437_p2), 64   ;;  %s1914_s22 = smov (!%p437_p2), 96   ;;  %vm579_vm2 = vcmask (!%p437_p2), 64512   ;;  %vm673_vm3 = vcmask (!%p437_p2), 1043456   ;;  %vm655_vm4 = vcmask (!%p437_p2), 27648  }
   0x8   : > { %1831 = vmatpush3.bf16.msra.mxu0 (!%p437_p2), %v1830_v4  ;;  %s1915_s23 = smov (!%p437_p2), 88   ;;  %s1916_s24 = smov (!%p437_p2), 120   ;;  %vm669_vm5 = vcmask (!%p437_p2), 31744   ;;  %vm1260_vm6 = vcmask (!%p437_p2), 130048   ;;  %vm1262_vm7 = vcmask (!%p437_p2), 195584   ;;  %vm1351_vm8 = vcmask (!%p437_p2), 257024  }
   0x9   : > { %1832 = vmatprep.subr.bf16.mxu0 (!%p437_p2), %v1910_v3  ;;  %s1917_s25 = smov (!%p437_p2), 80   ;;  %s1918_s26 = smov (!%p437_p2), 72  }
   0xa   : > { %s1919_s27 = smov (!%p437_p2), 112   ;;  %s1920_s29 = smov (!%p437_p2), 104  }
   0xb   : > { %s1921_s30 = smov (!%p437_p2), 56   ;;  %s1923_s17 = smov (!%p437_p2), 40  }
   0xc   : > { %1834 = vmatpush3.bf16.msra.mxu0 (!%p437_p2), %v1833_v7 }
   0xd   : > { %s2223_s19 = smov (!%p482_p3, %s1670_s19), 1  ;;  %1776 = vmatprep.subr.mxu0 %v1912_v6 }
   0xe   : > { %s1675_s28 = sshll.u32 %s2223_s19, 2 }
   0xf   : > { %s485_s16 = scalar_lea.vmem %s2206_s0, %s1675_s28 }
  0x10   : > { %v2042_v8 = vld [vmem:[%s485_s16] sm:$0xf]  ;;  %s1922_s16 = smov 48  }
  0x11   : > { %1754 = vmatmul.mubr.msk.f32.vlgmr.msra.gmra.mrb[0].mxu0 %vm502_vm1, %v2042_v8 }
  0x12   : > { %1778 = vmatprep.mubr.msk.f32.mxu0 %vm1911_vm0, %v1912_v6 }
  0xe4   : > { %v572_v10 = vpop.f32.mrb[0].mxu0 }
  0xe5   : > { %v2052_v11 = vadd.f32 %v1677_v9, %v572_v10  ;;  %v1755_v12 = vpop.f32.mrb[1].mxu0 }
  0xe7   : > { %667 = vrot.lane.b32.xlu1 %v2052_v11, %s1913_s21  ;;  %577 = vrot.lane.b32.xlu0 %v2052_v11, %s1914_s22 }
  0xeb   : > { %748 = vrot.lane.b32.xlu1 %v2052_v11, %s1915_s23 }
  0xef   : > { %746 = vrot.lane.b32.xlu1 %v2052_v11, %s1916_s24 }
  0xf3   : > { %915 = vrot.lane.b32.xlu1 %v2052_v11, %s1917_s25 }
 0x159   : > { %v668_v13 = vpop.permute.xlu1 %667  ;;  %v578_v14 = vpop.permute.xlu0 %577 }
 0x15a   : > { %1757 = vmatpush3.xpose.msk.msra.mxu1 %vm579_vm2, %v578_v14  ;;  %v1265_v14 = vld [vmem:[%s2209_s3 + $0x8] sm:$0xff] }
 0x15b   : > { %1761 = vmatprep.subr.mxu1 %v1912_v6 }
 0x15d   : > { %v749_v15 = vpop.permute.xlu1 %748  ;;  %1759 = vmatmul.mubr.msk.f32.vlgmr.msra.gmra.mrb[0].mxu1 %vm579_vm2, %v2052_v11 }
 0x15e   : > { %1762 = vmatpush3.msk.msra.mxu1 %vm673_vm3, %v668_v13  ;;  %1763 = vmatprep.mubr.msk.f32.mxu1 %vm1911_vm0, %v1912_v6  ;;  %v1264_v13 = vld [vmem:[%s2209_s3] sm:$0xff] }
 0x15f   : > { %1766 = vmatprep.subr.mxu1 %v1912_v6 }
 0x161   : > { %v747_v16 = vpop.permute.xlu1 %746 }
 0x165   : > { %v916_v17 = vpop.permute.xlu1 %915 }
 0x166   : > { %1777 = vmatpush3.xpose.msk.msra.mxu0 %vm579_vm2, %v916_v17  ;;  %v1267_v17 = vld [vmem:[%s2209_s3 + $0x18] sm:$0xff] }
 0x167   : > { %1786 = vmatprep.subr.mxu0 %v1912_v6 }
 0x230   : > { %v650_v18 = vpop.f32.mrb[0].mxu1 }
 0x231   : > { %v654_v19 = vmul.f32 0.35355338, %v650_v18  ;;  %v1760_v20 = vpop.f32.mrb[1].mxu1 }
 0x233   : > { %v656_v21 = vsel %vm655_vm4, %v654_v19, -inf }
 0x234   : > { %657 = vmax.xlane.f32.xlu0 %v656_v21 }
 0x24a   : > { %1082 = vrot.lane.b32.xlu0 %v2052_v11, %s1918_s26 }
 0x2c1   : > { %v658_v22 = vpop.xlane.xlu0 %657 }
 0x2c2   : > { %v659_v23 = vsub.f32 %v654_v19, %v658_v22 }
 0x2c4   : > { %v660_v24 = vmul.f32 1.442695, %v659_v23 }
 0x2c5   : > { %v1083_v29 = vpop.permute.xlu0 %1082 }
 0x2c6   : > { %1878 = vpow2.f32 %v660_v24 }
 0x2d0   : > { %v1879_v25 = vpop.eup %1878 }
 0x2d1   : > { %v662_v26 = vsel %vm655_vm4, %v1879_v25, 0.0 }
 0x2d2   : > { %663 = vadd.xlane.f32.xlu1 %v662_v26 }
 0x2e3   : > { %913 = vrot.lane.b32.xlu1 %v2052_v11, %s1919_s27 }
 0x2e7   : > { %1080 = vrot.lane.b32.xlu1 %v2052_v11, %s1920_s29  ;;  %s1924_s29 = smov 8  }
 0x35f   : > { %v664_v27 = vpop.xlane.xlu1 %663 }
 0x360   : > { %1880 = vrcp.f32 %v664_v27 }
 0x363   : > { %v914_v28 = vpop.permute.xlu1 %913 }
 0x364   : > { %1779 = vmatmul.mubr.msk.f32.vlgmr.msra.gmra.mrb[2].mxu0 %vm579_vm2, %v914_v28 }
 0x365   : > { %1787 = vmatpush3.xpose.msk.msra.mxu0 %vm579_vm2, %v1083_v29  ;;  %1788 = vmatprep.mubr.msk.f32.mxu0 %vm1911_vm0, %v1912_v6 }
 0x366   : > { %1835 = vmatprep.subr.bf16.mxu0 %v1910_v3 }
 0x367   : > { %v1081_v30 = vpop.permute.xlu1 %1080 }
 0x368   : > { %1789 = vmatmul.mubr.msk.f32.vlgmr.msra.gmra.mrb[4].mxu0 %vm579_vm2, %v1081_v30 }
 0x369   : > { %1804 = vmatprep.mubr.msk.f32.mxu0 %vm1911_vm0, %v1912_v6 }
 0x36a   : > { %v1881_v31 = vpop.eup %1880 }
 0x36b   : > { %v666_v32 = vmul.f32 %v1881_v31, %v1879_v25  ;;  %v1695_v31 = vld [vmem:[%s2210_s4] ss:$0 sm:$0xff] }
 0x36d   : > { %1764 = vmatmul.mubr.msk.f32.vlgmr.msra.gmra.mrb[2].mxu1 %vm669_vm5, %v666_v32 }
 0x36e   : > { %1767 = vmatpush3.xpose.msk.msra.mxu1 %vm579_vm2, %v749_v15  ;;  %1768 = vmatprep.mubr.msk.f32.mxu1 %vm1911_vm0, %v1912_v6  ;;  %v1836_v15 = vpack.c.bf16 %v1265_v14, %v1264_v13 }
 0x36f   : > { %1771 = vmatprep.subr.mxu1 %v1912_v6 }
 0x370   : > { %1837 = vmatpush3.bf16.msra.mxu0 %v1836_v15 }
 0x371   : > { %1769 = vmatmul.mubr.msk.f32.vlgmr.msra.gmra.mrb[4].mxu1 %vm579_vm2, %v747_v16  ;;  %1838 = vmatprep.subr.bf16.mxu0 %v1910_v3  ;;  %v1266_v16 = vld [vmem:[%s2209_s3 + $0x10] sm:$0xff] }
 0x372   : > { %1773 = vmatprep.mubr.msk.f32.mxu1 %vm1911_vm0, %v1912_v6  ;;  %v1839_v18 = vpack.c.bf16 %v1267_v17, %v1266_v16 }
 0x374   : > { %1840 = vmatpush3.bf16.msra.mxu0 %v1839_v18 }
 0x375   : > { %1847 = vmatprep.subr.bf16.mxu0 %v1910_v3 }
 0x437   : > { %v987_v33 = vpop.f32.mrb[2].mxu0 }
 0x438   : > { %v991_v34 = vmul.f32 0.35355338, %v987_v33  ;;  %v1780_v35 = vpop.f32.mrb[3].mxu0 }
 0x43a   : > { %v992_v36 = vsel %vm655_vm4, %v991_v34, -inf }
 0x43b   : > { %993 = vmax.xlane.f32.xlu0 %v992_v36  ;;  %v1154_v37 = vpop.f32.mrb[4].mxu0 }
 0x43c   : > { %v1790_v38 = vpop.f32.mrb[5].mxu0  ;;  %v1158_v44 = vmul.f32 0.35355338, %v1154_v37 }
 0x43e   : > { %v1159_v46 = vsel %vm655_vm4, %v1158_v44, -inf }
 0x440   : > { %v2091_v39 = vpop.f32.mrb[2].mxu1 }
 0x441   : > { %v1765_v40 = vpop.f32.mrb[3].mxu1 }
 0x444   : > { %v820_v41 = vpop.f32.mrb[4].mxu1 }
 0x445   : > { %v824_v42 = vmul.f32 0.35355338, %v820_v41  ;;  %v1770_v43 = vpop.f32.mrb[5].mxu1 }
 0x447   : > { %v825_v45 = vsel %vm655_vm4, %v824_v42, -inf }
 0x448   : > { %826 = vmax.xlane.f32.xlu1 %v825_v45 }
 0x44c   : > { %1160 = vmax.xlane.f32.xlu1 %v1159_v46 }
 0x4c8   : > { %v994_v47 = vpop.xlane.xlu0 %993 }
 0x4c9   : > { %v995_v48 = vsub.f32 %v991_v34, %v994_v47 }
 0x4cb   : > { %v996_v49 = vmul.f32 1.442695, %v995_v48 }
 0x4cd   : > { %1882 = vpow2.f32 %v996_v49 }
 0x4d5   : > { %v827_v50 = vpop.xlane.xlu1 %826 }
 0x4d6   : > { %v828_v58 = vsub.f32 %v824_v42, %v827_v50  ;;  %v1381_v42 = vld [vmem:[%s2213_s7 + $0x8] sm:$0xff]  ;;  %v1697_v50 = vld [vmem:[%s2211_s5] ss:$0 sm:$0xff] }
 0x4d7   : > { %v1883_v51 = vpop.eup %1882 }
 0x4d8   : > { %v998_v52 = vsel %vm655_vm4, %v1883_v51, 0.0  ;;  %v829_v59 = vmul.f32 1.442695, %v828_v58 }
 0x4d9   : > { %999 = vadd.xlane.f32.xlu1 %v998_v52  ;;  %v1161_v53 = vpop.xlane.xlu1 %1160  ;;  %v1698_v52 = vld [vmem:[%s2212_s6] ss:$0 sm:$0xff] }
 0x4da   : > { %v1162_v54 = vsub.f32 %v1158_v44, %v1161_v53  ;;  %v1383_v44 = vld [vmem:[%s2213_s7 + $0x18] sm:$0xff] }
 0x4dc   : > { %v1163_v55 = vmul.f32 1.442695, %v1162_v54 }
 0x4de   : > { %1884 = vpow2.f32 %v1163_v55  ;;  %v1473_v55 = vld [vmem:[%s2215_s9] sm:$0xff] }
 0x4df   : > { %1886 = vpow2.f32 %v829_v59  ;;  %v1476_v59 = vld [vmem:[%s2215_s9 + $0x18] sm:$0xff] }
 0x4e8   : > { %v1885_v56 = vpop.eup %1884 }
 0x4e9   : > { %v1165_v57 = vsel %vm655_vm4, %v1885_v56, 0.0  ;;  %v1887_v60 = vpop.eup %1886 }
 0x4ea   : > { %836 = vrot.lane.b32.xlu1 %v2052_v11, %s1921_s30  ;;  %1166 = vadd.xlane.f32.xlu0 %v1165_v57  ;;  %v831_v61 = vsel %vm655_vm4, %v1887_v60, 0.0  ;;  %s1925_s30 = smov 16   ;;  %v1475_v57 = vld [vmem:[%s2215_s9 + $0x10] sm:$0xff] }
 0x500   : > { %1003 = vrot.lane.b32.xlu0 %v2052_v11, %s1922_s16  ;;  %s1926_s16 = smov 24  }
 0x50e   : > { %832 = vadd.xlane.f32.xlu1 %v831_v61  ;;  %v1699_v61 = vld [vmem:[%s2214_s8] ss:$0 sm:$0xff] }
 0x51f   : > { %1170 = vrot.lane.b32.xlu1 %v2052_v11, %s1923_s17  ;;  %s489_s17 = scalar_lea.vmem %s2221_s15, %s1675_s28 }
 0x566   : > { %v1000_v62 = vpop.xlane.xlu1 %999 }
 0x56a   : > { %v837_v63 = vpop.permute.xlu1 %836 }
 0x56b   : > { %1772 = vmatpush3.msk.msra.mxu1 %vm673_vm3, %v837_v63 }
 0x56c   : > { %1781 = vmatprep.subr.mxu1 %v1912_v6 }
 0x577   : > { %v1167_v1 = vpop.xlane.xlu0 %1166 }
 0x57b   : > { %v1004_v7 = vpop.permute.xlu0 %1003 }
 0x59b   : > { %v833_v0 = vpop.xlane.xlu1 %832 }
 0x59c   : > { %1888 = vrcp.f32 %v833_v0 }
 0x59d   : > { %1890 = vrcp.f32 %v1000_v62 }
 0x59e   : > { %1892 = vrcp.f32 %v1167_v1 }
 0x59f   : > { %v1171_v11 = vpop.permute.xlu1 %1170 }
 0x5a6   : > { %v1889_v2 = vpop.eup %1888 }
 0x5a7   : > { %v835_v4 = vmul.f32 %v1889_v2, %v1887_v60  ;;  %v1891_v5 = vpop.eup %1890  ;;  %v1851_v60 = vpack.c.bf16 %v1476_v59, %v1475_v57 }
 0x5a8   : > { %v1002_v9 = vmul.f32 %v1891_v5, %v1883_v51  ;;  %v1893_v10 = vpop.eup %1892 }
 0x5a9   : > { %1774 = vmatmul.mubr.msk.f32.vlgmr.msra.gmra.mrb[6].mxu1 %vm669_vm5, %v835_v4  ;;  %v1169_v12 = vmul.f32 %v1893_v10, %v1885_v56  ;;  %v1474_v56 = vld [vmem:[%s2215_s9 + $0x8] sm:$0xff] }
 0x5aa   : > { %1782 = vmatpush3.msk.msra.mxu1 %vm673_vm3, %v1004_v7  ;;  %1783 = vmatprep.mubr.msk.f32.mxu1 %vm1911_vm0, %v1912_v6  ;;  %v1848_v58 = vpack.c.bf16 %v1474_v56, %v1473_v55 }
 0x5ab   : > { %1791 = vmatprep.subr.mxu1 %v1912_v6 }
 0x5ad   : > { %1784 = vmatmul.mubr.msk.f32.vlgmr.msra.gmra.mrb[8].mxu1 %vm669_vm5, %v1002_v9 }
 0x5ae   : > { %1792 = vmatpush3.msk.msra.mxu1 %vm673_vm3, %v1171_v11  ;;  %1793 = vmatprep.mubr.msk.f32.mxu1 %vm1911_vm0, %v1912_v6 }
 0x5af   : > { %1841 = vmatprep.subr.bf16.mxu1 %v1910_v3 }
 0x5b1   : > { %1794 = vmatmul.mubr.msk.f32.vlgmr.msra.gmra.mrb[10].mxu1 %vm669_vm5, %v1169_v12 }
 0x5b2   : > { %1815 = vmatprep.mubr.msk.f32.mxu1 %vm1911_vm0, %v1912_v6 }
 0x67c   : > { %v909_v19 = vpop.f32.mrb[6].mxu1 }
 0x67d   : > { %1248 = vrot.lane.b32.xlu1 %v909_v19, %s1924_s29  ;;  %v1775_v20 = vpop.f32.mrb[7].mxu1 }
 0x680   : > { %v1076_v21 = vpop.f32.mrb[8].mxu1 }
 0x681   : > { %1252 = vrot.lane.b32.xlu0 %v1076_v21, %s1925_s30  ;;  %v1785_v22 = vpop.f32.mrb[9].mxu1 }
 0x684   : > { %v1243_v23 = vpop.f32.mrb[10].mxu1 }
 0x685   : > { %1256 = vrot.lane.b32.xlu1 %v1243_v23, %s1926_s16  ;;  %v1795_v24 = vpop.f32.mrb[11].mxu1 }
 0x6ef   : > { %v1249_v25 = vpop.permute.xlu1 %1248 }
 0x6f0   : > { %v1259_v27 = vsel %vm579_vm2, %v2091_v39, %v1249_v25 }
 0x6f3   : > { %v1253_v26 = vpop.permute.xlu0 %1252 }
 0x6f4   : > { %v1261_v28 = vsel %vm1260_vm6, %v1259_v27, %v1253_v26  ;;  %v1703_v27 = vld [vmem:[%s2217_s11] ss:$0 sm:$0xff] }
 0x6f7   : > { %v1257_v29 = vpop.permute.xlu1 %1256 }
 0x6f8   : > { %v1263_v30 = vsel %vm1262_vm7, %v1261_v28, %v1257_v29  ;;  %v1704_v29 = vld [vmem:[%s2218_s12] ss:$0 sm:$0xff] }
 0x6f9   : > { %1805 = vmatmul.mubr.msk.f32.vlgmr.msra.gmra.mrb[6].mxu0 %vm502_vm1, %v1263_v30 }
 0x6fa   : > { %1826 = vmatprep.mubr.msk.f32.mxu0 %vm1911_vm0, %v1912_v6  ;;  %v1380_v6 = vld [vmem:[%s2213_s7] sm:$0xff]  ;;  %1849 = vmatpush3.bf16.msra.mxu0 %v1848_v58 }
 0x6fb   : > { %v1842_v43 = vpack.c.bf16 %v1381_v42, %v1380_v6  ;;  %1850 = vmatprep.subr.bf16.mxu0 %v1910_v3  ;;  %v1705_v6 = vld [vmem:[%s2219_s13] ss:$0 sm:$0xff] }
 0x6fd   : > { %1843 = vmatpush3.bf16.msra.mxu1 %v1842_v43  ;;  %v1706_v43 = vld [vmem:[%s2220_s14] ss:$0 sm:$0xff] }
 0x6fe   : > { %1844 = vmatprep.subr.bf16.mxu1 %v1910_v3  ;;  %1852 = vmatpush3.bf16.msra.mxu0 %v1851_v60  ;;  %v1701_v3 = vld [vmem:[%s2216_s10] ss:$0 sm:$0xff] }
 0x7cc   : > { %v1344_v32 = vpop.f32.mrb[6].mxu0 }
 0x7cd   : > { %v1345_v33 = vadd.f32 %v1695_v31, %v1344_v32  ;;  %v1806_v34 = vpop.f32.mrb[7].mxu0 }
 0x7cf   : > { %v1348_v35 = vadd.f32 %v1345_v33, %v2042_v8  ;;  %v1382_v8 = vld [vmem:[%s2213_s7 + $0x10] sm:$0xff] }
 0x7d0   : > { %v1845_v45 = vpack.c.bf16 %v1383_v44, %v1382_v8 }
 0x7d1   : > { %v1352_v36 = vsel %vm1351_vm8, %v1348_v35, 0.0 }
 0x7d2   : > { %1353 = vadd.xlane.f32.xlu0 %v1352_v36  ;;  %1846 = vmatpush3.bf16.msra.mxu1 %v1845_v45 }
 0x85f   : > { %v1354_v37 = vpop.xlane.xlu0 %1353 }
 0x860   : > { %v1356_v38 = vmul.f32 0.03125, %v1354_v37 }
 0x862   : > { %v1357_v39 = vsub.f32 %v1348_v35, %v1356_v38 }
 0x864   : > { %v1358_v40 = vmul.f32 %v1357_v39, %v1357_v39 }
 0x866   : > { %v1359_v41 = vsel %vm1351_vm8, %v1358_v40, 0.0 }
 0x867   : > { %1360 = vadd.xlane.f32.xlu1 %v1359_v41 }
 0x8f4   : > { %v1361_v46 = vpop.xlane.xlu1 %1360 }
 0x8f5   : > { %v1362_v47 = vmul.f32 0.03125, %v1361_v46 }
 0x8f7   : > { %v1363_v48 = vadd.f32 1e-05, %v1362_v47 }
 0x8f9   : > { %1894 = vrsqrt.f32 %v1363_v48 }
 0x903   : > { %v1895_v49 = vpop.eup %1894 }
 0x904   : > { %v1365_v51 = vmul.f32 %v1895_v49, %v1357_v39 }
 0x906   : > { %v1372_v53 = vmul.f32 %v1697_v50, %v1365_v51 }
 0x908   : > { %v1379_v54 = vadd.f32 %v1698_v52, %v1372_v53 }
 0x90a   : > { %1816 = vmatmul.mubr.msk.f32.vlgmr.msra.gmra.mrb[12].mxu1 %vm502_vm1, %v1379_v54 }
 0x9dd   : > { %v1460_v62 = vpop.f32.mrb[12].mxu1 }
 0x9de   : > { %v1461_v63 = vadd.f32 %v1699_v61, %v1460_v62  ;;  %v1817_v0 = vpop.f32.mrb[13].mxu1 }
 0x9e0   : > { %v1465_v1 = vmul.f32 0.044715, %v1461_v63  ;;  %v1464_v10 = vmul.f32 0.5, %v1461_v63 }
 0x9e2   : > { %v1466_v2 = vmul.f32 %v1465_v1, %v1461_v63 }
 0x9e4   : > { %v1467_v4 = vmul.f32 %v1466_v2, %v1461_v63 }
 0x9e6   : > { %v1468_v5 = vadd.f32 %v1467_v4, %v1461_v63 }
 0x9e8   : > { %v1469_v7 = vmul.f32 0.7978846, %v1468_v5 }
 0x9ea   : > { %1896 = vtanh.f32 %v1469_v7 }
 0x9f4   : > { %v1897_v9 = vpop.eup %1896 }
 0x9f5   : > { %v1471_v11 = vadd.f32 1.0, %v1897_v9 }
 0x9f7   : > { %v1472_v12 = vmul.f32 %v1471_v11, %v1464_v10 }
 0x9f9   : > { %1827 = vmatmul.mubr.msk.f32.vlgmr.msra.gmra.mrb[8].mxu0 %vm502_vm1, %v1472_v12 }
 0xacc   : > { %v1553_v13 = vpop.f32.mrb[8].mxu0 }
 0xacd   : > { %v1554_v14 = vadd.f32 %v1701_v3, %v1553_v13  ;;  %v1828_v15 = vpop.f32.mrb[9].mxu0 }
 0xacf   : > { %v1557_v16 = vadd.f32 %v1554_v14, %v1379_v54 }
 0xad1   : > { %v1560_v17 = vsel %vm1351_vm8, %v1557_v16, 0.0 }
 0xad2   : > { %1561 = vadd.xlane.f32.xlu0 %v1560_v17 }
 0xb5f   : > { %v1562_v18 = vpop.xlane.xlu0 %1561 }
 0xb60   : > { %v1563_v19 = vmul.f32 0.03125, %v1562_v18 }
 0xb62   : > { %v1564_v20 = vsub.f32 %v1557_v16, %v1563_v19 }
 0xb64   : > { %v1565_v21 = vmul.f32 %v1564_v20, %v1564_v20 }
 0xb66   : > { %v1566_v22 = vsel %vm1351_vm8, %v1565_v21, 0.0 }
 0xb67   : > { %1567 = vadd.xlane.f32.xlu0 %v1566_v22 }
 0xbf4   : > { %v1568_v23 = vpop.xlane.xlu0 %1567 }
 0xbf5   : > { %v1569_v24 = vmul.f32 0.03125, %v1568_v23 }
 0xbf7   : > { %v1570_v25 = vadd.f32 1e-05, %v1569_v24 }
 0xbf9   : > { %1898 = vrsqrt.f32 %v1570_v25 }
 0xc03   : > { %v1899_v26 = vpop.eup %1898 }
 0xc04   : > { %v1572_v28 = vmul.f32 %v1899_v26, %v1564_v20 }
 0xc06   : > { %v1579_v30 = vmul.f32 %v1703_v27, %v1572_v28 }
 0xc08   : > { %v1586_v31 = vadd.f32 %v1704_v29, %v1579_v30 }
 0xc0a   : > { %v1589_v32 = vsel %vm1351_vm8, %v1586_v31, 0.0 }
 0xc0b   : > { %1590 = vadd.xlane.f32.xlu1 %v1589_v32 }
 0xc98   : > { %v1591_v33 = vpop.xlane.xlu1 %1590 }
 0xc99   : > { %v1592_v34 = vmul.f32 0.03125, %v1591_v33 }
 0xc9b   : > { %v1593_v35 = vsub.f32 %v1586_v31, %v1592_v34 }
 0xc9d   : > { %v1594_v36 = vmul.f32 %v1593_v35, %v1593_v35 }
 0xc9f   : > { %v1595_v37 = vsel %vm1351_vm8, %v1594_v36, 0.0 }
 0xca0   : > { %1596 = vadd.xlane.f32.xlu0 %v1595_v37 }
 0xd2d   : > { %v1597_v38 = vpop.xlane.xlu0 %1596 }
 0xd2e   : > { %v1598_v39 = vmul.f32 0.03125, %v1597_v38 }
 0xd30   : > { %v1599_v40 = vadd.f32 1e-05, %v1598_v39 }
 0xd32   : > { %1900 = vrsqrt.f32 %v1599_v40 }
 0xd3c   : > { %v1901_v41 = vpop.eup %1900 }
 0xd3d   : > { %v1601_v42 = vmul.f32 %v1901_v41, %v1593_v35 }
 0xd3f   : > { %v1608_v8 = vmul.f32 %v1705_v6, %v1601_v42 }
 0xd41   : > { %v1615_v44 = vadd.f32 %v1706_v43, %v1608_v8 }
 0xd43   : > { %1616 = vst.msk [vmem:[%s489_s17] sm:$0xf] %vm1351_vm8, %v1615_v44 }
 0xd44 PF: > { %s25_s18 = sadd.s32 1, %s1908_s18  }
 0xd45   : > { %p22_p4 = scmp.ge.s32.totalorder %s25_s18, 4  }
 0xd47   :  { %24 = sbr.rel (!%p22_p4) target bundleno = 1 (0x1), region = 110 }

// kernel: run.33
= control target key start
LH: loop header
LB: loop body
LE: loop exit
PB: predicated region body
PF: predicated region fallthrough
CT: control target
= control target key end

     0   :  { %s381_s12 = smov 0   ;;  %s413_s0 = inlined_call_operand.vmem [shape: f32[2,8,32], index: 0, kind: input, shape index: {}]   ;;  %s414_s1 = inlined_call_operand.vmem [shape: f32[32,128], index: 1, kind: input, shape index: {}]   ;;  %s415_s2 = inlined_call_operand.vmem [shape: f32[1,128], index: 2, kind: input, shape index: {}]   ;;  %s416_s3 = inlined_call_operand.vmem [shape: f32[2,8,128], index: 3, kind: output, shape index: {}]  }
   0x1 LB: > { %s306_s13 = sadd.s32 4294967295, %s356_s12   ;;  %p310_p0 = scmp.ge.s32.totalorder %s356_s12, 1  ;;  %s356_s12 = sphi %s381_s12, %s13_s12  }
   0x2   : > { %p136_p1 = scmp.lt.s32.totalorder %s356_s12, 3 }
   0x4   : > { %p137_p2 = pnand %p310_p0, %p136_p1 }
   0x5   : > { %v167_v0 = vld [vmem:[%s414_s1] sm:$0xff] (!%p137_p2)  ;;  %v168_v1 = vld [vmem:[%s414_s1 + $0x8] sm:$0xff] (!%p137_p2)  ;;  %v169_v2 = vld [vmem:[%s414_s1 + $0x10] sm:$0xff] (!%p137_p2)  ;;  %v358_v3 = vmov (!%p137_p2), 0.0|0.0   ;;  %vm359_vm0 = vmmov (!%p137_p2), 0   ;;  %v360_v6 = vmov (!%p137_p2), 0.0  }
   0x6   : > { %140 = sbr.rel (%p137_p2) target bundleno = 232 (0xe8), region = 32  ;;  %333 = vmatprep.subr.bf16.mxu0 (!%p137_p2), %v358_v3  ;;  %v334_v4 = vpack.c.bf16 (!%p137_p2), %v168_v1, %v167_v0  ;;  %v170_v5 = vld [vmem:[%s414_s1 + $0x18] sm:$0xff] (!%p137_p2)  ;;  %330 = vmatprep.mubr.msk.f32.mxu0 (!%p137_p2), %vm359_vm0, %v360_v6  ;;  %p158_p3 = scmp.lt.s32.totalorder (!%p137_p2), %s306_s13, 1  ;;  %vm178_vm1 = vcmask (!%p137_p2), 261120   ;;  %v313_v9 = vld [vmem:[%s415_s2] ss:$0 sm:$0xff] (!%p137_p2) }
   0x7   : > { %v337_v7 = vpack.c.bf16 (!%p137_p2), %v170_v5, %v169_v2 }
   0x8   : > { %335 = vmatpush3.bf16.msra.mxu0 (!%p137_p2), %v334_v4 }
   0x9   : > { %336 = vmatprep.subr.bf16.mxu0 (!%p137_p2), %v358_v3 }
   0xc   : > { %338 = vmatpush3.bf16.msra.mxu0 (!%p137_p2), %v337_v7 }
   0xd   : > { %s418_s13 = smov (!%p158_p3, %s306_s13), 1 }
   0xe   : > { %s311_s22 = sshll.u32 %s418_s13, 3 }
   0xf   : > { %s161_s25 = scalar_lea.vmem %s413_s0, %s311_s22  ;;  %s165_s30 = scalar_lea.vmem %s416_s3, %s311_s22 }
  0x10   : > { %v166_v8 = vld [vmem:[%s161_s25] sm:$0xff] }
  0x11   : > { %331 = vmatmul.mubr.msk.f32.vlgmr.msra.gmra.mrb[0].mxu0 %vm178_vm1, %v166_v8 }
  0xe4   : > { %v248_v10 = vpop.f32.mrb[0].mxu0 }
  0xe5   : > { %v249_v11 = vadd.f32 %v313_v9, %v248_v10  ;;  %v332_v12 = vpop.f32.mrb[1].mxu0 }
  0xe7   : > { %252 = vst [vmem:[%s165_s30] sm:$0xff] %v249_v11 }
  0xe8 PF: > { %s13_s12 = sadd.s32 1, %s356_s12  }
  0xe9   : > { %p10_p4 = scmp.ge.s32.totalorder %s13_s12, 4  }
  0xeb   :  { %12 = sbr.rel (!%p10_p4) target bundleno = 1 (0x1), region = 62 }

// kernel: run.32
= control target key start
LH: loop header
LB: loop body
LE: loop exit
PB: predicated region body
PF: predicated region fallthrough
CT: control target
= control target key end

     0   :  { %s5105_s0 = inlined_call_operand.vmem [shape: f32[2,16,32], index: 0, kind: input, shape index: {}]   ;;  %s5106_s1 = inlined_call_operand.vmem [shape: f32[2,12,32], index: 1, kind: input, shape index: {}]   ;;  %s5107_s2 = inlined_call_operand.vmem [shape: f32[32,96], index: 2, kind: input, shape index: {}]   ;;  %s5108_s3 = inlined_call_operand.vmem [shape: f32[1,96], index: 3, kind: input, shape index: {}]   ;;  %s5109_s4 = inlined_call_operand.vmem [shape: f32[32,32], index: 4, kind: input, shape index: {}]   ;;  %s5110_s5 = inlined_call_operand.vmem [shape: f32[1,32], index: 5, kind: input, shape index: {}]   ;;  %s5111_s6 = inlined_call_operand.vmem [shape: f32[1,32], index: 6, kind: input, shape index: {}]   ;;  %s5112_s7 = inlined_call_operand.vmem [shape: f32[1,32], index: 7, kind: input, shape index: {}]   ;;  %s5113_s8 = inlined_call_operand.vmem [shape: f32[32,32], index: 8, kind: input, shape index: {}]   ;;  %s5114_s9 = inlined_call_operand.vmem [shape: f32[1,32], index: 9, kind: input, shape index: {}]   ;;  %s5115_s10 = inlined_call_operand.vmem [shape: f32[32,64], index: 10, kind: input, shape index: {}]   ;;  %s5116_s11 = inlined_call_operand.vmem [shape: f32[1,64], index: 11, kind: input, shape index: {}]   ;;  %s5117_s12 = inlined_call_operand.vmem [shape: f32[32,32], index: 12, kind: input, shape index: {}]   ;;  %s5118_s13 = inlined_call_operand.vmem [shape: f32[1,32], index: 13, kind: input, shape index: {}]   ;;  %s5119_s14 = inlined_call_operand.vmem [shape: f32[1,32], index: 14, kind: input, shape index: {}]   ;;  %s5120_s15 = inlined_call_operand.vmem [shape: f32[1,32], index: 15, kind: input, shape index: {}]   ;;  %s5121_s16 = inlined_call_operand.vmem [shape: f32[32,32], index: 16, kind: input, shape index: {}]   ;;  %s5122_s17 = inlined_call_operand.vmem [shape: f32[1,32], index: 17, kind: input, shape index: {}]   ;;  %s5123_s18 = inlined_call_operand.vmem [shape: f32[32,32], index: 18, kind: input, shape index: {}]   ;;  %s5124_s19 = inlined_call_operand.vmem [shape: f32[1,32], index: 19, kind: input, shape index: {}]   ;;  %s5125_s20 = inlined_call_operand.vmem [shape: f32[1,32], index: 20, kind: input, shape index: {}]   ;;  %s5126_s21 = inlined_call_operand.hbm [shape: f32[1,32], index: 21, kind: input, shape index: {}]   ;;  %s5127_s22 = inlined_call_operand.hbm [shape: f32[1,32], index: 22, kind: input, shape index: {}]   ;;  %s5128_s23 = inlined_call_operand.hbm [shape: f32[1,32], index: 23, kind: input, shape index: {}]   ;;  %s5129_s24 = inlined_call_operand.vmem [shape: f32[2,16,32], index: 24, kind: output, shape index: {}]  }
   0x1   :  { %5148 = sst [smem:[#allocation11_spill]] %s5105_s0 }
   0x2   :  { %5149 = sst [smem:[#allocation12_spill]] %s5106_s1 }
   0x3   :  { %5150 = sst [smem:[#allocation13_spill]] %s5107_s2 }
   0x4   :  { %5151 = sst [smem:[#allocation14_spill]] %s5108_s3 }
   0x5   :  { %5152 = sst [smem:[#allocation15_spill]] %s5109_s4 }
   0x6   :  { %5153 = sst [smem:[#allocation16_spill]] %s5110_s5 }
   0x7   :  { %5154 = sst [smem:[#allocation17_spill]] %s5111_s6 }
   0x8   :  { %5155 = sst [smem:[#allocation18_spill]] %s5112_s7 }
   0x9   :  { %5156 = sst [smem:[#allocation19_spill]] %s5113_s8 }
   0xa   :  { %5157 = sst [smem:[#allocation20_spill]] %s5129_s24 }
   0xb   :  { %29 = vsyncpa [#allocation4], 0 }
   0xc   :  { %30 = vsyncpa [#allocation6], 0  ;;  %s4507_s5 = smov 0  }
   0xd LB: > { %5158 = sst [smem:[#allocation10_spill]] %s4362_s5  ;;  %s4513_s26 = sadd.s32 4294967295, %s4362_s5   ;;  %s4362_s5 = sphi %s4507_s5, %s36_s5  }
   0xe   : > { %p3511_p0 = scmp.ge.s32.totalorder %s4362_s5, 1  ;;  %p581_p1 = scmp.lt.s32.totalorder %s4362_s5, 3 }
   0xf   : > { %p5133_p2 = scmp.eq.s32.totalorder %s4513_s26, 0  ;;  %s4364_s28 = smov [#allocation5]  }
  0x10   : > { %p4518_p3 = pnand %p3511_p0, %p581_p1  ;;  %s662_s6 = sshll.u32 %s4364_s28, 4  ;;  %s663_s6 = int_to_ptr.vmem [resolvable:$true] %s662_s6 }
  0x11   : > { %s4365_s2 = smov [#allocation3]   ;;  %s4366_s0 = smov [#allocation7]  }
  0x12   : > { %s5159_s27 = scalar_select %p4518_p3, 1, 0 }
  0x13   : > { %p4063_p4 = pneg %p4518_p3  ;;  %s651_s29 = sshll.u32 %s4365_s2, 4  ;;  %s4530_s29 = int_to_ptr.vmem [resolvable:$true] %s651_s29 }
  0x14   : > { %s673_s7 = sshll.u32 %s4366_s0, 4  ;;  %s4264_s8 = scalar_lea.hbm %s5127_s22, 16  ;;  %s4532_s7 = int_to_ptr.vmem [resolvable:$true] %s673_s7 }
  0x15   : > { %p4526_p5 = pnand %p5133_p2, %p4063_p4  ;;  %p4265_p6 = scmp.ne.s32.totalorder %s5127_s22, %s4264_s8 }
  0x16   : > { %p4271_p10 = scmp.lt.u32.totalorder %s4264_s8, %s5127_s22 }
  0x17   : > { %p4542_p7 = pneg %p4526_p5 }
  0x19   : > { %p4267_p8 = pnand %p4542_p7, %p4265_p6 }
  0x1b   : > { %p4268_p9 = pneg %p4267_p8 }
  0x1d   : > { %p4273_p11 = pnand %p4271_p10, %p4268_p9 }
  0x1f   : > { %4276 = shalt.err (!%p4273_p11)
}
  0x20   : > { %s4277_s3 = scalar_lea.vmem %s663_s6, 16  ;;  %s4284_s25 = scalar_lea.vmem %s663_s6, 32 }
  0x21   : > { %p4278_p12 = scmp.ne.s32.totalorder %s663_s6, %s4277_s3  ;;  %p4285_p1 = scmp.lt.s32.totalorder %s663_s6, %s663_s6 }
  0x22   : > { %p4286_p4 = scmp.lt.s32.totalorder %s4284_s25, %s4277_s3 }
  0x23   : > { %p4280_p13 = pnand %p4278_p12, %p4542_p7 }
  0x24   : > { %p4287_p2 = por %p4286_p4, %p4285_p1 }
  0x25   : > { %p4281_p0 = pneg %p4280_p13 }
  0x27   : > { %p4288_p3 = pnand %p4287_p2, %p4281_p0 }
  0x29   : > { %4291 = shalt.err (!%p4288_p3)
}
  0x2a   : > { %4069 = dma.hbm_to_vmem [thread:$0]  (!%p4526_p5), %s5127_s22, 16, %s663_s6, [#allocation6]  }
  0x2b   : > { %s4292_s0 = scalar_lea.hbm %s5126_s21, 16 }
  0x2c   : > { %p4293_p6 = scmp.ne.s32.totalorder %s5126_s21, %s4292_s0  ;;  %p4299_p2 = scmp.lt.u32.totalorder %s4292_s0, %s5126_s21 }
  0x2e   : > { %p4295_p8 = pnand %p4293_p6, %p4542_p7 }
  0x30   : > { %p4296_p9 = pneg %p4295_p8 }
  0x32   : > { %p4301_p3 = pnand %p4299_p2, %p4296_p9 }
  0x34   : > { %4304 = shalt.err (!%p4301_p3)
}
  0x35   : > { %s4305_s6 = scalar_lea.vmem %s4530_s29, 16  ;;  %s4312_s24 = scalar_lea.vmem %s4530_s29, 32 }
  0x36   : > { %p4306_p10 = scmp.ne.s32.totalorder %s4530_s29, %s4305_s6  ;;  %p4313_p13 = scmp.lt.s32.totalorder %s4530_s29, %s4530_s29 }
  0x37   : > { %p4314_p0 = scmp.lt.s32.totalorder %s4312_s24, %s4305_s6 }
  0x38   : > { %p4308_p11 = pnand %p4306_p10, %p4542_p7 }
  0x39   : > { %p4315_p1 = por %p4314_p0, %p4313_p13 }
  0x3a   : > { %p4309_p12 = pneg %p4308_p11 }
  0x3c   : > { %p4316_p4 = pnand %p4315_p1, %p4309_p12 }
  0x3e   : > { %4319 = shalt.err (!%p4316_p4)
}
  0x3f   : > { %4066 = dma.hbm_to_vmem [thread:$0]  (!%p4526_p5), %s5126_s21, 16, %s4530_s29, [#allocation4]  }
  0x40   : > { %s4320_s2 = scalar_lea.hbm %s5128_s23, 16 }
  0x41   : > { %p4321_p6 = scmp.ne.s32.totalorder %s5128_s23, %s4320_s2  ;;  %p4327_p2 = scmp.lt.u32.totalorder %s4320_s2, %s5128_s23 }
  0x43   : > { %p4323_p8 = pnand %p4321_p6, %p4542_p7 }
  0x45   : > { %p4324_p9 = pneg %p4323_p8 }
  0x47   : > { %p4329_p3 = pnand %p4327_p2, %p4324_p9 }
  0x49   : > { %4332 = shalt.err (!%p4329_p3)
}
  0x4a   : > { %s4333_s29 = scalar_lea.vmem %s4532_s7, 16  ;;  %s4340_s24 = scalar_lea.vmem %s4532_s7, 32 }
  0x4b   : > { %p4334_p10 = scmp.ne.s32.totalorder %s4532_s7, %s4333_s29  ;;  %p4341_p13 = scmp.lt.s32.totalorder %s4532_s7, %s4532_s7 }
  0x4c   : > { %p4342_p0 = scmp.lt.s32.totalorder %s4340_s24, %s4333_s29 }
  0x4d   : > { %p4336_p11 = pnand %p4334_p10, %p4542_p7 }
  0x4e   : > { %p4343_p1 = por %p4342_p0, %p4341_p13 }
  0x4f   : > { %p4337_p12 = pneg %p4336_p11 }
  0x51   : > { %p4344_p4 = pnand %p4343_p1, %p4337_p12 }
  0x53   : > { %4347 = shalt.err (!%p4344_p4)
}
  0x54   : > { %4072 = dma.hbm_to_vmem [thread:$0]  (!%p4526_p5), %s5128_s23, 16, %s4532_s7, [#allocation6]  }
  0x55   : > { %p5162_p6 = scmp.ne.s32.totalorder %s5159_s27, 0 }
  0x56   : > { %p5163_p7 = scmp.eq.s32.totalorder (!%p5162_p6), %s4513_s26, 0 }
  0x57   : > { %702 = sbr.rel (%p5162_p6) target bundleno = 7522 (0x1d62), region = 116 }
  0x5e   : > { %4353 = dma.done.wait (%p5163_p7), [#allocation4], 16   ;;  %p5164_p8 = pmov %p5163_p7 }
  0x5f   : > { %p5165_p9 = pmov %p5163_p7 }
  0x60   : > { %4355 = vsyncadd (%p5164_p8), [#allocation4], 4294967280 }
  0x61   : > { %4357 = dma.done.wait (%p5165_p9), [#allocation6], 32   ;;  %p5166_p2 = pmov %p5163_p7 }
  0x62   : > { %p781_p3 = scmp.lt.s32.totalorder %s4513_s26, 1  ;;  %s5167_s28 = sld [smem:[#allocation11_spill]]  ;;  %vm811_vm0 = vcmask 261120   ;;  %vm906_vm1 = vcmask 64512   ;;  %v893_v19 = vlaneseq  ;;  %vm994_vm4 = vcmask 130048  }
  0x63   : > { %4359 = vsyncadd (%p5166_p2), [#allocation6], 4294967264  ;;  %s5168_s0 = sld [smem:[#allocation13_spill]]  ;;  %s5169_s27 = sld [smem:[#allocation14_spill]]  ;;  %vm1744_vm6 = vcmask 195584   ;;  %vm1814_vm7 = vcmask 1043456  }
  0x64   : > { %s5191_s26 = smov (!%p781_p3, %s4513_s26), 1  ;;  %s5138_s30 = smov 96   ;;  %vm4661_vm2 = vmpackc.low %vm906_vm1, %vm906_vm1  ;;  %v4671_v20 = vshrl.u32 %v893_v19, 7  ;;  %v4676_v22 = vand.u32 127, %v893_v19  ;;  %vm2229_vm8 = vcmask 97280   ;;  %vm4381_vm9 = vmmov 1  }
  0x65   : > { %s4618_s7 = sshll.u32 %s5191_s26, 4  ;;  %s4370_s8 = smov 120   ;;  %vm4941_vm10 = vmpackc.low %vm1814_vm7, %vm4381_vm9 }
  0x66   : > { %v4674_v21 = vadd.s32 8, %v4671_v20  ;;  %vm898_vm5 = vcmp.gt.s32.totalorder %v4676_v22, %v4671_v20  ;;  %s4371_s2 = smov 56   ;;  %s5137_s3 = smov 80  }
  0x67   : > { %s4373_s25 = smov 112   ;;  %s5136_s6 = smov 72  }
  0x68   : > { %s785_s1 = scalar_lea.vmem %s5167_s28, %s4618_s7  ;;  %vm899_vm3 = vcmp.gt.s32.totalorder %v4676_v22, %v4674_v21  ;;  %s4368_s28 = smov 64  }
  0x69   : > { %v800_v0 = vld [vmem:[%s5168_s0] sm:$0xff]  ;;  %v801_v1 = vld [vmem:[%s5168_s0 + $0x8] sm:$0xff]  ;;  %v802_v2 = vld [vmem:[%s5168_s0 + $0x10] sm:$0xff]  ;;  %s5146_s29 = smov 104   ;;  %s4376_s26 = smov 48  }
  0x6a   : > { %v3907_v3 = vpack.c.bf16 %v801_v1, %v800_v0  ;;  %v803_v4 = vld [vmem:[%s5168_s0 + $0x18] sm:$0xff]  ;;  %v4636_v5 = vld [vmem:[%s785_s1] sm:$0xff]  ;;  %v4640_v7 = vld [vmem:[%s785_s1 + $0x8] sm:$0xff]  ;;  %s5139_s1 = smov 88   ;;  %s5144_s24 = smov 8  }
  0x6b   : > { %v3911_v6 = vpack.c.bf16 %v803_v4, %v802_v2  ;;  %3726 = vmatprep.mubr.msk.f32.mxu0 %vm811_vm0, %v4636_v5  ;;  %v3526_v8 = vld [vmem:[%s5169_s27] ss:$0 sm:$0xff]  ;;  %s4378_s5 = smov 40   ;;  %s5142_s4 = smov 16  }
  0x6c   : > { %3908 = vmatprep.subr.bf16.mxu0 %v3907_v3  ;;  %s5140_s27 = smov 24  }
  0x6d   : > { %3910 = vmatpush3.bf16.msra.mxu0 %v3907_v3 }
  0x6e   : > { %3912 = vmatprep.subr.bf16.mxu0 %v3911_v6 }
  0x71   : > { %3914 = vmatpush3.bf16.msra.mxu0 %v3911_v6 }
  0x74   : > { %3727 = vmatmul.mubr.msk.f32.vlgmr.msra.gmra.mrb[0].mxu0 %vm811_vm0, %v4640_v7 }
 0x147   : > { %v3728_v9 = vpop.f32.mrb[0].mxu0 }
 0x148   : > { %v4647_v10 = vadd.f32 %v3728_v9, %v3526_v8  ;;  %v884_v11 = vpop.f32.mrb[1].mxu0 }
 0x149   : > { %v4649_v12 = vadd.f32 %v3526_v8, %v884_v11 }
 0x14b   : > { %3733 = vmatprep.mubr.msk.f32.mxu1 %vm906_vm1, %v4649_v12  ;;  %v4655_v13 = vpack.i.bf16 %v4647_v10, %v4649_v12 }
 0x14d   : > { %4106 = vrot.lane.b32.xlu0 %v4655_v13, %s5138_s30  ;;  %s5173_s30 = smov 24  }
 0x1bf   : > { %v4107_v14 = vpop.permute.xlu0 %4106 }
 0x1c0   : > { %v4109_v15 = vunpack.i.h.bf16 %v4107_v14  ;;  %v4108_v16 = vunpack.i.l.bf16 %v4107_v14 }
 0x1c2   : > { %v3915_v18 = vpack.c.bf16 %v4109_v15, %v4108_v16 }
 0x1c4   : > { %3917 = vmatprep.subr.msk.bf16.mxu1 %vm4661_vm2, %v3915_v18 }
 0x1c5   : > { %3920 = vmatpush3.bf16.xpose.msk.msra.mxu1 %vm4661_vm2, %v3915_v18 }
 0x1cc   : > { %3734 = vmatmul.mubr.msk.f32.vlgmr.msra.gmra.mrb[0].mxu1 %vm906_vm1, %v4647_v10 }
 0x29f   : > { %v3735_v23 = vpop.f32.mrb[0].mxu1 }
 0x2a0   : > { %v991_v24 = vmul.f32 0.35355338, %v3735_v23  ;;  %v981_v25 = vpop.f32.mrb[1].mxu1 }
 0x2a1   : > { %v990_v26 = vmul.f32 0.35355338, %v981_v25 }
 0x2a2   : > { %v993_v27 = vsel %vm899_vm3, -1e+30, %v991_v24 }
 0x2a3   : > { %v998_v28 = vsel %vm994_vm4, %v993_v27, -inf  ;;  %v992_v29 = vsel %vm898_vm5, -1e+30, %v990_v26 }
 0x2a4   : > { %999 = vmax.xlane.f32.xlu1 %v998_v28  ;;  %v995_v30 = vsel %vm994_vm4, %v992_v29, -inf }
 0x2a5   : > { %996 = vmax.xlane.f32.xlu0 %v995_v30 }
 0x2b5   : > { %4111 = vrot.lane.b32.xlu1 %v4655_v13, %s4368_s28 }
 0x2b9   : > { %4116 = vrot.lane.b32.xlu1 %v4655_v13, %s5139_s1  ;;  %s5176_s1 = sld [smem:[#allocation19_spill]] }
 0x2bb   : > { %1106 = vrot.lane.b32.xlu0 %v4647_v10, %s4370_s8 }
 0x331   : > { %v1000_v31 = vpop.xlane.xlu1 %999 }
 0x332   : > { %v1002_v32 = vsub.f32 %v993_v27, %v1000_v31  ;;  %v997_v33 = vpop.xlane.xlu0 %996 }
 0x333   : > { %v1001_v34 = vsub.f32 %v992_v29, %v997_v33 }
 0x334   : > { %v1005_v35 = vmul.f32 1.442695, %v1002_v32 }
 0x335   : > { %v1003_v36 = vmul.f32 1.442695, %v1001_v34  ;;  %v4112_v37 = vpop.permute.xlu1 %4111 }
 0x336   : > { %4180 = vpow2.f32 %v1005_v35  ;;  %v4114_v38 = vunpack.i.h.bf16 %v4112_v37  ;;  %v4113_v39 = vunpack.i.l.bf16 %v4112_v37  ;;  %v1107_v56 = vpop.permute.xlu0 %1106 }
 0x337   : > { %4182 = vpow2.f32 %v1003_v36 }
 0x338   : > { %v3921_v40 = vpack.c.bf16 %v4114_v38, %v4113_v39 }
 0x339   : > { %v4117_v41 = vpop.permute.xlu1 %4116 }
 0x33a   : > { %v4119_v42 = vunpack.i.h.bf16 %v4117_v41  ;;  %v4118_v43 = vunpack.i.l.bf16 %v4117_v41  ;;  %3922 = vmatprep.subr.bf16.mxu1 %v3921_v40 }
 0x33b   : > { %3924 = vmatpush3.bf16.msra.mxu1 %v3921_v40 }
 0x33c   : > { %v3925_v44 = vpack.c.bf16 %v4119_v42, %v4118_v43 }
 0x33e   : > { %3927 = vmatprep.subr.msk.bf16.mxu1 %vm4661_vm2, %v3925_v44 }
 0x340   : > { %v4181_v45 = vpop.eup %4180 }
 0x341   : > { %v1010_v46 = vsel %vm994_vm4, %v4181_v45, 0.0  ;;  %v4183_v47 = vpop.eup %4182 }
 0x342   : > { %1011 = vadd.xlane.f32.xlu1 %v1010_v46  ;;  %v1007_v48 = vsel %vm994_vm4, %v4183_v47, 0.0 }
 0x346   : > { %1008 = vadd.xlane.f32.xlu1 %v1007_v48 }
 0x357   : > { %1104 = vrot.lane.b32.xlu1 %v4649_v12, %s4370_s8 }
 0x3cf   : > { %v1012_v49 = vpop.xlane.xlu1 %1011 }
 0x3d0   : > { %4184 = vrcp.f32 %v1012_v49 }
 0x3d3   : > { %v1009_v50 = vpop.xlane.xlu1 %1008 }
 0x3d4   : > { %4186 = vrcp.f32 %v1009_v50 }
 0x3d7   : > { %v1105_v55 = vpop.permute.xlu1 %1104 }
 0x3da   : > { %v4185_v51 = vpop.eup %4184 }
 0x3db   : > { %v1016_v54 = vmul.f32 %v4185_v51, %v4181_v45 }
 0x3de   : > { %v4187_v52 = vpop.eup %4186 }
 0x3df   : > { %v1015_v53 = vmul.f32 %v4187_v52, %v4183_v47 }
 0x3e1   : > { %3740 = vmatprep.mubr.msk.f32.mxu1 %vm994_vm4, %v1015_v53 }
 0x3e2   : > { %3741 = vmatmul.mubr.msk.f32.vlgmr.msra.gmra.mrb[2].mxu1 %vm994_vm4, %v1016_v54 }
 0x3e3   : > { %3930 = vmatpush3.bf16.xpose.msk.msra.mxu1 %vm4661_vm2, %v3925_v44  ;;  %3747 = vmatprep.mubr.msk.f32.mxu1 %vm906_vm1, %v1105_v55 }
 0x3ea   : > { %3748 = vmatmul.mubr.msk.f32.vlgmr.msra.gmra.mrb[4].mxu1 %vm906_vm1, %v1107_v56 }
 0x4b5   : > { %v4707_v57 = vpop.f32.mrb[2].mxu1 }
 0x4b6   : > { %v4709_v58 = vpop.f32.mrb[3].mxu1 }
 0x4bd   : > { %v3749_v59 = vpop.f32.mrb[4].mxu1 }
 0x4be   : > { %v1196_v60 = vmul.f32 0.35355338, %v3749_v59  ;;  %v1186_v61 = vpop.f32.mrb[5].mxu1 }
 0x4bf   : > { %v1195_v62 = vmul.f32 0.35355338, %v1186_v61 }
 0x4c0   : > { %v1198_v63 = vsel %vm899_vm3, -1e+30, %v1196_v60 }
 0x4c1   : > { %v1202_v0 = vsel %vm994_vm4, %v1198_v63, -inf  ;;  %v1197_v1 = vsel %vm898_vm5, -1e+30, %v1195_v62 }
 0x4c2   : > { %1203 = vmax.xlane.f32.xlu0 %v1202_v0  ;;  %v1199_v2 = vsel %vm994_vm4, %v1197_v1, -inf }
 0x4c3   : > { %1200 = vmax.xlane.f32.xlu1 %v1199_v2 }
 0x4d4   : > { %4121 = vrot.lane.b32.xlu1 %v4655_v13, %s4371_s2  ;;  %s5180_s2 = smov 96  }
 0x4d8   : > { %4126 = vrot.lane.b32.xlu0 %v4655_v13, %s5137_s3  ;;  %1308 = vrot.lane.b32.xlu1 %v4649_v12, %s4373_s25  ;;  %s5185_s3 = smov 72  }
 0x54f   : > { %v1204_v3 = vpop.xlane.xlu0 %1203 }
 0x550   : > { %v1206_v4 = vsub.f32 %v1198_v63, %v1204_v3  ;;  %v1201_v6 = vpop.xlane.xlu1 %1200 }
 0x551   : > { %v1205_v8 = vsub.f32 %v1197_v1, %v1201_v6 }
 0x552   : > { %v1209_v9 = vmul.f32 1.442695, %v1206_v4 }
 0x553   : > { %v1207_v11 = vmul.f32 1.442695, %v1205_v8  ;;  %v4127_v14 = vpop.permute.xlu0 %4126 }
 0x554   : > { %4188 = vpow2.f32 %v1209_v9  ;;  %v4122_v15 = vpop.permute.xlu1 %4121  ;;  %v4129_v16 = vunpack.i.h.bf16 %v4127_v14  ;;  %v4128_v18 = vunpack.i.l.bf16 %v4127_v14 }
 0x555   : > { %v4124_v19 = vunpack.i.h.bf16 %v4122_v15  ;;  %v4123_v23 = vunpack.i.l.bf16 %v4122_v15  ;;  %4190 = vpow2.f32 %v1207_v11 }
 0x556   : > { %v3935_v25 = vpack.c.bf16 %v4129_v16, %v4128_v18 }
 0x557   : > { %v3931_v24 = vpack.c.bf16 %v4124_v19, %v4123_v23 }
 0x558   : > { %v1309_v30 = vpop.permute.xlu1 %1308 }
 0x559   : > { %3932 = vmatprep.subr.bf16.mxu0 %v3931_v24 }
 0x55a   : > { %3934 = vmatpush3.bf16.msra.mxu0 %v3931_v24 }
 0x55b   : > { %3937 = vmatprep.subr.msk.bf16.mxu0 %vm4661_vm2, %v3935_v25 }
 0x55e   : > { %v4189_v26 = vpop.eup %4188 }
 0x55f   : > { %v1214_v27 = vsel %vm994_vm4, %v4189_v26, 0.0  ;;  %v4191_v28 = vpop.eup %4190 }
 0x560   : > { %1215 = vadd.xlane.f32.xlu1 %v1214_v27  ;;  %v1211_v29 = vsel %vm994_vm4, %v4191_v28, 0.0 }
 0x564   : > { %1212 = vadd.xlane.f32.xlu1 %v1211_v29 }
 0x575   : > { %1310 = vrot.lane.b32.xlu1 %v4647_v10, %s4373_s25 }
 0x5ed   : > { %v1216_v31 = vpop.xlane.xlu1 %1215 }
 0x5ee   : > { %4192 = vrcp.f32 %v1216_v31 }
 0x5f1   : > { %v1213_v32 = vpop.xlane.xlu1 %1212 }
 0x5f2   : > { %4194 = vrcp.f32 %v1213_v32 }
 0x5f5   : > { %v1311_v37 = vpop.permute.xlu1 %1310 }
 0x5f8   : > { %v4193_v33 = vpop.eup %4192 }
 0x5f9   : > { %v1220_v36 = vmul.f32 %v4193_v33, %v4189_v26 }
 0x5fc   : > { %v4195_v34 = vpop.eup %4194 }
 0x5fd   : > { %v1219_v35 = vmul.f32 %v4195_v34, %v4191_v28 }
 0x5ff   : > { %3754 = vmatprep.mubr.msk.f32.mxu0 %vm994_vm4, %v1219_v35 }
 0x600   : > { %3755 = vmatmul.mubr.msk.f32.vlgmr.msra.gmra.mrb[2].mxu0 %vm994_vm4, %v1220_v36 }
 0x601   : > { %3940 = vmatpush3.bf16.xpose.msk.msra.mxu0 %vm4661_vm2, %v3935_v25  ;;  %3761 = vmatprep.mubr.msk.f32.mxu0 %vm906_vm1, %v1309_v30 }
 0x608   : > { %3762 = vmatmul.mubr.msk.f32.vlgmr.msra.gmra.mrb[4].mxu0 %vm906_vm1, %v1311_v37 }
 0x6d3   : > { %v4736_v38 = vpop.f32.mrb[2].mxu0 }
 0x6d4   : > { %v4738_v39 = vpop.f32.mrb[3].mxu0 }
 0x6db   : > { %v3763_v40 = vpop.f32.mrb[4].mxu0 }
 0x6dc   : > { %v1400_v41 = vmul.f32 0.35355338, %v3763_v40  ;;  %v1390_v42 = vpop.f32.mrb[5].mxu0 }
 0x6dd   : > { %v1399_v43 = vmul.f32 0.35355338, %v1390_v42 }
 0x6de   : > { %v1402_v44 = vsel %vm899_vm3, -1e+30, %v1400_v41 }
 0x6df   : > { %v1406_v45 = vsel %vm994_vm4, %v1402_v44, -inf  ;;  %v1401_v46 = vsel %vm898_vm5, -1e+30, %v1399_v43 }
 0x6e0   : > { %1407 = vmax.xlane.f32.xlu0 %v1406_v45  ;;  %v1403_v47 = vsel %vm994_vm4, %v1401_v46, -inf }
 0x6e1   : > { %1404 = vmax.xlane.f32.xlu1 %v1403_v47 }
 0x76d   : > { %v1408_v48 = vpop.xlane.xlu0 %1407 }
 0x76e   : > { %v1410_v49 = vsub.f32 %v1402_v44, %v1408_v48  ;;  %v1405_v50 = vpop.xlane.xlu1 %1404 }
 0x76f   : > { %v1409_v51 = vsub.f32 %v1401_v46, %v1405_v50 }
 0x770   : > { %v1413_v52 = vmul.f32 1.442695, %v1410_v49 }
 0x771   : > { %v1411_v53 = vmul.f32 1.442695, %v1409_v51 }
 0x772   : > { %4196 = vpow2.f32 %v1413_v52 }
 0x773   : > { %4198 = vpow2.f32 %v1411_v53 }
 0x77c   : > { %v4197_v54 = vpop.eup %4196 }
 0x77d   : > { %v4199_v55 = vpop.eup %4198  ;;  %v1418_v56 = vsel %vm994_vm4, %v4197_v54, 0.0 }
 0x77e   : > { %1419 = vadd.xlane.f32.xlu1 %v1418_v56  ;;  %v1415_v59 = vsel %vm994_vm4, %v4199_v55, 0.0 }
 0x77f   : > { %1416 = vadd.xlane.f32.xlu0 %v1415_v59 }
 0x78f   : > { %4136 = vrot.lane.b32.xlu1 %v4655_v13, %s5136_s6  ;;  %s5174_s6 = sld [smem:[#allocation16_spill]] }
 0x793   : > { %1512 = vrot.lane.b32.xlu1 %v4649_v12, %s5146_s29 }
 0x795   : > { %4131 = vrot.lane.b32.xlu0 %v4655_v13, %s4376_s26  ;;  %s5172_s26 = sld [smem:[#allocation15_spill]] }
 0x799   : > { %1514 = vrot.lane.b32.xlu0 %v4647_v10, %s5146_s29 }
 0x80b   : > { %v1420_v60 = vpop.xlane.xlu1 %1419 }
 0x80c   : > { %4200 = vrcp.f32 %v1420_v60  ;;  %v1417_v61 = vpop.xlane.xlu0 %1416 }
 0x80d   : > { %4202 = vrcp.f32 %v1417_v61 }
 0x80f   : > { %v4137_v62 = vpop.permute.xlu1 %4136 }
 0x810   : > { %v4132_v63 = vpop.permute.xlu0 %4131  ;;  %v4139_v0 = vunpack.i.h.bf16 %v4137_v62  ;;  %v4138_v1 = vunpack.i.l.bf16 %v4137_v62 }
 0x811   : > { %v4134_v2 = vunpack.i.h.bf16 %v4132_v63  ;;  %v4133_v3 = vunpack.i.l.bf16 %v4132_v63 }
 0x812   : > { %v3945_v6 = vpack.c.bf16 %v4139_v0, %v4138_v1  ;;  %v1819_v1 = vld [vmem:[%s5172_s26 + $0x10] sm:$0xff] }
 0x813   : > { %v3941_v4 = vpack.c.bf16 %v4134_v2, %v4133_v3  ;;  %v1513_v11 = vpop.permute.xlu1 %1512  ;;  %v1820_v2 = vld [vmem:[%s5172_s26 + $0x18] sm:$0xff] }
 0x814   : > { %v1515_v14 = vpop.permute.xlu0 %1514  ;;  %v3959_v3 = vpack.c.bf16 %v1820_v2, %v1819_v1  ;;  %v1959_v1 = vld [vmem:[%s5176_s1 + $0x18] sm:$0xff] }
 0x815   : > { %3942 = vmatprep.subr.bf16.mxu1 %v3941_v4 }
 0x816   : > { %v4201_v12 = vpop.eup %4200  ;;  %3944 = vmatpush3.bf16.msra.mxu1 %v3941_v4 }
 0x817   : > { %v4203_v8 = vpop.eup %4202  ;;  %3947 = vmatprep.subr.msk.bf16.mxu1 %vm4661_vm2, %v3945_v6  ;;  %v1424_v9 = vmul.f32 %v4201_v12, %v4197_v54 }
 0x818   : > { %v1423_v10 = vmul.f32 %v4203_v8, %v4199_v55 }
 0x81a   : > { %3768 = vmatprep.mubr.msk.f32.mxu1 %vm994_vm4, %v1423_v10 }
 0x81b   : > { %3769 = vmatmul.mubr.msk.f32.vlgmr.msra.gmra.mrb[6].mxu1 %vm994_vm4, %v1424_v9 }
 0x81c   : > { %3775 = vmatprep.mubr.msk.f32.mxu1 %vm906_vm1, %v1513_v11 }
 0x81f   : > { %3950 = vmatpush3.bf16.xpose.msk.msra.mxu1 %vm4661_vm2, %v3945_v6 }
 0x826   : > { %3776 = vmatmul.mubr.msk.f32.vlgmr.msra.gmra.mrb[8].mxu1 %vm906_vm1, %v1515_v14 }
 0x8ee   : > { %v3770_v15 = vpop.f32.mrb[6].mxu1 }
 0x8ef   : > { %v1503_v16 = vpop.f32.mrb[7].mxu1 }
 0x8f9   : > { %v3777_v18 = vpop.f32.mrb[8].mxu1 }
 0x8fa   : > { %v1604_v19 = vmul.f32 0.35355338, %v3777_v18  ;;  %v1594_v23 = vpop.f32.mrb[9].mxu1 }
 0x8fb   : > { %v1603_v24 = vmul.f32 0.35355338, %v1594_v23 }
 0x8fc   : > { %v1606_v25 = vsel %vm899_vm3, -1e+30, %v1604_v19 }
 0x8fd   : > { %v1610_v26 = vsel %vm994_vm4, %v1606_v25, -inf  ;;  %v1605_v27 = vsel %vm898_vm5, -1e+30, %v1603_v24 }
 0x8fe   : > { %1611 = vmax.xlane.f32.xlu0 %v1610_v26  ;;  %v1607_v28 = vsel %vm994_vm4, %v1605_v27, -inf }
 0x8ff   : > { %1608 = vmax.xlane.f32.xlu1 %v1607_v28 }
 0x98b   : > { %v1612_v29 = vpop.xlane.xlu0 %1611 }
 0x98c   : > { %v1614_v30 = vsub.f32 %v1606_v25, %v1612_v29  ;;  %v1609_v31 = vpop.xlane.xlu1 %1608 }
 0x98d   : > { %v1613_v32 = vsub.f32 %v1605_v27, %v1609_v31 }
 0x98e   : > { %v1617_v33 = vmul.f32 1.442695, %v1614_v30 }
 0x98f   : > { %v1615_v34 = vmul.f32 1.442695, %v1613_v32 }
 0x990   : > { %4204 = vpow2.f32 %v1617_v33 }
 0x991   : > { %4206 = vpow2.f32 %v1615_v34 }
 0x99a   : > { %v4205_v21 = vpop.eup %4204 }
 0x99b   : > { %v4207_v35 = vpop.eup %4206  ;;  %v1622_v36 = vsel %vm994_vm4, %v4205_v21, 0.0 }
 0x99c   : > { %1623 = vadd.xlane.f32.xlu1 %v1622_v36  ;;  %v1619_v20 = vsel %vm994_vm4, %v4207_v35, 0.0 }
 0x99d   : > { %1620 = vadd.xlane.f32.xlu0 %v1619_v20 }
 0x9ad   : > { %1718 = vrot.lane.b32.xlu1 %v4738_v39, %s5144_s24 }
 0x9b1   : > { %1720 = vrot.lane.b32.xlu1 %v4736_v38, %s5144_s24 }
 0x9b3   : > { %4141 = vrot.lane.b32.xlu0 %v4655_v13, %s4378_s5  ;;  %s5177_s5 = sld [smem:[#allocation17_spill]] }
 0x9b5   : > { %1728 = vrot.lane.b32.xlu1 %v3770_v15, %s5142_s4 }
 0x9b7   : > { %1726 = vrot.lane.b32.xlu0 %v1503_v16, %s5142_s4 }
 0xa29   : > { %v1624_v22 = vpop.xlane.xlu1 %1623 }
 0xa2a   : > { %4208 = vrcp.f32 %v1624_v22  ;;  %v1621_v37 = vpop.xlane.xlu0 %1620 }
 0xa2b   : > { %4210 = vrcp.f32 %v1621_v37  ;;  %v3553_v37 = vld [vmem:[%s5174_s6] ss:$0 sm:$0xff]  ;;  %s5178_s6 = sld [smem:[#allocation18_spill]] }
 0xa2d   : > { %v1719_v47 = vpop.permute.xlu1 %1718 }
 0xa2e   : > { %v4142_v40 = vpop.permute.xlu0 %4141  ;;  %v1740_v52 = vsel %vm906_vm1, %v4709_v58, %v1719_v47  ;;  %v1818_v58 = vld [vmem:[%s5172_s26 + $0x8] sm:$0xff] }
 0xa2f   : > { %v4144_v41 = vunpack.i.h.bf16 %v4142_v40  ;;  %v4143_v42 = vunpack.i.l.bf16 %v4142_v40 }
 0xa31   : > { %v3951_v43 = vpack.c.bf16 %v4144_v41, %v4143_v42  ;;  %v1721_v48 = vpop.permute.xlu1 %1720 }
 0xa32   : > { %v1727_v50 = vpop.permute.xlu0 %1726  ;;  %v1741_v51 = vsel %vm906_vm1, %v4707_v57, %v1721_v48  ;;  %v1817_v57 = vld [vmem:[%s5172_s26] sm:$0xff] }
 0xa33   : > { %3952 = vmatprep.subr.bf16.mxu0 %v3951_v43  ;;  %v1742_v55 = vsel %vm994_vm4, %v1740_v52, %v1727_v50  ;;  %v3955_v63 = vpack.c.bf16 %v1818_v58, %v1817_v57  ;;  %v1956_v57 = vld [vmem:[%s5176_s1] sm:$0xff]  ;;  %v1957_v58 = vld [vmem:[%s5176_s1 + $0x8] sm:$0xff] }
 0xa34   : > { %v4209_v39 = vpop.eup %4208  ;;  %3954 = vmatpush3.bf16.msra.mxu0 %v3951_v43 }
 0xa35   : > { %v4211_v38 = vpop.eup %4210  ;;  %v1628_v45 = vmul.f32 %v4209_v39, %v4205_v21  ;;  %v1729_v49 = vpop.permute.xlu1 %1728  ;;  %3956 = vmatprep.subr.bf16.mxu0 %v3955_v63 }
 0xa36   : > { %v1627_v44 = vmul.f32 %v4211_v38, %v4207_v35  ;;  %v1743_v53 = vsel %vm994_vm4, %v1741_v51, %v1729_v49 }
 0xa38   : > { %3782 = vmatprep.mubr.msk.f32.mxu0 %vm994_vm4, %v1627_v44 }
 0xa39   : > { %3783 = vmatmul.mubr.msk.f32.vlgmr.msra.gmra.mrb[6].mxu0 %vm994_vm4, %v1628_v45 }
 0xa3a   : > { %3958 = vmatpush3.bf16.msra.mxu0 %v3955_v63  ;;  %v3963_v63 = vpack.c.bf16 %v1957_v58, %v1956_v57 }
 0xa3b   : > { %3960 = vmatprep.subr.bf16.mxu0 %v3959_v3 }
 0xa3c   : > { %3964 = vmatprep.subr.bf16.mxu1 %v3963_v63 }
 0xa3d   : > { %3966 = vmatpush3.bf16.msra.mxu1 %v3963_v63 }
 0xa3e   : > { %3962 = vmatpush3.bf16.msra.mxu0 %v3959_v3 }
 0xb0c   : > { %v3784_v13 = vpop.f32.mrb[6].mxu0 }
 0xb0d   : > { %1736 = vrot.lane.b32.xlu1 %v3784_v13, %s5140_s27  ;;  %v1707_v46 = vpop.f32.mrb[7].mxu0 }
 0xb0e   : > { %1734 = vrot.lane.b32.xlu0 %v1707_v46, %s5140_s27 }
 0xb7f   : > { %v1737_v54 = vpop.permute.xlu1 %1736 }
 0xb80   : > { %v1746_v56 = vsel %vm1744_vm6, %v1743_v53, %v1737_v54  ;;  %v1735_v59 = vpop.permute.xlu0 %1734  ;;  %v2049_v54 = vld [vmem:[%s5115_s10 + $0x8] sm:$0xff] }
 0xb81   : > { %1748 = vst.msk [vmem:[#allocation2 + $0x8] sm:$0xff] %vm811_vm0, %v1746_v56  ;;  %v1745_v60 = vsel %vm1744_vm6, %v1742_v55, %v1735_v59  ;;  %v2050_v56 = vld [vmem:[%s5115_s10 + $0x10] sm:$0xff]  ;;  %v2051_v59 = vld [vmem:[%s5115_s10 + $0x18] sm:$0xff] }
 0xb82   : > { %1747 = vst.msk [vmem:[#allocation2] sm:$0xff] %vm811_vm0, %v1745_v60  ;;  %v3975_v60 = vpack.c.bf16 %v2051_v59, %v2050_v56 }
 0xb89   : > { %v1753_v61 = vld [vmem:[#allocation2 + $0x2] ss:$4 sm:$0xf]  ;;  %v1749_v62 = vld [vmem:[#allocation2] ss:$4 sm:$0xf] }
 0xb8a   : > { %1775 = vrot.lane.b32.xlu1 %v1753_v61, %s5144_s24  ;;  %1772 = vrot.lane.b32.xlu0 %v1749_v62, %s4370_s8  ;;  %v1751_v0 = vld [vmem:[#allocation2 + $0x1] ss:$4 sm:$0xf]  ;;  %v1755_v4 = vld [vmem:[#allocation2 + $0x3] ss:$4 sm:$0xf] }
 0xb8e   : > { %1799 = vrot.lane.b32.xlu1 %v1751_v0, %s4373_s25  ;;  %1796 = vrot.lane.b32.xlu0 %v1749_v62, %s5146_s29 }
 0xb92   : > { %1778 = vrot.lane.b32.xlu1 %v1755_v4, %s5142_s4  ;;  %1757 = vrot.lane.b32.xlu0 %v1751_v0, %s5144_s24 }
 0xb96   : > { %1761 = vrot.lane.b32.xlu1 %v1753_v61, %s5142_s4  ;;  %1802 = vrot.lane.b32.xlu0 %v1753_v61, %s4370_s8  ;;  %s5186_s4 = smov 8  }
 0xb9a   : > { %1787 = vrot.lane.b32.xlu1 %v1751_v0, %s4370_s8  ;;  %1784 = vrot.lane.b32.xlu0 %v1749_v62, %s4373_s25 }
 0xb9e   : > { %1790 = vrot.lane.b32.xlu1 %v1755_v4, %s5144_s24  ;;  %1765 = vrot.lane.b32.xlu0 %v1755_v4, %s5173_s30  ;;  %s5175_s24 = sld [smem:[#allocation12_spill]] }
 0xba4   : > { %s790_s29 = scalar_lea.vmem %s5175_s24, %s4618_s7  ;;  %s5188_s24 = sld [smem:[#allocation20_spill]] }
 0xbaa   : > { %s795_s28 = scalar_lea.vmem %s5188_s24, %s4618_s7 }
 0xbfc   : > { %v1776_v6 = vpop.permute.xlu1 %1775  ;;  %v1773_v12 = vpop.permute.xlu0 %1772 }
 0xbfd   : > { %v1781_v16 = vsel %vm906_vm1, %v1773_v12, %v1751_v0  ;;  %v1958_v0 = vld [vmem:[%s5176_s1 + $0x10] sm:$0xff] }
 0xbfe   : > { %v1782_v23 = vsel %vm994_vm4, %v1781_v16, %v1776_v6  ;;  %v3967_v2 = vpack.c.bf16 %v1959_v1, %v1958_v0 }
 0xc00   : > { %v1800_v8 = vpop.permute.xlu1 %1799  ;;  %v1797_v10 = vpop.permute.xlu0 %1796  ;;  %3968 = vmatprep.subr.bf16.mxu1 %v3967_v2 }
 0xc01   : > { %v1805_v18 = vsel %vm906_vm1, %v1797_v10, %v1800_v8  ;;  %3970 = vmatpush3.bf16.msra.mxu1 %v3967_v2 }
 0xc04   : > { %v1779_v9 = vpop.permute.xlu1 %1778  ;;  %v1758_v11 = vpop.permute.xlu0 %1757 }
 0xc05   : > { %v1783_v26 = vsel %vm1744_vm6, %v1782_v23, %v1779_v9  ;;  %v1768_v29 = vsel %vm906_vm1, %v1749_v62, %v1758_v11  ;;  %v799_v62 = vld [vmem:[%s790_s29 + $0x8] sm:$0xf]  ;;  %v3556_v11 = vld [vmem:[%s5177_s5] ss:$0 sm:$0xff]  ;;  %s5184_s5 = smov 104  }
 0xc06   : > { %v1809_v30 = vrot.slane %v1783_v26, 4  ;;  %v3561_v26 = vld [vmem:[%s5116_s11] ss:$0 sm:$0xff] }
 0xc08   : > { %v1762_v14 = vpop.permute.xlu1 %1761  ;;  %v1803_v15 = vpop.permute.xlu0 %1802 }
 0xc09   : > { %v1806_v19 = vsel %vm994_vm4, %v1805_v18, %v1803_v15  ;;  %v1769_v31 = vsel %vm994_vm4, %v1768_v29, %v1762_v14  ;;  %v3557_v15 = vld [vmem:[%s5178_s6] ss:$0 sm:$0xff]  ;;  %s5187_s6 = smov 16  }
 0xc0a   : > { %v1807_v27 = vsel %vm1744_vm6, %v1806_v19, %v1755_v4 }
 0xc0b   : > { %v1812_v32 = vrot.slane %v1807_v27, 4 }
 0xc0c   : > { %v1788_v24 = vpop.permute.xlu1 %1787  ;;  %v1785_v25 = vpop.permute.xlu0 %1784 }
 0xc0d   : > { %v1793_v28 = vsel %vm906_vm1, %v1785_v25, %v1788_v24 }
 0xc0e   : > { %v1794_v34 = vsel %vm994_vm4, %v1793_v28, %v1753_v61  ;;  %v798_v61 = vld [vmem:[%s790_s29] sm:$0xff] }
 0xc10   : > { %v1791_v33 = vpop.permute.xlu1 %1790  ;;  %v1766_v21 = vpop.permute.xlu0 %1765 }
 0xc11   : > { %v1795_v35 = vsel %vm1744_vm6, %v1794_v34, %v1791_v33  ;;  %v1770_v36 = vsel %vm1744_vm6, %v1769_v31, %v1766_v21 }
 0xc12   : > { %v1816_v20 = vsel %vm1814_vm7, %v1795_v35, %v1812_v32  ;;  %v1815_v22 = vsel %vm1814_vm7, %v1770_v36, %v1809_v30  ;;  %v3558_v36 = vld [vmem:[%s5114_s9] ss:$0 sm:$0xff] }
 0xc13   : > { %3793 = vmatprep.mubr.msk.f32.mxu0 %vm811_vm0, %v1815_v22 }
 0xc14   : > { %3794 = vmatmul.mubr.msk.f32.vlgmr.msra.gmra.mrb[8].mxu0 %vm811_vm0, %v1816_v20 }
 0xc15   : > { %3815 = vmatprep.mubr.msk.f32.mxu0 %vm811_vm0, %v798_v61 }
 0xce7   : > { %v3795_v40 = vpop.f32.mrb[8].mxu0 }
 0xce8   : > { %v1906_v41 = vadd.f32 %v3795_v40, %v3553_v37  ;;  %v1900_v42 = vpop.f32.mrb[9].mxu0 }
 0xce9   : > { %v1901_v43 = vadd.f32 %v3553_v37, %v1900_v42 }
 0xcea   : > { %v1910_v39 = vadd.f32 %v1906_v41, %v4640_v7  ;;  %v2048_v7 = vld [vmem:[%s5115_s10] sm:$0xff] }
 0xceb   : > { %v1909_v38 = vadd.f32 %v1901_v43, %v4636_v5  ;;  %v3971_v55 = vpack.c.bf16 %v2049_v54, %v2048_v7 }
 0xcec   : > { %v1916_v44 = vsel %vm811_vm0, %v1910_v39, 0.0 }
 0xced   : > { %1917 = vadd.xlane.f32.xlu1 %v1916_v44  ;;  %v1913_v45 = vsel %vm811_vm0, %v1909_v38, 0.0  ;;  %3972 = vmatprep.subr.bf16.mxu0 %v3971_v55 }
 0xcee   : > { %1914 = vadd.xlane.f32.xlu0 %v1913_v45  ;;  %3974 = vmatpush3.bf16.msra.mxu0 %v3971_v55 }
 0xcef   : > { %3976 = vmatprep.subr.bf16.mxu0 %v3975_v60 }
 0xcf2   : > { %3978 = vmatpush3.bf16.msra.mxu0 %v3975_v60 }
 0xcf5   : > { %3816 = vmatmul.mubr.msk.f32.vlgmr.msra.gmra.mrb[10].mxu0 %vm811_vm0, %v799_v62 }
 0xd7a   : > { %v1918_v13 = vpop.xlane.xlu1 %1917 }
 0xd7b   : > { %v1921_v46 = vmul.f32 0.03125, %v1918_v13  ;;  %v1915_v47 = vpop.xlane.xlu0 %1914 }
 0xd7c   : > { %v1920_v48 = vmul.f32 0.03125, %v1915_v47 }
 0xd7d   : > { %v1923_v49 = vsub.f32 %v1910_v39, %v1921_v46 }
 0xd7e   : > { %v1922_v50 = vsub.f32 %v1909_v38, %v1920_v48 }
 0xd7f   : > { %v1925_v53 = vmul.f32 %v1923_v49, %v1923_v49 }
 0xd80   : > { %v1924_v51 = vmul.f32 %v1922_v50, %v1922_v50 }
 0xd81   : > { %v1929_v5 = vsel %vm811_vm0, %v1925_v53, 0.0 }
 0xd82   : > { %v1926_v52 = vsel %vm811_vm0, %v1924_v51, 0.0 }
 0xd83   : > { %1927 = vadd.xlane.f32.xlu0 %v1926_v52 }
 0xd87   : > { %1930 = vadd.xlane.f32.xlu0 %v1929_v5 }
 0xdc8   : > { %v3817_v27 = vpop.f32.mrb[10].mxu0 }
 0xdc9   : > { %v2137_v28 = vadd.f32 %v3817_v27, %v3561_v26  ;;  %v2131_v29 = vpop.f32.mrb[11].mxu0 }
 0xdca   : > { %v2132_v30 = vadd.f32 %v3561_v26, %v2131_v29 }
 0xdcc   : > { %v4892_v31 = vpack.i.bf16 %v2137_v28, %v2132_v30  ;;  %v3979_v32 = vpack.c.bf16 %v2137_v28, %v2132_v30 }
 0xdce   : > { %4146 = vrot.lane.b32.xlu1 %v4892_v31, %s4370_s8  ;;  %3981 = vmatprep.subr.msk.bf16.mxu1 %vm4661_vm2, %v3979_v32 }
 0xe10   : > { %v1928_v3 = vpop.xlane.xlu0 %1927 }
 0xe11   : > { %v1932_v4 = vmul.f32 0.03125, %v1928_v3 }
 0xe13   : > { %v1934_v6 = vadd.f32 1e-05, %v1932_v4 }
 0xe14   : > { %v1931_v12 = vpop.xlane.xlu0 %1930 }
 0xe15   : > { %4212 = vrsqrt.f32 %v1934_v6  ;;  %v1933_v8 = vmul.f32 0.03125, %v1931_v12 }
 0xe17   : > { %v1935_v10 = vadd.f32 1e-05, %v1933_v8 }
 0xe19   : > { %4214 = vrsqrt.f32 %v1935_v10 }
 0xe1f   : > { %v4213_v9 = vpop.eup %4212 }
 0xe20   : > { %v1938_v14 = vmul.f32 %v4213_v9, %v1922_v50 }
 0xe22   : > { %v1946_v16 = vmul.f32 %v3556_v11, %v1938_v14 }
 0xe23   : > { %v4215_v18 = vpop.eup %4214 }
 0xe24   : > { %v1939_v19 = vmul.f32 %v4215_v18, %v1923_v49  ;;  %v4881_v23 = vadd.f32 %v3557_v15, %v1946_v16 }
 0xe26   : > { %v1947_v24 = vmul.f32 %v3556_v11, %v1939_v19  ;;  %3804 = vmatprep.mubr.msk.f32.mxu1 %vm811_vm0, %v4881_v23 }
 0xe28   : > { %v4885_v25 = vadd.f32 %v3557_v15, %v1947_v24 }
 0xe2a   : > { %3805 = vmatmul.mubr.msk.f32.vlgmr.msra.gmra.mrb[10].mxu1 %vm811_vm0, %v4885_v25 }
 0xe2b   : > { %3984 = vmatpush3.bf16.xpose.msk.msra.mxu1 %vm4661_vm2, %v3979_v32 }
 0xe40   : > { %v4147_v33 = vpop.permute.xlu1 %4146 }
 0xe41   : > { %v4149_v34 = vunpack.i.h.bf16 %v4147_v33  ;;  %v4148_v21 = vunpack.i.l.bf16 %v4147_v33 }
 0xe43   : > { %v3991_v35 = vpack.c.bf16 %v4149_v34, %v4148_v21 }
 0xe45   : > { %3993 = vmatprep.subr.msk.bf16.mxu1 %vm4661_vm2, %v3991_v35 }
 0xefd   : > { %v3806_v20 = vpop.f32.mrb[10].mxu1 }
 0xefe   : > { %v4905_v22 = vadd.f32 %v3806_v20, %v3558_v36  ;;  %v2039_v37 = vpop.f32.mrb[11].mxu1 }
 0xeff   : > { %v4907_v40 = vadd.f32 %v3558_v36, %v2039_v37 }
 0xf00   : > { %2342 = vrot.lane.b32.xlu1 %v4905_v22, %s4370_s8 }
 0xf01   : > { %2340 = vrot.lane.b32.xlu0 %v4907_v40, %s4370_s8  ;;  %3822 = vmatprep.mubr.msk.f32.mxu1 %vm906_vm1, %v4907_v40  ;;  %s5179_s8 = smov 88  }
 0xf02   : > { %3823 = vmatmul.mubr.msk.f32.vlgmr.msra.gmra.mrb[12].mxu1 %vm906_vm1, %v4905_v22 }
 0xf03   : > { %3996 = vmatpush3.bf16.xpose.msk.msra.mxu1 %vm4661_vm2, %v3991_v35 }
 0xf72   : > { %v2343_v42 = vpop.permute.xlu1 %2342 }
 0xf73   : > { %v2341_v41 = vpop.permute.xlu0 %2340 }
 0xf74   : > { %3836 = vmatprep.mubr.msk.f32.mxu1 %vm906_vm1, %v2341_v41 }
 0xf75   : > { %3837 = vmatmul.mubr.msk.f32.vlgmr.msra.gmra.mrb[14].mxu1 %vm906_vm1, %v2343_v42 }
 0xfd5   : > { %v3824_v43 = vpop.f32.mrb[12].mxu1 }
 0xfd6   : > { %v2228_v39 = vmul.f32 0.35355338, %v3824_v43  ;;  %v2218_v38 = vpop.f32.mrb[13].mxu1 }
 0xfd7   : > { %v2227_v44 = vmul.f32 0.35355338, %v2218_v38 }
 0xfd8   : > { %v2233_v45 = vsel %vm2229_vm8, %v2228_v39, -inf }
 0xfd9   : > { %2234 = vmax.xlane.f32.xlu0 %v2233_v45  ;;  %v2230_v13 = vsel %vm2229_vm8, %v2227_v44, -inf }
 0xfda   : > { %2231 = vmax.xlane.f32.xlu1 %v2230_v13 }
0x1048   : > { %v3838_v46 = vpop.f32.mrb[14].mxu1 }
0x1049   : > { %v2432_v47 = vmul.f32 0.35355338, %v3838_v46  ;;  %v2422_v48 = vpop.f32.mrb[15].mxu1 }
0x104a   : > { %v2431_v49 = vmul.f32 0.35355338, %v2422_v48 }
0x104b   : > { %v2436_v50 = vsel %vm2229_vm8, %v2432_v47, -inf }
0x104c   : > { %2437 = vmax.xlane.f32.xlu1 %v2436_v50  ;;  %v2433_v51 = vsel %vm2229_vm8, %v2431_v49, -inf }
0x104d   : > { %2434 = vmax.xlane.f32.xlu0 %v2433_v51 }
0x1066   : > { %v2235_v52 = vpop.xlane.xlu0 %2234 }
0x1067   : > { %v2237_v53 = vsub.f32 %v2228_v39, %v2235_v52  ;;  %v2232_v5 = vpop.xlane.xlu1 %2231 }
0x1068   : > { %v2236_v7 = vsub.f32 %v2227_v44, %v2232_v5 }
0x1069   : > { %v2240_v54 = vmul.f32 1.442695, %v2237_v53 }
0x106a   : > { %v2238_v55 = vmul.f32 1.442695, %v2236_v7 }
0x106b   : > { %4216 = vpow2.f32 %v2240_v54 }
0x106c   : > { %4218 = vpow2.f32 %v2238_v55 }
0x1075   : > { %v4217_v56 = vpop.eup %4216 }
0x1076   : > { %v4219_v59 = vpop.eup %4218  ;;  %v2245_v60 = vsel %vm2229_vm8, %v4217_v56, 0.0 }
0x1077   : > { %2246 = vadd.xlane.f32.xlu1 %v2245_v60  ;;  %v2242_v61 = vsel %vm2229_vm8, %v4219_v59, 0.0 }
0x1078   : > { %2243 = vadd.xlane.f32.xlu0 %v2242_v61 }
0x10d9   : > { %v2438_v62 = vpop.xlane.xlu1 %2437 }
0x10da   : > { %v2440_v57 = vsub.f32 %v2432_v47, %v2438_v62  ;;  %v2435_v58 = vpop.xlane.xlu0 %2434 }
0x10db   : > { %v2439_v63 = vsub.f32 %v2431_v49, %v2435_v58 }
0x10dc   : > { %v2443_v0 = vmul.f32 1.442695, %v2440_v57 }
0x10dd   : > { %v2441_v1 = vmul.f32 1.442695, %v2439_v63 }
0x10de   : > { %4220 = vpow2.f32 %v2443_v0 }
0x10df   : > { %4222 = vpow2.f32 %v2441_v1 }
0x10e8   : > { %v4221_v2 = vpop.eup %4220 }
0x10e9   : > { %v4223_v3 = vpop.eup %4222  ;;  %v2448_v4 = vsel %vm2229_vm8, %v4221_v2, 0.0 }
0x10ea   : > { %2449 = vadd.xlane.f32.xlu1 %v2448_v4  ;;  %v2445_v6 = vsel %vm2229_vm8, %v4223_v3, 0.0 }
0x10eb   : > { %2446 = vadd.xlane.f32.xlu0 %v2445_v6 }
0x10fb   : > { %4156 = vrot.lane.b32.xlu1 %v4892_v31, %s5179_s8 }
0x10ff   : > { %4161 = vrot.lane.b32.xlu1 %v4892_v31, %s4373_s25 }
0x1101   : > { %4151 = vrot.lane.b32.xlu0 %v4892_v31, %s5180_s2 }
0x1103   : > { %2545 = vrot.lane.b32.xlu1 %v4905_v22, %s4373_s25 }
0x1104   : > { %v2247_v9 = vpop.xlane.xlu1 %2246 }
0x1105   : > { %2543 = vrot.lane.b32.xlu0 %v4907_v40, %s4373_s25  ;;  %v2244_v12 = vpop.xlane.xlu0 %2243  ;;  %s5183_s25 = smov 80  }
0x1106   : > { %4224 = vrcp.f32 %v2244_v12 }
0x1107   : > { %4226 = vrcp.f32 %v2247_v9 }
0x1110   : > { %v4225_v8 = vpop.eup %4224 }
0x1111   : > { %v2250_v10 = vmul.f32 %v4225_v8, %v4219_v59  ;;  %v4227_v30 = vpop.eup %4226 }
0x1112   : > { %v2251_v35 = vmul.f32 %v4227_v30, %v4217_v56 }
0x1113   : > { %3829 = vmatprep.mubr.msk.f32.mxu0 %vm2229_vm8, %v2250_v10 }
0x1177   : > { %v2450_v11 = vpop.xlane.xlu1 %2449 }
0x1178   : > { %v2447_v14 = vpop.xlane.xlu0 %2446 }
0x1179   : > { %4228 = vrcp.f32 %v2447_v14 }
0x117a   : > { %4230 = vrcp.f32 %v2450_v11 }
0x117b   : > { %v4157_v15 = vpop.permute.xlu1 %4156 }
0x117c   : > { %v4152_v16 = vpop.permute.xlu0 %4151  ;;  %v4159_v18 = vunpack.i.h.bf16 %v4157_v15  ;;  %v4158_v19 = vunpack.i.l.bf16 %v4157_v15 }
0x117d   : > { %v4154_v24 = vunpack.i.h.bf16 %v4152_v16  ;;  %v4153_v26 = vunpack.i.l.bf16 %v4152_v16 }
0x117e   : > { %v3997_v32 = vpack.c.bf16 %v4159_v18, %v4158_v19 }
0x117f   : > { %v3985_v28 = vpack.c.bf16 %v4154_v24, %v4153_v26  ;;  %v4162_v29 = vpop.permute.xlu1 %4161 }
0x1180   : > { %v4164_v33 = vunpack.i.h.bf16 %v4162_v29  ;;  %v4163_v34 = vunpack.i.l.bf16 %v4162_v29  ;;  %v2544_v42 = vpop.permute.xlu0 %2543 }
0x1181   : > { %3987 = vmatprep.subr.msk.bf16.mxu0 %vm4941_vm10, %v3985_v28 }
0x1182   : > { %3990 = vmatpush3.bf16.msk.msra.mxu0 %vm4941_vm10, %v3985_v28  ;;  %v4003_v37 = vpack.c.bf16 %v4164_v33, %v4163_v34 }
0x1183   : > { %v4229_v21 = vpop.eup %4228  ;;  %3999 = vmatprep.subr.msk.bf16.mxu0 %vm4941_vm10, %v3997_v32  ;;  %v2546_v43 = vpop.permute.xlu1 %2545 }
0x1184   : > { %v4231_v36 = vpop.eup %4230  ;;  %v2453_v20 = vmul.f32 %v4229_v21, %v4223_v3 }
0x1185   : > { %3830 = vmatmul.mubr.msk.f32.vlgmr.msra.gmra.mrb[12].mxu0 %vm2229_vm8, %v2251_v35  ;;  %v2454_v41 = vmul.f32 %v4231_v36, %v4221_v2 }
0x1186   : > { %4002 = vmatpush3.bf16.msk.msra.mxu0 %vm4941_vm10, %v3997_v32  ;;  %3843 = vmatprep.mubr.msk.f32.mxu0 %vm2229_vm8, %v2453_v20 }
0x1187   : > { %4005 = vmatprep.subr.msk.bf16.mxu0 %vm4661_vm2, %v4003_v37 }
0x1189   : > { %3844 = vmatmul.mubr.msk.f32.vlgmr.msra.gmra.mrb[14].mxu0 %vm2229_vm8, %v2454_v41 }
0x118a   : > { %3850 = vmatprep.mubr.msk.f32.mxu0 %vm906_vm1, %v2544_v42 }
0x118f   : > { %4008 = vmatpush3.bf16.xpose.msk.msra.mxu0 %vm4661_vm2, %v4003_v37 }
0x1196   : > { %3851 = vmatmul.mubr.msk.f32.vlgmr.msra.gmra.mrb[16].mxu0 %vm906_vm1, %v2546_v43 }
0x1258   : > { %v4962_v39 = vpop.f32.mrb[12].mxu0 }
0x1259   : > { %v4964_v38 = vpop.f32.mrb[13].mxu0 }
0x125c   : > { %v4966_v44 = vpop.f32.mrb[14].mxu0 }
0x125d   : > { %v4968_v45 = vpop.f32.mrb[15].mxu0 }
0x1269   : > { %v3852_v13 = vpop.f32.mrb[16].mxu0 }
0x126a   : > { %v2635_v46 = vmul.f32 0.35355338, %v3852_v13  ;;  %v2625_v47 = vpop.f32.mrb[17].mxu0 }
0x126b   : > { %v2634_v48 = vmul.f32 0.35355338, %v2625_v47  ;;  %v2981_v47 = vld [vmem:[%s5117_s12 + $0x10] sm:$0xff] }
0x126c   : > { %v2639_v49 = vsel %vm2229_vm8, %v2635_v46, -inf }
0x126d   : > { %2640 = vmax.xlane.f32.xlu1 %v2639_v49  ;;  %v2636_v50 = vsel %vm2229_vm8, %v2634_v48, -inf  ;;  %v2982_v49 = vld [vmem:[%s5117_s12 + $0x18] sm:$0xff] }
0x126e   : > { %2637 = vmax.xlane.f32.xlu0 %v2636_v50  ;;  %v4031_v50 = vpack.c.bf16 %v2982_v49, %v2981_v47 }
0x127e   : > { %4166 = vrot.lane.b32.xlu1 %v4892_v31, %s5183_s25 }
0x1282   : > { %2746 = vrot.lane.b32.xlu1 %v4907_v40, %s5184_s5 }
0x1286   : > { %2748 = vrot.lane.b32.xlu1 %v4905_v22, %s5184_s5 }
0x12fa   : > { %v2641_v51 = vpop.xlane.xlu1 %2640 }
0x12fb   : > { %v2643_v52 = vsub.f32 %v2635_v46, %v2641_v51  ;;  %v2638_v53 = vpop.xlane.xlu0 %2637  ;;  %v2979_v46 = vld [vmem:[%s5117_s12] sm:$0xff] }
0x12fc   : > { %v2642_v5 = vsub.f32 %v2634_v48, %v2638_v53 }
0x12fd   : > { %v2646_v7 = vmul.f32 1.442695, %v2643_v52 }
0x12fe   : > { %v2644_v54 = vmul.f32 1.442695, %v2642_v5  ;;  %v4167_v55 = vpop.permute.xlu1 %4166 }
0x12ff   : > { %4232 = vpow2.f32 %v2646_v7  ;;  %v4169_v56 = vunpack.i.h.bf16 %v4167_v55  ;;  %v4168_v59 = vunpack.i.l.bf16 %v4167_v55 }
0x1300   : > { %4234 = vpow2.f32 %v2644_v54 }
0x1301   : > { %v4009_v60 = vpack.c.bf16 %v4169_v56, %v4168_v59 }
0x1302   : > { %v2747_v8 = vpop.permute.xlu1 %2746 }
0x1303   : > { %4011 = vmatprep.subr.msk.bf16.mxu1 %vm4941_vm10, %v4009_v60 }
0x1304   : > { %4014 = vmatpush3.bf16.msk.msra.mxu1 %vm4941_vm10, %v4009_v60 }
0x1306   : > { %v2749_v10 = vpop.permute.xlu1 %2748 }
0x1309   : > { %v4233_v40 = vpop.eup %4232 }
0x130a   : > { %v2651_v22 = vsel %vm2229_vm8, %v4233_v40, 0.0  ;;  %v4235_v61 = vpop.eup %4234 }
0x130b   : > { %2652 = vadd.xlane.f32.xlu0 %v2651_v22  ;;  %v2648_v62 = vsel %vm2229_vm8, %v4235_v61, 0.0 }
0x130f   : > { %2649 = vadd.xlane.f32.xlu0 %v2648_v62 }
0x1325   : > { %4171 = vrot.lane.b32.xlu0 %v4892_v31, %s5184_s5 }
0x1398   : > { %v2653_v57 = vpop.xlane.xlu0 %2652 }
0x1399   : > { %4236 = vrcp.f32 %v2653_v57 }
0x139c   : > { %v2650_v58 = vpop.xlane.xlu0 %2649 }
0x139d   : > { %4238 = vrcp.f32 %v2650_v58 }
0x13a0   : > { %v4172_v63 = vpop.permute.xlu0 %4171 }
0x13a1   : > { %v4174_v0 = vunpack.i.h.bf16 %v4172_v63  ;;  %v4173_v1 = vunpack.i.l.bf16 %v4172_v63 }
0x13a3   : > { %v4015_v2 = vpack.c.bf16 %v4174_v0, %v4173_v1  ;;  %v4237_v3 = vpop.eup %4236 }
0x13a4   : > { %v2657_v12 = vmul.f32 %v4237_v3, %v4233_v40 }
0x13a5   : > { %4017 = vmatprep.subr.msk.bf16.mxu1 %vm4661_vm2, %v4015_v2 }
0x13a7   : > { %v4239_v4 = vpop.eup %4238 }
0x13a8   : > { %v2656_v6 = vmul.f32 %v4239_v4, %v4235_v61 }
0x13aa   : > { %3857 = vmatprep.mubr.msk.f32.mxu1 %vm2229_vm8, %v2656_v6 }
0x13ab   : > { %3858 = vmatmul.mubr.msk.f32.vlgmr.msra.gmra.mrb[16].mxu1 %vm2229_vm8, %v2657_v12 }
0x13ac   : > { %4020 = vmatpush3.bf16.xpose.msk.msra.mxu1 %vm4661_vm2, %v4015_v2  ;;  %3864 = vmatprep.mubr.msk.f32.mxu1 %vm906_vm1, %v2747_v8 }
0x13b3   : > { %3865 = vmatmul.mubr.msk.f32.vlgmr.msra.gmra.mrb[18].mxu1 %vm906_vm1, %v2749_v10 }
0x147e   : > { %v3859_v9 = vpop.f32.mrb[16].mxu1 }
0x147f   : > { %v2737_v11 = vpop.f32.mrb[17].mxu1 }
0x1486   : > { %v3866_v14 = vpop.f32.mrb[18].mxu1 }
0x1487   : > { %v2838_v15 = vmul.f32 0.35355338, %v3866_v14  ;;  %v2828_v16 = vpop.f32.mrb[19].mxu1 }
0x1488   : > { %v2837_v18 = vmul.f32 0.35355338, %v2828_v16  ;;  %v3118_v16 = vld [vmem:[%s5121_s16 + $0x8] sm:$0xff] }
0x1489   : > { %v2842_v19 = vsel %vm2229_vm8, %v2838_v15, -inf }
0x148a   : > { %2843 = vmax.xlane.f32.xlu1 %v2842_v19  ;;  %v2839_v24 = vsel %vm2229_vm8, %v2837_v18, -inf  ;;  %v3119_v19 = vld [vmem:[%s5121_s16 + $0x10] sm:$0xff] }
0x148b   : > { %2840 = vmax.xlane.f32.xlu0 %v2839_v24  ;;  %v3120_v24 = vld [vmem:[%s5121_s16 + $0x18] sm:$0xff] }
0x149b   : > { %4176 = vrot.lane.b32.xlu1 %v4892_v31, %s5185_s3 }
0x149f   : > { %2953 = vrot.lane.b32.xlu1 %v4966_v44, %s5186_s4 }
0x14a3   : > { %2959 = vrot.lane.b32.xlu1 %v2737_v11, %s5187_s6 }
0x1517   : > { %v2844_v17 = vpop.xlane.xlu1 %2843 }
0x1518   : > { %v2846_v26 = vsub.f32 %v2838_v15, %v2844_v17  ;;  %v2841_v28 = vpop.xlane.xlu0 %2840  ;;  %v4039_v17 = vpack.c.bf16 %v3120_v24, %v3119_v19 }
0x1519   : > { %v2845_v29 = vsub.f32 %v2837_v18, %v2841_v28 }
0x151a   : > { %v2849_v30 = vmul.f32 1.442695, %v2846_v26 }
0x151b   : > { %v2847_v32 = vmul.f32 1.442695, %v2845_v29  ;;  %v4177_v33 = vpop.permute.xlu1 %4176 }
0x151c   : > { %v4179_v34 = vunpack.i.h.bf16 %v4177_v33  ;;  %v4178_v21 = vunpack.i.l.bf16 %v4177_v33 }
0x151d   : > { %4240 = vpow2.f32 %v2847_v32 }
0x151e   : > { %v4021_v35 = vpack.c.bf16 %v4179_v34, %v4178_v21  ;;  %4242 = vpow2.f32 %v2849_v30  ;;  %v3595_v21 = vld [vmem:[%s5119_s14] ss:$0 sm:$0xff] }
0x151f   : > { %v2954_v5 = vpop.permute.xlu1 %2953 }
0x1520   : > { %4023 = vmatprep.subr.msk.bf16.mxu0 %vm4941_vm10, %v4021_v35  ;;  %v2974_v59 = vsel %vm906_vm1, %v4962_v39, %v2954_v5 }
0x1521   : > { %4026 = vmatpush3.bf16.msk.msra.mxu0 %vm4941_vm10, %v4021_v35 }
0x1523   : > { %v2960_v54 = vpop.permute.xlu1 %2959 }
0x1527   : > { %v4241_v31 = vpop.eup %4240 }
0x1528   : > { %v2851_v36 = vsel %vm2229_vm8, %v4241_v31, 0.0  ;;  %v4243_v20 = vpop.eup %4242 }
0x1529   : > { %2852 = vadd.xlane.f32.xlu0 %v2851_v36  ;;  %v2854_v37 = vsel %vm2229_vm8, %v4243_v20, 0.0 }
0x152d   : > { %2855 = vadd.xlane.f32.xlu0 %v2854_v37 }
0x1543   : > { %2951 = vrot.lane.b32.xlu0 %v4968_v45, %s5186_s4  ;;  %v2980_v45 = vld [vmem:[%s5117_s12 + $0x8] sm:$0xff] }
0x1544   : > { %v4027_v48 = vpack.c.bf16 %v2980_v45, %v2979_v46  ;;  %v3230_v45 = vld [vmem:[%s5123_s18 + $0x18] sm:$0xff] }
0x1546   : > { %4028 = vmatprep.subr.bf16.mxu0 %v4027_v48 }
0x1547   : > { %2961 = vrot.lane.b32.xlu0 %v3859_v9, %s5187_s6 }
0x15b6   : > { %v2853_v41 = vpop.xlane.xlu0 %2852 }
0x15b7   : > { %4244 = vrcp.f32 %v2853_v41 }
0x15ba   : > { %v2856_v42 = vpop.xlane.xlu0 %2855 }
0x15bb   : > { %4246 = vrcp.f32 %v2856_v42 }
0x15be   : > { %v2952_v53 = vpop.permute.xlu0 %2951 }
0x15bf   : > { %v2973_v55 = vsel %vm906_vm1, %v4964_v38, %v2952_v53  ;;  %v3592_v38 = vld [vmem:[%s5118_s13] ss:$0 sm:$0xff] }
0x15c0   : > { %v2975_v40 = vsel %vm994_vm4, %v2973_v55, %v2960_v54 }
0x15c1   : > { %v4245_v43 = vpop.eup %4244 }
0x15c2   : > { %v2859_v27 = vmul.f32 %v4245_v43, %v4241_v31  ;;  %v2962_v7 = vpop.permute.xlu0 %2961 }
0x15c3   : > { %v2976_v22 = vsel %vm994_vm4, %v2974_v59, %v2962_v7 }
0x15c4   : > { %3871 = vmatprep.mubr.msk.f32.mxu0 %vm2229_vm8, %v2859_v27  ;;  %v3227_v27 = vld [vmem:[%s5123_s18] sm:$0xff] }
0x15c5   : > { %v4247_v44 = vpop.eup %4246 }
0x15c6   : > { %v2860_v13 = vmul.f32 %v4247_v44, %v4243_v20  ;;  %v3596_v20 = vld [vmem:[%s5120_s15] ss:$0 sm:$0xff]  ;;  %v3228_v44 = vld [vmem:[%s5123_s18 + $0x8] sm:$0xff] }
0x15c7   : > { %v4043_v46 = vpack.c.bf16 %v3228_v44, %v3227_v27 }
0x15c8   : > { %3872 = vmatmul.mubr.msk.f32.vlgmr.msra.gmra.mrb[18].mxu0 %vm2229_vm8, %v2860_v13  ;;  %v3229_v13 = vld [vmem:[%s5123_s18 + $0x10] sm:$0xff] }
0x15c9   : > { %4030 = vmatpush3.bf16.msra.mxu0 %v4027_v48  ;;  %v4047_v47 = vpack.c.bf16 %v3230_v45, %v3229_v13  ;;  %v3597_v48 = vld [vmem:[%s5122_s17] ss:$0 sm:$0xff] }
0x15ca   : > { %4032 = vmatprep.subr.bf16.mxu0 %v4031_v50 }
0x15cd   : > { %4034 = vmatpush3.bf16.msra.mxu0 %v4031_v50 }
0x15ce   : > { %4044 = vmatprep.subr.bf16.mxu0 %v4043_v46 }
0x169b   : > { %v3873_v51 = vpop.f32.mrb[18].mxu0 }
0x169c   : > { %2969 = vrot.lane.b32.xlu0 %v3873_v51, %s5173_s30  ;;  %v2940_v52 = vpop.f32.mrb[19].mxu0 }
0x169d   : > { %2967 = vrot.lane.b32.xlu1 %v2940_v52, %s5173_s30 }
0x170e   : > { %v2970_v56 = vpop.permute.xlu0 %2969 }
0x170f   : > { %v2968_v60 = vpop.permute.xlu1 %2967  ;;  %v2978_v62 = vsel %vm1744_vm6, %v2976_v22, %v2970_v56 }
0x1710   : > { %v2977_v61 = vsel %vm1744_vm6, %v2975_v40, %v2968_v60 }
0x1711   : > { %3882 = vmatprep.mubr.msk.f32.mxu0 %vm811_vm0, %v2977_v61 }
0x1712   : > { %3883 = vmatmul.mubr.msk.f32.vlgmr.msra.gmra.mrb[20].mxu0 %vm811_vm0, %v2978_v62 }
0x1713   : > { %4046 = vmatpush3.bf16.msra.mxu0 %v4043_v46 }
0x1714   : > { %4048 = vmatprep.subr.bf16.mxu0 %v4047_v47 }
0x1717   : > { %4050 = vmatpush3.bf16.msra.mxu0 %v4047_v47 }
0x17e5   : > { %v3884_v57 = vpop.f32.mrb[20].mxu0 }
0x17e6   : > { %v3068_v58 = vadd.f32 %v3884_v57, %v3592_v38  ;;  %v3062_v39 = vpop.f32.mrb[21].mxu0 }
0x17e7   : > { %v3063_v63 = vadd.f32 %v3592_v38, %v3062_v39 }
0x17e8   : > { %v3072_v0 = vadd.f32 %v3068_v58, %v4885_v25 }
0x17e9   : > { %v3071_v1 = vadd.f32 %v3063_v63, %v4881_v23  ;;  %v3117_v23 = vld [vmem:[%s5121_s16] sm:$0xff] }
0x17ea   : > { %v3078_v2 = vsel %vm811_vm0, %v3072_v0, 0.0  ;;  %v4035_v18 = vpack.c.bf16 %v3118_v16, %v3117_v23 }
0x17eb   : > { %3079 = vadd.xlane.f32.xlu0 %v3078_v2  ;;  %v3075_v3 = vsel %vm811_vm0, %v3071_v1, 0.0 }
0x17ec   : > { %3076 = vadd.xlane.f32.xlu1 %v3075_v3  ;;  %4036 = vmatprep.subr.bf16.mxu1 %v4035_v18 }
0x17ed   : > { %4038 = vmatpush3.bf16.msra.mxu1 %v4035_v18 }
0x17ee   : > { %4040 = vmatprep.subr.bf16.mxu1 %v4039_v17 }
0x17f1   : > { %4042 = vmatpush3.bf16.msra.mxu1 %v4039_v17 }
0x1878   : > { %v3080_v4 = vpop.xlane.xlu0 %3079 }
0x1879   : > { %v3082_v6 = vmul.f32 0.03125, %v3080_v4  ;;  %v3077_v12 = vpop.xlane.xlu1 %3076 }
0x187a   : > { %v3081_v8 = vmul.f32 0.03125, %v3077_v12 }
0x187b   : > { %v3084_v10 = vsub.f32 %v3072_v0, %v3082_v6 }
0x187c   : > { %v3083_v9 = vsub.f32 %v3071_v1, %v3081_v8  ;;  %v3600_v1 = vld [vmem:[%s5124_s19] ss:$0 sm:$0xff] }
0x187d   : > { %v3086_v11 = vmul.f32 %v3084_v10, %v3084_v10 }
0x187e   : > { %v3085_v14 = vmul.f32 %v3083_v9, %v3083_v9 }
0x187f   : > { %v3090_v15 = vsel %vm811_vm0, %v3086_v11, 0.0 }
0x1880   : > { %3091 = vadd.xlane.f32.xlu1 %v3090_v15  ;;  %v3087_v25 = vsel %vm811_vm0, %v3085_v14, 0.0 }
0x1881   : > { %3088 = vadd.xlane.f32.xlu0 %v3087_v25 }
0x190d   : > { %v3092_v26 = vpop.xlane.xlu1 %3091 }
0x190e   : > { %v3094_v28 = vmul.f32 0.03125, %v3092_v26  ;;  %v3089_v29 = vpop.xlane.xlu0 %3088 }
0x190f   : > { %v3093_v30 = vmul.f32 0.03125, %v3089_v29 }
0x1910   : > { %v3096_v32 = vadd.f32 1e-05, %v3094_v28 }
0x1911   : > { %v3095_v33 = vadd.f32 1e-05, %v3093_v30 }
0x1912   : > { %4248 = vrsqrt.f32 %v3096_v32 }
0x1913   : > { %4250 = vrsqrt.f32 %v3095_v33 }
0x191c   : > { %v4249_v34 = vpop.eup %4248 }
0x191d   : > { %v4251_v35 = vpop.eup %4250  ;;  %v3100_v31 = vmul.f32 %v4249_v34, %v3084_v10 }
0x191e   : > { %v3099_v36 = vmul.f32 %v4251_v35, %v3083_v9 }
0x191f   : > { %v3108_v37 = vmul.f32 %v3595_v21, %v3100_v31 }
0x1920   : > { %v3107_v41 = vmul.f32 %v3595_v21, %v3099_v36  ;;  %v3603_v21 = vld [vmem:[%s5125_s20] ss:$0 sm:$0xff]  ;;  %v3604_v36 = vld [vmem:[#allocation3] ss:$0 sm:$0xff] }
0x1921   : > { %v3116_v43 = vadd.f32 %v3596_v20, %v3108_v37 }
0x1922   : > { %v3115_v42 = vadd.f32 %v3596_v20, %v3107_v41 }
0x1924   : > { %3893 = vmatprep.mubr.msk.f32.mxu1 %vm811_vm0, %v3115_v42 }
0x1925   : > { %3894 = vmatmul.mubr.msk.f32.vlgmr.msra.gmra.mrb[20].mxu1 %vm811_vm0, %v3116_v43 }
0x19f8   : > { %v3895_v49 = vpop.f32.mrb[20].mxu1 }
0x19f9   : > { %v3206_v50 = vadd.f32 %v3895_v49, %v3597_v48  ;;  %v3200_v51 = vpop.f32.mrb[21].mxu1 }
0x19fa   : > { %v3201_v52 = vadd.f32 %v3597_v48, %v3200_v51 }
0x19fb   : > { %v3212_v53 = vmul.f32 0.044715, %v3206_v50  ;;  %v3210_v39 = vmul.f32 0.5, %v3206_v50 }
0x19fc   : > { %v3211_v5 = vmul.f32 0.044715, %v3201_v52  ;;  %v3209_v57 = vmul.f32 0.5, %v3201_v52 }
0x19fd   : > { %v3214_v7 = vmul.f32 %v3212_v53, %v3206_v50 }
0x19fe   : > { %v3213_v54 = vmul.f32 %v3211_v5, %v3201_v52 }
0x19ff   : > { %v3216_v55 = vmul.f32 %v3214_v7, %v3206_v50 }
0x1a00   : > { %v3215_v56 = vmul.f32 %v3213_v54, %v3201_v52 }
0x1a01   : > { %v3218_v59 = vadd.f32 %v3216_v55, %v3206_v50 }
0x1a02   : > { %v3217_v60 = vadd.f32 %v3215_v56, %v3201_v52 }
0x1a03   : > { %v3220_v40 = vmul.f32 0.7978846, %v3218_v59 }
0x1a04   : > { %v3219_v22 = vmul.f32 0.7978846, %v3217_v60 }
0x1a05   : > { %4252 = vtanh.f32 %v3220_v40  ;;  %v3605_v40 = vld [vmem:[#allocation5] ss:$0 sm:$0xff] }
0x1a06   : > { %4254 = vtanh.f32 %v3219_v22 }
0x1a0f   : > { %v4253_v61 = vpop.eup %4252 }
0x1a10   : > { %v4255_v62 = vpop.eup %4254  ;;  %v3224_v38 = vadd.f32 1.0, %v4253_v61 }
0x1a11   : > { %v3223_v58 = vadd.f32 1.0, %v4255_v62  ;;  %v3606_v62 = vld [vmem:[#allocation7] ss:$0 sm:$0xff] }
0x1a12   : > { %v3226_v0 = vmul.f32 %v3224_v38, %v3210_v39 }
0x1a13   : > { %v3225_v63 = vmul.f32 %v3223_v58, %v3209_v57 }
0x1a15   : > { %3904 = vmatprep.mubr.msk.f32.mxu0 %vm811_vm0, %v3225_v63 }
0x1a16   : > { %3905 = vmatmul.mubr.msk.f32.vlgmr.msra.gmra.mrb[22].mxu0 %vm811_vm0, %v3226_v0 }
0x1ae9   : > { %v3906_v2 = vpop.f32.mrb[22].mxu0 }
0x1aea   : > { %v3316_v3 = vadd.f32 %v3906_v2, %v3600_v1  ;;  %v3310_v4 = vpop.f32.mrb[23].mxu0 }
0x1aeb   : > { %v3311_v6 = vadd.f32 %v3600_v1, %v3310_v4 }
0x1aec   : > { %v3320_v12 = vadd.f32 %v3316_v3, %v3116_v43 }
0x1aed   : > { %v3319_v8 = vadd.f32 %v3311_v6, %v3115_v42 }
0x1aee   : > { %v3326_v10 = vsel %vm811_vm0, %v3320_v12, 0.0 }
0x1aef   : > { %3327 = vadd.xlane.f32.xlu1 %v3326_v10  ;;  %v3323_v9 = vsel %vm811_vm0, %v3319_v8, 0.0 }
0x1af0   : > { %3324 = vadd.xlane.f32.xlu0 %v3323_v9 }
0x1b7c   : > { %v3328_v11 = vpop.xlane.xlu1 %3327 }
0x1b7d   : > { %v3330_v14 = vmul.f32 0.03125, %v3328_v11  ;;  %v3325_v15 = vpop.xlane.xlu0 %3324 }
0x1b7e   : > { %v3329_v25 = vmul.f32 0.03125, %v3325_v15 }
0x1b7f   : > { %v3332_v23 = vsub.f32 %v3320_v12, %v3330_v14 }
0x1b80   : > { %v3331_v16 = vsub.f32 %v3319_v8, %v3329_v25 }
0x1b81   : > { %v3334_v18 = vmul.f32 %v3332_v23, %v3332_v23 }
0x1b82   : > { %v3333_v19 = vmul.f32 %v3331_v16, %v3331_v16 }
0x1b83   : > { %v3338_v24 = vsel %vm811_vm0, %v3334_v18, 0.0 }
0x1b84   : > { %3339 = vadd.xlane.f32.xlu1 %v3338_v24  ;;  %v3335_v17 = vsel %vm811_vm0, %v3333_v19, 0.0 }
0x1b85   : > { %3336 = vadd.xlane.f32.xlu0 %v3335_v17 }
0x1c11   : > { %v3340_v26 = vpop.xlane.xlu1 %3339 }
0x1c12   : > { %v3342_v28 = vmul.f32 0.03125, %v3340_v26  ;;  %v3337_v29 = vpop.xlane.xlu0 %3336 }
0x1c13   : > { %v3341_v30 = vmul.f32 0.03125, %v3337_v29 }
0x1c14   : > { %v3344_v32 = vadd.f32 1e-05, %v3342_v28 }
0x1c15   : > { %v3343_v33 = vadd.f32 1e-05, %v3341_v30 }
0x1c16   : > { %4256 = vrsqrt.f32 %v3344_v32 }
0x1c17   : > { %4258 = vrsqrt.f32 %v3343_v33 }
0x1c20   : > { %v4257_v34 = vpop.eup %4256 }
0x1c21   : > { %v4259_v35 = vpop.eup %4258  ;;  %v3348_v31 = vmul.f32 %v4257_v34, %v3332_v23 }
0x1c22   : > { %v3347_v20 = vmul.f32 %v4259_v35, %v3331_v16 }
0x1c23   : > { %v3356_v37 = vmul.f32 %v3603_v21, %v3348_v31 }
0x1c24   : > { %v3355_v41 = vmul.f32 %v3603_v21, %v3347_v20 }
0x1c25   : > { %v3364_v42 = vadd.f32 %v3604_v36, %v3356_v37 }
0x1c26   : > { %v3363_v43 = vadd.f32 %v3604_v36, %v3355_v41 }
0x1c27   : > { %v3370_v27 = vsel %vm811_vm0, %v3364_v42, 0.0 }
0x1c28   : > { %3371 = vadd.xlane.f32.xlu1 %v3370_v27  ;;  %v3367_v44 = vsel %vm811_vm0, %v3363_v43, 0.0 }
0x1c29   : > { %3368 = vadd.xlane.f32.xlu0 %v3367_v44 }
0x1cb5   : > { %v3372_v13 = vpop.xlane.xlu1 %3371 }
0x1cb6   : > { %v3374_v46 = vmul.f32 0.03125, %v3372_v13  ;;  %v3369_v45 = vpop.xlane.xlu0 %3368 }
0x1cb7   : > { %v3373_v47 = vmul.f32 0.03125, %v3369_v45 }
0x1cb8   : > { %v3376_v48 = vsub.f32 %v3364_v42, %v3374_v46 }
0x1cb9   : > { %v3375_v49 = vsub.f32 %v3363_v43, %v3373_v47 }
0x1cba   : > { %v3378_v50 = vmul.f32 %v3376_v48, %v3376_v48 }
0x1cbb   : > { %v3377_v51 = vmul.f32 %v3375_v49, %v3375_v49 }
0x1cbc   : > { %v3382_v52 = vsel %vm811_vm0, %v3378_v50, 0.0 }
0x1cbd   : > { %3383 = vadd.xlane.f32.xlu1 %v3382_v52  ;;  %v3379_v53 = vsel %vm811_vm0, %v3377_v51, 0.0 }
0x1cbe   : > { %3380 = vadd.xlane.f32.xlu0 %v3379_v53 }
0x1d4a   : > { %v3384_v5 = vpop.xlane.xlu1 %3383 }
0x1d4b   : > { %v3386_v7 = vmul.f32 0.03125, %v3384_v5  ;;  %v3381_v54 = vpop.xlane.xlu0 %3380 }
0x1d4c   : > { %v3385_v55 = vmul.f32 0.03125, %v3381_v54 }
0x1d4d   : > { %v3388_v56 = vadd.f32 1e-05, %v3386_v7 }
0x1d4e   : > { %v3387_v59 = vadd.f32 1e-05, %v3385_v55 }
0x1d4f   : > { %4260 = vrsqrt.f32 %v3388_v56 }
0x1d50   : > { %4262 = vrsqrt.f32 %v3387_v59 }
0x1d59   : > { %v4261_v60 = vpop.eup %4260 }
0x1d5a   : > { %v4263_v22 = vpop.eup %4262  ;;  %v3392_v61 = vmul.f32 %v4261_v60, %v3376_v48 }
0x1d5b   : > { %v3391_v38 = vmul.f32 %v4263_v22, %v3375_v49 }
0x1d5c   : > { %v3400_v57 = vmul.f32 %v3605_v40, %v3392_v61 }
0x1d5d   : > { %v3399_v58 = vmul.f32 %v3605_v40, %v3391_v38 }
0x1d5e   : > { %v3408_v39 = vadd.f32 %v3606_v62, %v3400_v57 }
0x1d5f   : > { %v3407_v63 = vadd.f32 %v3606_v62, %v3399_v58 }
0x1d60   : > { %3410 = vst.msk [vmem:[%s795_s28 + $0x8] sm:$0xff] %vm811_vm0, %v3408_v39 }
0x1d61   : > { %3409 = vst.msk [vmem:[%s795_s28] sm:$0xff] %vm811_vm0, %v3407_v63 }
0x1d62 PF: > { %s5189_s8 = sld [smem:[#allocation10_spill]] }
0x1d68   : > { %s36_s5 = sadd.s32 1, %s5189_s8  }
0x1d69   : > { %p33_p5 = scmp.ge.s32.totalorder %s36_s5, 4  }
0x1d6b   :  { %35 = sbr.rel (!%p33_p5) target bundleno = 13 (0xd), region = 165 }
0x1d72   :  { %3432 = vsyncpa [#allocation4], 1 }
0x1d73   :  { %3434 = vsyncpa [#allocation4 + $0x1], 1 }
0x1d74   :  { %3435 = vsyncpa [#allocation6], 1 }

// kernel: run.31
= control target key start
LH: loop header
LB: loop body
LE: loop exit
PB: predicated region body
PF: predicated region fallthrough
CT: control target
= control target key end

     0   :  { %s4750_s0 = inlined_call_operand.vmem [shape: f32[2,16,32], index: 0, kind: input, shape index: {}]   ;;  %s4751_s1 = inlined_call_operand.vmem [shape: f32[2,12,32], index: 1, kind: input, shape index: {}]   ;;  %s4752_s2 = inlined_call_operand.vmem [shape: f32[32,96], index: 2, kind: input, shape index: {}]   ;;  %s4753_s3 = inlined_call_operand.vmem [shape: f32[1,96], index: 3, kind: input, shape index: {}]   ;;  %s4754_s4 = inlined_call_operand.vmem [shape: f32[32,32], index: 4, kind: input, shape index: {}]   ;;  %s4755_s5 = inlined_call_operand.vmem [shape: f32[1,32], index: 5, kind: input, shape index: {}]   ;;  %s4756_s6 = inlined_call_operand.vmem [shape: f32[1,32], index: 6, kind: input, shape index: {}]   ;;  %s4757_s7 = inlined_call_operand.vmem [shape: f32[1,32], index: 7, kind: input, shape index: {}]   ;;  %s4758_s8 = inlined_call_operand.vmem [shape: f32[32,32], index: 8, kind: input, shape index: {}]   ;;  %s4759_s9 = inlined_call_operand.vmem [shape: f32[1,32], index: 9, kind: input, shape index: {}]   ;;  %s4760_s10 = inlined_call_operand.vmem [shape: f32[32,64], index: 10, kind: input, shape index: {}]   ;;  %s4761_s11 = inlined_call_operand.vmem [shape: f32[1,64], index: 11, kind: input, shape index: {}]   ;;  %s4762_s12 = inlined_call_operand.vmem [shape: f32[32,32], index: 12, kind: input, shape index: {}]   ;;  %s4763_s13 = inlined_call_operand.vmem [shape: f32[1,32], index: 13, kind: input, shape index: {}]   ;;  %s4764_s14 = inlined_call_operand.vmem [shape: f32[1,32], index: 14, kind: input, shape index: {}]   ;;  %s4765_s15 = inlined_call_operand.vmem [shape: f32[1,32], index: 15, kind: input, shape index: {}]   ;;  %s4766_s16 = inlined_call_operand.vmem [shape: f32[32,32], index: 16, kind: input, shape index: {}]   ;;  %s4767_s17 = inlined_call_operand.vmem [shape: f32[1,32], index: 17, kind: input, shape index: {}]   ;;  %s4768_s18 = inlined_call_operand.vmem [shape: f32[32,32], index: 18, kind: input, shape index: {}]   ;;  %s4769_s19 = inlined_call_operand.vmem [shape: f32[1,32], index: 19, kind: input, shape index: {}]   ;;  %s4770_s20 = inlined_call_operand.vmem [shape: f32[1,32], index: 20, kind: input, shape index: {}, may-alias: {20,22}]   ;;  %s4771_s21 = inlined_call_operand.vmem [shape: f32[1,32], index: 21, kind: input, shape index: {}, may-alias: {21,23}]   ;;  %s4772_s22 = inlined_call_operand.vmem [shape: f32[1,32], index: 22, kind: input, shape index: {}, may-alias: {20,22}]   ;;  %s4773_s23 = inlined_call_operand.vmem [shape: f32[1,32], index: 23, kind: input, shape index: {}, may-alias: {21,23}]   ;;  %s4774_s24 = inlined_call_operand.vmem [shape: f32[2,16,32], index: 24, kind: output, shape index: {}]  }
   0x1   :  { %4790 = sst [smem:[#allocation3_spill]] %s4750_s0 }
   0x2   :  { %4791 = sst [smem:[#allocation4_spill]] %s4751_s1 }
   0x3   :  { %4792 = sst [smem:[#allocation5_spill]] %s4752_s2 }
   0x4   :  { %4793 = sst [smem:[#allocation6_spill]] %s4753_s3 }
   0x5   :  { %4794 = sst [smem:[#allocation7_spill]] %s4754_s4 }
   0x6   :  { %4795 = sst [smem:[#allocation8_spill]] %s4755_s5  ;;  %s4256_s5 = smov 0  }
   0x7   :  { %4796 = sst [smem:[#allocation9_spill]] %s4756_s6 }
   0x8   :  { %4797 = sst [smem:[#allocation10_spill]] %s4757_s7 }
   0x9   :  { %4798 = sst [smem:[#allocation11_spill]] %s4758_s8 }
   0xa LB: > { %s3396_s26 = sadd.s32 4294967295, %s4114_s5   ;;  %p3400_p0 = scmp.ge.s32.totalorder %s4114_s5, 1  ;;  %s4114_s5 = sphi %s4256_s5, %s34_s5  }
   0xb   : > { %p672_p1 = scmp.lt.s32.totalorder %s4114_s5, 3 }
   0xd   : > { %p673_p2 = pnand %p3400_p0, %p672_p1 }
   0xe   : > { %s4799_s27 = sld [smem:[#allocation5_spill]] (!%p673_p2)  ;;  %p743_p3 = scmp.lt.s32.totalorder (!%p673_p2), %s3396_s26, 1  ;;  %vm773_vm0 = vcmask (!%p673_p2), 261120   ;;  %vm868_vm1 = vcmask (!%p673_p2), 64512   ;;  %v855_v19 = vlaneseq (!%p673_p2)  ;;  %vm956_vm4 = vcmask (!%p673_p2), 130048  }
   0xf   : > { %676 = sbr.rel (%p673_p2) target bundleno = 7124 (0x1bd4), region = 116  ;;  %s4800_s8 = sld [smem:[#allocation3_spill]] (!%p673_p2)  ;;  %vm4307_vm2 = vmpackc.low (!%p673_p2), %vm868_vm1, %vm868_vm1  ;;  %vm1706_vm6 = vcmask (!%p673_p2), 195584   ;;  %vm1776_vm7 = vcmask (!%p673_p2), 1043456   ;;  %vm2191_vm8 = vcmask (!%p673_p2), 97280   ;;  %vm4130_vm9 = vmmov (!%p673_p2), 1  }
  0x10   : > { %s4801_s22 = sld [smem:[#allocation6_spill]] (!%p673_p2)  ;;  %s4780_s23 = smov (!%p673_p2), 96   ;;  %v4317_v20 = vshrl.u32 (!%p673_p2), %v855_v19, 7  ;;  %v4322_v22 = vand.u32 (!%p673_p2), 127, %v855_v19  ;;  %vm4587_vm10 = vmpackc.low (!%p673_p2), %vm1776_vm7, %vm4130_vm9 }
  0x11   : > { %s4117_s28 = smov (!%p673_p2), 64   ;;  %s4781_s6 = smov (!%p673_p2), 88  }
  0x12   : > { %v4320_v21 = vadd.s32 (!%p673_p2), 8, %v4317_v20  ;;  %vm860_vm5 = vcmp.gt.s32.totalorder (!%p673_p2), %v4322_v22, %v4317_v20  ;;  %s4119_s2 = smov (!%p673_p2), 120   ;;  %s4120_s29 = smov (!%p673_p2), 56  }
  0x13   : > { %s4779_s0 = smov (!%p673_p2), 80   ;;  %s4122_s7 = smov (!%p673_p2), 112  }
  0x14   : > { %v762_v0 = vld [vmem:[%s4799_s27] sm:$0xff] (!%p673_p2)  ;;  %v763_v1 = vld [vmem:[%s4799_s27 + $0x8] sm:$0xff] (!%p673_p2)  ;;  %v764_v2 = vld [vmem:[%s4799_s27 + $0x10] sm:$0xff] (!%p673_p2)  ;;  %vm861_vm3 = vcmp.gt.s32.totalorder (!%p673_p2), %v4322_v22, %v4320_v21  ;;  %s4778_s3 = smov (!%p673_p2), 72   ;;  %s4788_s25 = smov (!%p673_p2), 104  }
  0x15   : > { %v3786_v3 = vpack.c.bf16 (!%p673_p2), %v763_v1, %v762_v0  ;;  %v765_v4 = vld [vmem:[%s4799_s27 + $0x18] sm:$0xff] (!%p673_p2)  ;;  %s4127_s1 = smov (!%p673_p2), 40  }
  0x16   : > { %v3790_v5 = vpack.c.bf16 %v765_v4, %v764_v2  ;;  %s4821_s26 = smov (!%p743_p3, %s3396_s26), 1  ;;  %v3407_v8 = vld [vmem:[%s4801_s22] ss:$0 sm:$0xff]  ;;  %s4782_s22 = smov 24  }
  0x17   : > { %3787 = vmatprep.subr.bf16.mxu0 %v3786_v3  ;;  %s4276_s30 = sshll.u32 %s4821_s26, 4  ;;  %s4784_s26 = smov 16  }
  0x18   : > { %3789 = vmatpush3.bf16.msra.mxu0 %v3786_v3  ;;  %s747_s4 = scalar_lea.vmem %s4800_s8, %s4276_s30  ;;  %s4125_s8 = smov 48  }
  0x19   : > { %3791 = vmatprep.subr.bf16.mxu0 %v3790_v5  ;;  %v4282_v6 = vld [vmem:[%s747_s4] sm:$0xff]  ;;  %v4286_v7 = vld [vmem:[%s747_s4 + $0x8] sm:$0xff]  ;;  %s4786_s4 = smov 8  }
  0x1a   : > { %3605 = vmatprep.mubr.msk.f32.mxu0 %vm773_vm0, %v4282_v6 }
  0x1c   : > { %3793 = vmatpush3.bf16.msra.mxu0 %v3790_v5 }
  0x1f   : > { %3606 = vmatmul.mubr.msk.f32.vlgmr.msra.gmra.mrb[0].mxu0 %vm773_vm0, %v4286_v7 }
  0xf2   : > { %v3607_v9 = vpop.f32.mrb[0].mxu0 }
  0xf3   : > { %v4293_v10 = vadd.f32 %v3607_v9, %v3407_v8  ;;  %v846_v11 = vpop.f32.mrb[1].mxu0 }
  0xf4   : > { %v4295_v12 = vadd.f32 %v3407_v8, %v846_v11 }
  0xf6   : > { %3612 = vmatprep.mubr.msk.f32.mxu1 %vm868_vm1, %v4295_v12  ;;  %v4301_v13 = vpack.i.bf16 %v4293_v10, %v4295_v12 }
  0xf8   : > { %3954 = vrot.lane.b32.xlu0 %v4301_v13, %s4780_s23  ;;  %s4805_s23 = smov 24  }
 0x16a   : > { %v3955_v14 = vpop.permute.xlu0 %3954 }
 0x16b   : > { %v3957_v15 = vunpack.i.h.bf16 %v3955_v14  ;;  %v3956_v16 = vunpack.i.l.bf16 %v3955_v14 }
 0x16d   : > { %v3794_v18 = vpack.c.bf16 %v3957_v15, %v3956_v16 }
 0x16f   : > { %3796 = vmatprep.subr.msk.bf16.mxu1 %vm4307_vm2, %v3794_v18 }
 0x170   : > { %3799 = vmatpush3.bf16.xpose.msk.msra.mxu1 %vm4307_vm2, %v3794_v18 }
 0x177   : > { %3613 = vmatmul.mubr.msk.f32.vlgmr.msra.gmra.mrb[0].mxu1 %vm868_vm1, %v4293_v10 }
 0x24a   : > { %v3614_v23 = vpop.f32.mrb[0].mxu1 }
 0x24b   : > { %v953_v24 = vmul.f32 0.35355338, %v3614_v23  ;;  %v943_v25 = vpop.f32.mrb[1].mxu1 }
 0x24c   : > { %v952_v26 = vmul.f32 0.35355338, %v943_v25 }
 0x24d   : > { %v955_v27 = vsel %vm861_vm3, -1e+30, %v953_v24 }
 0x24e   : > { %v960_v28 = vsel %vm956_vm4, %v955_v27, -inf  ;;  %v954_v29 = vsel %vm860_vm5, -1e+30, %v952_v26 }
 0x24f   : > { %961 = vmax.xlane.f32.xlu1 %v960_v28  ;;  %v957_v30 = vsel %vm956_vm4, %v954_v29, -inf }
 0x250   : > { %958 = vmax.xlane.f32.xlu0 %v957_v30 }
 0x260   : > { %3959 = vrot.lane.b32.xlu1 %v4301_v13, %s4117_s28 }
 0x264   : > { %3964 = vrot.lane.b32.xlu1 %v4301_v13, %s4781_s6  ;;  %s4808_s6 = sld [smem:[#allocation11_spill]] }
 0x266   : > { %1068 = vrot.lane.b32.xlu0 %v4293_v10, %s4119_s2 }
 0x2dc   : > { %v962_v31 = vpop.xlane.xlu1 %961 }
 0x2dd   : > { %v964_v32 = vsub.f32 %v955_v27, %v962_v31  ;;  %v959_v33 = vpop.xlane.xlu0 %958 }
 0x2de   : > { %v963_v34 = vsub.f32 %v954_v29, %v959_v33 }
 0x2df   : > { %v967_v35 = vmul.f32 1.442695, %v964_v32 }
 0x2e0   : > { %v965_v36 = vmul.f32 1.442695, %v963_v34  ;;  %v3960_v37 = vpop.permute.xlu1 %3959 }
 0x2e1   : > { %4028 = vpow2.f32 %v967_v35  ;;  %v3962_v38 = vunpack.i.h.bf16 %v3960_v37  ;;  %v3961_v39 = vunpack.i.l.bf16 %v3960_v37  ;;  %v1069_v56 = vpop.permute.xlu0 %1068 }
 0x2e2   : > { %4030 = vpow2.f32 %v965_v36 }
 0x2e3   : > { %v3800_v40 = vpack.c.bf16 %v3962_v38, %v3961_v39 }
 0x2e4   : > { %v3965_v41 = vpop.permute.xlu1 %3964 }
 0x2e5   : > { %v3967_v42 = vunpack.i.h.bf16 %v3965_v41  ;;  %v3966_v43 = vunpack.i.l.bf16 %v3965_v41  ;;  %3801 = vmatprep.subr.bf16.mxu1 %v3800_v40 }
 0x2e6   : > { %3803 = vmatpush3.bf16.msra.mxu1 %v3800_v40 }
 0x2e7   : > { %v3804_v44 = vpack.c.bf16 %v3967_v42, %v3966_v43 }
 0x2e9   : > { %3806 = vmatprep.subr.msk.bf16.mxu1 %vm4307_vm2, %v3804_v44 }
 0x2eb   : > { %v4029_v45 = vpop.eup %4028 }
 0x2ec   : > { %v972_v46 = vsel %vm956_vm4, %v4029_v45, 0.0  ;;  %v4031_v47 = vpop.eup %4030 }
 0x2ed   : > { %973 = vadd.xlane.f32.xlu1 %v972_v46  ;;  %v969_v48 = vsel %vm956_vm4, %v4031_v47, 0.0 }
 0x2f1   : > { %970 = vadd.xlane.f32.xlu1 %v969_v48 }
 0x302   : > { %1066 = vrot.lane.b32.xlu1 %v4295_v12, %s4119_s2 }
 0x37a   : > { %v974_v49 = vpop.xlane.xlu1 %973 }
 0x37b   : > { %4032 = vrcp.f32 %v974_v49 }
 0x37e   : > { %v971_v50 = vpop.xlane.xlu1 %970 }
 0x37f   : > { %4034 = vrcp.f32 %v971_v50 }
 0x382   : > { %v1067_v55 = vpop.permute.xlu1 %1066 }
 0x385   : > { %v4033_v51 = vpop.eup %4032 }
 0x386   : > { %v978_v54 = vmul.f32 %v4033_v51, %v4029_v45 }
 0x389   : > { %v4035_v52 = vpop.eup %4034 }
 0x38a   : > { %v977_v53 = vmul.f32 %v4035_v52, %v4031_v47 }
 0x38c   : > { %3619 = vmatprep.mubr.msk.f32.mxu1 %vm956_vm4, %v977_v53 }
 0x38d   : > { %3620 = vmatmul.mubr.msk.f32.vlgmr.msra.gmra.mrb[2].mxu1 %vm956_vm4, %v978_v54 }
 0x38e   : > { %3809 = vmatpush3.bf16.xpose.msk.msra.mxu1 %vm4307_vm2, %v3804_v44  ;;  %3626 = vmatprep.mubr.msk.f32.mxu1 %vm868_vm1, %v1067_v55 }
 0x395   : > { %3627 = vmatmul.mubr.msk.f32.vlgmr.msra.gmra.mrb[4].mxu1 %vm868_vm1, %v1069_v56 }
 0x460   : > { %v4353_v57 = vpop.f32.mrb[2].mxu1 }
 0x461   : > { %v4355_v58 = vpop.f32.mrb[3].mxu1 }
 0x468   : > { %v3628_v59 = vpop.f32.mrb[4].mxu1 }
 0x469   : > { %v1158_v60 = vmul.f32 0.35355338, %v3628_v59  ;;  %v1148_v61 = vpop.f32.mrb[5].mxu1 }
 0x46a   : > { %v1157_v62 = vmul.f32 0.35355338, %v1148_v61 }
 0x46b   : > { %v1160_v63 = vsel %vm861_vm3, -1e+30, %v1158_v60 }
 0x46c   : > { %v1164_v0 = vsel %vm956_vm4, %v1160_v63, -inf  ;;  %v1159_v1 = vsel %vm860_vm5, -1e+30, %v1157_v62 }
 0x46d   : > { %1165 = vmax.xlane.f32.xlu0 %v1164_v0  ;;  %v1161_v2 = vsel %vm956_vm4, %v1159_v1, -inf }
 0x46e   : > { %1162 = vmax.xlane.f32.xlu1 %v1161_v2 }
 0x47f   : > { %3969 = vrot.lane.b32.xlu1 %v4301_v13, %s4120_s29  ;;  %s4812_s29 = smov 96  }
 0x483   : > { %3974 = vrot.lane.b32.xlu0 %v4301_v13, %s4779_s0  ;;  %1270 = vrot.lane.b32.xlu1 %v4295_v12, %s4122_s7  ;;  %s4817_s0 = smov 72  }
 0x4fa   : > { %v1166_v3 = vpop.xlane.xlu0 %1165 }
 0x4fb   : > { %v1168_v4 = vsub.f32 %v1160_v63, %v1166_v3  ;;  %v1163_v5 = vpop.xlane.xlu1 %1162 }
 0x4fc   : > { %v1167_v8 = vsub.f32 %v1159_v1, %v1163_v5 }
 0x4fd   : > { %v1171_v9 = vmul.f32 1.442695, %v1168_v4 }
 0x4fe   : > { %v1169_v11 = vmul.f32 1.442695, %v1167_v8  ;;  %v3975_v14 = vpop.permute.xlu0 %3974 }
 0x4ff   : > { %4036 = vpow2.f32 %v1171_v9  ;;  %v3970_v15 = vpop.permute.xlu1 %3969  ;;  %v3977_v16 = vunpack.i.h.bf16 %v3975_v14  ;;  %v3976_v18 = vunpack.i.l.bf16 %v3975_v14 }
 0x500   : > { %v3972_v19 = vunpack.i.h.bf16 %v3970_v15  ;;  %v3971_v23 = vunpack.i.l.bf16 %v3970_v15  ;;  %4038 = vpow2.f32 %v1169_v11 }
 0x501   : > { %v3814_v25 = vpack.c.bf16 %v3977_v16, %v3976_v18 }
 0x502   : > { %v3810_v24 = vpack.c.bf16 %v3972_v19, %v3971_v23 }
 0x503   : > { %v1271_v30 = vpop.permute.xlu1 %1270 }
 0x504   : > { %3811 = vmatprep.subr.bf16.mxu0 %v3810_v24 }
 0x505   : > { %3813 = vmatpush3.bf16.msra.mxu0 %v3810_v24 }
 0x506   : > { %3816 = vmatprep.subr.msk.bf16.mxu0 %vm4307_vm2, %v3814_v25 }
 0x509   : > { %v4037_v26 = vpop.eup %4036 }
 0x50a   : > { %v1176_v27 = vsel %vm956_vm4, %v4037_v26, 0.0  ;;  %v4039_v28 = vpop.eup %4038 }
 0x50b   : > { %1177 = vadd.xlane.f32.xlu1 %v1176_v27  ;;  %v1173_v29 = vsel %vm956_vm4, %v4039_v28, 0.0 }
 0x50f   : > { %1174 = vadd.xlane.f32.xlu1 %v1173_v29 }
 0x520   : > { %1272 = vrot.lane.b32.xlu1 %v4293_v10, %s4122_s7 }
 0x598   : > { %v1178_v31 = vpop.xlane.xlu1 %1177 }
 0x599   : > { %4040 = vrcp.f32 %v1178_v31 }
 0x59c   : > { %v1175_v32 = vpop.xlane.xlu1 %1174 }
 0x59d   : > { %4042 = vrcp.f32 %v1175_v32 }
 0x5a0   : > { %v1273_v37 = vpop.permute.xlu1 %1272 }
 0x5a3   : > { %v4041_v33 = vpop.eup %4040 }
 0x5a4   : > { %v1182_v36 = vmul.f32 %v4041_v33, %v4037_v26 }
 0x5a7   : > { %v4043_v34 = vpop.eup %4042 }
 0x5a8   : > { %v1181_v35 = vmul.f32 %v4043_v34, %v4039_v28 }
 0x5aa   : > { %3633 = vmatprep.mubr.msk.f32.mxu0 %vm956_vm4, %v1181_v35 }
 0x5ab   : > { %3634 = vmatmul.mubr.msk.f32.vlgmr.msra.gmra.mrb[2].mxu0 %vm956_vm4, %v1182_v36 }
 0x5ac   : > { %3819 = vmatpush3.bf16.xpose.msk.msra.mxu0 %vm4307_vm2, %v3814_v25  ;;  %3640 = vmatprep.mubr.msk.f32.mxu0 %vm868_vm1, %v1271_v30 }
 0x5b3   : > { %3641 = vmatmul.mubr.msk.f32.vlgmr.msra.gmra.mrb[4].mxu0 %vm868_vm1, %v1273_v37 }
 0x67e   : > { %v4382_v38 = vpop.f32.mrb[2].mxu0 }
 0x67f   : > { %v4384_v39 = vpop.f32.mrb[3].mxu0 }
 0x686   : > { %v3642_v40 = vpop.f32.mrb[4].mxu0 }
 0x687   : > { %v1362_v41 = vmul.f32 0.35355338, %v3642_v40  ;;  %v1352_v42 = vpop.f32.mrb[5].mxu0 }
 0x688   : > { %v1361_v43 = vmul.f32 0.35355338, %v1352_v42 }
 0x689   : > { %v1364_v44 = vsel %vm861_vm3, -1e+30, %v1362_v41 }
 0x68a   : > { %v1368_v45 = vsel %vm956_vm4, %v1364_v44, -inf  ;;  %v1363_v46 = vsel %vm860_vm5, -1e+30, %v1361_v43 }
 0x68b   : > { %1369 = vmax.xlane.f32.xlu0 %v1368_v45  ;;  %v1365_v47 = vsel %vm956_vm4, %v1363_v46, -inf }
 0x68c   : > { %1366 = vmax.xlane.f32.xlu1 %v1365_v47 }
 0x718   : > { %v1370_v48 = vpop.xlane.xlu0 %1369 }
 0x719   : > { %v1372_v49 = vsub.f32 %v1364_v44, %v1370_v48  ;;  %v1367_v50 = vpop.xlane.xlu1 %1366 }
 0x71a   : > { %v1371_v51 = vsub.f32 %v1363_v46, %v1367_v50 }
 0x71b   : > { %v1375_v52 = vmul.f32 1.442695, %v1372_v49 }
 0x71c   : > { %v1373_v53 = vmul.f32 1.442695, %v1371_v51 }
 0x71d   : > { %4044 = vpow2.f32 %v1375_v52 }
 0x71e   : > { %4046 = vpow2.f32 %v1373_v53 }
 0x727   : > { %v4045_v54 = vpop.eup %4044 }
 0x728   : > { %v4047_v55 = vpop.eup %4046  ;;  %v1380_v56 = vsel %vm956_vm4, %v4045_v54, 0.0 }
 0x729   : > { %1381 = vadd.xlane.f32.xlu1 %v1380_v56  ;;  %v1377_v59 = vsel %vm956_vm4, %v4047_v55, 0.0 }
 0x72a   : > { %1378 = vadd.xlane.f32.xlu0 %v1377_v59 }
 0x73a   : > { %3984 = vrot.lane.b32.xlu1 %v4301_v13, %s4778_s3  ;;  %s4806_s3 = sld [smem:[#allocation8_spill]] }
 0x73e   : > { %1474 = vrot.lane.b32.xlu1 %v4295_v12, %s4788_s25 }
 0x740   : > { %3979 = vrot.lane.b32.xlu0 %v4301_v13, %s4125_s8  ;;  %s4804_s8 = sld [smem:[#allocation7_spill]] }
 0x744   : > { %1476 = vrot.lane.b32.xlu0 %v4293_v10, %s4788_s25 }
 0x7b6   : > { %v1382_v60 = vpop.xlane.xlu1 %1381 }
 0x7b7   : > { %4048 = vrcp.f32 %v1382_v60  ;;  %v1379_v61 = vpop.xlane.xlu0 %1378 }
 0x7b8   : > { %4050 = vrcp.f32 %v1379_v61 }
 0x7ba   : > { %v3985_v62 = vpop.permute.xlu1 %3984 }
 0x7bb   : > { %v3980_v63 = vpop.permute.xlu0 %3979  ;;  %v3987_v0 = vunpack.i.h.bf16 %v3985_v62  ;;  %v3986_v1 = vunpack.i.l.bf16 %v3985_v62 }
 0x7bc   : > { %v3982_v2 = vunpack.i.h.bf16 %v3980_v63  ;;  %v3981_v3 = vunpack.i.l.bf16 %v3980_v63 }
 0x7bd   : > { %v3824_v5 = vpack.c.bf16 %v3987_v0, %v3986_v1  ;;  %v1781_v1 = vld [vmem:[%s4804_s8 + $0x10] sm:$0xff] }
 0x7be   : > { %v3820_v4 = vpack.c.bf16 %v3982_v2, %v3981_v3  ;;  %v1475_v11 = vpop.permute.xlu1 %1474  ;;  %v1782_v2 = vld [vmem:[%s4804_s8 + $0x18] sm:$0xff] }
 0x7bf   : > { %v1477_v14 = vpop.permute.xlu0 %1476  ;;  %v3838_v3 = vpack.c.bf16 %v1782_v2, %v1781_v1  ;;  %v1921_v1 = vld [vmem:[%s4808_s6 + $0x18] sm:$0xff] }
 0x7c0   : > { %3821 = vmatprep.subr.bf16.mxu1 %v3820_v4 }
 0x7c1   : > { %v4049_v12 = vpop.eup %4048  ;;  %3823 = vmatpush3.bf16.msra.mxu1 %v3820_v4 }
 0x7c2   : > { %v4051_v8 = vpop.eup %4050  ;;  %3826 = vmatprep.subr.msk.bf16.mxu1 %vm4307_vm2, %v3824_v5  ;;  %v1386_v9 = vmul.f32 %v4049_v12, %v4045_v54 }
 0x7c3   : > { %v1385_v10 = vmul.f32 %v4051_v8, %v4047_v55 }
 0x7c5   : > { %3647 = vmatprep.mubr.msk.f32.mxu1 %vm956_vm4, %v1385_v10 }
 0x7c6   : > { %3648 = vmatmul.mubr.msk.f32.vlgmr.msra.gmra.mrb[6].mxu1 %vm956_vm4, %v1386_v9 }
 0x7c7   : > { %3654 = vmatprep.mubr.msk.f32.mxu1 %vm868_vm1, %v1475_v11 }
 0x7ca   : > { %3829 = vmatpush3.bf16.xpose.msk.msra.mxu1 %vm4307_vm2, %v3824_v5 }
 0x7d1   : > { %3655 = vmatmul.mubr.msk.f32.vlgmr.msra.gmra.mrb[8].mxu1 %vm868_vm1, %v1477_v14 }
 0x899   : > { %v3649_v15 = vpop.f32.mrb[6].mxu1 }
 0x89a   : > { %v1465_v16 = vpop.f32.mrb[7].mxu1 }
 0x8a4   : > { %v3656_v18 = vpop.f32.mrb[8].mxu1 }
 0x8a5   : > { %v1566_v19 = vmul.f32 0.35355338, %v3656_v18  ;;  %v1556_v23 = vpop.f32.mrb[9].mxu1 }
 0x8a6   : > { %v1565_v24 = vmul.f32 0.35355338, %v1556_v23 }
 0x8a7   : > { %v1568_v25 = vsel %vm861_vm3, -1e+30, %v1566_v19 }
 0x8a8   : > { %v1572_v26 = vsel %vm956_vm4, %v1568_v25, -inf  ;;  %v1567_v27 = vsel %vm860_vm5, -1e+30, %v1565_v24 }
 0x8a9   : > { %1573 = vmax.xlane.f32.xlu0 %v1572_v26  ;;  %v1569_v28 = vsel %vm956_vm4, %v1567_v27, -inf }
 0x8aa   : > { %1570 = vmax.xlane.f32.xlu1 %v1569_v28 }
 0x936   : > { %v1574_v29 = vpop.xlane.xlu0 %1573 }
 0x937   : > { %v1576_v30 = vsub.f32 %v1568_v25, %v1574_v29  ;;  %v1571_v31 = vpop.xlane.xlu1 %1570 }
 0x938   : > { %v1575_v32 = vsub.f32 %v1567_v27, %v1571_v31 }
 0x939   : > { %v1579_v33 = vmul.f32 1.442695, %v1576_v30 }
 0x93a   : > { %v1577_v34 = vmul.f32 1.442695, %v1575_v32 }
 0x93b   : > { %4052 = vpow2.f32 %v1579_v33 }
 0x93c   : > { %4054 = vpow2.f32 %v1577_v34 }
 0x945   : > { %v4053_v21 = vpop.eup %4052 }
 0x946   : > { %v4055_v35 = vpop.eup %4054  ;;  %v1584_v36 = vsel %vm956_vm4, %v4053_v21, 0.0 }
 0x947   : > { %1585 = vadd.xlane.f32.xlu1 %v1584_v36  ;;  %v1581_v20 = vsel %vm956_vm4, %v4055_v35, 0.0 }
 0x948   : > { %1582 = vadd.xlane.f32.xlu0 %v1581_v20 }
 0x958   : > { %1680 = vrot.lane.b32.xlu1 %v4384_v39, %s4786_s4 }
 0x95c   : > { %1682 = vrot.lane.b32.xlu1 %v4382_v38, %s4786_s4 }
 0x95e   : > { %3989 = vrot.lane.b32.xlu0 %v4301_v13, %s4127_s1  ;;  %s4809_s1 = sld [smem:[#allocation9_spill]] }
 0x960   : > { %1690 = vrot.lane.b32.xlu1 %v3649_v15, %s4784_s26 }
 0x962   : > { %1688 = vrot.lane.b32.xlu0 %v1465_v16, %s4784_s26 }
 0x9d4   : > { %v1586_v22 = vpop.xlane.xlu1 %1585 }
 0x9d5   : > { %4056 = vrcp.f32 %v1586_v22  ;;  %v1583_v37 = vpop.xlane.xlu0 %1582 }
 0x9d6   : > { %4058 = vrcp.f32 %v1583_v37  ;;  %v3434_v37 = vld [vmem:[%s4806_s3] ss:$0 sm:$0xff]  ;;  %s4810_s3 = sld [smem:[#allocation10_spill]] }
 0x9d8   : > { %v1681_v47 = vpop.permute.xlu1 %1680 }
 0x9d9   : > { %v3990_v40 = vpop.permute.xlu0 %3989  ;;  %v1702_v52 = vsel %vm868_vm1, %v4355_v58, %v1681_v47  ;;  %v1780_v58 = vld [vmem:[%s4804_s8 + $0x8] sm:$0xff] }
 0x9da   : > { %v3992_v41 = vunpack.i.h.bf16 %v3990_v40  ;;  %v3991_v42 = vunpack.i.l.bf16 %v3990_v40 }
 0x9dc   : > { %v3830_v43 = vpack.c.bf16 %v3992_v41, %v3991_v42  ;;  %v1683_v48 = vpop.permute.xlu1 %1682 }
 0x9dd   : > { %v1689_v50 = vpop.permute.xlu0 %1688  ;;  %v1703_v51 = vsel %vm868_vm1, %v4353_v57, %v1683_v48  ;;  %v1779_v57 = vld [vmem:[%s4804_s8] sm:$0xff] }
 0x9de   : > { %3831 = vmatprep.subr.bf16.mxu0 %v3830_v43  ;;  %v1704_v55 = vsel %vm956_vm4, %v1702_v52, %v1689_v50  ;;  %v3834_v63 = vpack.c.bf16 %v1780_v58, %v1779_v57  ;;  %v1918_v57 = vld [vmem:[%s4808_s6] sm:$0xff]  ;;  %v1919_v58 = vld [vmem:[%s4808_s6 + $0x8] sm:$0xff] }
 0x9df   : > { %v4057_v39 = vpop.eup %4056  ;;  %3833 = vmatpush3.bf16.msra.mxu0 %v3830_v43 }
 0x9e0   : > { %v4059_v38 = vpop.eup %4058  ;;  %v1590_v45 = vmul.f32 %v4057_v39, %v4053_v21  ;;  %v1691_v49 = vpop.permute.xlu1 %1690  ;;  %3835 = vmatprep.subr.bf16.mxu0 %v3834_v63 }
 0x9e1   : > { %v1589_v44 = vmul.f32 %v4059_v38, %v4055_v35  ;;  %v1705_v53 = vsel %vm956_vm4, %v1703_v51, %v1691_v49 }
 0x9e3   : > { %3661 = vmatprep.mubr.msk.f32.mxu0 %vm956_vm4, %v1589_v44 }
 0x9e4   : > { %3662 = vmatmul.mubr.msk.f32.vlgmr.msra.gmra.mrb[6].mxu0 %vm956_vm4, %v1590_v45 }
 0x9e5   : > { %3837 = vmatpush3.bf16.msra.mxu0 %v3834_v63  ;;  %v3842_v63 = vpack.c.bf16 %v1919_v58, %v1918_v57 }
 0x9e6   : > { %3839 = vmatprep.subr.bf16.mxu0 %v3838_v3 }
 0x9e7   : > { %3843 = vmatprep.subr.bf16.mxu1 %v3842_v63 }
 0x9e8   : > { %3845 = vmatpush3.bf16.msra.mxu1 %v3842_v63 }
 0x9e9   : > { %3841 = vmatpush3.bf16.msra.mxu0 %v3838_v3 }
 0xab7   : > { %v3663_v13 = vpop.f32.mrb[6].mxu0 }
 0xab8   : > { %1698 = vrot.lane.b32.xlu1 %v3663_v13, %s4782_s22  ;;  %v1669_v46 = vpop.f32.mrb[7].mxu0 }
 0xab9   : > { %1696 = vrot.lane.b32.xlu0 %v1669_v46, %s4782_s22 }
 0xb2a   : > { %v1699_v54 = vpop.permute.xlu1 %1698 }
 0xb2b   : > { %v1708_v56 = vsel %vm1706_vm6, %v1705_v53, %v1699_v54  ;;  %v1697_v59 = vpop.permute.xlu0 %1696  ;;  %v2011_v54 = vld [vmem:[%s4760_s10 + $0x8] sm:$0xff] }
 0xb2c   : > { %1710 = vst.msk [vmem:[#allocation2 + $0x8] sm:$0xff] %vm773_vm0, %v1708_v56  ;;  %v1707_v60 = vsel %vm1706_vm6, %v1704_v55, %v1697_v59  ;;  %v2012_v56 = vld [vmem:[%s4760_s10 + $0x10] sm:$0xff]  ;;  %v2013_v59 = vld [vmem:[%s4760_s10 + $0x18] sm:$0xff] }
 0xb2d   : > { %1709 = vst.msk [vmem:[#allocation2] sm:$0xff] %vm773_vm0, %v1707_v60  ;;  %v3854_v60 = vpack.c.bf16 %v2013_v59, %v2012_v56 }
 0xb34   : > { %v1715_v61 = vld [vmem:[#allocation2 + $0x2] ss:$4 sm:$0xf]  ;;  %v1711_v62 = vld [vmem:[#allocation2] ss:$4 sm:$0xf] }
 0xb35   : > { %1737 = vrot.lane.b32.xlu1 %v1715_v61, %s4786_s4  ;;  %1734 = vrot.lane.b32.xlu0 %v1711_v62, %s4119_s2  ;;  %v1713_v0 = vld [vmem:[#allocation2 + $0x1] ss:$4 sm:$0xf]  ;;  %v1717_v4 = vld [vmem:[#allocation2 + $0x3] ss:$4 sm:$0xf] }
 0xb39   : > { %1761 = vrot.lane.b32.xlu1 %v1713_v0, %s4122_s7  ;;  %1758 = vrot.lane.b32.xlu0 %v1711_v62, %s4788_s25 }
 0xb3d   : > { %1740 = vrot.lane.b32.xlu1 %v1717_v4, %s4784_s26  ;;  %1719 = vrot.lane.b32.xlu0 %v1713_v0, %s4786_s4 }
 0xb41   : > { %1723 = vrot.lane.b32.xlu1 %v1715_v61, %s4784_s26  ;;  %1764 = vrot.lane.b32.xlu0 %v1715_v61, %s4119_s2  ;;  %s4818_s26 = smov 8  }
 0xb45   : > { %1749 = vrot.lane.b32.xlu1 %v1713_v0, %s4119_s2  ;;  %1746 = vrot.lane.b32.xlu0 %v1711_v62, %s4122_s7 }
 0xb49   : > { %1752 = vrot.lane.b32.xlu1 %v1717_v4, %s4786_s4  ;;  %1727 = vrot.lane.b32.xlu0 %v1717_v4, %s4805_s23  ;;  %s4807_s4 = sld [smem:[#allocation4_spill]] }
 0xb4f   : > { %s752_s25 = scalar_lea.vmem %s4807_s4, %s4276_s30 }
 0xba7   : > { %v1738_v5 = vpop.permute.xlu1 %1737  ;;  %v1735_v12 = vpop.permute.xlu0 %1734 }
 0xba8   : > { %v1743_v16 = vsel %vm868_vm1, %v1735_v12, %v1713_v0  ;;  %v1920_v0 = vld [vmem:[%s4808_s6 + $0x10] sm:$0xff] }
 0xba9   : > { %v1744_v23 = vsel %vm956_vm4, %v1743_v16, %v1738_v5  ;;  %v3846_v2 = vpack.c.bf16 %v1921_v1, %v1920_v0 }
 0xbab   : > { %v1762_v8 = vpop.permute.xlu1 %1761  ;;  %v1759_v10 = vpop.permute.xlu0 %1758  ;;  %3847 = vmatprep.subr.bf16.mxu1 %v3846_v2 }
 0xbac   : > { %v1767_v18 = vsel %vm868_vm1, %v1759_v10, %v1762_v8  ;;  %3849 = vmatpush3.bf16.msra.mxu1 %v3846_v2 }
 0xbaf   : > { %v1741_v9 = vpop.permute.xlu1 %1740  ;;  %v1720_v11 = vpop.permute.xlu0 %1719 }
 0xbb0   : > { %v1745_v26 = vsel %vm1706_vm6, %v1744_v23, %v1741_v9  ;;  %v1730_v29 = vsel %vm868_vm1, %v1711_v62, %v1720_v11  ;;  %v761_v62 = vld [vmem:[%s752_s25 + $0x8] sm:$0xf]  ;;  %v3437_v11 = vld [vmem:[%s4809_s1] ss:$0 sm:$0xff]  ;;  %s4816_s1 = smov 104  }
 0xbb1   : > { %v1771_v30 = vrot.slane %v1745_v26, 4  ;;  %v3442_v26 = vld [vmem:[%s4761_s11] ss:$0 sm:$0xff] }
 0xbb3   : > { %v1724_v14 = vpop.permute.xlu1 %1723  ;;  %v1765_v15 = vpop.permute.xlu0 %1764 }
 0xbb4   : > { %v1768_v19 = vsel %vm956_vm4, %v1767_v18, %v1765_v15  ;;  %v1731_v31 = vsel %vm956_vm4, %v1730_v29, %v1724_v14  ;;  %v3438_v15 = vld [vmem:[%s4810_s3] ss:$0 sm:$0xff]  ;;  %s4819_s3 = smov 16  }
 0xbb5   : > { %v1769_v27 = vsel %vm1706_vm6, %v1768_v19, %v1717_v4 }
 0xbb6   : > { %v1774_v32 = vrot.slane %v1769_v27, 4 }
 0xbb7   : > { %v1750_v24 = vpop.permute.xlu1 %1749  ;;  %v1747_v25 = vpop.permute.xlu0 %1746 }
 0xbb8   : > { %v1755_v28 = vsel %vm868_vm1, %v1747_v25, %v1750_v24 }
 0xbb9   : > { %v1756_v34 = vsel %vm956_vm4, %v1755_v28, %v1715_v61  ;;  %v760_v61 = vld [vmem:[%s752_s25] sm:$0xff] }
 0xbbb   : > { %v1753_v33 = vpop.permute.xlu1 %1752  ;;  %v1728_v21 = vpop.permute.xlu0 %1727 }
 0xbbc   : > { %v1757_v35 = vsel %vm1706_vm6, %v1756_v34, %v1753_v33  ;;  %v1732_v36 = vsel %vm1706_vm6, %v1731_v31, %v1728_v21 }
 0xbbd   : > { %v1778_v20 = vsel %vm1776_vm7, %v1757_v35, %v1774_v32  ;;  %v1777_v22 = vsel %vm1776_vm7, %v1732_v36, %v1771_v30  ;;  %v3439_v36 = vld [vmem:[%s4759_s9] ss:$0 sm:$0xff] }
 0xbbe   : > { %3672 = vmatprep.mubr.msk.f32.mxu0 %vm773_vm0, %v1777_v22 }
 0xbbf   : > { %3673 = vmatmul.mubr.msk.f32.vlgmr.msra.gmra.mrb[8].mxu0 %vm773_vm0, %v1778_v20 }
 0xbc0   : > { %3694 = vmatprep.mubr.msk.f32.mxu0 %vm773_vm0, %v760_v61 }
 0xc92   : > { %v3674_v40 = vpop.f32.mrb[8].mxu0 }
 0xc93   : > { %v1868_v41 = vadd.f32 %v3674_v40, %v3434_v37  ;;  %v1862_v42 = vpop.f32.mrb[9].mxu0 }
 0xc94   : > { %v1863_v43 = vadd.f32 %v3434_v37, %v1862_v42 }
 0xc95   : > { %v1872_v39 = vadd.f32 %v1868_v41, %v4286_v7  ;;  %v2010_v7 = vld [vmem:[%s4760_s10] sm:$0xff] }
 0xc96   : > { %v1871_v38 = vadd.f32 %v1863_v43, %v4282_v6  ;;  %v3850_v55 = vpack.c.bf16 %v2011_v54, %v2010_v7 }
 0xc97   : > { %v1878_v44 = vsel %vm773_vm0, %v1872_v39, 0.0 }
 0xc98   : > { %1879 = vadd.xlane.f32.xlu1 %v1878_v44  ;;  %v1875_v45 = vsel %vm773_vm0, %v1871_v38, 0.0  ;;  %3851 = vmatprep.subr.bf16.mxu0 %v3850_v55 }
 0xc99   : > { %1876 = vadd.xlane.f32.xlu0 %v1875_v45  ;;  %3853 = vmatpush3.bf16.msra.mxu0 %v3850_v55 }
 0xc9a   : > { %3855 = vmatprep.subr.bf16.mxu0 %v3854_v60 }
 0xc9d   : > { %3857 = vmatpush3.bf16.msra.mxu0 %v3854_v60 }
 0xca0   : > { %3695 = vmatmul.mubr.msk.f32.vlgmr.msra.gmra.mrb[10].mxu0 %vm773_vm0, %v761_v62 }
 0xd25   : > { %v1880_v13 = vpop.xlane.xlu1 %1879 }
 0xd26   : > { %v1883_v46 = vmul.f32 0.03125, %v1880_v13  ;;  %v1877_v47 = vpop.xlane.xlu0 %1876 }
 0xd27   : > { %v1882_v48 = vmul.f32 0.03125, %v1877_v47 }
 0xd28   : > { %v1885_v49 = vsub.f32 %v1872_v39, %v1883_v46 }
 0xd29   : > { %v1884_v50 = vsub.f32 %v1871_v38, %v1882_v48 }
 0xd2a   : > { %v1887_v53 = vmul.f32 %v1885_v49, %v1885_v49 }
 0xd2b   : > { %v1886_v51 = vmul.f32 %v1884_v50, %v1884_v50 }
 0xd2c   : > { %v1891_v6 = vsel %vm773_vm0, %v1887_v53, 0.0 }
 0xd2d   : > { %v1888_v52 = vsel %vm773_vm0, %v1886_v51, 0.0 }
 0xd2e   : > { %1889 = vadd.xlane.f32.xlu0 %v1888_v52 }
 0xd32   : > { %1892 = vadd.xlane.f32.xlu0 %v1891_v6 }
 0xd73   : > { %v3696_v27 = vpop.f32.mrb[10].mxu0 }
 0xd74   : > { %v2099_v28 = vadd.f32 %v3696_v27, %v3442_v26  ;;  %v2093_v29 = vpop.f32.mrb[11].mxu0 }
 0xd75   : > { %v2094_v30 = vadd.f32 %v3442_v26, %v2093_v29 }
 0xd77   : > { %v4538_v31 = vpack.i.bf16 %v2099_v28, %v2094_v30  ;;  %v3858_v32 = vpack.c.bf16 %v2099_v28, %v2094_v30 }
 0xd79   : > { %3994 = vrot.lane.b32.xlu1 %v4538_v31, %s4119_s2  ;;  %3860 = vmatprep.subr.msk.bf16.mxu1 %vm4307_vm2, %v3858_v32 }
 0xdbb   : > { %v1890_v3 = vpop.xlane.xlu0 %1889 }
 0xdbc   : > { %v1894_v4 = vmul.f32 0.03125, %v1890_v3 }
 0xdbe   : > { %v1896_v5 = vadd.f32 1e-05, %v1894_v4 }
 0xdbf   : > { %v1893_v12 = vpop.xlane.xlu0 %1892 }
 0xdc0   : > { %4060 = vrsqrt.f32 %v1896_v5  ;;  %v1895_v8 = vmul.f32 0.03125, %v1893_v12 }
 0xdc2   : > { %v1897_v10 = vadd.f32 1e-05, %v1895_v8 }
 0xdc4   : > { %4062 = vrsqrt.f32 %v1897_v10 }
 0xdca   : > { %v4061_v9 = vpop.eup %4060 }
 0xdcb   : > { %v1900_v14 = vmul.f32 %v4061_v9, %v1884_v50 }
 0xdcd   : > { %v1908_v16 = vmul.f32 %v3437_v11, %v1900_v14 }
 0xdce   : > { %v4063_v18 = vpop.eup %4062 }
 0xdcf   : > { %v1901_v19 = vmul.f32 %v4063_v18, %v1885_v49  ;;  %v4527_v23 = vadd.f32 %v3438_v15, %v1908_v16 }
 0xdd1   : > { %v1909_v24 = vmul.f32 %v3437_v11, %v1901_v19  ;;  %3683 = vmatprep.mubr.msk.f32.mxu1 %vm773_vm0, %v4527_v23 }
 0xdd3   : > { %v4531_v25 = vadd.f32 %v3438_v15, %v1909_v24 }
 0xdd5   : > { %3684 = vmatmul.mubr.msk.f32.vlgmr.msra.gmra.mrb[10].mxu1 %vm773_vm0, %v4531_v25 }
 0xdd6   : > { %3863 = vmatpush3.bf16.xpose.msk.msra.mxu1 %vm4307_vm2, %v3858_v32 }
 0xdeb   : > { %v3995_v33 = vpop.permute.xlu1 %3994 }
 0xdec   : > { %v3997_v34 = vunpack.i.h.bf16 %v3995_v33  ;;  %v3996_v21 = vunpack.i.l.bf16 %v3995_v33 }
 0xdee   : > { %v3870_v35 = vpack.c.bf16 %v3997_v34, %v3996_v21 }
 0xdf0   : > { %3872 = vmatprep.subr.msk.bf16.mxu1 %vm4307_vm2, %v3870_v35 }
 0xea8   : > { %v3685_v20 = vpop.f32.mrb[10].mxu1 }
 0xea9   : > { %v4551_v22 = vadd.f32 %v3685_v20, %v3439_v36  ;;  %v2001_v37 = vpop.f32.mrb[11].mxu1 }
 0xeaa   : > { %v4553_v40 = vadd.f32 %v3439_v36, %v2001_v37 }
 0xeab   : > { %2304 = vrot.lane.b32.xlu1 %v4551_v22, %s4119_s2 }
 0xeac   : > { %2302 = vrot.lane.b32.xlu0 %v4553_v40, %s4119_s2  ;;  %3701 = vmatprep.mubr.msk.f32.mxu1 %vm868_vm1, %v4553_v40  ;;  %s4811_s2 = smov 88  }
 0xead   : > { %3702 = vmatmul.mubr.msk.f32.vlgmr.msra.gmra.mrb[12].mxu1 %vm868_vm1, %v4551_v22 }
 0xeae   : > { %3875 = vmatpush3.bf16.xpose.msk.msra.mxu1 %vm4307_vm2, %v3870_v35 }
 0xf1d   : > { %v2305_v42 = vpop.permute.xlu1 %2304 }
 0xf1e   : > { %v2303_v41 = vpop.permute.xlu0 %2302 }
 0xf1f   : > { %3715 = vmatprep.mubr.msk.f32.mxu1 %vm868_vm1, %v2303_v41 }
 0xf20   : > { %3716 = vmatmul.mubr.msk.f32.vlgmr.msra.gmra.mrb[14].mxu1 %vm868_vm1, %v2305_v42 }
 0xf80   : > { %v3703_v43 = vpop.f32.mrb[12].mxu1 }
 0xf81   : > { %v2190_v39 = vmul.f32 0.35355338, %v3703_v43  ;;  %v2180_v38 = vpop.f32.mrb[13].mxu1 }
 0xf82   : > { %v2189_v44 = vmul.f32 0.35355338, %v2180_v38 }
 0xf83   : > { %v2195_v45 = vsel %vm2191_vm8, %v2190_v39, -inf }
 0xf84   : > { %2196 = vmax.xlane.f32.xlu0 %v2195_v45  ;;  %v2192_v13 = vsel %vm2191_vm8, %v2189_v44, -inf }
 0xf85   : > { %2193 = vmax.xlane.f32.xlu1 %v2192_v13 }
 0xff3   : > { %v3717_v46 = vpop.f32.mrb[14].mxu1 }
 0xff4   : > { %v2394_v47 = vmul.f32 0.35355338, %v3717_v46  ;;  %v2384_v48 = vpop.f32.mrb[15].mxu1 }
 0xff5   : > { %v2393_v49 = vmul.f32 0.35355338, %v2384_v48 }
 0xff6   : > { %v2398_v50 = vsel %vm2191_vm8, %v2394_v47, -inf }
 0xff7   : > { %2399 = vmax.xlane.f32.xlu1 %v2398_v50  ;;  %v2395_v51 = vsel %vm2191_vm8, %v2393_v49, -inf }
 0xff8   : > { %2396 = vmax.xlane.f32.xlu0 %v2395_v51 }
0x1011   : > { %v2197_v52 = vpop.xlane.xlu0 %2196 }
0x1012   : > { %v2199_v53 = vsub.f32 %v2190_v39, %v2197_v52  ;;  %v2194_v6 = vpop.xlane.xlu1 %2193 }
0x1013   : > { %v2198_v7 = vsub.f32 %v2189_v44, %v2194_v6 }
0x1014   : > { %v2202_v54 = vmul.f32 1.442695, %v2199_v53 }
0x1015   : > { %v2200_v55 = vmul.f32 1.442695, %v2198_v7 }
0x1016   : > { %4064 = vpow2.f32 %v2202_v54 }
0x1017   : > { %4066 = vpow2.f32 %v2200_v55 }
0x1020   : > { %v4065_v56 = vpop.eup %4064 }
0x1021   : > { %v4067_v59 = vpop.eup %4066  ;;  %v2207_v60 = vsel %vm2191_vm8, %v4065_v56, 0.0 }
0x1022   : > { %2208 = vadd.xlane.f32.xlu1 %v2207_v60  ;;  %v2204_v61 = vsel %vm2191_vm8, %v4067_v59, 0.0 }
0x1023   : > { %2205 = vadd.xlane.f32.xlu0 %v2204_v61 }
0x1084   : > { %v2400_v62 = vpop.xlane.xlu1 %2399 }
0x1085   : > { %v2402_v57 = vsub.f32 %v2394_v47, %v2400_v62  ;;  %v2397_v58 = vpop.xlane.xlu0 %2396 }
0x1086   : > { %v2401_v63 = vsub.f32 %v2393_v49, %v2397_v58 }
0x1087   : > { %v2405_v0 = vmul.f32 1.442695, %v2402_v57 }
0x1088   : > { %v2403_v1 = vmul.f32 1.442695, %v2401_v63 }
0x1089   : > { %4068 = vpow2.f32 %v2405_v0 }
0x108a   : > { %4070 = vpow2.f32 %v2403_v1 }
0x1093   : > { %v4069_v2 = vpop.eup %4068 }
0x1094   : > { %v4071_v3 = vpop.eup %4070  ;;  %v2410_v4 = vsel %vm2191_vm8, %v4069_v2, 0.0 }
0x1095   : > { %2411 = vadd.xlane.f32.xlu1 %v2410_v4  ;;  %v2407_v5 = vsel %vm2191_vm8, %v4071_v3, 0.0 }
0x1096   : > { %2408 = vadd.xlane.f32.xlu0 %v2407_v5 }
0x10a6   : > { %4004 = vrot.lane.b32.xlu1 %v4538_v31, %s4811_s2  ;;  %s757_s2 = scalar_lea.vmem %s4774_s24, %s4276_s30 }
0x10aa   : > { %4009 = vrot.lane.b32.xlu1 %v4538_v31, %s4122_s7 }
0x10ac   : > { %3999 = vrot.lane.b32.xlu0 %v4538_v31, %s4812_s29 }
0x10ae   : > { %2507 = vrot.lane.b32.xlu1 %v4551_v22, %s4122_s7 }
0x10af   : > { %v2209_v9 = vpop.xlane.xlu1 %2208 }
0x10b0   : > { %2505 = vrot.lane.b32.xlu0 %v4553_v40, %s4122_s7  ;;  %v2206_v12 = vpop.xlane.xlu0 %2205  ;;  %s4815_s7 = smov 80  }
0x10b1   : > { %4072 = vrcp.f32 %v2206_v12 }
0x10b2   : > { %4074 = vrcp.f32 %v2209_v9 }
0x10bb   : > { %v4073_v8 = vpop.eup %4072 }
0x10bc   : > { %v2212_v10 = vmul.f32 %v4073_v8, %v4067_v59  ;;  %v4075_v30 = vpop.eup %4074 }
0x10bd   : > { %v2213_v35 = vmul.f32 %v4075_v30, %v4065_v56 }
0x10be   : > { %3708 = vmatprep.mubr.msk.f32.mxu0 %vm2191_vm8, %v2212_v10 }
0x1122   : > { %v2412_v11 = vpop.xlane.xlu1 %2411 }
0x1123   : > { %v2409_v14 = vpop.xlane.xlu0 %2408 }
0x1124   : > { %4076 = vrcp.f32 %v2409_v14 }
0x1125   : > { %4078 = vrcp.f32 %v2412_v11 }
0x1126   : > { %v4005_v15 = vpop.permute.xlu1 %4004 }
0x1127   : > { %v4000_v16 = vpop.permute.xlu0 %3999  ;;  %v4007_v18 = vunpack.i.h.bf16 %v4005_v15  ;;  %v4006_v19 = vunpack.i.l.bf16 %v4005_v15 }
0x1128   : > { %v4002_v24 = vunpack.i.h.bf16 %v4000_v16  ;;  %v4001_v26 = vunpack.i.l.bf16 %v4000_v16 }
0x1129   : > { %v3876_v32 = vpack.c.bf16 %v4007_v18, %v4006_v19 }
0x112a   : > { %v3864_v28 = vpack.c.bf16 %v4002_v24, %v4001_v26  ;;  %v4010_v29 = vpop.permute.xlu1 %4009 }
0x112b   : > { %v4012_v33 = vunpack.i.h.bf16 %v4010_v29  ;;  %v4011_v34 = vunpack.i.l.bf16 %v4010_v29  ;;  %v2506_v42 = vpop.permute.xlu0 %2505 }
0x112c   : > { %3866 = vmatprep.subr.msk.bf16.mxu0 %vm4587_vm10, %v3864_v28 }
0x112d   : > { %3869 = vmatpush3.bf16.msk.msra.mxu0 %vm4587_vm10, %v3864_v28  ;;  %v3882_v37 = vpack.c.bf16 %v4012_v33, %v4011_v34 }
0x112e   : > { %v4077_v21 = vpop.eup %4076  ;;  %3878 = vmatprep.subr.msk.bf16.mxu0 %vm4587_vm10, %v3876_v32  ;;  %v2508_v43 = vpop.permute.xlu1 %2507 }
0x112f   : > { %v4079_v36 = vpop.eup %4078  ;;  %v2415_v20 = vmul.f32 %v4077_v21, %v4071_v3 }
0x1130   : > { %3709 = vmatmul.mubr.msk.f32.vlgmr.msra.gmra.mrb[12].mxu0 %vm2191_vm8, %v2213_v35  ;;  %v2416_v41 = vmul.f32 %v4079_v36, %v4069_v2 }
0x1131   : > { %3881 = vmatpush3.bf16.msk.msra.mxu0 %vm4587_vm10, %v3876_v32  ;;  %3722 = vmatprep.mubr.msk.f32.mxu0 %vm2191_vm8, %v2415_v20 }
0x1132   : > { %3884 = vmatprep.subr.msk.bf16.mxu0 %vm4307_vm2, %v3882_v37 }
0x1134   : > { %3723 = vmatmul.mubr.msk.f32.vlgmr.msra.gmra.mrb[14].mxu0 %vm2191_vm8, %v2416_v41 }
0x1135   : > { %3729 = vmatprep.mubr.msk.f32.mxu0 %vm868_vm1, %v2506_v42 }
0x113a   : > { %3887 = vmatpush3.bf16.xpose.msk.msra.mxu0 %vm4307_vm2, %v3882_v37 }
0x1141   : > { %3730 = vmatmul.mubr.msk.f32.vlgmr.msra.gmra.mrb[16].mxu0 %vm868_vm1, %v2508_v43 }
0x1203   : > { %v4608_v39 = vpop.f32.mrb[12].mxu0 }
0x1204   : > { %v4610_v38 = vpop.f32.mrb[13].mxu0 }
0x1207   : > { %v4612_v44 = vpop.f32.mrb[14].mxu0 }
0x1208   : > { %v4614_v45 = vpop.f32.mrb[15].mxu0 }
0x1214   : > { %v3731_v13 = vpop.f32.mrb[16].mxu0 }
0x1215   : > { %v2597_v46 = vmul.f32 0.35355338, %v3731_v13  ;;  %v2587_v47 = vpop.f32.mrb[17].mxu0 }
0x1216   : > { %v2596_v48 = vmul.f32 0.35355338, %v2587_v47  ;;  %v2943_v47 = vld [vmem:[%s4762_s12 + $0x10] sm:$0xff] }
0x1217   : > { %v2601_v49 = vsel %vm2191_vm8, %v2597_v46, -inf }
0x1218   : > { %2602 = vmax.xlane.f32.xlu1 %v2601_v49  ;;  %v2598_v50 = vsel %vm2191_vm8, %v2596_v48, -inf  ;;  %v2944_v49 = vld [vmem:[%s4762_s12 + $0x18] sm:$0xff] }
0x1219   : > { %2599 = vmax.xlane.f32.xlu0 %v2598_v50  ;;  %v3910_v50 = vpack.c.bf16 %v2944_v49, %v2943_v47 }
0x1229   : > { %4014 = vrot.lane.b32.xlu1 %v4538_v31, %s4815_s7 }
0x122d   : > { %2708 = vrot.lane.b32.xlu1 %v4553_v40, %s4816_s1 }
0x1231   : > { %2710 = vrot.lane.b32.xlu1 %v4551_v22, %s4816_s1 }
0x12a5   : > { %v2603_v51 = vpop.xlane.xlu1 %2602 }
0x12a6   : > { %v2605_v52 = vsub.f32 %v2597_v46, %v2603_v51  ;;  %v2600_v53 = vpop.xlane.xlu0 %2599  ;;  %v2941_v46 = vld [vmem:[%s4762_s12] sm:$0xff] }
0x12a7   : > { %v2604_v6 = vsub.f32 %v2596_v48, %v2600_v53 }
0x12a8   : > { %v2608_v7 = vmul.f32 1.442695, %v2605_v52 }
0x12a9   : > { %v2606_v54 = vmul.f32 1.442695, %v2604_v6  ;;  %v4015_v55 = vpop.permute.xlu1 %4014 }
0x12aa   : > { %4080 = vpow2.f32 %v2608_v7  ;;  %v4017_v56 = vunpack.i.h.bf16 %v4015_v55  ;;  %v4016_v59 = vunpack.i.l.bf16 %v4015_v55 }
0x12ab   : > { %4082 = vpow2.f32 %v2606_v54 }
0x12ac   : > { %v3888_v60 = vpack.c.bf16 %v4017_v56, %v4016_v59 }
0x12ad   : > { %v2709_v8 = vpop.permute.xlu1 %2708 }
0x12ae   : > { %3890 = vmatprep.subr.msk.bf16.mxu1 %vm4587_vm10, %v3888_v60 }
0x12af   : > { %3893 = vmatpush3.bf16.msk.msra.mxu1 %vm4587_vm10, %v3888_v60 }
0x12b1   : > { %v2711_v10 = vpop.permute.xlu1 %2710 }
0x12b4   : > { %v4081_v40 = vpop.eup %4080 }
0x12b5   : > { %v2613_v22 = vsel %vm2191_vm8, %v4081_v40, 0.0  ;;  %v4083_v61 = vpop.eup %4082 }
0x12b6   : > { %2614 = vadd.xlane.f32.xlu0 %v2613_v22  ;;  %v2610_v62 = vsel %vm2191_vm8, %v4083_v61, 0.0 }
0x12ba   : > { %2611 = vadd.xlane.f32.xlu0 %v2610_v62 }
0x12d0   : > { %4019 = vrot.lane.b32.xlu0 %v4538_v31, %s4816_s1 }
0x1343   : > { %v2615_v57 = vpop.xlane.xlu0 %2614 }
0x1344   : > { %4084 = vrcp.f32 %v2615_v57 }
0x1347   : > { %v2612_v58 = vpop.xlane.xlu0 %2611 }
0x1348   : > { %4086 = vrcp.f32 %v2612_v58 }
0x134b   : > { %v4020_v63 = vpop.permute.xlu0 %4019 }
0x134c   : > { %v4022_v0 = vunpack.i.h.bf16 %v4020_v63  ;;  %v4021_v1 = vunpack.i.l.bf16 %v4020_v63 }
0x134e   : > { %v3894_v2 = vpack.c.bf16 %v4022_v0, %v4021_v1  ;;  %v4085_v3 = vpop.eup %4084 }
0x134f   : > { %v2619_v12 = vmul.f32 %v4085_v3, %v4081_v40 }
0x1350   : > { %3896 = vmatprep.subr.msk.bf16.mxu1 %vm4307_vm2, %v3894_v2 }
0x1352   : > { %v4087_v4 = vpop.eup %4086 }
0x1353   : > { %v2618_v5 = vmul.f32 %v4087_v4, %v4083_v61 }
0x1355   : > { %3736 = vmatprep.mubr.msk.f32.mxu1 %vm2191_vm8, %v2618_v5 }
0x1356   : > { %3737 = vmatmul.mubr.msk.f32.vlgmr.msra.gmra.mrb[16].mxu1 %vm2191_vm8, %v2619_v12 }
0x1357   : > { %3899 = vmatpush3.bf16.xpose.msk.msra.mxu1 %vm4307_vm2, %v3894_v2  ;;  %3743 = vmatprep.mubr.msk.f32.mxu1 %vm868_vm1, %v2709_v8 }
0x135e   : > { %3744 = vmatmul.mubr.msk.f32.vlgmr.msra.gmra.mrb[18].mxu1 %vm868_vm1, %v2711_v10 }
0x1429   : > { %v3738_v9 = vpop.f32.mrb[16].mxu1 }
0x142a   : > { %v2699_v11 = vpop.f32.mrb[17].mxu1 }
0x1431   : > { %v3745_v14 = vpop.f32.mrb[18].mxu1 }
0x1432   : > { %v2800_v15 = vmul.f32 0.35355338, %v3745_v14  ;;  %v2790_v16 = vpop.f32.mrb[19].mxu1 }
0x1433   : > { %v2799_v18 = vmul.f32 0.35355338, %v2790_v16  ;;  %v3080_v16 = vld [vmem:[%s4766_s16 + $0x8] sm:$0xff] }
0x1434   : > { %v2804_v19 = vsel %vm2191_vm8, %v2800_v15, -inf }
0x1435   : > { %2805 = vmax.xlane.f32.xlu1 %v2804_v19  ;;  %v2801_v24 = vsel %vm2191_vm8, %v2799_v18, -inf  ;;  %v3081_v19 = vld [vmem:[%s4766_s16 + $0x10] sm:$0xff] }
0x1436   : > { %2802 = vmax.xlane.f32.xlu0 %v2801_v24  ;;  %v3082_v24 = vld [vmem:[%s4766_s16 + $0x18] sm:$0xff] }
0x1446   : > { %4024 = vrot.lane.b32.xlu1 %v4538_v31, %s4817_s0 }
0x144a   : > { %2915 = vrot.lane.b32.xlu1 %v4612_v44, %s4818_s26 }
0x144e   : > { %2921 = vrot.lane.b32.xlu1 %v2699_v11, %s4819_s3 }
0x14c2   : > { %v2806_v17 = vpop.xlane.xlu1 %2805 }
0x14c3   : > { %v2808_v26 = vsub.f32 %v2800_v15, %v2806_v17  ;;  %v2803_v28 = vpop.xlane.xlu0 %2802  ;;  %v3918_v17 = vpack.c.bf16 %v3082_v24, %v3081_v19 }
0x14c4   : > { %v2807_v29 = vsub.f32 %v2799_v18, %v2803_v28 }
0x14c5   : > { %v2811_v30 = vmul.f32 1.442695, %v2808_v26 }
0x14c6   : > { %v2809_v32 = vmul.f32 1.442695, %v2807_v29  ;;  %v4025_v33 = vpop.permute.xlu1 %4024 }
0x14c7   : > { %v4027_v34 = vunpack.i.h.bf16 %v4025_v33  ;;  %v4026_v21 = vunpack.i.l.bf16 %v4025_v33 }
0x14c8   : > { %4088 = vpow2.f32 %v2809_v32 }
0x14c9   : > { %v3900_v35 = vpack.c.bf16 %v4027_v34, %v4026_v21  ;;  %4090 = vpow2.f32 %v2811_v30  ;;  %v3476_v21 = vld [vmem:[%s4764_s14] ss:$0 sm:$0xff] }
0x14ca   : > { %v2916_v6 = vpop.permute.xlu1 %2915 }
0x14cb   : > { %3902 = vmatprep.subr.msk.bf16.mxu0 %vm4587_vm10, %v3900_v35  ;;  %v2936_v59 = vsel %vm868_vm1, %v4608_v39, %v2916_v6 }
0x14cc   : > { %3905 = vmatpush3.bf16.msk.msra.mxu0 %vm4587_vm10, %v3900_v35 }
0x14ce   : > { %v2922_v54 = vpop.permute.xlu1 %2921 }
0x14d2   : > { %v4089_v31 = vpop.eup %4088 }
0x14d3   : > { %v2813_v36 = vsel %vm2191_vm8, %v4089_v31, 0.0  ;;  %v4091_v20 = vpop.eup %4090 }
0x14d4   : > { %2814 = vadd.xlane.f32.xlu0 %v2813_v36  ;;  %v2816_v37 = vsel %vm2191_vm8, %v4091_v20, 0.0 }
0x14d8   : > { %2817 = vadd.xlane.f32.xlu0 %v2816_v37 }
0x14ee   : > { %2913 = vrot.lane.b32.xlu0 %v4614_v45, %s4818_s26  ;;  %v2942_v45 = vld [vmem:[%s4762_s12 + $0x8] sm:$0xff] }
0x14ef   : > { %v3906_v48 = vpack.c.bf16 %v2942_v45, %v2941_v46  ;;  %v3192_v45 = vld [vmem:[%s4768_s18 + $0x18] sm:$0xff] }
0x14f1   : > { %3907 = vmatprep.subr.bf16.mxu0 %v3906_v48 }
0x14f2   : > { %2923 = vrot.lane.b32.xlu0 %v3738_v9, %s4819_s3 }
0x1561   : > { %v2815_v41 = vpop.xlane.xlu0 %2814 }
0x1562   : > { %4092 = vrcp.f32 %v2815_v41 }
0x1565   : > { %v2818_v42 = vpop.xlane.xlu0 %2817 }
0x1566   : > { %4094 = vrcp.f32 %v2818_v42 }
0x1569   : > { %v2914_v53 = vpop.permute.xlu0 %2913 }
0x156a   : > { %v2935_v55 = vsel %vm868_vm1, %v4610_v38, %v2914_v53  ;;  %v3473_v38 = vld [vmem:[%s4763_s13] ss:$0 sm:$0xff] }
0x156b   : > { %v2937_v40 = vsel %vm956_vm4, %v2935_v55, %v2922_v54 }
0x156c   : > { %v4093_v43 = vpop.eup %4092 }
0x156d   : > { %v2821_v27 = vmul.f32 %v4093_v43, %v4089_v31  ;;  %v2924_v7 = vpop.permute.xlu0 %2923 }
0x156e   : > { %v2938_v22 = vsel %vm956_vm4, %v2936_v59, %v2924_v7 }
0x156f   : > { %3750 = vmatprep.mubr.msk.f32.mxu0 %vm2191_vm8, %v2821_v27  ;;  %v3189_v27 = vld [vmem:[%s4768_s18] sm:$0xff] }
0x1570   : > { %v4095_v44 = vpop.eup %4094 }
0x1571   : > { %v2822_v13 = vmul.f32 %v4095_v44, %v4091_v20  ;;  %v3477_v20 = vld [vmem:[%s4765_s15] ss:$0 sm:$0xff]  ;;  %v3190_v44 = vld [vmem:[%s4768_s18 + $0x8] sm:$0xff] }
0x1572   : > { %v3922_v46 = vpack.c.bf16 %v3190_v44, %v3189_v27 }
0x1573   : > { %3751 = vmatmul.mubr.msk.f32.vlgmr.msra.gmra.mrb[18].mxu0 %vm2191_vm8, %v2822_v13  ;;  %v3191_v13 = vld [vmem:[%s4768_s18 + $0x10] sm:$0xff] }
0x1574   : > { %3909 = vmatpush3.bf16.msra.mxu0 %v3906_v48  ;;  %v3926_v47 = vpack.c.bf16 %v3192_v45, %v3191_v13  ;;  %v3478_v48 = vld [vmem:[%s4767_s17] ss:$0 sm:$0xff] }
0x1575   : > { %3911 = vmatprep.subr.bf16.mxu0 %v3910_v50 }
0x1578   : > { %3913 = vmatpush3.bf16.msra.mxu0 %v3910_v50 }
0x1579   : > { %3923 = vmatprep.subr.bf16.mxu0 %v3922_v46 }
0x1646   : > { %v3752_v51 = vpop.f32.mrb[18].mxu0 }
0x1647   : > { %2931 = vrot.lane.b32.xlu0 %v3752_v51, %s4805_s23  ;;  %v2902_v52 = vpop.f32.mrb[19].mxu0 }
0x1648   : > { %2929 = vrot.lane.b32.xlu1 %v2902_v52, %s4805_s23 }
0x16b9   : > { %v2932_v56 = vpop.permute.xlu0 %2931 }
0x16ba   : > { %v2930_v60 = vpop.permute.xlu1 %2929  ;;  %v2940_v62 = vsel %vm1706_vm6, %v2938_v22, %v2932_v56 }
0x16bb   : > { %v2939_v61 = vsel %vm1706_vm6, %v2937_v40, %v2930_v60 }
0x16bc   : > { %3761 = vmatprep.mubr.msk.f32.mxu0 %vm773_vm0, %v2939_v61 }
0x16bd   : > { %3762 = vmatmul.mubr.msk.f32.vlgmr.msra.gmra.mrb[20].mxu0 %vm773_vm0, %v2940_v62 }
0x16be   : > { %3925 = vmatpush3.bf16.msra.mxu0 %v3922_v46 }
0x16bf   : > { %3927 = vmatprep.subr.bf16.mxu0 %v3926_v47 }
0x16c2   : > { %3929 = vmatpush3.bf16.msra.mxu0 %v3926_v47 }
0x1790   : > { %v3763_v57 = vpop.f32.mrb[20].mxu0 }
0x1791   : > { %v3030_v58 = vadd.f32 %v3763_v57, %v3473_v38  ;;  %v3024_v39 = vpop.f32.mrb[21].mxu0 }
0x1792   : > { %v3025_v63 = vadd.f32 %v3473_v38, %v3024_v39 }
0x1793   : > { %v3034_v0 = vadd.f32 %v3030_v58, %v4531_v25 }
0x1794   : > { %v3033_v1 = vadd.f32 %v3025_v63, %v4527_v23  ;;  %v3079_v23 = vld [vmem:[%s4766_s16] sm:$0xff] }
0x1795   : > { %v3040_v2 = vsel %vm773_vm0, %v3034_v0, 0.0  ;;  %v3914_v18 = vpack.c.bf16 %v3080_v16, %v3079_v23 }
0x1796   : > { %3041 = vadd.xlane.f32.xlu0 %v3040_v2  ;;  %v3037_v3 = vsel %vm773_vm0, %v3033_v1, 0.0 }
0x1797   : > { %3038 = vadd.xlane.f32.xlu1 %v3037_v3  ;;  %3915 = vmatprep.subr.bf16.mxu1 %v3914_v18 }
0x1798   : > { %3917 = vmatpush3.bf16.msra.mxu1 %v3914_v18 }
0x1799   : > { %3919 = vmatprep.subr.bf16.mxu1 %v3918_v17 }
0x179c   : > { %3921 = vmatpush3.bf16.msra.mxu1 %v3918_v17 }
0x1823   : > { %v3042_v4 = vpop.xlane.xlu0 %3041 }
0x1824   : > { %v3044_v5 = vmul.f32 0.03125, %v3042_v4  ;;  %v3039_v12 = vpop.xlane.xlu1 %3038 }
0x1825   : > { %v3043_v8 = vmul.f32 0.03125, %v3039_v12 }
0x1826   : > { %v3046_v10 = vsub.f32 %v3034_v0, %v3044_v5 }
0x1827   : > { %v3045_v9 = vsub.f32 %v3033_v1, %v3043_v8  ;;  %v3481_v1 = vld [vmem:[%s4769_s19] ss:$0 sm:$0xff] }
0x1828   : > { %v3048_v11 = vmul.f32 %v3046_v10, %v3046_v10 }
0x1829   : > { %v3047_v14 = vmul.f32 %v3045_v9, %v3045_v9 }
0x182a   : > { %v3052_v15 = vsel %vm773_vm0, %v3048_v11, 0.0 }
0x182b   : > { %3053 = vadd.xlane.f32.xlu1 %v3052_v15  ;;  %v3049_v25 = vsel %vm773_vm0, %v3047_v14, 0.0 }
0x182c   : > { %3050 = vadd.xlane.f32.xlu0 %v3049_v25 }
0x18b8   : > { %v3054_v26 = vpop.xlane.xlu1 %3053 }
0x18b9   : > { %v3056_v28 = vmul.f32 0.03125, %v3054_v26  ;;  %v3051_v29 = vpop.xlane.xlu0 %3050 }
0x18ba   : > { %v3055_v30 = vmul.f32 0.03125, %v3051_v29 }
0x18bb   : > { %v3058_v32 = vadd.f32 1e-05, %v3056_v28 }
0x18bc   : > { %v3057_v33 = vadd.f32 1e-05, %v3055_v30 }
0x18bd   : > { %4096 = vrsqrt.f32 %v3058_v32 }
0x18be   : > { %4098 = vrsqrt.f32 %v3057_v33 }
0x18c7   : > { %v4097_v34 = vpop.eup %4096 }
0x18c8   : > { %v4099_v35 = vpop.eup %4098  ;;  %v3062_v31 = vmul.f32 %v4097_v34, %v3046_v10 }
0x18c9   : > { %v3061_v36 = vmul.f32 %v4099_v35, %v3045_v9 }
0x18ca   : > { %v3070_v37 = vmul.f32 %v3476_v21, %v3062_v31 }
0x18cb   : > { %v3069_v41 = vmul.f32 %v3476_v21, %v3061_v36  ;;  %v3484_v21 = vld [vmem:[%s4770_s20] ss:$0 sm:$0xff] }
0x18cc   : > { %v3078_v43 = vadd.f32 %v3477_v20, %v3070_v37  ;;  %v3485_v36 = vld [vmem:[%s4771_s21] ss:$0 sm:$0xff] }
0x18cd   : > { %v3077_v42 = vadd.f32 %v3477_v20, %v3069_v41 }
0x18cf   : > { %3772 = vmatprep.mubr.msk.f32.mxu1 %vm773_vm0, %v3077_v42 }
0x18d0   : > { %3773 = vmatmul.mubr.msk.f32.vlgmr.msra.gmra.mrb[20].mxu1 %vm773_vm0, %v3078_v43 }
0x19a3   : > { %v3774_v49 = vpop.f32.mrb[20].mxu1 }
0x19a4   : > { %v3168_v50 = vadd.f32 %v3774_v49, %v3478_v48  ;;  %v3162_v51 = vpop.f32.mrb[21].mxu1 }
0x19a5   : > { %v3163_v52 = vadd.f32 %v3478_v48, %v3162_v51 }
0x19a6   : > { %v3174_v53 = vmul.f32 0.044715, %v3168_v50  ;;  %v3172_v39 = vmul.f32 0.5, %v3168_v50 }
0x19a7   : > { %v3173_v6 = vmul.f32 0.044715, %v3163_v52  ;;  %v3171_v57 = vmul.f32 0.5, %v3163_v52 }
0x19a8   : > { %v3176_v7 = vmul.f32 %v3174_v53, %v3168_v50 }
0x19a9   : > { %v3175_v54 = vmul.f32 %v3173_v6, %v3163_v52 }
0x19aa   : > { %v3178_v55 = vmul.f32 %v3176_v7, %v3168_v50 }
0x19ab   : > { %v3177_v56 = vmul.f32 %v3175_v54, %v3163_v52 }
0x19ac   : > { %v3180_v59 = vadd.f32 %v3178_v55, %v3168_v50 }
0x19ad   : > { %v3179_v60 = vadd.f32 %v3177_v56, %v3163_v52 }
0x19ae   : > { %v3182_v40 = vmul.f32 0.7978846, %v3180_v59 }
0x19af   : > { %v3181_v22 = vmul.f32 0.7978846, %v3179_v60 }
0x19b0   : > { %4100 = vtanh.f32 %v3182_v40 }
0x19b1   : > { %4102 = vtanh.f32 %v3181_v22 }
0x19ba   : > { %v4101_v61 = vpop.eup %4100 }
0x19bb   : > { %v4103_v62 = vpop.eup %4102  ;;  %v3186_v38 = vadd.f32 1.0, %v4101_v61 }
0x19bc   : > { %v3185_v58 = vadd.f32 1.0, %v4103_v62 }
0x19bd   : > { %v3188_v0 = vmul.f32 %v3186_v38, %v3172_v39 }
0x19be   : > { %v3187_v63 = vmul.f32 %v3185_v58, %v3171_v57 }
0x19c0   : > { %3783 = vmatprep.mubr.msk.f32.mxu0 %vm773_vm0, %v3187_v63 }
0x19c1   : > { %3784 = vmatmul.mubr.msk.f32.vlgmr.msra.gmra.mrb[22].mxu0 %vm773_vm0, %v3188_v0 }
0x1a94   : > { %v3785_v2 = vpop.f32.mrb[22].mxu0 }
0x1a95   : > { %v3278_v3 = vadd.f32 %v3785_v2, %v3481_v1  ;;  %v3272_v4 = vpop.f32.mrb[23].mxu0 }
0x1a96   : > { %v3273_v5 = vadd.f32 %v3481_v1, %v3272_v4 }
0x1a97   : > { %v3282_v12 = vadd.f32 %v3278_v3, %v3078_v43 }
0x1a98   : > { %v3281_v8 = vadd.f32 %v3273_v5, %v3077_v42 }
0x1a99   : > { %v3288_v10 = vsel %vm773_vm0, %v3282_v12, 0.0 }
0x1a9a   : > { %3289 = vadd.xlane.f32.xlu1 %v3288_v10  ;;  %v3285_v9 = vsel %vm773_vm0, %v3281_v8, 0.0 }
0x1a9b   : > { %3286 = vadd.xlane.f32.xlu0 %v3285_v9 }
0x1b27   : > { %v3290_v11 = vpop.xlane.xlu1 %3289 }
0x1b28   : > { %v3292_v14 = vmul.f32 0.03125, %v3290_v11  ;;  %v3287_v15 = vpop.xlane.xlu0 %3286 }
0x1b29   : > { %v3291_v25 = vmul.f32 0.03125, %v3287_v15 }
0x1b2a   : > { %v3294_v23 = vsub.f32 %v3282_v12, %v3292_v14 }
0x1b2b   : > { %v3293_v16 = vsub.f32 %v3281_v8, %v3291_v25 }
0x1b2c   : > { %v3296_v18 = vmul.f32 %v3294_v23, %v3294_v23 }
0x1b2d   : > { %v3295_v19 = vmul.f32 %v3293_v16, %v3293_v16 }
0x1b2e   : > { %v3300_v24 = vsel %vm773_vm0, %v3296_v18, 0.0 }
0x1b2f   : > { %3301 = vadd.xlane.f32.xlu1 %v3300_v24  ;;  %v3297_v17 = vsel %vm773_vm0, %v3295_v19, 0.0 }
0x1b30   : > { %3298 = vadd.xlane.f32.xlu0 %v3297_v17 }
0x1bbc   : > { %v3302_v26 = vpop.xlane.xlu1 %3301 }
0x1bbd   : > { %v3304_v28 = vmul.f32 0.03125, %v3302_v26  ;;  %v3299_v29 = vpop.xlane.xlu0 %3298 }
0x1bbe   : > { %v3303_v30 = vmul.f32 0.03125, %v3299_v29 }
0x1bbf   : > { %v3306_v32 = vadd.f32 1e-05, %v3304_v28 }
0x1bc0   : > { %v3305_v33 = vadd.f32 1e-05, %v3303_v30 }
0x1bc1   : > { %4104 = vrsqrt.f32 %v3306_v32 }
0x1bc2   : > { %4106 = vrsqrt.f32 %v3305_v33 }
0x1bcb   : > { %v4105_v34 = vpop.eup %4104 }
0x1bcc   : > { %v4107_v35 = vpop.eup %4106  ;;  %v3310_v31 = vmul.f32 %v4105_v34, %v3294_v23 }
0x1bcd   : > { %v3309_v20 = vmul.f32 %v4107_v35, %v3293_v16 }
0x1bce   : > { %v3318_v37 = vmul.f32 %v3484_v21, %v3310_v31 }
0x1bcf   : > { %v3317_v41 = vmul.f32 %v3484_v21, %v3309_v20 }
0x1bd0   : > { %v3326_v42 = vadd.f32 %v3485_v36, %v3318_v37 }
0x1bd1   : > { %v3325_v43 = vadd.f32 %v3485_v36, %v3317_v41 }
0x1bd2   : > { %3328 = vst.msk [vmem:[%s757_s2 + $0x8] sm:$0xff] %vm773_vm0, %v3326_v42 }
0x1bd3   : > { %3327 = vst.msk [vmem:[%s757_s2] sm:$0xff] %vm773_vm0, %v3325_v43 }
0x1bd4 PF: > { %s34_s5 = sadd.s32 1, %s4114_s5  }
0x1bd5   : > { %p31_p4 = scmp.ge.s32.totalorder %s34_s5, 4  }
0x1bd7   :  { %33 = sbr.rel (!%p31_p4) target bundleno = 10 (0xa), region = 152 }

</bundles_post_ra>
